<compile_context>
chip_gen: v5e
topology: v5e:2x2
jax: 0.10.0
libtpu: 0.0.40
codegen_flags: <defaults>
</compile_context>

<pallas_src>
import functools

import jax
import jax.numpy as jnp
from jax import lax
from jax.experimental import pallas as pl
from jax.experimental.pallas import tpu as pltpu


_TILE_M = 1024                     # token-tile for M-tiled GEMM kernels


def _vmem_limit_bytes():
    # ~3/4 of physical VMEM: ~96 MiB on v5e/v6e (128 MiB), ~48 MiB on v7x (64 MiB)
    try:
        cap = int(pltpu.get_tpu_info().vmem_capacity_bytes)
    except Exception:  # no TPU info available -> conservative default
        cap = 64 * 1024 * 1024
    return int(min(max(cap * 3 // 4, 32 * 1024 * 1024), 100 * 1024 * 1024))


_VMEM_LIMIT = _vmem_limit_bytes()


def _round_up(x, m):
    return ((x + m - 1) // m) * m


def _tile_m(m):
    tm = min(_TILE_M, m)
    if tm % 8 != 0:
        tm = _round_up(tm, 8)
    return tm


def _cparams(n_grid_axes):
    return pltpu.CompilerParams(
        dimension_semantics=("parallel",) * n_grid_axes,
        vmem_limit_bytes=_VMEM_LIMIT)


# ----------------------------- Pallas kernels ------------------------------


def _patch_embed_kernel(x_ref, w_ref, b_ref, g_ref, beta_ref, o_ref, *, eps):
    # LayerNorm(x @ w + b), one modality (grid axis 0) and one M tile per step.
    acc = jnp.dot(x_ref[...].astype(jnp.bfloat16), w_ref[...],
                  preferred_element_type=jnp.float32)
    acc = acc + b_ref[...].astype(jnp.float32)
    mu = jnp.mean(acc, axis=-1, keepdims=True)
    var = jnp.mean(jnp.square(acc - mu), axis=-1, keepdims=True)
    y = (acc - mu) * lax.rsqrt(var + eps)
    o_ref[...] = (y * g_ref[...] + beta_ref[...]).astype(o_ref.dtype)


def pallas_patch_embed(xs, w, b, g, beta, eps=1e-5):
    """xs: (2, M, Kp) stacked im2col tokens (modality x / y), w: (2, Kp, D) bf16.
    Returns (2, M, D) f32 = LayerNorm(xs @ w + b)."""
    _, M, Kp = xs.shape
    D = w.shape[-1]
    tm = _tile_m(M)
    grid = (2, pl.cdiv(M, tm))
    kernel = functools.partial(_patch_embed_kernel, eps=eps)
    return pl.pallas_call(
        kernel,
        out_shape=jax.ShapeDtypeStruct((2, M, D), jnp.float32),
        grid=grid,
        in_specs=[
            pl.BlockSpec((None, tm, Kp), lambda s, i: (s, i, 0)),
            pl.BlockSpec((None, Kp, D), lambda s, i: (s, 0, 0)),
            pl.BlockSpec((None, 1, D), lambda s, i: (s, 0, 0)),
            pl.BlockSpec((None, 1, D), lambda s, i: (s, 0, 0)),
            pl.BlockSpec((None, 1, D), lambda s, i: (s, 0, 0)),
        ],
        out_specs=pl.BlockSpec((None, tm, D), lambda s, i: (s, i, 0)),
        compiler_params=_cparams(2),
        cost_estimate=pl.CostEstimate(
            flops=int(2 * 2 * M * Kp * D), transcendentals=int(2 * M),
            bytes_accessed=int(4 * 2 * M * (Kp + D) + 2 * 2 * Kp * D)),
    )(xs, w, b, g, beta)


def _block_kernel(t_ref, g1_ref, b1_ref, wqkv_ref, bqkv_ref, wproj_ref,
                  bproj_ref, g2_ref, b2_ref, wfc1_ref, bfc1_ref, wfc2_ref,
                  bfc2_ref, gf_ref, bf_ref, o_ref, *, heads, scale, eps,
                  final_ln):
    # One fully fused transformer block per (modality, batch) grid point:
    #   LN1 -> QKV -> per-head softmax attention -> concat -> proj -> +res
    #   -> LN2 -> fc1 + gelu -> fc2 -> +res [-> stage-final LayerNorm]
    t = t_ref[...].astype(jnp.float32)                         # (N, D)
    D = t.shape[-1]
    dh = D // heads

    # --- attention branch ---------------------------------------------------
    mu = jnp.mean(t, axis=-1, keepdims=True)
    var = jnp.mean(jnp.square(t - mu), axis=-1, keepdims=True)
    h = (t - mu) * lax.rsqrt(var + eps) * g1_ref[...] + b1_ref[...]

    qkv = jnp.dot(h.astype(jnp.bfloat16), wqkv_ref[...],
                  preferred_element_type=jnp.float32)
    qkv = qkv + bqkv_ref[...].astype(jnp.float32)              # (N, 3D)
    q = qkv[:, :D]
    k = qkv[:, D:2 * D]
    v = qkv[:, 2 * D:]

    # Per-head attention; head outputs concatenated in-register then projected
    # with ONE full-D matmul (no per-head split-K projection starving the MXU).
    heads_out = []
    for hd in range(heads):
        sl = slice(hd * dh, (hd + 1) * dh)
        qh, kh, vh = q[:, sl], k[:, sl], v[:, sl]
        s = lax.dot_general(qh.astype(jnp.bfloat16), kh.astype(jnp.bfloat16),
                            (((1,), (1,)), ((), ())),
                            preferred_element_type=jnp.float32) * scale
        s = s - jnp.max(s, axis=-1, keepdims=True)
        p = jnp.exp(s)
        p = p / jnp.sum(p, axis=-1, keepdims=True)             # exact softmax
        heads_out.append(jnp.dot(p.astype(jnp.bfloat16),
                                 vh.astype(jnp.bfloat16),
                                 preferred_element_type=jnp.float32))
    attn = jnp.concatenate(heads_out, axis=-1)                 # (N, D)
    attn = jnp.dot(attn.astype(jnp.bfloat16), wproj_ref[...],
                   preferred_element_type=jnp.float32)
    attn = attn + bproj_ref[...].astype(jnp.float32)
    t = t + attn

    # --- MLP branch -----------------------------------------------------------
    mu2 = jnp.mean(t, axis=-1, keepdims=True)
    var2 = jnp.mean(jnp.square(t - mu2), axis=-1, keepdims=True)
    h2 = (t - mu2) * lax.rsqrt(var2 + eps) * g2_ref[...] + b2_ref[...]
    h2 = jnp.dot(h2.astype(jnp.bfloat16), wfc1_ref[...],
                 preferred_element_type=jnp.float32) + bfc1_ref[...].astype(jnp.float32)
    # TODO(synk): PyTorch default GELU is exact (erf); tanh-approx keeps the
    #             nonlinearity on the EUP slot.
    h2 = jax.nn.gelu(h2, approximate=True)
    h2 = jnp.dot(h2.astype(jnp.bfloat16), wfc2_ref[...],
                 preferred_element_type=jnp.float32) + bfc2_ref[...].astype(jnp.float32)
    out = t + h2

    if final_ln:
        # stage-final LayerNorm fused as epilogue of the last block
        mu3 = jnp.mean(out, axis=-1, keepdims=True)
        var3 = jnp.mean(jnp.square(out - mu3), axis=-1, keepdims=True)
        out = (out - mu3) * lax.rsqrt(var3 + eps) * gf_ref[...] + bf_ref[...]

    o_ref[...] = out.astype(o_ref.dtype)


def pallas_transformer_block(t, bp, gf, bf, *, heads, final_ln, eps=1e-5):
    """Fused transformer block on stacked modality tokens t: (2, B, N, D)."""
    _, B, N, D = t.shape
    Hid = bp["wfc1"].shape[-1]
    dh = D // heads
    kernel = functools.partial(_block_kernel, heads=heads, scale=dh ** -0.5,
                               eps=eps, final_ln=final_ln)
    tok = pl.BlockSpec((None, None, N, D), lambda s, b: (s, b, 0, 0))

    def vec(d):
        return pl.BlockSpec((None, 1, d), lambda s, b: (s, 0, 0))

    def mat(r, c):
        return pl.BlockSpec((None, r, c), lambda s, b: (s, 0, 0))

    flops = int(2 * B * (2 * N * D * 3 * D + 4 * N * N * D + 2 * N * D * D
                         + 4 * N * D * Hid))
    return pl.pallas_call(
        kernel,
        out_shape=jax.ShapeDtypeStruct((2, B, N, D), jnp.float32),
        grid=(2, B),
        in_specs=[tok, vec(D), vec(D), mat(D, 3 * D), vec(3 * D),
                  mat(D, D), vec(D), vec(D), vec(D),
                  mat(D, Hid), vec(Hid), mat(Hid, D), vec(D),
                  vec(D), vec(D)],
        out_specs=tok,
        compiler_params=_cparams(2),
        cost_estimate=pl.CostEstimate(
            flops=flops, transcendentals=int(2 * B * N * (N + Hid)),
            bytes_accessed=int(4 * 2 * 2 * B * N * D
                               + 2 * 2 * (4 * D * D + 2 * D * Hid))),
    )(t, bp["g1"], bp["b1"], bp["wqkv"], bp["bqkv"], bp["wproj"], bp["bproj"],
      bp["g2"], bp["b2"], bp["wfc1"], bp["bfc1"], bp["wfc2"], bp["bfc2"],
      gf, bf)


def _fuse_kernel(tx_ref, ty_ref, wx_ref, wy_ref, b_ref, o_ref):
    # concat([tx, ty], -1) @ W + b  ==  tx @ Wx + ty @ Wy + b  (split-K).
    acc = jnp.dot(tx_ref[...].astype(jnp.bfloat16), wx_ref[...],
                  preferred_element_type=jnp.float32)
    acc = acc + jnp.dot(ty_ref[...].astype(jnp.bfloat16), wy_ref[...],
                        preferred_element_type=jnp.float32)
    o_ref[...] = (acc + b_ref[...].astype(jnp.float32)).astype(o_ref.dtype)


def pallas_fuse(t_all, wx, wy, b):
    """Modality fusion. t_all: (2, M, D) stacked tokens, weights bf16.
    Reads both modality halves from the same stacked buffer (no HBM concat)."""
    _, M, D = t_all.shape
    tm = _tile_m(M)
    grid = (pl.cdiv(M, tm),)
    return pl.pallas_call(
        _fuse_kernel,
        out_shape=jax.ShapeDtypeStruct((M, D), jnp.float32),
        grid=grid,
        in_specs=[
            pl.BlockSpec((None, tm, D), lambda i: (0, i, 0)),
            pl.BlockSpec((None, tm, D), lambda i: (1, i, 0)),
            pl.BlockSpec((D, D), lambda i: (0, 0)),
            pl.BlockSpec((D, D), lambda i: (0, 0)),
            pl.BlockSpec((1, D), lambda i: (0, 0)),
        ],
        out_specs=pl.BlockSpec((tm, D), lambda i: (i, 0)),
        compiler_params=_cparams(1),
        cost_estimate=pl.CostEstimate(
            flops=int(4 * M * D * D), transcendentals=0,
            bytes_accessed=int(4 * 3 * M * D + 2 * 2 * D * D)),
    )(t_all, t_all, wx, wy, b)


def _nddr_kernel(ts_ref, tv_ref, w1s_ref, w1v_ref, w2s_ref, w2v_ref,
                 b1_ref, b2_ref, o1_ref, o2_ref):
    # Both NDDR 1x1 convs share the concat input; compute both outputs from the
    # same loaded activation tiles and emit two aligned outputs (no HBM slice).
    ts = ts_ref[...].astype(jnp.bfloat16)
    tv = tv_ref[...].astype(jnp.bfloat16)
    a1 = (jnp.dot(ts, w1s_ref[...], preferred_element_type=jnp.float32)
          + jnp.dot(tv, w1v_ref[...], preferred_element_type=jnp.float32)
          + b1_ref[...].astype(jnp.float32))
    a2 = (jnp.dot(ts, w2s_ref[...], preferred_element_type=jnp.float32)
          + jnp.dot(tv, w2v_ref[...], preferred_element_type=jnp.float32)
          + b2_ref[...].astype(jnp.float32))
    o1_ref[...] = jnp.maximum(a1, 0.0).astype(o1_ref.dtype)
    o2_ref[...] = jnp.maximum(a2, 0.0).astype(o2_ref.dtype)


def pallas_nddr(ts, tv, w1s, w1v, w2s, w2v, b1, b2):
    M, D = ts.shape
    tm = _tile_m(M)
    grid = (pl.cdiv(M, tm),)
    x_spec = pl.BlockSpec((tm, D), lambda i: (i, 0))
    w_spec = pl.BlockSpec((D, D), lambda i: (0, 0))
    b_spec = pl.BlockSpec((1, D), lambda i: (0, 0))
    return pl.pallas_call(
        _nddr_kernel,
        out_shape=(jax.ShapeDtypeStruct((M, D), jnp.float32),
                   jax.ShapeDtypeStruct((M, D), jnp.float32)),
        grid=grid,
        in_specs=[x_spec, x_spec, w_spec, w_spec, w_spec, w_spec,
                  b_spec, b_spec],
        out_specs=(pl.BlockSpec((tm, D), lambda i: (i, 0)),
                   pl.BlockSpec((tm, D), lambda i: (i, 0))),
        compiler_params=_cparams(1),
        cost_estimate=pl.CostEstimate(
            flops=int(8 * M * D * D), transcendentals=0,
            bytes_accessed=int(4 * 4 * M * D + 2 * 4 * D * D)),
    )(ts, tv, w1s, w1v, w2s, w2v, b1, b2)


def _seg_decoder_kernel(*refs, n_in):
    # relu(sum_i x_i @ W_i + b_mid) @ W_cls + b_cls     (split-K over stages)
    xs = refs[:n_in]
    ws = refs[n_in:2 * n_in]
    b_mid_ref = refs[2 * n_in]
    wcls_ref = refs[2 * n_in + 1]
    bcls_ref = refs[2 * n_in + 2]
    o_ref = refs[2 * n_in + 3]
    acc = b_mid_ref[...].astype(jnp.float32)
    for xr, wr in zip(xs, ws):
        acc = acc + jnp.dot(xr[...].astype(jnp.bfloat16), wr[...],
                            preferred_element_type=jnp.float32)
    acc = jnp.maximum(acc, 0.0)
    out = jnp.dot(acc.astype(jnp.bfloat16), wcls_ref[...],
                  preferred_element_type=jnp.float32)
    out = out + bcls_ref[...].astype(jnp.float32)
    o_ref[...] = out.astype(o_ref.dtype)


def pallas_seg_decoder(xs, ws, b_mid, wcls, bcls):
    M = xs[0].shape[0]
    E = ws[0].shape[1]
    NC = wcls.shape[1]
    n_in = len(xs)
    tm = _tile_m(M)
    grid = (pl.cdiv(M, tm),)
    in_specs = [pl.BlockSpec((tm, int(x.shape[1])), lambda i: (i, 0)) for x in xs]
    in_specs += [pl.BlockSpec(tuple(w.shape), lambda i: (0, 0)) for w in ws]
    in_specs += [pl.BlockSpec((1, E), lambda i: (0, 0)),
                 pl.BlockSpec((E, NC), lambda i: (0, 0)),
                 pl.BlockSpec((1, NC), lambda i: (0, 0))]
    kernel = functools.partial(_seg_decoder_kernel, n_in=n_in)
    return pl.pallas_call(
        kernel,
        out_shape=jax.ShapeDtypeStruct((M, NC), jnp.float32),
        grid=grid,
        in_specs=in_specs,
        out_specs=pl.BlockSpec((tm, NC), lambda i: (i, 0)),
        compiler_params=_cparams(1),
    )(*xs, *ws, b_mid, wcls, bcls)


def _fusion_decoder_kernel(*refs, group_sizes):
    # (sum_g relu(sum_{i in g} x_i @ W_i + b_g)) @ W_out + b_out
    n_x = sum(group_sizes)
    n_g = len(group_sizes)
    xs = refs[:n_x]
    ws = refs[n_x:2 * n_x]
    bs = refs[2 * n_x:2 * n_x + n_g]
    wout_ref = refs[2 * n_x + n_g]
    bout_ref = refs[2 * n_x + n_g + 1]
    o_ref = refs[2 * n_x + n_g + 2]
    acc = None
    xi = 0
    for g, gsz in enumerate(group_sizes):
        term = bs[g][...].astype(jnp.float32)
        for _ in range(gsz):
            term = term + jnp.dot(xs[xi][...].astype(jnp.bfloat16), ws[xi][...],
                                  preferred_element_type=jnp.float32)
            xi += 1
        term = jnp.maximum(term, 0.0)
        acc = term if acc is None else acc + term
    out = jnp.dot(acc.astype(jnp.bfloat16), wout_ref[...],
                  preferred_element_type=jnp.float32)
    out = out + bout_ref[...].astype(jnp.float32)
    o_ref[...] = out.astype(o_ref.dtype)


def pallas_fusion_decoder(xs, ws, bs, wout, bout, group_sizes):
    M = xs[0].shape[0]
    F = wout.shape[0]
    OC = wout.shape[1]
    tm = _tile_m(M)
    grid = (pl.cdiv(M, tm),)
    in_specs = [pl.BlockSpec((tm, int(x.shape[1])), lambda i: (i, 0)) for x in xs]
    in_specs += [pl.BlockSpec(tuple(w.shape), lambda i: (0, 0)) for w in ws]
    in_specs += [pl.BlockSpec((1, F), lambda i: (0, 0)) for _ in bs]
    in_specs += [pl.BlockSpec((F, OC), lambda i: (0, 0)),
                 pl.BlockSpec((1, OC), lambda i: (0, 0))]
    kernel = functools.partial(_fusion_decoder_kernel,
                               group_sizes=tuple(group_sizes))
    return pl.pallas_call(
        kernel,
        out_shape=jax.ShapeDtypeStruct((M, OC), jnp.float32),
        grid=grid,
        in_specs=in_specs,
        out_specs=pl.BlockSpec((tm, OC), lambda i: (i, 0)),
        compiler_params=_cparams(1),
    )(*xs, *ws, *bs, wout, bout)


# --------------------------- layout helper glue -----------------------------


def _im2col_nhwc(x, patch):
    """Non-overlapping conv(patch, stride=patch) unfold in channels-last layout."""
    B, H, W, C = x.shape
    Hp, Wp = H // patch, W // patch
    xp = x.reshape(B, Hp, patch, Wp, patch, C)
    xp = jnp.transpose(xp, (0, 1, 3, 2, 4, 5))
    return xp.reshape(B * Hp * Wp, patch * patch * C), Hp, Wp


def _upsample_nhwc(x, H, W):
    B, h, w, _ = x.shape
    if h == H and w == W:
        return x
    # TODO(synk): fold the nearest-neighbor upsample into the consumer kernel's
    #             index_map instead of materializing it in HBM.
    return jnp.repeat(jnp.repeat(x, H // h, axis=1), W // w, axis=2)


# ------------------------------ parameters ----------------------------------


def _wmat(key, r, c, scale=0.02):
    return (jax.random.normal(key, (r, c), jnp.float32) * scale).astype(jnp.bfloat16)


def _bvec(key, c, scale=0.02):
    return jax.random.normal(key, (1, c), jnp.float32) * scale


def _stacked_block_params(key, dim, mlp_ratio):
    hidden = dim * mlp_ratio
    ks = jax.random.split(key, 8)

    def smat(k, r, c):
        return (jax.random.normal(k, (2, r, c), jnp.float32) * 0.02).astype(jnp.bfloat16)

    def svec(k, c):
        return jax.random.normal(k, (2, 1, c), jnp.float32) * 0.02

    return {
        "g1": jnp.ones((2, 1, dim), jnp.float32),
        "b1": jnp.zeros((2, 1, dim), jnp.float32),
        # q / kv projections pre-merged into one (D, 3D) weight at init time.
        "wqkv": smat(ks[0], dim, 3 * dim),
        "bqkv": svec(ks[1], 3 * dim),
        "wproj": smat(ks[2], dim, dim),
        "bproj": svec(ks[3], dim),
        "g2": jnp.ones((2, 1, dim), jnp.float32),
        "b2": jnp.zeros((2, 1, dim), jnp.float32),
        "wfc1": smat(ks[4], dim, hidden),
        "bfc1": svec(ks[5], hidden),
        "wfc2": smat(ks[6], hidden, dim),
        "bfc2": svec(ks[7], dim),
    }


def _encoder_stage_params(key, in_ch, patch, dim, mlp_ratio, depth):
    ks = jax.random.split(key, depth + 3)
    kp = in_ch * patch * patch
    pe = {
        "w": (jax.random.normal(ks[0], (2, kp, dim), jnp.float32) * 0.02).astype(jnp.bfloat16),
        "b": jax.random.normal(jax.random.fold_in(ks[0], 1), (2, 1, dim), jnp.float32) * 0.02,
        "g": jnp.ones((2, 1, dim), jnp.float32),
        "beta": jnp.zeros((2, 1, dim), jnp.float32),
    }
    blocks = [_stacked_block_params(ks[1 + i], dim, mlp_ratio) for i in range(depth)]
    norm = {"g": jnp.ones((2, 1, dim), jnp.float32),
            "b": jnp.zeros((2, 1, dim), jnp.float32)}
    kf = ks[depth + 1]
    fuse = {"wx": _wmat(kf, dim, dim),
            "wy": _wmat(jax.random.fold_in(kf, 1), dim, dim),
            "b": _bvec(jax.random.fold_in(kf, 2), dim)}
    return {"pe": pe, "blocks": blocks, "norm": norm, "fuse": fuse}


def _nddr_params(key, dim):
    ks = jax.random.split(key, 6)
    return {"w1s": _wmat(ks[0], dim, dim), "w1v": _wmat(ks[1], dim, dim),
            "b1": _bvec(ks[2], dim),
            "w2s": _wmat(ks[3], dim, dim), "w2v": _wmat(ks[4], dim, dim),
            "b2": _bvec(ks[5], dim)}


def _seg_decoder_params(key, in_channels, embed_dim, num_classes):
    ks = jax.random.split(key, len(in_channels) + 2)
    proj = [_wmat(ks[i], c, embed_dim) for i, c in enumerate(in_channels)]
    return {"proj": proj,
            "b": _bvec(ks[-2], embed_dim),
            "wcls": _wmat(ks[-1], embed_dim, num_classes),
            "bcls": _bvec(jax.random.fold_in(ks[-1], 1), num_classes)}


def _fusion_decoder_params(key, in_chans, embed_dims, fdim):
    n = len(embed_dims)
    ks = jax.random.split(key, 2 * n + 5)
    proj_ws = [_wmat(ks[0], in_chans, fdim), _wmat(ks[1], in_chans, fdim)]
    proj_bs = [_bvec(ks[2], fdim)]
    idx = 3
    for d in embed_dims:
        proj_ws.append(_wmat(ks[idx], d, fdim)); idx += 1
        proj_bs.append(_bvec(ks[idx], fdim)); idx += 1
    return {"proj_ws": proj_ws, "proj_bs": proj_bs,
            "wout": _wmat(ks[idx], fdim, in_chans),
            "bout": _bvec(ks[idx + 1], in_chans)}


def init_params(key, cfg):
    ks = jax.random.split(key, 5)
    enc_in = [cfg["in_chans"]] + list(cfg["embed_dims"][:-1])
    k1 = jax.random.split(ks[0], cfg["num_stages"])
    k2 = jax.random.split(ks[1], cfg["num_stages"])
    k3 = jax.random.split(ks[2], cfg["num_stages"])
    task1_enc, task2_enc, nddrs = [], [], []
    for s in range(cfg["num_stages"]):
        dim = cfg["embed_dims"][s]
        task1_enc.append(_encoder_stage_params(
            k1[s], enc_in[s], cfg["patch_size"][s], dim,
            cfg["mlp_ratios"][s], cfg["depths"][s]))
        task2_enc.append(_encoder_stage_params(
            k2[s], enc_in[s], cfg["patch_size"][s], dim,
            cfg["mlp_ratios"][s], cfg["depths"][s]))
        nddrs.append(_nddr_params(k3[s], dim))
    seg_dec = _seg_decoder_params(ks[3], cfg["embed_dims"],
                                  cfg["decoder_embed_dim"], cfg["num_classes"])
    fus_dec = _fusion_decoder_params(ks[4], cfg["in_chans"],
                                     list(cfg["embed_dims"]),
                                     cfg["decoder_embed_dim"])
    return {"task1_enc": task1_enc, "task2_enc": task2_enc, "nddrs": nddrs,
            "seg_dec": seg_dec, "fus_dec": fus_dec}


# ------------------------------ forward pass ---------------------------------


def encoder_stage_forward(p, fx, fy, patch, heads):
    """fx, fy: channels-last feature maps (B, H, W, C).
    Returns per-modality stage outputs (NHWC) and the fused map (NHWC)."""
    B = fx.shape[0]
    tx, Hp, Wp = _im2col_nhwc(fx, patch)
    ty, _, _ = _im2col_nhwc(fy, patch)
    xs = jnp.stack([tx, ty], axis=0)                          # (2, M, Kp)
    t = pallas_patch_embed(xs, p["pe"]["w"], p["pe"]["b"],
                           p["pe"]["g"], p["pe"]["beta"])
    N = Hp * Wp
    D = t.shape[-1]
    t = t.reshape(2, B, N, D)
    n_blocks = len(p["blocks"])
    for bi, bp in enumerate(p["blocks"]):
        t = pallas_transformer_block(t, bp, p["norm"]["g"], p["norm"]["b"],
                                     heads=heads,
                                     final_ln=(bi == n_blocks - 1))
    fx_out = t[0].reshape(B, Hp, Wp, D)
    fy_out = t[1].reshape(B, Hp, Wp, D)
    fuse = pallas_fuse(t.reshape(2, B * N, D),
                       p["fuse"]["wx"], p["fuse"]["wy"], p["fuse"]["b"])
    return fx_out, fy_out, fuse.reshape(B, Hp, Wp, D)


def nddr_forward(p, fuse_sem, fuse_vis):
    B, Hp, Wp, D = fuse_sem.shape
    M = B * Hp * Wp
    o1, o2 = pallas_nddr(fuse_sem.reshape(M, D), fuse_vis.reshape(M, D),
                         p["w1s"], p["w1v"], p["w2s"], p["w2v"],
                         p["b1"], p["b2"])
    return o1.reshape(B, Hp, Wp, D), o2.reshape(B, Hp, Wp, D)


def seg_decoder_forward(p, feats):
    B, H0, W0, _ = feats[0].shape
    M = B * H0 * W0
    xs = [_upsample_nhwc(f, H0, W0).reshape(M, -1) for f in feats]
    out = pallas_seg_decoder(xs, p["proj"], p["b"], p["wcls"], p["bcls"])
    return out.reshape(B, H0, W0, -1)


def fusion_decoder_forward(p, feats, group_sizes, H, W):
    B = feats[0].shape[0]
    M = B * H * W
    xs = [_upsample_nhwc(f, H, W).reshape(M, -1) for f in feats]
    out = pallas_fusion_decoder(xs, p["proj_ws"], p["proj_bs"],
                                p["wout"], p["bout"], group_sizes)
    return out.reshape(B, H, W, -1)


def nddr_tasknet_forward(params, modal_x, modal_y, cfg):
    # NCHW -> NHWC exactly once at the module boundary.
    x = jnp.transpose(modal_x, (0, 2, 3, 1))
    y = jnp.transpose(modal_y, (0, 2, 3, 1))

    out_semantic = []
    # reference's torch.cat([modal_x, modal_y], dim=1) is kept as the split
    # pair; the channel concat is folded into the decoder's split-K kernel.
    out_visual = [x, y]
    fx_sem, fy_sem = x, y
    fx_vis, fy_vis = x, y
    for s in range(cfg["num_stages"]):
        patch = cfg["patch_size"][s]
        heads = cfg["num_heads"][s]
        fx_sem, fy_sem, fuse_sem = encoder_stage_forward(
            params["task1_enc"][s], fx_sem, fy_sem, patch, heads)
        fx_vis, fy_vis, fuse_vis = encoder_stage_forward(
            params["task2_enc"][s], fx_vis, fy_vis, patch, heads)
        s_sem, s_vis = nddr_forward(params["nddrs"][s], fuse_sem, fuse_vis)
        out_semantic.append(s_sem)
        out_visual.append(s_vis)

    out1 = seg_decoder_forward(params["seg_dec"], out_semantic)
    out2 = fusion_decoder_forward(params["fus_dec"], out_visual,
                                  (2,) + (1,) * cfg["num_stages"],
                                  cfg["img_size"], cfg["img_size"])
    # NHWC -> NCHW once for each module output.
    return (jnp.transpose(out1, (0, 3, 1, 2)),
            jnp.transpose(out2, (0, 3, 1, 2)))


# ---------------------------------- main -------------------------------------

if __name__ == "__main__":
    cfg = dict(
        in_chans=4,
        num_stages=2,
        num_classes=8,
        img_size=16,
        patch_size=[4, 2],
        stride=[4, 2],
        depths=[1, 1],
        embed_dims=[32, 64],
        num_heads=[1, 2],
        mlp_ratios=[2, 2],
        sr_ratios=[1, 1],   # sr=1 -> plain attention (no spatial reduction)
        decoder_embed_dim=32,
    )

    key = jax.random.PRNGKey(0)
    kp, kx, ky = jax.random.split(key, 3)
    params = init_params(kp, cfg)

    B = 2
    modal_x = jax.random.normal(
        kx, (B, cfg["in_chans"], cfg["img_size"], cfg["img_size"]), jnp.float32)
    modal_y = jax.random.normal(
        ky, (B, cfg["in_chans"], cfg["img_size"], cfg["img_size"]), jnp.float32)

    fwd = jax.jit(lambda p, mx, my: nddr_tasknet_forward(p, mx, my, cfg))
    out1, out2 = fwd(params, modal_x, modal_y)
    jax.block_until_ready((out1, out2))

    assert out1.shape == (B, cfg["num_classes"], cfg["img_size"] // 4,
                          cfg["img_size"] // 4), out1.shape
    assert out2.shape == (B, cfg["in_chans"], cfg["img_size"],
                          cfg["img_size"]), out2.shape
    print("KERNEL_OK")
</pallas_src>

<mosaic_0001>
module attributes {stable_mosaic.version = 11 : i64} {
  func.func @_patch_embed_kernel(%arg0: i32, %arg1: i32, %arg2: memref<1x32x64xf32, #tpu.memory_space<vmem>>, %arg3: memref<1x64x32xbf16, #tpu.memory_space<vmem>>, %arg4: memref<1x1x32xf32, #tpu.memory_space<vmem>>, %arg5: memref<1x1x32xf32, #tpu.memory_space<vmem>>, %arg6: memref<1x1x32xf32, #tpu.memory_space<vmem>>, %arg7: memref<1x32x32xf32, #tpu.memory_space<vmem>>) attributes {dimension_semantics = [#tpu.dimension_semantics<parallel>, #tpu.dimension_semantics<parallel>], iteration_bounds = array<i64: 2, 1>, scalar_prefetch = 0 : i64, scratch_operands = 0 : i64, tpu.core_type = #tpu.core_type<tc>, window_params = [{transform_indices = @transform_0, window_bounds = array<i64: 1, 32, 64>}, {transform_indices = @transform_1, window_bounds = array<i64: 1, 64, 32>}, {transform_indices = @transform_2, window_bounds = array<i64: 1, 1, 32>}, {transform_indices = @transform_3, window_bounds = array<i64: 1, 1, 32>}, {transform_indices = @transform_4, window_bounds = array<i64: 1, 1, 32>}, {transform_indices = @transform_5, window_bounds = array<i64: 1, 32, 32>}]} {
    %c0 = arith.constant 0 : index
    %c0_0 = arith.constant 0 : index
    %c0_1 = arith.constant 0 : index
    %0 = vector.load %arg2[%c0, %c0_0, %c0_1] : memref<1x32x64xf32, #tpu.memory_space<vmem>>, vector<1x32x64xf32>
    %1 = vector.shape_cast %0 : vector<1x32x64xf32> to vector<32x64xf32>
    %2 = arith.truncf %1 : vector<32x64xf32> to vector<32x64xbf16>
    %c0_2 = arith.constant 0 : index
    %c0_3 = arith.constant 0 : index
    %c0_4 = arith.constant 0 : index
    %3 = vector.load %arg3[%c0_2, %c0_3, %c0_4] : memref<1x64x32xbf16, #tpu.memory_space<vmem>>, vector<1x64x32xbf16>
    %4 = vector.shape_cast %3 : vector<1x64x32xbf16> to vector<64x32xbf16>
    %cst = arith.constant dense<0.000000e+00> : vector<32x32xf32>
    %5 = tpu.matmul %2, %4, %cst {dimension_numbers = #tpu.dot_dimension_numbers<[1], [0], [0], [1], [0, 0, 1, 1], [], []>} : vector<32x64xbf16>, vector<64x32xbf16>, vector<32x32xf32> -> vector<32x32xf32>
    %c0_5 = arith.constant 0 : index
    %c0_6 = arith.constant 0 : index
    %c0_7 = arith.constant 0 : index
    %6 = vector.load %arg4[%c0_5, %c0_6, %c0_7] : memref<1x1x32xf32, #tpu.memory_space<vmem>>, vector<1x1x32xf32>
    %7 = vector.shape_cast %6 : vector<1x1x32xf32> to vector<1x32xf32>
    %8 = vector.broadcast %7 : vector<1x32xf32> to vector<32x32xf32>
    %9 = arith.addf %5, %8 : vector<32x32xf32>
    %cst_8 = arith.constant dense<0.000000e+00> : vector<32xf32>
    %10 = vector.multi_reduction <add>, %9, %cst_8 [1] : vector<32x32xf32> to vector<32xf32>
    %11 = vector.shape_cast %10 : vector<32xf32> to vector<32x1xf32>
    %cst_9 = arith.constant 3.200000e+01 : f32
    %12 = vector.broadcast %cst_9 : f32 to vector<32x1xf32>
    %13 = arith.divf %11, %12 : vector<32x1xf32>
    %14 = vector.broadcast %13 : vector<32x1xf32> to vector<32x32xf32>
    %15 = arith.subf %9, %14 : vector<32x32xf32>
    %16 = arith.mulf %15, %15 : vector<32x32xf32>
    %cst_10 = arith.constant dense<0.000000e+00> : vector<32xf32>
    %17 = vector.multi_reduction <add>, %16, %cst_10 [1] : vector<32x32xf32> to vector<32xf32>
    %18 = vector.shape_cast %17 : vector<32xf32> to vector<32x1xf32>
    %cst_11 = arith.constant 3.200000e+01 : f32
    %19 = vector.broadcast %cst_11 : f32 to vector<32x1xf32>
    %20 = arith.divf %18, %19 : vector<32x1xf32>
    %21 = vector.broadcast %13 : vector<32x1xf32> to vector<32x32xf32>
    %22 = arith.subf %9, %21 : vector<32x32xf32>
    %cst_12 = arith.constant 9.99999974E-6 : f32
    %23 = vector.broadcast %cst_12 : f32 to vector<32x1xf32>
    %24 = arith.addf %20, %23 : vector<32x1xf32>
    %25 = math.rsqrt %24 : vector<32x1xf32>
    %26 = vector.broadcast %25 : vector<32x1xf32> to vector<32x32xf32>
    %27 = arith.mulf %22, %26 : vector<32x32xf32>
    %c0_13 = arith.constant 0 : index
    %c0_14 = arith.constant 0 : index
    %c0_15 = arith.constant 0 : index
    %28 = vector.load %arg5[%c0_13, %c0_14, %c0_15] : memref<1x1x32xf32, #tpu.memory_space<vmem>>, vector<1x1x32xf32>
    %29 = vector.shape_cast %28 : vector<1x1x32xf32> to vector<1x32xf32>
    %30 = vector.broadcast %29 : vector<1x32xf32> to vector<32x32xf32>
    %31 = arith.mulf %27, %30 : vector<32x32xf32>
    %c0_16 = arith.constant 0 : index
    %c0_17 = arith.constant 0 : index
    %c0_18 = arith.constant 0 : index
    %32 = vector.load %arg6[%c0_16, %c0_17, %c0_18] : memref<1x1x32xf32, #tpu.memory_space<vmem>>, vector<1x1x32xf32>
    %33 = vector.shape_cast %32 : vector<1x1x32xf32> to vector<1x32xf32>
    %34 = vector.broadcast %33 : vector<1x32xf32> to vector<32x32xf32>
    %35 = arith.addf %31, %34 : vector<32x32xf32>
    %c0_19 = arith.constant 0 : index
    %c0_20 = arith.constant 0 : index
    %c0_21 = arith.constant 0 : index
    %36 = vector.load %arg7[%c0_19, %c0_20, %c0_21] : memref<1x32x32xf32, #tpu.memory_space<vmem>>, vector<1x32x32xf32>
    %37 = vector.shape_cast %36 : vector<1x32x32xf32> to vector<32x32xf32>
    %38 = vector.shape_cast %35 : vector<32x32xf32> to vector<1x32x32xf32>
    tpu.vector_store %arg7[%c0_19, %c0_20, %c0_21], %38 {strides = array<i32>} : memref<1x32x32xf32, #tpu.memory_space<vmem>>, vector<1x32x32xf32>,
    return
  }
  func.func @transform_0(%arg0: i32, %arg1: i32) -> (i32, i32, i32) {
    %c0_i32 = arith.constant 0 : i32
    %c0_i32_0 = arith.constant 0 : i32
    return %arg0, %arg1, %c0_i32 : i32, i32, i32
  }
  func.func @transform_1(%arg0: i32, %arg1: i32) -> (i32, i32, i32) {
    %c0_i32 = arith.constant 0 : i32
    %c0_i32_0 = arith.constant 0 : i32
    %c0_i32_1 = arith.constant 0 : i32
    return %arg0, %c0_i32, %c0_i32_0 : i32, i32, i32
  }
  func.func @transform_2(%arg0: i32, %arg1: i32) -> (i32, i32, i32) {
    %c0_i32 = arith.constant 0 : i32
    %c0_i32_0 = arith.constant 0 : i32
    %c0_i32_1 = arith.constant 0 : i32
    return %arg0, %c0_i32, %c0_i32_0 : i32, i32, i32
  }
  func.func @transform_3(%arg0: i32, %arg1: i32) -> (i32, i32, i32) {
    %c0_i32 = arith.constant 0 : i32
    %c0_i32_0 = arith.constant 0 : i32
    %c0_i32_1 = arith.constant 0 : i32
    return %arg0, %c0_i32, %c0_i32_0 : i32, i32, i32
  }
  func.func @transform_4(%arg0: i32, %arg1: i32) -> (i32, i32, i32) {
    %c0_i32 = arith.constant 0 : i32
    %c0_i32_0 = arith.constant 0 : i32
    %c0_i32_1 = arith.constant 0 : i32
    return %arg0, %c0_i32, %c0_i32_0 : i32, i32, i32
  }
  func.func @transform_5(%arg0: i32, %arg1: i32) -> (i32, i32, i32) {
    %c0_i32 = arith.constant 0 : i32
    %c0_i32_0 = arith.constant 0 : i32
    return %arg0, %arg1, %c0_i32 : i32, i32, i32
  }
}

module attributes {stable_mosaic.version = 11 : i64} {
  func.func @_block_kernel(%arg0: i32, %arg1: i32, %arg2: memref<1x1x16x32xf32, #tpu.memory_space<vmem>>, %arg3: memref<1x1x32xf32, #tpu.memory_space<vmem>>, %arg4: memref<1x1x32xf32, #tpu.memory_space<vmem>>, %arg5: memref<1x32x96xbf16, #tpu.memory_space<vmem>>, %arg6: memref<1x1x96xf32, #tpu.memory_space<vmem>>, %arg7: memref<1x32x32xbf16, #tpu.memory_space<vmem>>, %arg8: memref<1x1x32xf32, #tpu.memory_space<vmem>>, %arg9: memref<1x1x32xf32, #tpu.memory_space<vmem>>, %arg10: memref<1x1x32xf32, #tpu.memory_space<vmem>>, %arg11: memref<1x32x64xbf16, #tpu.memory_space<vmem>>, %arg12: memref<1x1x64xf32, #tpu.memory_space<vmem>>, %arg13: memref<1x64x32xbf16, #tpu.memory_space<vmem>>, %arg14: memref<1x1x32xf32, #tpu.memory_space<vmem>>, %arg15: memref<1x1x32xf32, #tpu.memory_space<vmem>>, %arg16: memref<1x1x32xf32, #tpu.memory_space<vmem>>, %arg17: memref<1x1x16x32xf32, #tpu.memory_space<vmem>>) attributes {dimension_semantics = [#tpu.dimension_semantics<parallel>, #tpu.dimension_semantics<parallel>], iteration_bounds = array<i64: 2, 2>, scalar_prefetch = 0 : i64, scratch_operands = 0 : i64, tpu.core_type = #tpu.core_type<tc>, window_params = [{transform_indices = @transform_0, window_bounds = array<i64: 1, 1, 16, 32>}, {transform_indices = @transform_1, window_bounds = array<i64: 1, 1, 32>}, {transform_indices = @transform_2, window_bounds = array<i64: 1, 1, 32>}, {transform_indices = @transform_3, window_bounds = array<i64: 1, 32, 96>}, {transform_indices = @transform_4, window_bounds = array<i64: 1, 1, 96>}, {transform_indices = @transform_5, window_bounds = array<i64: 1, 32, 32>}, {transform_indices = @transform_6, window_bounds = array<i64: 1, 1, 32>}, {transform_indices = @transform_7, window_bounds = array<i64: 1, 1, 32>}, {transform_indices = @transform_8, window_bounds = array<i64: 1, 1, 32>}, {transform_indices = @transform_9, window_bounds = array<i64: 1, 32, 64>}, {transform_indices = @transform_10, window_bounds = array<i64: 1, 1, 64>}, {transform_indices = @transform_11, window_bounds = array<i64: 1, 64, 32>}, {transform_indices = @transform_12, window_bounds = array<i64: 1, 1, 32>}, {transform_indices = @transform_13, window_bounds = array<i64: 1, 1, 32>}, {transform_indices = @transform_14, window_bounds = array<i64: 1, 1, 32>}, {transform_indices = @transform_15, window_bounds = array<i64: 1, 1, 16, 32>}]} {
    %c0 = arith.constant 0 : index
    %c0_0 = arith.constant 0 : index
    %c0_1 = arith.constant 0 : index
    %c0_2 = arith.constant 0 : index
    %0 = vector.load %arg2[%c0, %c0_0, %c0_1, %c0_2] : memref<1x1x16x32xf32, #tpu.memory_space<vmem>>, vector<1x1x16x32xf32>
    %1 = vector.shape_cast %0 : vector<1x1x16x32xf32> to vector<16x32xf32>
    %cst = arith.constant dense<0.000000e+00> : vector<16xf32>
    %2 = vector.multi_reduction <add>, %1, %cst [1] : vector<16x32xf32> to vector<16xf32>
    %3 = vector.shape_cast %2 : vector<16xf32> to vector<16x1xf32>
    %cst_3 = arith.constant 3.200000e+01 : f32
    %4 = vector.broadcast %cst_3 : f32 to vector<16x1xf32>
    %5 = arith.divf %3, %4 : vector<16x1xf32>
    %6 = vector.broadcast %5 : vector<16x1xf32> to vector<16x32xf32>
    %7 = arith.subf %1, %6 : vector<16x32xf32>
    %8 = arith.mulf %7, %7 : vector<16x32xf32>
    %cst_4 = arith.constant dense<0.000000e+00> : vector<16xf32>
    %9 = vector.multi_reduction <add>, %8, %cst_4 [1] : vector<16x32xf32> to vector<16xf32>
    %10 = vector.shape_cast %9 : vector<16xf32> to vector<16x1xf32>
    %cst_5 = arith.constant 3.200000e+01 : f32
    %11 = vector.broadcast %cst_5 : f32 to vector<16x1xf32>
    %12 = arith.divf %10, %11 : vector<16x1xf32>
    %13 = vector.broadcast %5 : vector<16x1xf32> to vector<16x32xf32>
    %14 = arith.subf %1, %13 : vector<16x32xf32>
    %cst_6 = arith.constant 9.99999974E-6 : f32
    %15 = vector.broadcast %cst_6 : f32 to vector<16x1xf32>
    %16 = arith.addf %12, %15 : vector<16x1xf32>
    %17 = math.rsqrt %16 : vector<16x1xf32>
    %18 = vector.broadcast %17 : vector<16x1xf32> to vector<16x32xf32>
    %19 = arith.mulf %14, %18 : vector<16x32xf32>
    %c0_7 = arith.constant 0 : index
    %c0_8 = arith.constant 0 : index
    %c0_9 = arith.constant 0 : index
    %20 = vector.load %arg3[%c0_7, %c0_8, %c0_9] : memref<1x1x32xf32, #tpu.memory_space<vmem>>, vector<1x1x32xf32>
    %21 = vector.shape_cast %20 : vector<1x1x32xf32> to vector<1x32xf32>
    %22 = vector.broadcast %21 : vector<1x32xf32> to vector<16x32xf32>
    %23 = arith.mulf %19, %22 : vector<16x32xf32>
    %c0_10 = arith.constant 0 : index
    %c0_11 = arith.constant 0 : index
    %c0_12 = arith.constant 0 : index
    %24 = vector.load %arg4[%c0_10, %c0_11, %c0_12] : memref<1x1x32xf32, #tpu.memory_space<vmem>>, vector<1x1x32xf32>
    %25 = vector.shape_cast %24 : vector<1x1x32xf32> to vector<1x32xf32>
    %26 = vector.broadcast %25 : vector<1x32xf32> to vector<16x32xf32>
    %27 = arith.addf %23, %26 : vector<16x32xf32>
    %28 = arith.truncf %27 : vector<16x32xf32> to vector<16x32xbf16>
    %c0_13 = arith.constant 0 : index
    %c0_14 = arith.constant 0 : index
    %c0_15 = arith.constant 0 : index
    %29 = vector.load %arg5[%c0_13, %c0_14, %c0_15] : memref<1x32x96xbf16, #tpu.memory_space<vmem>>, vector<1x32x96xbf16>
    %30 = vector.shape_cast %29 : vector<1x32x96xbf16> to vector<32x96xbf16>
    %cst_16 = arith.constant dense<0.000000e+00> : vector<16x96xf32>
    %31 = tpu.matmul %28, %30, %cst_16 {dimension_numbers = #tpu.dot_dimension_numbers<[1], [0], [0], [1], [0, 0, 1, 1], [], []>} : vector<16x32xbf16>, vector<32x96xbf16>, vector<16x96xf32> -> vector<16x96xf32>
    %c0_17 = arith.constant 0 : index
    %c0_18 = arith.constant 0 : index
    %c0_19 = arith.constant 0 : index
    %32 = vector.load %arg6[%c0_17, %c0_18, %c0_19] : memref<1x1x96xf32, #tpu.memory_space<vmem>>, vector<1x1x96xf32>
    %33 = vector.shape_cast %32 : vector<1x1x96xf32> to vector<1x96xf32>
    %34 = vector.broadcast %33 : vector<1x96xf32> to vector<16x96xf32>
    %35 = arith.addf %31, %34 : vector<16x96xf32>
    %36 = vector.extract_strided_slice %35 {offsets = [0, 0], sizes = [16, 32], strides = [1, 1]} : vector<16x96xf32> to vector<16x32xf32>
    %37 = vector.extract_strided_slice %35 {offsets = [0, 32], sizes = [16, 32], strides = [1, 1]} : vector<16x96xf32> to vector<16x32xf32>
    %38 = vector.extract_strided_slice %35 {offsets = [0, 64], sizes = [16, 32], strides = [1, 1]} : vector<16x96xf32> to vector<16x32xf32>
    %39 = arith.truncf %36 : vector<16x32xf32> to vector<16x32xbf16>
    %40 = arith.truncf %37 : vector<16x32xf32> to vector<16x32xbf16>
    %cst_20 = arith.constant dense<0.000000e+00> : vector<16x16xf32>
    %41 = tpu.matmul %39, %40, %cst_20 {dimension_numbers = #tpu.dot_dimension_numbers<[1], [1], [0], [0], [0, 0, 1, 0], [], []>} : vector<16x32xbf16>, vector<16x32xbf16>, vector<16x16xf32> -> vector<16x16xf32>
    %cst_21 = arith.constant 0.176776692 : f32
    %42 = vector.broadcast %cst_21 : f32 to vector<16x16xf32>
    %43 = arith.mulf %41, %42 : vector<16x16xf32>
    %cst_22 = arith.constant dense<0xFF800000> : vector<16xf32>
    %44 = vector.multi_reduction <maximumf>, %43, %cst_22 [1] : vector<16x16xf32> to vector<16xf32>
    %45 = vector.shape_cast %44 : vector<16xf32> to vector<16x1xf32>
    %46 = vector.broadcast %45 : vector<16x1xf32> to vector<16x16xf32>
    %47 = arith.subf %43, %46 : vector<16x16xf32>
    %48 = math.exp %47 : vector<16x16xf32>
    %cst_23 = arith.constant dense<0.000000e+00> : vector<16xf32>
    %49 = vector.multi_reduction <add>, %48, %cst_23 [1] : vector<16x16xf32> to vector<16xf32>
    %50 = vector.shape_cast %49 : vector<16xf32> to vector<16x1xf32>
    %51 = vector.broadcast %50 : vector<16x1xf32> to vector<16x16xf32>
    %52 = arith.divf %48, %51 : vector<16x16xf32>
    %53 = arith.truncf %52 : vector<16x16xf32> to vector<16x16xbf16>
    %54 = arith.truncf %38 : vector<16x32xf32> to vector<16x32xbf16>
    %cst_24 = arith.constant dense<0.000000e+00> : vector<16x32xf32>
    %55 = tpu.matmul %53, %54, %cst_24 {dimension_numbers = #tpu.dot_dimension_numbers<[1], [0], [0], [1], [0, 0, 1, 1], [], []>} : vector<16x16xbf16>, vector<16x32xbf16>, vector<16x32xf32> -> vector<16x32xf32>
    %56 = arith.truncf %55 : vector<16x32xf32> to vector<16x32xbf16>
    %c0_25 = arith.constant 0 : index
    %c0_26 = arith.constant 0 : index
    %c0_27 = arith.constant 0 : index
    %57 = vector.load %arg7[%c0_25, %c0_26, %c0_27] : memref<1x32x32xbf16, #tpu.memory_space<vmem>>, vector<1x32x32xbf16>
    %58 = vector.shape_cast %57 : vector<1x32x32xbf16> to vector<32x32xbf16>
    %cst_28 = arith.constant dense<0.000000e+00> : vector<16x32xf32>
    %59 = tpu.matmul %56, %58, %cst_28 {dimension_numbers = #tpu.dot_dimension_numbers<[1], [0], [0], [1], [0, 0, 1, 1], [], []>} : vector<16x32xbf16>, vector<32x32xbf16>, vector<16x32xf32> -> vector<16x32xf32>
    %c0_29 = arith.constant 0 : index
    %c0_30 = arith.constant 0 : index
    %c0_31 = arith.constant 0 : index
    %60 = vector.load %arg8[%c0_29, %c0_30, %c0_31] : memref<1x1x32xf32, #tpu.memory_space<vmem>>, vector<1x1x32xf32>
    %61 = vector.shape_cast %60 : vector<1x1x32xf32> to vector<1x32xf32>
    %62 = vector.broadcast %61 : vector<1x32xf32> to vector<16x32xf32>
    %63 = arith.addf %59, %62 : vector<16x32xf32>
    %64 = arith.addf %1, %63 : vector<16x32xf32>
    %cst_32 = arith.constant dense<0.000000e+00> : vector<16xf32>
    %65 = vector.multi_reduction <add>, %64, %cst_32 [1] : vector<16x32xf32> to vector<16xf32>
    %66 = vector.shape_cast %65 : vector<16xf32> to vector<16x1xf32>
    %cst_33 = arith.constant 3.200000e+01 : f32
    %67 = vector.broadcast %cst_33 : f32 to vector<16x1xf32>
    %68 = arith.divf %66, %67 : vector<16x1xf32>
    %69 = vector.broadcast %68 : vector<16x1xf32> to vector<16x32xf32>
    %70 = arith.subf %64, %69 : vector<16x32xf32>
    %71 = arith.mulf %70, %70 : vector<16x32xf32>
    %cst_34 = arith.constant dense<0.000000e+00> : vector<16xf32>
    %72 = vector.multi_reduction <add>, %71, %cst_34 [1] : vector<16x32xf32> to vector<16xf32>
    %73 = vector.shape_cast %72 : vector<16xf32> to vector<16x1xf32>
    %cst_35 = arith.constant 3.200000e+01 : f32
    %74 = vector.broadcast %cst_35 : f32 to vector<16x1xf32>
    %75 = arith.divf %73, %74 : vector<16x1xf32>
    %76 = vector.broadcast %68 : vector<16x1xf32> to vector<16x32xf32>
    %77 = arith.subf %64, %76 : vector<16x32xf32>
    %cst_36 = arith.constant 9.99999974E-6 : f32
    %78 = vector.broadcast %cst_36 : f32 to vector<16x1xf32>
    %79 = arith.addf %75, %78 : vector<16x1xf32>
    %80 = math.rsqrt %79 : vector<16x1xf32>
    %81 = vector.broadcast %80 : vector<16x1xf32> to vector<16x32xf32>
    %82 = arith.mulf %77, %81 : vector<16x32xf32>
    %c0_37 = arith.constant 0 : index
    %c0_38 = arith.constant 0 : index
    %c0_39 = arith.constant 0 : index
    %83 = vector.load %arg9[%c0_37, %c0_38, %c0_39] : memref<1x1x32xf32, #tpu.memory_space<vmem>>, vector<1x1x32xf32>
    %84 = vector.shape_cast %83 : vector<1x1x32xf32> to vector<1x32xf32>
    %85 = vector.broadcast %84 : vector<1x32xf32> to vector<16x32xf32>
    %86 = arith.mulf %82, %85 : vector<16x32xf32>
    %c0_40 = arith.constant 0 : index
    %c0_41 = arith.constant 0 : index
    %c0_42 = arith.constant 0 : index
    %87 = vector.load %arg10[%c0_40, %c0_41, %c0_42] : memref<1x1x32xf32, #tpu.memory_space<vmem>>, vector<1x1x32xf32>
    %88 = vector.shape_cast %87 : vector<1x1x32xf32> to vector<1x32xf32>
    %89 = vector.broadcast %88 : vector<1x32xf32> to vector<16x32xf32>
    %90 = arith.addf %86, %89 : vector<16x32xf32>
    %91 = arith.truncf %90 : vector<16x32xf32> to vector<16x32xbf16>
    %c0_43 = arith.constant 0 : index
    %c0_44 = arith.constant 0 : index
    %c0_45 = arith.constant 0 : index
    %92 = vector.load %arg11[%c0_43, %c0_44, %c0_45] : memref<1x32x64xbf16, #tpu.memory_space<vmem>>, vector<1x32x64xbf16>
    %93 = vector.shape_cast %92 : vector<1x32x64xbf16> to vector<32x64xbf16>
    %cst_46 = arith.constant dense<0.000000e+00> : vector<16x64xf32>
    %94 = tpu.matmul %91, %93, %cst_46 {dimension_numbers = #tpu.dot_dimension_numbers<[1], [0], [0], [1], [0, 0, 1, 1], [], []>} : vector<16x32xbf16>, vector<32x64xbf16>, vector<16x64xf32> -> vector<16x64xf32>
    %c0_47 = arith.constant 0 : index
    %c0_48 = arith.constant 0 : index
    %c0_49 = arith.constant 0 : index
    %95 = vector.load %arg12[%c0_47, %c0_48, %c0_49] : memref<1x1x64xf32, #tpu.memory_space<vmem>>, vector<1x1x64xf32>
    %96 = vector.shape_cast %95 : vector<1x1x64xf32> to vector<1x64xf32>
    %97 = vector.broadcast %96 : vector<1x64xf32> to vector<16x64xf32>
    %98 = arith.addf %94, %97 : vector<16x64xf32>
    %99 = arith.mulf %98, %98 : vector<16x64xf32>
    %100 = arith.mulf %98, %99 : vector<16x64xf32>
    %cst_50 = arith.constant 4.471500e-02 : f32
    %101 = vector.broadcast %cst_50 : f32 to vector<16x64xf32>
    %102 = arith.mulf %101, %100 : vector<16x64xf32>
    %103 = arith.addf %98, %102 : vector<16x64xf32>
    %cst_51 = arith.constant 0.797884583 : f32
    %104 = vector.broadcast %cst_51 : f32 to vector<16x64xf32>
    %105 = arith.mulf %104, %103 : vector<16x64xf32>
    %106 = math.tanh %105 : vector<16x64xf32>
    %cst_52 = arith.constant 1.000000e+00 : f32
    %107 = vector.broadcast %cst_52 : f32 to vector<16x64xf32>
    %108 = arith.addf %107, %106 : vector<16x64xf32>
    %cst_53 = arith.constant 5.000000e-01 : f32
    %109 = vector.broadcast %cst_53 : f32 to vector<16x64xf32>
    %110 = arith.mulf %109, %108 : vector<16x64xf32>
    %111 = arith.mulf %98, %110 : vector<16x64xf32>
    %112 = arith.truncf %111 : vector<16x64xf32> to vector<16x64xbf16>
    %c0_54 = arith.constant 0 : index
    %c0_55 = arith.constant 0 : index
    %c0_56 = arith.constant 0 : index
    %113 = vector.load %arg13[%c0_54, %c0_55, %c0_56] : memref<1x64x32xbf16, #tpu.memory_space<vmem>>, vector<1x64x32xbf16>
    %114 = vector.shape_cast %113 : vector<1x64x32xbf16> to vector<64x32xbf16>
    %cst_57 = arith.constant dense<0.000000e+00> : vector<16x32xf32>
    %115 = tpu.matmul %112, %114, %cst_57 {dimension_numbers = #tpu.dot_dimension_numbers<[1], [0], [0], [1], [0, 0, 1, 1], [], []>} : vector<16x64xbf16>, vector<64x32xbf16>, vector<16x32xf32> -> vector<16x32xf32>
    %c0_58 = arith.constant 0 : index
    %c0_59 = arith.constant 0 : index
    %c0_60 = arith.constant 0 : index
    %116 = vector.load %arg14[%c0_58, %c0_59, %c0_60] : memref<1x1x32xf32, #tpu.memory_space<vmem>>, vector<1x1x32xf32>
    %117 = vector.shape_cast %116 : vector<1x1x32xf32> to vector<1x32xf32>
    %118 = vector.broadcast %117 : vector<1x32xf32> to vector<16x32xf32>
    %119 = arith.addf %115, %118 : vector<16x32xf32>
    %120 = arith.addf %64, %119 : vector<16x32xf32>
    %cst_61 = arith.constant dense<0.000000e+00> : vector<16xf32>
    %121 = vector.multi_reduction <add>, %120, %cst_61 [1] : vector<16x32xf32> to vector<16xf32>
    %122 = vector.shape_cast %121 : vector<16xf32> to vector<16x1xf32>
    %cst_62 = arith.constant 3.200000e+01 : f32
    %123 = vector.broadcast %cst_62 : f32 to vector<16x1xf32>
    %124 = arith.divf %122, %123 : vector<16x1xf32>
    %125 = vector.broadcast %124 : vector<16x1xf32> to vector<16x32xf32>
    %126 = arith.subf %120, %125 : vector<16x32xf32>
    %127 = arith.mulf %126, %126 : vector<16x32xf32>
    %cst_63 = arith.constant dense<0.000000e+00> : vector<16xf32>
    %128 = vector.multi_reduction <add>, %127, %cst_63 [1] : vector<16x32xf32> to vector<16xf32>
    %129 = vector.shape_cast %128 : vector<16xf32> to vector<16x1xf32>
    %cst_64 = arith.constant 3.200000e+01 : f32
    %130 = vector.broadcast %cst_64 : f32 to vector<16x1xf32>
    %131 = arith.divf %129, %130 : vector<16x1xf32>
    %132 = vector.broadcast %124 : vector<16x1xf32> to vector<16x32xf32>
    %133 = arith.subf %120, %132 : vector<16x32xf32>
    %cst_65 = arith.constant 9.99999974E-6 : f32
    %134 = vector.broadcast %cst_65 : f32 to vector<16x1xf32>
    %135 = arith.addf %131, %134 : vector<16x1xf32>
    %136 = math.rsqrt %135 : vector<16x1xf32>
    %137 = vector.broadcast %136 : vector<16x1xf32> to vector<16x32xf32>
    %138 = arith.mulf %133, %137 : vector<16x32xf32>
    %c0_66 = arith.constant 0 : index
    %c0_67 = arith.constant 0 : index
    %c0_68 = arith.constant 0 : index
    %139 = vector.load %arg15[%c0_66, %c0_67, %c0_68] : memref<1x1x32xf32, #tpu.memory_space<vmem>>, vector<1x1x32xf32>
    %140 = vector.shape_cast %139 : vector<1x1x32xf32> to vector<1x32xf32>
    %141 = vector.broadcast %140 : vector<1x32xf32> to vector<16x32xf32>
    %142 = arith.mulf %138, %141 : vector<16x32xf32>
    %c0_69 = arith.constant 0 : index
    %c0_70 = arith.constant 0 : index
    %c0_71 = arith.constant 0 : index
    %143 = vector.load %arg16[%c0_69, %c0_70, %c0_71] : memref<1x1x32xf32, #tpu.memory_space<vmem>>, vector<1x1x32xf32>
    %144 = vector.shape_cast %143 : vector<1x1x32xf32> to vector<1x32xf32>
    %145 = vector.broadcast %144 : vector<1x32xf32> to vector<16x32xf32>
    %146 = arith.addf %142, %145 : vector<16x32xf32>
    %c0_72 = arith.constant 0 : index
    %c0_73 = arith.constant 0 : index
    %c0_74 = arith.constant 0 : index
    %c0_75 = arith.constant 0 : index
    %147 = vector.load %arg17[%c0_72, %c0_73, %c0_74, %c0_75] : memref<1x1x16x32xf32, #tpu.memory_space<vmem>>, vector<1x1x16x32xf32>
    %148 = vector.shape_cast %147 : vector<1x1x16x32xf32> to vector<16x32xf32>
    %149 = vector.shape_cast %146 : vector<16x32xf32> to vector<1x1x16x32xf32>
    tpu.vector_store %arg17[%c0_72, %c0_73, %c0_74, %c0_75], %149 {strides = array<i32>} : memref<1x1x16x32xf32, #tpu.memory_space<vmem>>, vector<1x1x16x32xf32>,
    return
  }
  func.func @transform_0(%arg0: i32, %arg1: i32) -> (i32, i32, i32, i32) {
    %c0_i32 = arith.constant 0 : i32
    %c0_i32_0 = arith.constant 0 : i32
    %c0_i32_1 = arith.constant 0 : i32
    return %arg0, %arg1, %c0_i32, %c0_i32_0 : i32, i32, i32, i32
  }
  func.func @transform_1(%arg0: i32, %arg1: i32) -> (i32, i32, i32) {
    %c0_i32 = arith.constant 0 : i32
    %c0_i32_0 = arith.constant 0 : i32
    %c0_i32_1 = arith.constant 0 : i32
    return %arg0, %c0_i32, %c0_i32_0 : i32, i32, i32
  }
  func.func @transform_2(%arg0: i32, %arg1: i32) -> (i32, i32, i32) {
    %c0_i32 = arith.constant 0 : i32
    %c0_i32_0 = arith.constant 0 : i32
    %c0_i32_1 = arith.constant 0 : i32
    return %arg0, %c0_i32, %c0_i32_0 : i32, i32, i32
  }
  func.func @transform_3(%arg0: i32, %arg1: i32) -> (i32, i32, i32) {
    %c0_i32 = arith.constant 0 : i32
    %c0_i32_0 = arith.constant 0 : i32
    %c0_i32_1 = arith.constant 0 : i32
    return %arg0, %c0_i32, %c0_i32_0 : i32, i32, i32
  }
  func.func @transform_4(%arg0: i32, %arg1: i32) -> (i32, i32, i32) {
    %c0_i32 = arith.constant 0 : i32
    %c0_i32_0 = arith.constant 0 : i32
    %c0_i32_1 = arith.constant 0 : i32
    return %arg0, %c0_i32, %c0_i32_0 : i32, i32, i32
  }
  func.func @transform_5(%arg0: i32, %arg1: i32) -> (i32, i32, i32) {
    %c0_i32 = arith.constant 0 : i32
    %c0_i32_0 = arith.constant 0 : i32
    %c0_i32_1 = arith.constant 0 : i32
    return %arg0, %c0_i32, %c0_i32_0 : i32, i32, i32
  }
  func.func @transform_6(%arg0: i32, %arg1: i32) -> (i32, i32, i32) {
    %c0_i32 = arith.constant 0 : i32
    %c0_i32_0 = arith.constant 0 : i32
    %c0_i32_1 = arith.constant 0 : i32
    return %arg0, %c0_i32, %c0_i32_0 : i32, i32, i32
  }
  func.func @transform_7(%arg0: i32, %arg1: i32) -> (i32, i32, i32) {
    %c0_i32 = arith.constant 0 : i32
    %c0_i32_0 = arith.constant 0 : i32
    %c0_i32_1 = arith.constant 0 : i32
    return %arg0, %c0_i32, %c0_i32_0 : i32, i32, i32
  }
  func.func @transform_8(%arg0: i32, %arg1: i32) -> (i32, i32, i32) {
    %c0_i32 = arith.constant 0 : i32
    %c0_i32_0 = arith.constant 0 : i32
    %c0_i32_1 = arith.constant 0 : i32
    return %arg0, %c0_i32, %c0_i32_0 : i32, i32, i32
  }
  func.func @transform_9(%arg0: i32, %arg1: i32) -> (i32, i32, i32) {
    %c0_i32 = arith.constant 0 : i32
    %c0_i32_0 = arith.constant 0 : i32
    %c0_i32_1 = arith.constant 0 : i32
    return %arg0, %c0_i32, %c0_i32_0 : i32, i32, i32
  }
  func.func @transform_10(%arg0: i32, %arg1: i32) -> (i32, i32, i32) {
    %c0_i32 = arith.constant 0 : i32
    %c0_i32_0 = arith.constant 0 : i32
    %c0_i32_1 = arith.constant 0 : i32
    return %arg0, %c0_i32, %c0_i32_0 : i32, i32, i32
  }
  func.func @transform_11(%arg0: i32, %arg1: i32) -> (i32, i32, i32) {
    %c0_i32 = arith.constant 0 : i32
    %c0_i32_0 = arith.constant 0 : i32
    %c0_i32_1 = arith.constant 0 : i32
    return %arg0, %c0_i32, %c0_i32_0 : i32, i32, i32
  }
  func.func @transform_12(%arg0: i32, %arg1: i32) -> (i32, i32, i32) {
    %c0_i32 = arith.constant 0 : i32
    %c0_i32_0 = arith.constant 0 : i32
    %c0_i32_1 = arith.constant 0 : i32
    return %arg0, %c0_i32, %c0_i32_0 : i32, i32, i32
  }
  func.func @transform_13(%arg0: i32, %arg1: i32) -> (i32, i32, i32) {
    %c0_i32 = arith.constant 0 : i32
    %c0_i32_0 = arith.constant 0 : i32
    %c0_i32_1 = arith.constant 0 : i32
    return %arg0, %c0_i32, %c0_i32_0 : i32, i32, i32
  }
  func.func @transform_14(%arg0: i32, %arg1: i32) -> (i32, i32, i32) {
    %c0_i32 = arith.constant 0 : i32
    %c0_i32_0 = arith.constant 0 : i32
    %c0_i32_1 = arith.constant 0 : i32
    return %arg0, %c0_i32, %c0_i32_0 : i32, i32, i32
  }
  func.func @transform_15(%arg0: i32, %arg1: i32) -> (i32, i32, i32, i32) {
    %c0_i32 = arith.constant 0 : i32
    %c0_i32_0 = arith.constant 0 : i32
    %c0_i32_1 = arith.constant 0 : i32
    return %arg0, %arg1, %c0_i32, %c0_i32_0 : i32, i32, i32, i32
  }
}

module attributes {stable_mosaic.version = 11 : i64} {
  func.func @_fuse_kernel(%arg0: i32, %arg1: memref<1x32x32xf32, #tpu.memory_space<vmem>>, %arg2: memref<1x32x32xf32, #tpu.memory_space<vmem>>, %arg3: memref<32x32xbf16, #tpu.memory_space<vmem>>, %arg4: memref<32x32xbf16, #tpu.memory_space<vmem>>, %arg5: memref<1x32xf32, #tpu.memory_space<vmem>>, %arg6: memref<32x32xf32, #tpu.memory_space<vmem>>) attributes {dimension_semantics = [#tpu.dimension_semantics<parallel>], iteration_bounds = array<i64: 1>, scalar_prefetch = 0 : i64, scratch_operands = 0 : i64, tpu.core_type = #tpu.core_type<tc>, window_params = [{transform_indices = @transform_0, window_bounds = array<i64: 1, 32, 32>}, {transform_indices = @transform_1, window_bounds = array<i64: 1, 32, 32>}, {pipeline_mode = #tpu.pipeline_mode<synchronous>, transform_indices = @transform_2, window_bounds = array<i64: 32, 32>}, {pipeline_mode = #tpu.pipeline_mode<synchronous>, transform_indices = @transform_3, window_bounds = array<i64: 32, 32>}, {pipeline_mode = #tpu.pipeline_mode<synchronous>, transform_indices = @transform_4, window_bounds = array<i64: 1, 32>}, {transform_indices = @transform_5, window_bounds = array<i64: 32, 32>}]} {
    %c0 = arith.constant 0 : index
    %c0_0 = arith.constant 0 : index
    %c0_1 = arith.constant 0 : index
    %0 = vector.load %arg1[%c0, %c0_0, %c0_1] : memref<1x32x32xf32, #tpu.memory_space<vmem>>, vector<1x32x32xf32>
    %1 = vector.shape_cast %0 : vector<1x32x32xf32> to vector<32x32xf32>
    %2 = arith.truncf %1 : vector<32x32xf32> to vector<32x32xbf16>
    %c0_2 = arith.constant 0 : index
    %c0_3 = arith.constant 0 : index
    %3 = vector.load %arg3[%c0_2, %c0_3] : memref<32x32xbf16, #tpu.memory_space<vmem>>, vector<32x32xbf16>
    %cst = arith.constant dense<0.000000e+00> : vector<32x32xf32>
    %4 = tpu.matmul %2, %3, %cst {dimension_numbers = #tpu.dot_dimension_numbers<[1], [0], [0], [1], [0, 0, 1, 1], [], []>} : vector<32x32xbf16>, vector<32x32xbf16>, vector<32x32xf32> -> vector<32x32xf32>
    %c0_4 = arith.constant 0 : index
    %c0_5 = arith.constant 0 : index
    %c0_6 = arith.constant 0 : index
    %5 = vector.load %arg2[%c0_4, %c0_5, %c0_6] : memref<1x32x32xf32, #tpu.memory_space<vmem>>, vector<1x32x32xf32>
    %6 = vector.shape_cast %5 : vector<1x32x32xf32> to vector<32x32xf32>
    %7 = arith.truncf %6 : vector<32x32xf32> to vector<32x32xbf16>
    %c0_7 = arith.constant 0 : index
    %c0_8 = arith.constant 0 : index
    %8 = vector.load %arg4[%c0_7, %c0_8] : memref<32x32xbf16, #tpu.memory_space<vmem>>, vector<32x32xbf16>
    %cst_9 = arith.constant dense<0.000000e+00> : vector<32x32xf32>
    %9 = tpu.matmul %7, %8, %cst_9 {dimension_numbers = #tpu.dot_dimension_numbers<[1], [0], [0], [1], [0, 0, 1, 1], [], []>} : vector<32x32xbf16>, vector<32x32xbf16>, vector<32x32xf32> -> vector<32x32xf32>
    %10 = arith.addf %4, %9 : vector<32x32xf32>
    %c0_10 = arith.constant 0 : index
    %c0_11 = arith.constant 0 : index
    %11 = vector.load %arg5[%c0_10, %c0_11] : memref<1x32xf32, #tpu.memory_space<vmem>>, vector<1x32xf32>
    %12 = vector.broadcast %11 : vector<1x32xf32> to vector<32x32xf32>
    %13 = arith.addf %10, %12 : vector<32x32xf32>
    %c0_12 = arith.constant 0 : index
    %c0_13 = arith.constant 0 : index
    %14 = vector.load %arg6[%c0_12, %c0_13] : memref<32x32xf32, #tpu.memory_space<vmem>>, vector<32x32xf32>
    tpu.vector_store %arg6[%c0_12, %c0_13], %13 {strides = array<i32>} : memref<32x32xf32, #tpu.memory_space<vmem>>, vector<32x32xf32>,
    return
  }
  func.func @transform_0(%arg0: i32) -> (i32, i32, i32) {
    %c0_i32 = arith.constant 0 : i32
    %c0_i32_0 = arith.constant 0 : i32
    %c0_i32_1 = arith.constant 0 : i32
    return %c0_i32, %arg0, %c0_i32_0 : i32, i32, i32
  }
  func.func @transform_1(%arg0: i32) -> (i32, i32, i32) {
    %c1_i32 = arith.constant 1 : i32
    %c0_i32 = arith.constant 0 : i32
    %c0_i32_0 = arith.constant 0 : i32
    return %c1_i32, %arg0, %c0_i32 : i32, i32, i32
  }
  func.func @transform_2(%arg0: i32) -> (i32, i32) {
    %c0_i32 = arith.constant 0 : i32
    %c0_i32_0 = arith.constant 0 : i32
    %c0_i32_1 = arith.constant 0 : i32
    return %c0_i32, %c0_i32_0 : i32, i32
  }
  func.func @transform_3(%arg0: i32) -> (i32, i32) {
    %c0_i32 = arith.constant 0 : i32
    %c0_i32_0 = arith.constant 0 : i32
    %c0_i32_1 = arith.constant 0 : i32
    return %c0_i32, %c0_i32_0 : i32, i32
  }
  func.func @transform_4(%arg0: i32) -> (i32, i32) {
    %c0_i32 = arith.constant 0 : i32
    %c0_i32_0 = arith.constant 0 : i32
    %c0_i32_1 = arith.constant 0 : i32
    return %c0_i32, %c0_i32_0 : i32, i32
  }
  func.func @transform_5(%arg0: i32) -> (i32, i32) {
    %c0_i32 = arith.constant 0 : i32
    %c0_i32_0 = arith.constant 0 : i32
    return %arg0, %c0_i32 : i32, i32
  }
}

module attributes {stable_mosaic.version = 11 : i64} {
  func.func @_nddr_kernel(%arg0: i32, %arg1: memref<32x32xf32, #tpu.memory_space<vmem>>, %arg2: memref<32x32xf32, #tpu.memory_space<vmem>>, %arg3: memref<32x32xbf16, #tpu.memory_space<vmem>>, %arg4: memref<32x32xbf16, #tpu.memory_space<vmem>>, %arg5: memref<32x32xbf16, #tpu.memory_space<vmem>>, %arg6: memref<32x32xbf16, #tpu.memory_space<vmem>>, %arg7: memref<1x32xf32, #tpu.memory_space<vmem>>, %arg8: memref<1x32xf32, #tpu.memory_space<vmem>>, %arg9: memref<32x32xf32, #tpu.memory_space<vmem>>, %arg10: memref<32x32xf32, #tpu.memory_space<vmem>>) attributes {dimension_semantics = [#tpu.dimension_semantics<parallel>], iteration_bounds = array<i64: 1>, scalar_prefetch = 0 : i64, scratch_operands = 0 : i64, tpu.core_type = #tpu.core_type<tc>, window_params = [{transform_indices = @transform_0, window_bounds = array<i64: 32, 32>}, {transform_indices = @transform_1, window_bounds = array<i64: 32, 32>}, {pipeline_mode = #tpu.pipeline_mode<synchronous>, transform_indices = @transform_2, window_bounds = array<i64: 32, 32>}, {pipeline_mode = #tpu.pipeline_mode<synchronous>, transform_indices = @transform_3, window_bounds = array<i64: 32, 32>}, {pipeline_mode = #tpu.pipeline_mode<synchronous>, transform_indices = @transform_4, window_bounds = array<i64: 32, 32>}, {pipeline_mode = #tpu.pipeline_mode<synchronous>, transform_indices = @transform_5, window_bounds = array<i64: 32, 32>}, {pipeline_mode = #tpu.pipeline_mode<synchronous>, transform_indices = @transform_6, window_bounds = array<i64: 1, 32>}, {pipeline_mode = #tpu.pipeline_mode<synchronous>, transform_indices = @transform_7, window_bounds = array<i64: 1, 32>}, {transform_indices = @transform_8, window_bounds = array<i64: 32, 32>}, {transform_indices = @transform_9, window_bounds = array<i64: 32, 32>}]} {
    %c0 = arith.constant 0 : index
    %c0_0 = arith.constant 0 : index
    %0 = vector.load %arg1[%c0, %c0_0] : memref<32x32xf32, #tpu.memory_space<vmem>>, vector<32x32xf32>
    %1 = arith.truncf %0 : vector<32x32xf32> to vector<32x32xbf16>
    %c0_1 = arith.constant 0 : index
    %c0_2 = arith.constant 0 : index
    %2 = vector.load %arg2[%c0_1, %c0_2] : memref<32x32xf32, #tpu.memory_space<vmem>>, vector<32x32xf32>
    %3 = arith.truncf %2 : vector<32x32xf32> to vector<32x32xbf16>
    %c0_3 = arith.constant 0 : index
    %c0_4 = arith.constant 0 : index
    %4 = vector.load %arg3[%c0_3, %c0_4] : memref<32x32xbf16, #tpu.memory_space<vmem>>, vector<32x32xbf16>
    %cst = arith.constant dense<0.000000e+00> : vector<32x32xf32>
    %5 = tpu.matmul %1, %4, %cst {dimension_numbers = #tpu.dot_dimension_numbers<[1], [0], [0], [1], [0, 0, 1, 1], [], []>} : vector<32x32xbf16>, vector<32x32xbf16>, vector<32x32xf32> -> vector<32x32xf32>
    %c0_5 = arith.constant 0 : index
    %c0_6 = arith.constant 0 : index
    %6 = vector.load %arg4[%c0_5, %c0_6] : memref<32x32xbf16, #tpu.memory_space<vmem>>, vector<32x32xbf16>
    %cst_7 = arith.constant dense<0.000000e+00> : vector<32x32xf32>
    %7 = tpu.matmul %3, %6, %cst_7 {dimension_numbers = #tpu.dot_dimension_numbers<[1], [0], [0], [1], [0, 0, 1, 1], [], []>} : vector<32x32xbf16>, vector<32x32xbf16>, vector<32x32xf32> -> vector<32x32xf32>
    %8 = arith.addf %5, %7 : vector<32x32xf32>
    %c0_8 = arith.constant 0 : index
    %c0_9 = arith.constant 0 : index
    %9 = vector.load %arg7[%c0_8, %c0_9] : memref<1x32xf32, #tpu.memory_space<vmem>>, vector<1x32xf32>
    %10 = vector.broadcast %9 : vector<1x32xf32> to vector<32x32xf32>
    %11 = arith.addf %8, %10 : vector<32x32xf32>
    %c0_10 = arith.constant 0 : index
    %c0_11 = arith.constant 0 : index
    %12 = vector.load %arg5[%c0_10, %c0_11] : memref<32x32xbf16, #tpu.memory_space<vmem>>, vector<32x32xbf16>
    %cst_12 = arith.constant dense<0.000000e+00> : vector<32x32xf32>
    %13 = tpu.matmul %1, %12, %cst_12 {dimension_numbers = #tpu.dot_dimension_numbers<[1], [0], [0], [1], [0, 0, 1, 1], [], []>} : vector<32x32xbf16>, vector<32x32xbf16>, vector<32x32xf32> -> vector<32x32xf32>
    %c0_13 = arith.constant 0 : index
    %c0_14 = arith.constant 0 : index
    %14 = vector.load %arg6[%c0_13, %c0_14] : memref<32x32xbf16, #tpu.memory_space<vmem>>, vector<32x32xbf16>
    %cst_15 = arith.constant dense<0.000000e+00> : vector<32x32xf32>
    %15 = tpu.matmul %3, %14, %cst_15 {dimension_numbers = #tpu.dot_dimension_numbers<[1], [0], [0], [1], [0, 0, 1, 1], [], []>} : vector<32x32xbf16>, vector<32x32xbf16>, vector<32x32xf32> -> vector<32x32xf32>
    %16 = arith.addf %13, %15 : vector<32x32xf32>
    %c0_16 = arith.constant 0 : index
    %c0_17 = arith.constant 0 : index
    %17 = vector.load %arg8[%c0_16, %c0_17] : memref<1x32xf32, #tpu.memory_space<vmem>>, vector<1x32xf32>
    %18 = vector.broadcast %17 : vector<1x32xf32> to vector<32x32xf32>
    %19 = arith.addf %16, %18 : vector<32x32xf32>
    %cst_18 = arith.constant 0.000000e+00 : f32
    %20 = vector.broadcast %cst_18 : f32 to vector<32x32xf32>
    %21 = arith.maximumf %11, %20 : vector<32x32xf32>
    %c0_19 = arith.constant 0 : index
    %c0_20 = arith.constant 0 : index
    %22 = vector.load %arg9[%c0_19, %c0_20] : memref<32x32xf32, #tpu.memory_space<vmem>>, vector<32x32xf32>
    tpu.vector_store %arg9[%c0_19, %c0_20], %21 {strides = array<i32>} : memref<32x32xf32, #tpu.memory_space<vmem>>, vector<32x32xf32>,
    %cst_21 = arith.constant 0.000000e+00 : f32
    %23 = vector.broadcast %cst_21 : f32 to vector<32x32xf32>
    %24 = arith.maximumf %19, %23 : vector<32x32xf32>
    %c0_22 = arith.constant 0 : index
    %c0_23 = arith.constant 0 : index
    %25 = vector.load %arg10[%c0_22, %c0_23] : memref<32x32xf32, #tpu.memory_space<vmem>>, vector<32x32xf32>
    tpu.vector_store %arg10[%c0_22, %c0_23], %24 {strides = array<i32>} : memref<32x32xf32, #tpu.memory_space<vmem>>, vector<32x32xf32>,
    return
  }
  func.func @transform_0(%arg0: i32) -> (i32, i32) {
    %c0_i32 = arith.constant 0 : i32
    %c0_i32_0 = arith.constant 0 : i32
    return %arg0, %c0_i32 : i32, i32
  }
  func.func @transform_1(%arg0: i32) -> (i32, i32) {
    %c0_i32 = arith.constant 0 : i32
    %c0_i32_0 = arith.constant 0 : i32
    return %arg0, %c0_i32 : i32, i32
  }
  func.func @transform_2(%arg0: i32) -> (i32, i32) {
    %c0_i32 = arith.constant 0 : i32
    %c0_i32_0 = arith.constant 0 : i32
    %c0_i32_1 = arith.constant 0 : i32
    return %c0_i32, %c0_i32_0 : i32, i32
  }
  func.func @transform_3(%arg0: i32) -> (i32, i32) {
    %c0_i32 = arith.constant 0 : i32
    %c0_i32_0 = arith.constant 0 : i32
    %c0_i32_1 = arith.constant 0 : i32
    return %c0_i32, %c0_i32_0 : i32, i32
  }
  func.func @transform_4(%arg0: i32) -> (i32, i32) {
    %c0_i32 = arith.constant 0 : i32
    %c0_i32_0 = arith.constant 0 : i32
    %c0_i32_1 = arith.constant 0 : i32
    return %c0_i32, %c0_i32_0 : i32, i32
  }
  func.func @transform_5(%arg0: i32) -> (i32, i32) {
    %c0_i32 = arith.constant 0 : i32
    %c0_i32_0 = arith.constant 0 : i32
    %c0_i32_1 = arith.constant 0 : i32
    return %c0_i32, %c0_i32_0 : i32, i32
  }
  func.func @transform_6(%arg0: i32) -> (i32, i32) {
    %c0_i32 = arith.constant 0 : i32
    %c0_i32_0 = arith.constant 0 : i32
    %c0_i32_1 = arith.constant 0 : i32
    return %c0_i32, %c0_i32_0 : i32, i32
  }
  func.func @transform_7(%arg0: i32) -> (i32, i32) {
    %c0_i32 = arith.constant 0 : i32
    %c0_i32_0 = arith.constant 0 : i32
    %c0_i32_1 = arith.constant 0 : i32
    return %c0_i32, %c0_i32_0 : i32, i32
  }
  func.func @transform_8(%arg0: i32) -> (i32, i32) {
    %c0_i32 = arith.constant 0 : i32
    %c0_i32_0 = arith.constant 0 : i32
    return %arg0, %c0_i32 : i32, i32
  }
  func.func @transform_9(%arg0: i32) -> (i32, i32) {
    %c0_i32 = arith.constant 0 : i32
    %c0_i32_0 = arith.constant 0 : i32
    return %arg0, %c0_i32 : i32, i32
  }
}

module attributes {stable_mosaic.version = 11 : i64} {
  func.func @_patch_embed_kernel(%arg0: i32, %arg1: i32, %arg2: memref<1x8x128xf32, #tpu.memory_space<vmem>>, %arg3: memref<1x128x64xbf16, #tpu.memory_space<vmem>>, %arg4: memref<1x1x64xf32, #tpu.memory_space<vmem>>, %arg5: memref<1x1x64xf32, #tpu.memory_space<vmem>>, %arg6: memref<1x1x64xf32, #tpu.memory_space<vmem>>, %arg7: memref<1x8x64xf32, #tpu.memory_space<vmem>>) attributes {dimension_semantics = [#tpu.dimension_semantics<parallel>, #tpu.dimension_semantics<parallel>], iteration_bounds = array<i64: 2, 1>, scalar_prefetch = 0 : i64, scratch_operands = 0 : i64, tpu.core_type = #tpu.core_type<tc>, window_params = [{transform_indices = @transform_0, window_bounds = array<i64: 1, 8, 128>}, {transform_indices = @transform_1, window_bounds = array<i64: 1, 128, 64>}, {transform_indices = @transform_2, window_bounds = array<i64: 1, 1, 64>}, {transform_indices = @transform_3, window_bounds = array<i64: 1, 1, 64>}, {transform_indices = @transform_4, window_bounds = array<i64: 1, 1, 64>}, {transform_indices = @transform_5, window_bounds = array<i64: 1, 8, 64>}]} {
    %c0 = arith.constant 0 : index
    %c0_0 = arith.constant 0 : index
    %c0_1 = arith.constant 0 : index
    %0 = vector.load %arg2[%c0, %c0_0, %c0_1] : memref<1x8x128xf32, #tpu.memory_space<vmem>>, vector<1x8x128xf32>
    %1 = vector.shape_cast %0 : vector<1x8x128xf32> to vector<8x128xf32>
    %2 = arith.truncf %1 : vector<8x128xf32> to vector<8x128xbf16>
    %c0_2 = arith.constant 0 : index
    %c0_3 = arith.constant 0 : index
    %c0_4 = arith.constant 0 : index
    %3 = vector.load %arg3[%c0_2, %c0_3, %c0_4] : memref<1x128x64xbf16, #tpu.memory_space<vmem>>, vector<1x128x64xbf16>
    %4 = vector.shape_cast %3 : vector<1x128x64xbf16> to vector<128x64xbf16>
    %cst = arith.constant dense<0.000000e+00> : vector<8x64xf32>
    %5 = tpu.matmul %2, %4, %cst {dimension_numbers = #tpu.dot_dimension_numbers<[1], [0], [0], [1], [0, 0, 1, 1], [], []>} : vector<8x128xbf16>, vector<128x64xbf16>, vector<8x64xf32> -> vector<8x64xf32>
    %c0_5 = arith.constant 0 : index
    %c0_6 = arith.constant 0 : index
    %c0_7 = arith.constant 0 : index
    %6 = vector.load %arg4[%c0_5, %c0_6, %c0_7] : memref<1x1x64xf32, #tpu.memory_space<vmem>>, vector<1x1x64xf32>
    %7 = vector.shape_cast %6 : vector<1x1x64xf32> to vector<1x64xf32>
    %8 = vector.broadcast %7 : vector<1x64xf32> to vector<8x64xf32>
    %9 = arith.addf %5, %8 : vector<8x64xf32>
    %cst_8 = arith.constant dense<0.000000e+00> : vector<8xf32>
    %10 = vector.multi_reduction <add>, %9, %cst_8 [1] : vector<8x64xf32> to vector<8xf32>
    %11 = vector.shape_cast %10 : vector<8xf32> to vector<8x1xf32>
    %cst_9 = arith.constant 6.400000e+01 : f32
    %12 = vector.broadcast %cst_9 : f32 to vector<8x1xf32>
    %13 = arith.divf %11, %12 : vector<8x1xf32>
    %14 = vector.broadcast %13 : vector<8x1xf32> to vector<8x64xf32>
    %15 = arith.subf %9, %14 : vector<8x64xf32>
    %16 = arith.mulf %15, %15 : vector<8x64xf32>
    %cst_10 = arith.constant dense<0.000000e+00> : vector<8xf32>
    %17 = vector.multi_reduction <add>, %16, %cst_10 [1] : vector<8x64xf32> to vector<8xf32>
    %18 = vector.shape_cast %17 : vector<8xf32> to vector<8x1xf32>
    %cst_11 = arith.constant 6.400000e+01 : f32
    %19 = vector.broadcast %cst_11 : f32 to vector<8x1xf32>
    %20 = arith.divf %18, %19 : vector<8x1xf32>
    %21 = vector.broadcast %13 : vector<8x1xf32> to vector<8x64xf32>
    %22 = arith.subf %9, %21 : vector<8x64xf32>
    %cst_12 = arith.constant 9.99999974E-6 : f32
    %23 = vector.broadcast %cst_12 : f32 to vector<8x1xf32>
    %24 = arith.addf %20, %23 : vector<8x1xf32>
    %25 = math.rsqrt %24 : vector<8x1xf32>
    %26 = vector.broadcast %25 : vector<8x1xf32> to vector<8x64xf32>
    %27 = arith.mulf %22, %26 : vector<8x64xf32>
    %c0_13 = arith.constant 0 : index
    %c0_14 = arith.constant 0 : index
    %c0_15 = arith.constant 0 : index
    %28 = vector.load %arg5[%c0_13, %c0_14, %c0_15] : memref<1x1x64xf32, #tpu.memory_space<vmem>>, vector<1x1x64xf32>
    %29 = vector.shape_cast %28 : vector<1x1x64xf32> to vector<1x64xf32>
    %30 = vector.broadcast %29 : vector<1x64xf32> to vector<8x64xf32>
    %31 = arith.mulf %27, %30 : vector<8x64xf32>
    %c0_16 = arith.constant 0 : index
    %c0_17 = arith.constant 0 : index
    %c0_18 = arith.constant 0 : index
    %32 = vector.load %arg6[%c0_16, %c0_17, %c0_18] : memref<1x1x64xf32, #tpu.memory_space<vmem>>, vector<1x1x64xf32>
    %33 = vector.shape_cast %32 : vector<1x1x64xf32> to vector<1x64xf32>
    %34 = vector.broadcast %33 : vector<1x64xf32> to vector<8x64xf32>
    %35 = arith.addf %31, %34 : vector<8x64xf32>
    %c0_19 = arith.constant 0 : index
    %c0_20 = arith.constant 0 : index
    %c0_21 = arith.constant 0 : index
    %36 = vector.load %arg7[%c0_19, %c0_20, %c0_21] : memref<1x8x64xf32, #tpu.memory_space<vmem>>, vector<1x8x64xf32>
    %37 = vector.shape_cast %36 : vector<1x8x64xf32> to vector<8x64xf32>
    %38 = vector.shape_cast %35 : vector<8x64xf32> to vector<1x8x64xf32>
    tpu.vector_store %arg7[%c0_19, %c0_20, %c0_21], %38 {strides = array<i32>} : memref<1x8x64xf32, #tpu.memory_space<vmem>>, vector<1x8x64xf32>,
    return
  }
  func.func @transform_0(%arg0: i32, %arg1: i32) -> (i32, i32, i32) {
    %c0_i32 = arith.constant 0 : i32
    %c0_i32_0 = arith.constant 0 : i32
    return %arg0, %arg1, %c0_i32 : i32, i32, i32
  }
  func.func @transform_1(%arg0: i32, %arg1: i32) -> (i32, i32, i32) {
    %c0_i32 = arith.constant 0 : i32
    %c0_i32_0 = arith.constant 0 : i32
    %c0_i32_1 = arith.constant 0 : i32
    return %arg0, %c0_i32, %c0_i32_0 : i32, i32, i32
  }
  func.func @transform_2(%arg0: i32, %arg1: i32) -> (i32, i32, i32) {
    %c0_i32 = arith.constant 0 : i32
    %c0_i32_0 = arith.constant 0 : i32
    %c0_i32_1 = arith.constant 0 : i32
    return %arg0, %c0_i32, %c0_i32_0 : i32, i32, i32
  }
  func.func @transform_3(%arg0: i32, %arg1: i32) -> (i32, i32, i32) {
    %c0_i32 = arith.constant 0 : i32
    %c0_i32_0 = arith.constant 0 : i32
    %c0_i32_1 = arith.constant 0 : i32
    return %arg0, %c0_i32, %c0_i32_0 : i32, i32, i32
  }
  func.func @transform_4(%arg0: i32, %arg1: i32) -> (i32, i32, i32) {
    %c0_i32 = arith.constant 0 : i32
    %c0_i32_0 = arith.constant 0 : i32
    %c0_i32_1 = arith.constant 0 : i32
    return %arg0, %c0_i32, %c0_i32_0 : i32, i32, i32
  }
  func.func @transform_5(%arg0: i32, %arg1: i32) -> (i32, i32, i32) {
    %c0_i32 = arith.constant 0 : i32
    %c0_i32_0 = arith.constant 0 : i32
    return %arg0, %arg1, %c0_i32 : i32, i32, i32
  }
}

module attributes {stable_mosaic.version = 11 : i64} {
  func.func @_block_kernel(%arg0: i32, %arg1: i32, %arg2: memref<1x1x4x64xf32, #tpu.memory_space<vmem>>, %arg3: memref<1x1x64xf32, #tpu.memory_space<vmem>>, %arg4: memref<1x1x64xf32, #tpu.memory_space<vmem>>, %arg5: memref<1x64x192xbf16, #tpu.memory_space<vmem>>, %arg6: memref<1x1x192xf32, #tpu.memory_space<vmem>>, %arg7: memref<1x64x64xbf16, #tpu.memory_space<vmem>>, %arg8: memref<1x1x64xf32, #tpu.memory_space<vmem>>, %arg9: memref<1x1x64xf32, #tpu.memory_space<vmem>>, %arg10: memref<1x1x64xf32, #tpu.memory_space<vmem>>, %arg11: memref<1x64x128xbf16, #tpu.memory_space<vmem>>, %arg12: memref<1x1x128xf32, #tpu.memory_space<vmem>>, %arg13: memref<1x128x64xbf16, #tpu.memory_space<vmem>>, %arg14: memref<1x1x64xf32, #tpu.memory_space<vmem>>, %arg15: memref<1x1x64xf32, #tpu.memory_space<vmem>>, %arg16: memref<1x1x64xf32, #tpu.memory_space<vmem>>, %arg17: memref<1x1x4x64xf32, #tpu.memory_space<vmem>>) attributes {dimension_semantics = [#tpu.dimension_semantics<parallel>, #tpu.dimension_semantics<parallel>], iteration_bounds = array<i64: 2, 2>, scalar_prefetch = 0 : i64, scratch_operands = 0 : i64, tpu.core_type = #tpu.core_type<tc>, window_params = [{transform_indices = @transform_0, window_bounds = array<i64: 1, 1, 4, 64>}, {transform_indices = @transform_1, window_bounds = array<i64: 1, 1, 64>}, {transform_indices = @transform_2, window_bounds = array<i64: 1, 1, 64>}, {transform_indices = @transform_3, window_bounds = array<i64: 1, 64, 192>}, {transform_indices = @transform_4, window_bounds = array<i64: 1, 1, 192>}, {transform_indices = @transform_5, window_bounds = array<i64: 1, 64, 64>}, {transform_indices = @transform_6, window_bounds = array<i64: 1, 1, 64>}, {transform_indices = @transform_7, window_bounds = array<i64: 1, 1, 64>}, {transform_indices = @transform_8, window_bounds = array<i64: 1, 1, 64>}, {transform_indices = @transform_9, window_bounds = array<i64: 1, 64, 128>}, {transform_indices = @transform_10, window_bounds = array<i64: 1, 1, 128>}, {transform_indices = @transform_11, window_bounds = array<i64: 1, 128, 64>}, {transform_indices = @transform_12, window_bounds = array<i64: 1, 1, 64>}, {transform_indices = @transform_13, window_bounds = array<i64: 1, 1, 64>}, {transform_indices = @transform_14, window_bounds = array<i64: 1, 1, 64>}, {transform_indices = @transform_15, window_bounds = array<i64: 1, 1, 4, 64>}]} {
    %c0 = arith.constant 0 : index
    %c0_0 = arith.constant 0 : index
    %c0_1 = arith.constant 0 : index
    %c0_2 = arith.constant 0 : index
    %0 = vector.load %arg2[%c0, %c0_0, %c0_1, %c0_2] : memref<1x1x4x64xf32, #tpu.memory_space<vmem>>, vector<1x1x4x64xf32>
    %1 = vector.shape_cast %0 : vector<1x1x4x64xf32> to vector<4x64xf32>
    %cst = arith.constant dense<0.000000e+00> : vector<4xf32>
    %2 = vector.multi_reduction <add>, %1, %cst [1] : vector<4x64xf32> to vector<4xf32>
    %3 = vector.shape_cast %2 : vector<4xf32> to vector<4x1xf32>
    %cst_3 = arith.constant 6.400000e+01 : f32
    %4 = vector.broadcast %cst_3 : f32 to vector<4x1xf32>
    %5 = arith.divf %3, %4 : vector<4x1xf32>
    %6 = vector.broadcast %5 : vector<4x1xf32> to vector<4x64xf32>
    %7 = arith.subf %1, %6 : vector<4x64xf32>
    %8 = arith.mulf %7, %7 : vector<4x64xf32>
    %cst_4 = arith.constant dense<0.000000e+00> : vector<4xf32>
    %9 = vector.multi_reduction <add>, %8, %cst_4 [1] : vector<4x64xf32> to vector<4xf32>
    %10 = vector.shape_cast %9 : vector<4xf32> to vector<4x1xf32>
    %cst_5 = arith.constant 6.400000e+01 : f32
    %11 = vector.broadcast %cst_5 : f32 to vector<4x1xf32>
    %12 = arith.divf %10, %11 : vector<4x1xf32>
    %13 = vector.broadcast %5 : vector<4x1xf32> to vector<4x64xf32>
    %14 = arith.subf %1, %13 : vector<4x64xf32>
    %cst_6 = arith.constant 9.99999974E-6 : f32
    %15 = vector.broadcast %cst_6 : f32 to vector<4x1xf32>
    %16 = arith.addf %12, %15 : vector<4x1xf32>
    %17 = math.rsqrt %16 : vector<4x1xf32>
    %18 = vector.broadcast %17 : vector<4x1xf32> to vector<4x64xf32>
    %19 = arith.mulf %14, %18 : vector<4x64xf32>
    %c0_7 = arith.constant 0 : index
    %c0_8 = arith.constant 0 : index
    %c0_9 = arith.constant 0 : index
    %20 = vector.load %arg3[%c0_7, %c0_8, %c0_9] : memref<1x1x64xf32, #tpu.memory_space<vmem>>, vector<1x1x64xf32>
    %21 = vector.shape_cast %20 : vector<1x1x64xf32> to vector<1x64xf32>
    %22 = vector.broadcast %21 : vector<1x64xf32> to vector<4x64xf32>
    %23 = arith.mulf %19, %22 : vector<4x64xf32>
    %c0_10 = arith.constant 0 : index
    %c0_11 = arith.constant 0 : index
    %c0_12 = arith.constant 0 : index
    %24 = vector.load %arg4[%c0_10, %c0_11, %c0_12] : memref<1x1x64xf32, #tpu.memory_space<vmem>>, vector<1x1x64xf32>
    %25 = vector.shape_cast %24 : vector<1x1x64xf32> to vector<1x64xf32>
    %26 = vector.broadcast %25 : vector<1x64xf32> to vector<4x64xf32>
    %27 = arith.addf %23, %26 : vector<4x64xf32>
    %28 = arith.truncf %27 : vector<4x64xf32> to vector<4x64xbf16>
    %c0_13 = arith.constant 0 : index
    %c0_14 = arith.constant 0 : index
    %c0_15 = arith.constant 0 : index
    %29 = vector.load %arg5[%c0_13, %c0_14, %c0_15] : memref<1x64x192xbf16, #tpu.memory_space<vmem>>, vector<1x64x192xbf16>
    %30 = vector.shape_cast %29 : vector<1x64x192xbf16> to vector<64x192xbf16>
    %cst_16 = arith.constant dense<0.000000e+00> : vector<4x192xf32>
    %31 = tpu.matmul %28, %30, %cst_16 {dimension_numbers = #tpu.dot_dimension_numbers<[1], [0], [0], [1], [0, 0, 1, 1], [], []>} : vector<4x64xbf16>, vector<64x192xbf16>, vector<4x192xf32> -> vector<4x192xf32>
    %c0_17 = arith.constant 0 : index
    %c0_18 = arith.constant 0 : index
    %c0_19 = arith.constant 0 : index
    %32 = vector.load %arg6[%c0_17, %c0_18, %c0_19] : memref<1x1x192xf32, #tpu.memory_space<vmem>>, vector<1x1x192xf32>
    %33 = vector.shape_cast %32 : vector<1x1x192xf32> to vector<1x192xf32>
    %34 = vector.broadcast %33 : vector<1x192xf32> to vector<4x192xf32>
    %35 = arith.addf %31, %34 : vector<4x192xf32>
    %36 = vector.extract_strided_slice %35 {offsets = [0, 0], sizes = [4, 64], strides = [1, 1]} : vector<4x192xf32> to vector<4x64xf32>
    %37 = vector.extract_strided_slice %35 {offsets = [0, 64], sizes = [4, 64], strides = [1, 1]} : vector<4x192xf32> to vector<4x64xf32>
    %38 = vector.extract_strided_slice %35 {offsets = [0, 128], sizes = [4, 64], strides = [1, 1]} : vector<4x192xf32> to vector<4x64xf32>
    %39 = vector.extract_strided_slice %36 {offsets = [0, 0], sizes = [4, 32], strides = [1, 1]} : vector<4x64xf32> to vector<4x32xf32>
    %40 = vector.extract_strided_slice %37 {offsets = [0, 0], sizes = [4, 32], strides = [1, 1]} : vector<4x64xf32> to vector<4x32xf32>
    %41 = vector.extract_strided_slice %38 {offsets = [0, 0], sizes = [4, 32], strides = [1, 1]} : vector<4x64xf32> to vector<4x32xf32>
    %42 = arith.truncf %39 : vector<4x32xf32> to vector<4x32xbf16>
    %43 = arith.truncf %40 : vector<4x32xf32> to vector<4x32xbf16>
    %cst_20 = arith.constant dense<0.000000e+00> : vector<4x4xf32>
    %44 = tpu.matmul %42, %43, %cst_20 {dimension_numbers = #tpu.dot_dimension_numbers<[1], [1], [0], [0], [0, 0, 1, 0], [], []>} : vector<4x32xbf16>, vector<4x32xbf16>, vector<4x4xf32> -> vector<4x4xf32>
    %cst_21 = arith.constant 0.176776692 : f32
    %45 = vector.broadcast %cst_21 : f32 to vector<4x4xf32>
    %46 = arith.mulf %44, %45 : vector<4x4xf32>
    %cst_22 = arith.constant dense<0xFF800000> : vector<4xf32>
    %47 = vector.multi_reduction <maximumf>, %46, %cst_22 [1] : vector<4x4xf32> to vector<4xf32>
    %48 = vector.shape_cast %47 : vector<4xf32> to vector<4x1xf32>
    %49 = vector.broadcast %48 : vector<4x1xf32> to vector<4x4xf32>
    %50 = arith.subf %46, %49 : vector<4x4xf32>
    %51 = math.exp %50 : vector<4x4xf32>
    %cst_23 = arith.constant dense<0.000000e+00> : vector<4xf32>
    %52 = vector.multi_reduction <add>, %51, %cst_23 [1] : vector<4x4xf32> to vector<4xf32>
    %53 = vector.shape_cast %52 : vector<4xf32> to vector<4x1xf32>
    %54 = vector.broadcast %53 : vector<4x1xf32> to vector<4x4xf32>
    %55 = arith.divf %51, %54 : vector<4x4xf32>
    %56 = arith.truncf %55 : vector<4x4xf32> to vector<4x4xbf16>
    %57 = arith.truncf %41 : vector<4x32xf32> to vector<4x32xbf16>
    %cst_24 = arith.constant dense<0.000000e+00> : vector<4x32xf32>
    %58 = tpu.matmul %56, %57, %cst_24 {dimension_numbers = #tpu.dot_dimension_numbers<[1], [0], [0], [1], [0, 0, 1, 1], [], []>} : vector<4x4xbf16>, vector<4x32xbf16>, vector<4x32xf32> -> vector<4x32xf32>
    %59 = vector.extract_strided_slice %36 {offsets = [0, 32], sizes = [4, 32], strides = [1, 1]} : vector<4x64xf32> to vector<4x32xf32>
    %60 = vector.extract_strided_slice %37 {offsets = [0, 32], sizes = [4, 32], strides = [1, 1]} : vector<4x64xf32> to vector<4x32xf32>
    %61 = vector.extract_strided_slice %38 {offsets = [0, 32], sizes = [4, 32], strides = [1, 1]} : vector<4x64xf32> to vector<4x32xf32>
    %62 = arith.truncf %59 : vector<4x32xf32> to vector<4x32xbf16>
    %63 = arith.truncf %60 : vector<4x32xf32> to vector<4x32xbf16>
    %cst_25 = arith.constant dense<0.000000e+00> : vector<4x4xf32>
    %64 = tpu.matmul %62, %63, %cst_25 {dimension_numbers = #tpu.dot_dimension_numbers<[1], [1], [0], [0], [0, 0, 1, 0], [], []>} : vector<4x32xbf16>, vector<4x32xbf16>, vector<4x4xf32> -> vector<4x4xf32>
    %cst_26 = arith.constant 0.176776692 : f32
    %65 = vector.broadcast %cst_26 : f32 to vector<4x4xf32>
    %66 = arith.mulf %64, %65 : vector<4x4xf32>
    %cst_27 = arith.constant dense<0xFF800000> : vector<4xf32>
    %67 = vector.multi_reduction <maximumf>, %66, %cst_27 [1] : vector<4x4xf32> to vector<4xf32>
    %68 = vector.shape_cast %67 : vector<4xf32> to vector<4x1xf32>
    %69 = vector.broadcast %68 : vector<4x1xf32> to vector<4x4xf32>
    %70 = arith.subf %66, %69 : vector<4x4xf32>
    %71 = math.exp %70 : vector<4x4xf32>
    %cst_28 = arith.constant dense<0.000000e+00> : vector<4xf32>
    %72 = vector.multi_reduction <add>, %71, %cst_28 [1] : vector<4x4xf32> to vector<4xf32>
    %73 = vector.shape_cast %72 : vector<4xf32> to vector<4x1xf32>
    %74 = vector.broadcast %73 : vector<4x1xf32> to vector<4x4xf32>
    %75 = arith.divf %71, %74 : vector<4x4xf32>
    %76 = arith.truncf %75 : vector<4x4xf32> to vector<4x4xbf16>
    %77 = arith.truncf %61 : vector<4x32xf32> to vector<4x32xbf16>
    %cst_29 = arith.constant dense<0.000000e+00> : vector<4x32xf32>
    %78 = tpu.matmul %76, %77, %cst_29 {dimension_numbers = #tpu.dot_dimension_numbers<[1], [0], [0], [1], [0, 0, 1, 1], [], []>} : vector<4x4xbf16>, vector<4x32xbf16>, vector<4x32xf32> -> vector<4x32xf32>
    %79 = tpu.concatenate %58, %78 in 1 : vector<4x32xf32>, vector<4x32xf32> -> vector<4x64xf32>
    %80 = arith.truncf %79 : vector<4x64xf32> to vector<4x64xbf16>
    %c0_30 = arith.constant 0 : index
    %c0_31 = arith.constant 0 : index
    %c0_32 = arith.constant 0 : index
    %81 = vector.load %arg7[%c0_30, %c0_31, %c0_32] : memref<1x64x64xbf16, #tpu.memory_space<vmem>>, vector<1x64x64xbf16>
    %82 = vector.shape_cast %81 : vector<1x64x64xbf16> to vector<64x64xbf16>
    %cst_33 = arith.constant dense<0.000000e+00> : vector<4x64xf32>
    %83 = tpu.matmul %80, %82, %cst_33 {dimension_numbers = #tpu.dot_dimension_numbers<[1], [0], [0], [1], [0, 0, 1, 1], [], []>} : vector<4x64xbf16>, vector<64x64xbf16>, vector<4x64xf32> -> vector<4x64xf32>
    %c0_34 = arith.constant 0 : index
    %c0_35 = arith.constant 0 : index
    %c0_36 = arith.constant 0 : index
    %84 = vector.load %arg8[%c0_34, %c0_35, %c0_36] : memref<1x1x64xf32, #tpu.memory_space<vmem>>, vector<1x1x64xf32>
    %85 = vector.shape_cast %84 : vector<1x1x64xf32> to vector<1x64xf32>
    %86 = vector.broadcast %85 : vector<1x64xf32> to vector<4x64xf32>
    %87 = arith.addf %83, %86 : vector<4x64xf32>
    %88 = arith.addf %1, %87 : vector<4x64xf32>
    %cst_37 = arith.constant dense<0.000000e+00> : vector<4xf32>
    %89 = vector.multi_reduction <add>, %88, %cst_37 [1] : vector<4x64xf32> to vector<4xf32>
    %90 = vector.shape_cast %89 : vector<4xf32> to vector<4x1xf32>
    %cst_38 = arith.constant 6.400000e+01 : f32
    %91 = vector.broadcast %cst_38 : f32 to vector<4x1xf32>
    %92 = arith.divf %90, %91 : vector<4x1xf32>
    %93 = vector.broadcast %92 : vector<4x1xf32> to vector<4x64xf32>
    %94 = arith.subf %88, %93 : vector<4x64xf32>
    %95 = arith.mulf %94, %94 : vector<4x64xf32>
    %cst_39 = arith.constant dense<0.000000e+00> : vector<4xf32>
    %96 = vector.multi_reduction <add>, %95, %cst_39 [1] : vector<4x64xf32> to vector<4xf32>
    %97 = vector.shape_cast %96 : vector<4xf32> to vector<4x1xf32>
    %cst_40 = arith.constant 6.400000e+01 : f32
    %98 = vector.broadcast %cst_40 : f32 to vector<4x1xf32>
    %99 = arith.divf %97, %98 : vector<4x1xf32>
    %100 = vector.broadcast %92 : vector<4x1xf32> to vector<4x64xf32>
    %101 = arith.subf %88, %100 : vector<4x64xf32>
    %cst_41 = arith.constant 9.99999974E-6 : f32
    %102 = vector.broadcast %cst_41 : f32 to vector<4x1xf32>
    %103 = arith.addf %99, %102 : vector<4x1xf32>
    %104 = math.rsqrt %103 : vector<4x1xf32>
    %105 = vector.broadcast %104 : vector<4x1xf32> to vector<4x64xf32>
    %106 = arith.mulf %101, %105 : vector<4x64xf32>
    %c0_42 = arith.constant 0 : index
    %c0_43 = arith.constant 0 : index
    %c0_44 = arith.constant 0 : index
    %107 = vector.load %arg9[%c0_42, %c0_43, %c0_44] : memref<1x1x64xf32, #tpu.memory_space<vmem>>, vector<1x1x64xf32>
    %108 = vector.shape_cast %107 : vector<1x1x64xf32> to vector<1x64xf32>
    %109 = vector.broadcast %108 : vector<1x64xf32> to vector<4x64xf32>
    %110 = arith.mulf %106, %109 : vector<4x64xf32>
    %c0_45 = arith.constant 0 : index
    %c0_46 = arith.constant 0 : index
    %c0_47 = arith.constant 0 : index
    %111 = vector.load %arg10[%c0_45, %c0_46, %c0_47] : memref<1x1x64xf32, #tpu.memory_space<vmem>>, vector<1x1x64xf32>
    %112 = vector.shape_cast %111 : vector<1x1x64xf32> to vector<1x64xf32>
    %113 = vector.broadcast %112 : vector<1x64xf32> to vector<4x64xf32>
    %114 = arith.addf %110, %113 : vector<4x64xf32>
    %115 = arith.truncf %114 : vector<4x64xf32> to vector<4x64xbf16>
    %c0_48 = arith.constant 0 : index
    %c0_49 = arith.constant 0 : index
    %c0_50 = arith.constant 0 : index
    %116 = vector.load %arg11[%c0_48, %c0_49, %c0_50] : memref<1x64x128xbf16, #tpu.memory_space<vmem>>, vector<1x64x128xbf16>
    %117 = vector.shape_cast %116 : vector<1x64x128xbf16> to vector<64x128xbf16>
    %cst_51 = arith.constant dense<0.000000e+00> : vector<4x128xf32>
    %118 = tpu.matmul %115, %117, %cst_51 {dimension_numbers = #tpu.dot_dimension_numbers<[1], [0], [0], [1], [0, 0, 1, 1], [], []>} : vector<4x64xbf16>, vector<64x128xbf16>, vector<4x128xf32> -> vector<4x128xf32>
    %c0_52 = arith.constant 0 : index
    %c0_53 = arith.constant 0 : index
    %c0_54 = arith.constant 0 : index
    %119 = vector.load %arg12[%c0_52, %c0_53, %c0_54] : memref<1x1x128xf32, #tpu.memory_space<vmem>>, vector<1x1x128xf32>
    %120 = vector.shape_cast %119 : vector<1x1x128xf32> to vector<1x128xf32>
    %121 = vector.broadcast %120 : vector<1x128xf32> to vector<4x128xf32>
    %122 = arith.addf %118, %121 : vector<4x128xf32>
    %123 = arith.mulf %122, %122 : vector<4x128xf32>
    %124 = arith.mulf %122, %123 : vector<4x128xf32>
    %cst_55 = arith.constant 4.471500e-02 : f32
    %125 = vector.broadcast %cst_55 : f32 to vector<4x128xf32>
    %126 = arith.mulf %125, %124 : vector<4x128xf32>
    %127 = arith.addf %122, %126 : vector<4x128xf32>
    %cst_56 = arith.constant 0.797884583 : f32
    %128 = vector.broadcast %cst_56 : f32 to vector<4x128xf32>
    %129 = arith.mulf %128, %127 : vector<4x128xf32>
    %130 = math.tanh %129 : vector<4x128xf32>
    %cst_57 = arith.constant 1.000000e+00 : f32
    %131 = vector.broadcast %cst_57 : f32 to vector<4x128xf32>
    %132 = arith.addf %131, %130 : vector<4x128xf32>
    %cst_58 = arith.constant 5.000000e-01 : f32
    %133 = vector.broadcast %cst_58 : f32 to vector<4x128xf32>
    %134 = arith.mulf %133, %132 : vector<4x128xf32>
    %135 = arith.mulf %122, %134 : vector<4x128xf32>
    %136 = arith.truncf %135 : vector<4x128xf32> to vector<4x128xbf16>
    %c0_59 = arith.constant 0 : index
    %c0_60 = arith.constant 0 : index
    %c0_61 = arith.constant 0 : index
    %137 = vector.load %arg13[%c0_59, %c0_60, %c0_61] : memref<1x128x64xbf16, #tpu.memory_space<vmem>>, vector<1x128x64xbf16>
    %138 = vector.shape_cast %137 : vector<1x128x64xbf16> to vector<128x64xbf16>
    %cst_62 = arith.constant dense<0.000000e+00> : vector<4x64xf32>
    %139 = tpu.matmul %136, %138, %cst_62 {dimension_numbers = #tpu.dot_dimension_numbers<[1], [0], [0], [1], [0, 0, 1, 1], [], []>} : vector<4x128xbf16>, vector<128x64xbf16>, vector<4x64xf32> -> vector<4x64xf32>
    %c0_63 = arith.constant 0 : index
    %c0_64 = arith.constant 0 : index
    %c0_65 = arith.constant 0 : index
    %140 = vector.load %arg14[%c0_63, %c0_64, %c0_65] : memref<1x1x64xf32, #tpu.memory_space<vmem>>, vector<1x1x64xf32>
    %141 = vector.shape_cast %140 : vector<1x1x64xf32> to vector<1x64xf32>
    %142 = vector.broadcast %141 : vector<1x64xf32> to vector<4x64xf32>
    %143 = arith.addf %139, %142 : vector<4x64xf32>
    %144 = arith.addf %88, %143 : vector<4x64xf32>
    %cst_66 = arith.constant dense<0.000000e+00> : vector<4xf32>
    %145 = vector.multi_reduction <add>, %144, %cst_66 [1] : vector<4x64xf32> to vector<4xf32>
    %146 = vector.shape_cast %145 : vector<4xf32> to vector<4x1xf32>
    %cst_67 = arith.constant 6.400000e+01 : f32
    %147 = vector.broadcast %cst_67 : f32 to vector<4x1xf32>
    %148 = arith.divf %146, %147 : vector<4x1xf32>
    %149 = vector.broadcast %148 : vector<4x1xf32> to vector<4x64xf32>
    %150 = arith.subf %144, %149 : vector<4x64xf32>
    %151 = arith.mulf %150, %150 : vector<4x64xf32>
    %cst_68 = arith.constant dense<0.000000e+00> : vector<4xf32>
    %152 = vector.multi_reduction <add>, %151, %cst_68 [1] : vector<4x64xf32> to vector<4xf32>
    %153 = vector.shape_cast %152 : vector<4xf32> to vector<4x1xf32>
    %cst_69 = arith.constant 6.400000e+01 : f32
    %154 = vector.broadcast %cst_69 : f32 to vector<4x1xf32>
    %155 = arith.divf %153, %154 : vector<4x1xf32>
    %156 = vector.broadcast %148 : vector<4x1xf32> to vector<4x64xf32>
    %157 = arith.subf %144, %156 : vector<4x64xf32>
    %cst_70 = arith.constant 9.99999974E-6 : f32
    %158 = vector.broadcast %cst_70 : f32 to vector<4x1xf32>
    %159 = arith.addf %155, %158 : vector<4x1xf32>
    %160 = math.rsqrt %159 : vector<4x1xf32>
    %161 = vector.broadcast %160 : vector<4x1xf32> to vector<4x64xf32>
    %162 = arith.mulf %157, %161 : vector<4x64xf32>
    %c0_71 = arith.constant 0 : index
    %c0_72 = arith.constant 0 : index
    %c0_73 = arith.constant 0 : index
    %163 = vector.load %arg15[%c0_71, %c0_72, %c0_73] : memref<1x1x64xf32, #tpu.memory_space<vmem>>, vector<1x1x64xf32>
    %164 = vector.shape_cast %163 : vector<1x1x64xf32> to vector<1x64xf32>
    %165 = vector.broadcast %164 : vector<1x64xf32> to vector<4x64xf32>
    %166 = arith.mulf %162, %165 : vector<4x64xf32>
    %c0_74 = arith.constant 0 : index
    %c0_75 = arith.constant 0 : index
    %c0_76 = arith.constant 0 : index
    %167 = vector.load %arg16[%c0_74, %c0_75, %c0_76] : memref<1x1x64xf32, #tpu.memory_space<vmem>>, vector<1x1x64xf32>
    %168 = vector.shape_cast %167 : vector<1x1x64xf32> to vector<1x64xf32>
    %169 = vector.broadcast %168 : vector<1x64xf32> to vector<4x64xf32>
    %170 = arith.addf %166, %169 : vector<4x64xf32>
    %c0_77 = arith.constant 0 : index
    %c0_78 = arith.constant 0 : index
    %c0_79 = arith.constant 0 : index
    %c0_80 = arith.constant 0 : index
    %171 = vector.load %arg17[%c0_77, %c0_78, %c0_79, %c0_80] : memref<1x1x4x64xf32, #tpu.memory_space<vmem>>, vector<1x1x4x64xf32>
    %172 = vector.shape_cast %171 : vector<1x1x4x64xf32> to vector<4x64xf32>
    %173 = vector.shape_cast %170 : vector<4x64xf32> to vector<1x1x4x64xf32>
    tpu.vector_store %arg17[%c0_77, %c0_78, %c0_79, %c0_80], %173 {strides = array<i32>} : memref<1x1x4x64xf32, #tpu.memory_space<vmem>>, vector<1x1x4x64xf32>,
    return
  }
  func.func @transform_0(%arg0: i32, %arg1: i32) -> (i32, i32, i32, i32) {
    %c0_i32 = arith.constant 0 : i32
    %c0_i32_0 = arith.constant 0 : i32
    %c0_i32_1 = arith.constant 0 : i32
    return %arg0, %arg1, %c0_i32, %c0_i32_0 : i32, i32, i32, i32
  }
  func.func @transform_1(%arg0: i32, %arg1: i32) -> (i32, i32, i32) {
    %c0_i32 = arith.constant 0 : i32
    %c0_i32_0 = arith.constant 0 : i32
    %c0_i32_1 = arith.constant 0 : i32
    return %arg0, %c0_i32, %c0_i32_0 : i32, i32, i32
  }
  func.func @transform_2(%arg0: i32, %arg1: i32) -> (i32, i32, i32) {
    %c0_i32 = arith.constant 0 : i32
    %c0_i32_0 = arith.constant 0 : i32
    %c0_i32_1 = arith.constant 0 : i32
    return %arg0, %c0_i32, %c0_i32_0 : i32, i32, i32
  }
  func.func @transform_3(%arg0: i32, %arg1: i32) -> (i32, i32, i32) {
    %c0_i32 = arith.constant 0 : i32
    %c0_i32_0 = arith.constant 0 : i32
    %c0_i32_1 = arith.constant 0 : i32
    return %arg0, %c0_i32, %c0_i32_0 : i32, i32, i32
  }
  func.func @transform_4(%arg0: i32, %arg1: i32) -> (i32, i32, i32) {
    %c0_i32 = arith.constant 0 : i32
    %c0_i32_0 = arith.constant 0 : i32
    %c0_i32_1 = arith.constant 0 : i32
    return %arg0, %c0_i32, %c0_i32_0 : i32, i32, i32
  }
  func.func @transform_5(%arg0: i32, %arg1: i32) -> (i32, i32, i32) {
    %c0_i32 = arith.constant 0 : i32
    %c0_i32_0 = arith.constant 0 : i32
    %c0_i32_1 = arith.constant 0 : i32
    return %arg0, %c0_i32, %c0_i32_0 : i32, i32, i32
  }
  func.func @transform_6(%arg0: i32, %arg1: i32) -> (i32, i32, i32) {
    %c0_i32 = arith.constant 0 : i32
    %c0_i32_0 = arith.constant 0 : i32
    %c0_i32_1 = arith.constant 0 : i32
    return %arg0, %c0_i32, %c0_i32_0 : i32, i32, i32
  }
  func.func @transform_7(%arg0: i32, %arg1: i32) -> (i32, i32, i32) {
    %c0_i32 = arith.constant 0 : i32
    %c0_i32_0 = arith.constant 0 : i32
    %c0_i32_1 = arith.constant 0 : i32
    return %arg0, %c0_i32, %c0_i32_0 : i32, i32, i32
  }
  func.func @transform_8(%arg0: i32, %arg1: i32) -> (i32, i32, i32) {
    %c0_i32 = arith.constant 0 : i32
    %c0_i32_0 = arith.constant 0 : i32
    %c0_i32_1 = arith.constant 0 : i32
    return %arg0, %c0_i32, %c0_i32_0 : i32, i32, i32
  }
  func.func @transform_9(%arg0: i32, %arg1: i32) -> (i32, i32, i32) {
    %c0_i32 = arith.constant 0 : i32
    %c0_i32_0 = arith.constant 0 : i32
    %c0_i32_1 = arith.constant 0 : i32
    return %arg0, %c0_i32, %c0_i32_0 : i32, i32, i32
  }
  func.func @transform_10(%arg0: i32, %arg1: i32) -> (i32, i32, i32) {
    %c0_i32 = arith.constant 0 : i32
    %c0_i32_0 = arith.constant 0 : i32
    %c0_i32_1 = arith.constant 0 : i32
    return %arg0, %c0_i32, %c0_i32_0 : i32, i32, i32
  }
  func.func @transform_11(%arg0: i32, %arg1: i32) -> (i32, i32, i32) {
    %c0_i32 = arith.constant 0 : i32
    %c0_i32_0 = arith.constant 0 : i32
    %c0_i32_1 = arith.constant 0 : i32
    return %arg0, %c0_i32, %c0_i32_0 : i32, i32, i32
  }
  func.func @transform_12(%arg0: i32, %arg1: i32) -> (i32, i32, i32) {
    %c0_i32 = arith.constant 0 : i32
    %c0_i32_0 = arith.constant 0 : i32
    %c0_i32_1 = arith.constant 0 : i32
    return %arg0, %c0_i32, %c0_i32_0 : i32, i32, i32
  }
  func.func @transform_13(%arg0: i32, %arg1: i32) -> (i32, i32, i32) {
    %c0_i32 = arith.constant 0 : i32
    %c0_i32_0 = arith.constant 0 : i32
    %c0_i32_1 = arith.constant 0 : i32
    return %arg0, %c0_i32, %c0_i32_0 : i32, i32, i32
  }
  func.func @transform_14(%arg0: i32, %arg1: i32) -> (i32, i32, i32) {
    %c0_i32 = arith.constant 0 : i32
    %c0_i32_0 = arith.constant 0 : i32
    %c0_i32_1 = arith.constant 0 : i32
    return %arg0, %c0_i32, %c0_i32_0 : i32, i32, i32
  }
  func.func @transform_15(%arg0: i32, %arg1: i32) -> (i32, i32, i32, i32) {
    %c0_i32 = arith.constant 0 : i32
    %c0_i32_0 = arith.constant 0 : i32
    %c0_i32_1 = arith.constant 0 : i32
    return %arg0, %arg1, %c0_i32, %c0_i32_0 : i32, i32, i32, i32
  }
}

module attributes {stable_mosaic.version = 11 : i64} {
  func.func @_fuse_kernel(%arg0: i32, %arg1: memref<1x8x64xf32, #tpu.memory_space<vmem>>, %arg2: memref<1x8x64xf32, #tpu.memory_space<vmem>>, %arg3: memref<64x64xbf16, #tpu.memory_space<vmem>>, %arg4: memref<64x64xbf16, #tpu.memory_space<vmem>>, %arg5: memref<1x64xf32, #tpu.memory_space<vmem>>, %arg6: memref<8x64xf32, #tpu.memory_space<vmem>>) attributes {dimension_semantics = [#tpu.dimension_semantics<parallel>], iteration_bounds = array<i64: 1>, scalar_prefetch = 0 : i64, scratch_operands = 0 : i64, tpu.core_type = #tpu.core_type<tc>, window_params = [{transform_indices = @transform_0, window_bounds = array<i64: 1, 8, 64>}, {transform_indices = @transform_1, window_bounds = array<i64: 1, 8, 64>}, {pipeline_mode = #tpu.pipeline_mode<synchronous>, transform_indices = @transform_2, window_bounds = array<i64: 64, 64>}, {pipeline_mode = #tpu.pipeline_mode<synchronous>, transform_indices = @transform_3, window_bounds = array<i64: 64, 64>}, {pipeline_mode = #tpu.pipeline_mode<synchronous>, transform_indices = @transform_4, window_bounds = array<i64: 1, 64>}, {transform_indices = @transform_5, window_bounds = array<i64: 8, 64>}]} {
    %c0 = arith.constant 0 : index
    %c0_0 = arith.constant 0 : index
    %c0_1 = arith.constant 0 : index
    %0 = vector.load %arg1[%c0, %c0_0, %c0_1] : memref<1x8x64xf32, #tpu.memory_space<vmem>>, vector<1x8x64xf32>
    %1 = vector.shape_cast %0 : vector<1x8x64xf32> to vector<8x64xf32>
    %2 = arith.truncf %1 : vector<8x64xf32> to vector<8x64xbf16>
    %c0_2 = arith.constant 0 : index
    %c0_3 = arith.constant 0 : index
    %3 = vector.load %arg3[%c0_2, %c0_3] : memref<64x64xbf16, #tpu.memory_space<vmem>>, vector<64x64xbf16>
    %cst = arith.constant dense<0.000000e+00> : vector<8x64xf32>
    %4 = tpu.matmul %2, %3, %cst {dimension_numbers = #tpu.dot_dimension_numbers<[1], [0], [0], [1], [0, 0, 1, 1], [], []>} : vector<8x64xbf16>, vector<64x64xbf16>, vector<8x64xf32> -> vector<8x64xf32>
    %c0_4 = arith.constant 0 : index
    %c0_5 = arith.constant 0 : index
    %c0_6 = arith.constant 0 : index
    %5 = vector.load %arg2[%c0_4, %c0_5, %c0_6] : memref<1x8x64xf32, #tpu.memory_space<vmem>>, vector<1x8x64xf32>
    %6 = vector.shape_cast %5 : vector<1x8x64xf32> to vector<8x64xf32>
    %7 = arith.truncf %6 : vector<8x64xf32> to vector<8x64xbf16>
    %c0_7 = arith.constant 0 : index
    %c0_8 = arith.constant 0 : index
    %8 = vector.load %arg4[%c0_7, %c0_8] : memref<64x64xbf16, #tpu.memory_space<vmem>>, vector<64x64xbf16>
    %cst_9 = arith.constant dense<0.000000e+00> : vector<8x64xf32>
    %9 = tpu.matmul %7, %8, %cst_9 {dimension_numbers = #tpu.dot_dimension_numbers<[1], [0], [0], [1], [0, 0, 1, 1], [], []>} : vector<8x64xbf16>, vector<64x64xbf16>, vector<8x64xf32> -> vector<8x64xf32>
    %10 = arith.addf %4, %9 : vector<8x64xf32>
    %c0_10 = arith.constant 0 : index
    %c0_11 = arith.constant 0 : index
    %11 = vector.load %arg5[%c0_10, %c0_11] : memref<1x64xf32, #tpu.memory_space<vmem>>, vector<1x64xf32>
    %12 = vector.broadcast %11 : vector<1x64xf32> to vector<8x64xf32>
    %13 = arith.addf %10, %12 : vector<8x64xf32>
    %c0_12 = arith.constant 0 : index
    %c0_13 = arith.constant 0 : index
    %14 = vector.load %arg6[%c0_12, %c0_13] : memref<8x64xf32, #tpu.memory_space<vmem>>, vector<8x64xf32>
    tpu.vector_store %arg6[%c0_12, %c0_13], %13 {strides = array<i32>} : memref<8x64xf32, #tpu.memory_space<vmem>>, vector<8x64xf32>,
    return
  }
  func.func @transform_0(%arg0: i32) -> (i32, i32, i32) {
    %c0_i32 = arith.constant 0 : i32
    %c0_i32_0 = arith.constant 0 : i32
    %c0_i32_1 = arith.constant 0 : i32
    return %c0_i32, %arg0, %c0_i32_0 : i32, i32, i32
  }
  func.func @transform_1(%arg0: i32) -> (i32, i32, i32) {
    %c1_i32 = arith.constant 1 : i32
    %c0_i32 = arith.constant 0 : i32
    %c0_i32_0 = arith.constant 0 : i32
    return %c1_i32, %arg0, %c0_i32 : i32, i32, i32
  }
  func.func @transform_2(%arg0: i32) -> (i32, i32) {
    %c0_i32 = arith.constant 0 : i32
    %c0_i32_0 = arith.constant 0 : i32
    %c0_i32_1 = arith.constant 0 : i32
    return %c0_i32, %c0_i32_0 : i32, i32
  }
  func.func @transform_3(%arg0: i32) -> (i32, i32) {
    %c0_i32 = arith.constant 0 : i32
    %c0_i32_0 = arith.constant 0 : i32
    %c0_i32_1 = arith.constant 0 : i32
    return %c0_i32, %c0_i32_0 : i32, i32
  }
  func.func @transform_4(%arg0: i32) -> (i32, i32) {
    %c0_i32 = arith.constant 0 : i32
    %c0_i32_0 = arith.constant 0 : i32
    %c0_i32_1 = arith.constant 0 : i32
    return %c0_i32, %c0_i32_0 : i32, i32
  }
  func.func @transform_5(%arg0: i32) -> (i32, i32) {
    %c0_i32 = arith.constant 0 : i32
    %c0_i32_0 = arith.constant 0 : i32
    return %arg0, %c0_i32 : i32, i32
  }
}

module attributes {stable_mosaic.version = 11 : i64} {
  func.func @_nddr_kernel(%arg0: i32, %arg1: memref<8x64xf32, #tpu.memory_space<vmem>>, %arg2: memref<8x64xf32, #tpu.memory_space<vmem>>, %arg3: memref<64x64xbf16, #tpu.memory_space<vmem>>, %arg4: memref<64x64xbf16, #tpu.memory_space<vmem>>, %arg5: memref<64x64xbf16, #tpu.memory_space<vmem>>, %arg6: memref<64x64xbf16, #tpu.memory_space<vmem>>, %arg7: memref<1x64xf32, #tpu.memory_space<vmem>>, %arg8: memref<1x64xf32, #tpu.memory_space<vmem>>, %arg9: memref<8x64xf32, #tpu.memory_space<vmem>>, %arg10: memref<8x64xf32, #tpu.memory_space<vmem>>) attributes {dimension_semantics = [#tpu.dimension_semantics<parallel>], iteration_bounds = array<i64: 1>, scalar_prefetch = 0 : i64, scratch_operands = 0 : i64, tpu.core_type = #tpu.core_type<tc>, window_params = [{transform_indices = @transform_0, window_bounds = array<i64: 8, 64>}, {transform_indices = @transform_1, window_bounds = array<i64: 8, 64>}, {pipeline_mode = #tpu.pipeline_mode<synchronous>, transform_indices = @transform_2, window_bounds = array<i64: 64, 64>}, {pipeline_mode = #tpu.pipeline_mode<synchronous>, transform_indices = @transform_3, window_bounds = array<i64: 64, 64>}, {pipeline_mode = #tpu.pipeline_mode<synchronous>, transform_indices = @transform_4, window_bounds = array<i64: 64, 64>}, {pipeline_mode = #tpu.pipeline_mode<synchronous>, transform_indices = @transform_5, window_bounds = array<i64: 64, 64>}, {pipeline_mode = #tpu.pipeline_mode<synchronous>, transform_indices = @transform_6, window_bounds = array<i64: 1, 64>}, {pipeline_mode = #tpu.pipeline_mode<synchronous>, transform_indices = @transform_7, window_bounds = array<i64: 1, 64>}, {transform_indices = @transform_8, window_bounds = array<i64: 8, 64>}, {transform_indices = @transform_9, window_bounds = array<i64: 8, 64>}]} {
    %c0 = arith.constant 0 : index
    %c0_0 = arith.constant 0 : index
    %0 = vector.load %arg1[%c0, %c0_0] : memref<8x64xf32, #tpu.memory_space<vmem>>, vector<8x64xf32>
    %1 = arith.truncf %0 : vector<8x64xf32> to vector<8x64xbf16>
    %c0_1 = arith.constant 0 : index
    %c0_2 = arith.constant 0 : index
    %2 = vector.load %arg2[%c0_1, %c0_2] : memref<8x64xf32, #tpu.memory_space<vmem>>, vector<8x64xf32>
    %3 = arith.truncf %2 : vector<8x64xf32> to vector<8x64xbf16>
    %c0_3 = arith.constant 0 : index
    %c0_4 = arith.constant 0 : index
    %4 = vector.load %arg3[%c0_3, %c0_4] : memref<64x64xbf16, #tpu.memory_space<vmem>>, vector<64x64xbf16>
    %cst = arith.constant dense<0.000000e+00> : vector<8x64xf32>
    %5 = tpu.matmul %1, %4, %cst {dimension_numbers = #tpu.dot_dimension_numbers<[1], [0], [0], [1], [0, 0, 1, 1], [], []>} : vector<8x64xbf16>, vector<64x64xbf16>, vector<8x64xf32> -> vector<8x64xf32>
    %c0_5 = arith.constant 0 : index
    %c0_6 = arith.constant 0 : index
    %6 = vector.load %arg4[%c0_5, %c0_6] : memref<64x64xbf16, #tpu.memory_space<vmem>>, vector<64x64xbf16>
    %cst_7 = arith.constant dense<0.000000e+00> : vector<8x64xf32>
    %7 = tpu.matmul %3, %6, %cst_7 {dimension_numbers = #tpu.dot_dimension_numbers<[1], [0], [0], [1], [0, 0, 1, 1], [], []>} : vector<8x64xbf16>, vector<64x64xbf16>, vector<8x64xf32> -> vector<8x64xf32>
    %8 = arith.addf %5, %7 : vector<8x64xf32>
    %c0_8 = arith.constant 0 : index
    %c0_9 = arith.constant 0 : index
    %9 = vector.load %arg7[%c0_8, %c0_9] : memref<1x64xf32, #tpu.memory_space<vmem>>, vector<1x64xf32>
    %10 = vector.broadcast %9 : vector<1x64xf32> to vector<8x64xf32>
    %11 = arith.addf %8, %10 : vector<8x64xf32>
    %c0_10 = arith.constant 0 : index
    %c0_11 = arith.constant 0 : index
    %12 = vector.load %arg5[%c0_10, %c0_11] : memref<64x64xbf16, #tpu.memory_space<vmem>>, vector<64x64xbf16>
    %cst_12 = arith.constant dense<0.000000e+00> : vector<8x64xf32>
    %13 = tpu.matmul %1, %12, %cst_12 {dimension_numbers = #tpu.dot_dimension_numbers<[1], [0], [0], [1], [0, 0, 1, 1], [], []>} : vector<8x64xbf16>, vector<64x64xbf16>, vector<8x64xf32> -> vector<8x64xf32>
    %c0_13 = arith.constant 0 : index
    %c0_14 = arith.constant 0 : index
    %14 = vector.load %arg6[%c0_13, %c0_14] : memref<64x64xbf16, #tpu.memory_space<vmem>>, vector<64x64xbf16>
    %cst_15 = arith.constant dense<0.000000e+00> : vector<8x64xf32>
    %15 = tpu.matmul %3, %14, %cst_15 {dimension_numbers = #tpu.dot_dimension_numbers<[1], [0], [0], [1], [0, 0, 1, 1], [], []>} : vector<8x64xbf16>, vector<64x64xbf16>, vector<8x64xf32> -> vector<8x64xf32>
    %16 = arith.addf %13, %15 : vector<8x64xf32>
    %c0_16 = arith.constant 0 : index
    %c0_17 = arith.constant 0 : index
    %17 = vector.load %arg8[%c0_16, %c0_17] : memref<1x64xf32, #tpu.memory_space<vmem>>, vector<1x64xf32>
    %18 = vector.broadcast %17 : vector<1x64xf32> to vector<8x64xf32>
    %19 = arith.addf %16, %18 : vector<8x64xf32>
    %cst_18 = arith.constant 0.000000e+00 : f32
    %20 = vector.broadcast %cst_18 : f32 to vector<8x64xf32>
    %21 = arith.maximumf %11, %20 : vector<8x64xf32>
    %c0_19 = arith.constant 0 : index
    %c0_20 = arith.constant 0 : index
    %22 = vector.load %arg9[%c0_19, %c0_20] : memref<8x64xf32, #tpu.memory_space<vmem>>, vector<8x64xf32>
    tpu.vector_store %arg9[%c0_19, %c0_20], %21 {strides = array<i32>} : memref<8x64xf32, #tpu.memory_space<vmem>>, vector<8x64xf32>,
    %cst_21 = arith.constant 0.000000e+00 : f32
    %23 = vector.broadcast %cst_21 : f32 to vector<8x64xf32>
    %24 = arith.maximumf %19, %23 : vector<8x64xf32>
    %c0_22 = arith.constant 0 : index
    %c0_23 = arith.constant 0 : index
    %25 = vector.load %arg10[%c0_22, %c0_23] : memref<8x64xf32, #tpu.memory_space<vmem>>, vector<8x64xf32>
    tpu.vector_store %arg10[%c0_22, %c0_23], %24 {strides = array<i32>} : memref<8x64xf32, #tpu.memory_space<vmem>>, vector<8x64xf32>,
    return
  }
  func.func @transform_0(%arg0: i32) -> (i32, i32) {
    %c0_i32 = arith.constant 0 : i32
    %c0_i32_0 = arith.constant 0 : i32
    return %arg0, %c0_i32 : i32, i32
  }
  func.func @transform_1(%arg0: i32) -> (i32, i32) {
    %c0_i32 = arith.constant 0 : i32
    %c0_i32_0 = arith.constant 0 : i32
    return %arg0, %c0_i32 : i32, i32
  }
  func.func @transform_2(%arg0: i32) -> (i32, i32) {
    %c0_i32 = arith.constant 0 : i32
    %c0_i32_0 = arith.constant 0 : i32
    %c0_i32_1 = arith.constant 0 : i32
    return %c0_i32, %c0_i32_0 : i32, i32
  }
  func.func @transform_3(%arg0: i32) -> (i32, i32) {
    %c0_i32 = arith.constant 0 : i32
    %c0_i32_0 = arith.constant 0 : i32
    %c0_i32_1 = arith.constant 0 : i32
    return %c0_i32, %c0_i32_0 : i32, i32
  }
  func.func @transform_4(%arg0: i32) -> (i32, i32) {
    %c0_i32 = arith.constant 0 : i32
    %c0_i32_0 = arith.constant 0 : i32
    %c0_i32_1 = arith.constant 0 : i32
    return %c0_i32, %c0_i32_0 : i32, i32
  }
  func.func @transform_5(%arg0: i32) -> (i32, i32) {
    %c0_i32 = arith.constant 0 : i32
    %c0_i32_0 = arith.constant 0 : i32
    %c0_i32_1 = arith.constant 0 : i32
    return %c0_i32, %c0_i32_0 : i32, i32
  }
  func.func @transform_6(%arg0: i32) -> (i32, i32) {
    %c0_i32 = arith.constant 0 : i32
    %c0_i32_0 = arith.constant 0 : i32
    %c0_i32_1 = arith.constant 0 : i32
    return %c0_i32, %c0_i32_0 : i32, i32
  }
  func.func @transform_7(%arg0: i32) -> (i32, i32) {
    %c0_i32 = arith.constant 0 : i32
    %c0_i32_0 = arith.constant 0 : i32
    %c0_i32_1 = arith.constant 0 : i32
    return %c0_i32, %c0_i32_0 : i32, i32
  }
  func.func @transform_8(%arg0: i32) -> (i32, i32) {
    %c0_i32 = arith.constant 0 : i32
    %c0_i32_0 = arith.constant 0 : i32
    return %arg0, %c0_i32 : i32, i32
  }
  func.func @transform_9(%arg0: i32) -> (i32, i32) {
    %c0_i32 = arith.constant 0 : i32
    %c0_i32_0 = arith.constant 0 : i32
    return %arg0, %c0_i32 : i32, i32
  }
}

module attributes {stable_mosaic.version = 11 : i64} {
  func.func @_seg_decoder_kernel(%arg0: i32, %arg1: memref<32x32xf32, #tpu.memory_space<vmem>>, %arg2: memref<32x64xf32, #tpu.memory_space<vmem>>, %arg3: memref<32x32xbf16, #tpu.memory_space<vmem>>, %arg4: memref<64x32xbf16, #tpu.memory_space<vmem>>, %arg5: memref<1x32xf32, #tpu.memory_space<vmem>>, %arg6: memref<32x8xbf16, #tpu.memory_space<vmem>>, %arg7: memref<1x8xf32, #tpu.memory_space<vmem>>, %arg8: memref<32x8xf32, #tpu.memory_space<vmem>>) attributes {dimension_semantics = [#tpu.dimension_semantics<parallel>], iteration_bounds = array<i64: 1>, scalar_prefetch = 0 : i64, scratch_operands = 0 : i64, tpu.core_type = #tpu.core_type<tc>, window_params = [{transform_indices = @transform_0, window_bounds = array<i64: 32, 32>}, {transform_indices = @transform_1, window_bounds = array<i64: 32, 64>}, {pipeline_mode = #tpu.pipeline_mode<synchronous>, transform_indices = @transform_2, window_bounds = array<i64: 32, 32>}, {pipeline_mode = #tpu.pipeline_mode<synchronous>, transform_indices = @transform_3, window_bounds = array<i64: 64, 32>}, {pipeline_mode = #tpu.pipeline_mode<synchronous>, transform_indices = @transform_4, window_bounds = array<i64: 1, 32>}, {pipeline_mode = #tpu.pipeline_mode<synchronous>, transform_indices = @transform_5, window_bounds = array<i64: 32, 8>}, {pipeline_mode = #tpu.pipeline_mode<synchronous>, transform_indices = @transform_6, window_bounds = array<i64: 1, 8>}, {transform_indices = @transform_7, window_bounds = array<i64: 32, 8>}]} {
    %c0 = arith.constant 0 : index
    %c0_0 = arith.constant 0 : index
    %0 = vector.load %arg5[%c0, %c0_0] : memref<1x32xf32, #tpu.memory_space<vmem>>, vector<1x32xf32>
    %c0_1 = arith.constant 0 : index
    %c0_2 = arith.constant 0 : index
    %1 = vector.load %arg1[%c0_1, %c0_2] : memref<32x32xf32, #tpu.memory_space<vmem>>, vector<32x32xf32>
    %2 = arith.truncf %1 : vector<32x32xf32> to vector<32x32xbf16>
    %c0_3 = arith.constant 0 : index
    %c0_4 = arith.constant 0 : index
    %3 = vector.load %arg3[%c0_3, %c0_4] : memref<32x32xbf16, #tpu.memory_space<vmem>>, vector<32x32xbf16>
    %cst = arith.constant dense<0.000000e+00> : vector<32x32xf32>
    %4 = tpu.matmul %2, %3, %cst {dimension_numbers = #tpu.dot_dimension_numbers<[1], [0], [0], [1], [0, 0, 1, 1], [], []>} : vector<32x32xbf16>, vector<32x32xbf16>, vector<32x32xf32> -> vector<32x32xf32>
    %5 = vector.broadcast %0 : vector<1x32xf32> to vector<32x32xf32>
    %6 = arith.addf %5, %4 : vector<32x32xf32>
    %c0_5 = arith.constant 0 : index
    %c0_6 = arith.constant 0 : index
    %7 = vector.load %arg2[%c0_5, %c0_6] : memref<32x64xf32, #tpu.memory_space<vmem>>, vector<32x64xf32>
    %8 = arith.truncf %7 : vector<32x64xf32> to vector<32x64xbf16>
    %c0_7 = arith.constant 0 : index
    %c0_8 = arith.constant 0 : index
    %9 = vector.load %arg4[%c0_7, %c0_8] : memref<64x32xbf16, #tpu.memory_space<vmem>>, vector<64x32xbf16>
    %cst_9 = arith.constant dense<0.000000e+00> : vector<32x32xf32>
    %10 = tpu.matmul %8, %9, %cst_9 {dimension_numbers = #tpu.dot_dimension_numbers<[1], [0], [0], [1], [0, 0, 1, 1], [], []>} : vector<32x64xbf16>, vector<64x32xbf16>, vector<32x32xf32> -> vector<32x32xf32>
    %11 = arith.addf %6, %10 : vector<32x32xf32>
    %cst_10 = arith.constant 0.000000e+00 : f32
    %12 = vector.broadcast %cst_10 : f32 to vector<32x32xf32>
    %13 = arith.maximumf %11, %12 : vector<32x32xf32>
    %14 = arith.truncf %13 : vector<32x32xf32> to vector<32x32xbf16>
    %c0_11 = arith.constant 0 : index
    %c0_12 = arith.constant 0 : index
    %15 = vector.load %arg6[%c0_11, %c0_12] : memref<32x8xbf16, #tpu.memory_space<vmem>>, vector<32x8xbf16>
    %cst_13 = arith.constant dense<0.000000e+00> : vector<32x8xf32>
    %16 = tpu.matmul %14, %15, %cst_13 {dimension_numbers = #tpu.dot_dimension_numbers<[1], [0], [0], [1], [0, 0, 1, 1], [], []>} : vector<32x32xbf16>, vector<32x8xbf16>, vector<32x8xf32> -> vector<32x8xf32>
    %c0_14 = arith.constant 0 : index
    %c0_15 = arith.constant 0 : index
    %17 = vector.load %arg7[%c0_14, %c0_15] : memref<1x8xf32, #tpu.memory_space<vmem>>, vector<1x8xf32>
    %18 = vector.broadcast %17 : vector<1x8xf32> to vector<32x8xf32>
    %19 = arith.addf %16, %18 : vector<32x8xf32>
    %c0_16 = arith.constant 0 : index
    %c0_17 = arith.constant 0 : index
    %20 = vector.load %arg8[%c0_16, %c0_17] : memref<32x8xf32, #tpu.memory_space<vmem>>, vector<32x8xf32>
    tpu.vector_store %arg8[%c0_16, %c0_17], %19 {strides = array<i32>} : memref<32x8xf32, #tpu.memory_space<vmem>>, vector<32x8xf32>,
    return
  }
  func.func @transform_0(%arg0: i32) -> (i32, i32) {
    %c0_i32 = arith.constant 0 : i32
    %c0_i32_0 = arith.constant 0 : i32
    return %arg0, %c0_i32 : i32, i32
  }
  func.func @transform_1(%arg0: i32) -> (i32, i32) {
    %c0_i32 = arith.constant 0 : i32
    %c0_i32_0 = arith.constant 0 : i32
    return %arg0, %c0_i32 : i32, i32
  }
  func.func @transform_2(%arg0: i32) -> (i32, i32) {
    %c0_i32 = arith.constant 0 : i32
    %c0_i32_0 = arith.constant 0 : i32
    %c0_i32_1 = arith.constant 0 : i32
    return %c0_i32, %c0_i32_0 : i32, i32
  }
  func.func @transform_3(%arg0: i32) -> (i32, i32) {
    %c0_i32 = arith.constant 0 : i32
    %c0_i32_0 = arith.constant 0 : i32
    %c0_i32_1 = arith.constant 0 : i32
    return %c0_i32, %c0_i32_0 : i32, i32
  }
  func.func @transform_4(%arg0: i32) -> (i32, i32) {
    %c0_i32 = arith.constant 0 : i32
    %c0_i32_0 = arith.constant 0 : i32
    %c0_i32_1 = arith.constant 0 : i32
    return %c0_i32, %c0_i32_0 : i32, i32
  }
  func.func @transform_5(%arg0: i32) -> (i32, i32) {
    %c0_i32 = arith.constant 0 : i32
    %c0_i32_0 = arith.constant 0 : i32
    %c0_i32_1 = arith.constant 0 : i32
    return %c0_i32, %c0_i32_0 : i32, i32
  }
  func.func @transform_6(%arg0: i32) -> (i32, i32) {
    %c0_i32 = arith.constant 0 : i32
    %c0_i32_0 = arith.constant 0 : i32
    %c0_i32_1 = arith.constant 0 : i32
    return %c0_i32, %c0_i32_0 : i32, i32
  }
  func.func @transform_7(%arg0: i32) -> (i32, i32) {
    %c0_i32 = arith.constant 0 : i32
    %c0_i32_0 = arith.constant 0 : i32
    return %arg0, %c0_i32 : i32, i32
  }
}

module attributes {stable_mosaic.version = 11 : i64} {
  func.func @_fusion_decoder_kernel(%arg0: i32, %arg1: memref<512x4xf32, #tpu.memory_space<vmem>>, %arg2: memref<512x4xf32, #tpu.memory_space<vmem>>, %arg3: memref<512x32xf32, #tpu.memory_space<vmem>>, %arg4: memref<512x64xf32, #tpu.memory_space<vmem>>, %arg5: memref<4x32xbf16, #tpu.memory_space<vmem>>, %arg6: memref<4x32xbf16, #tpu.memory_space<vmem>>, %arg7: memref<32x32xbf16, #tpu.memory_space<vmem>>, %arg8: memref<64x32xbf16, #tpu.memory_space<vmem>>, %arg9: memref<1x32xf32, #tpu.memory_space<vmem>>, %arg10: memref<1x32xf32, #tpu.memory_space<vmem>>, %arg11: memref<1x32xf32, #tpu.memory_space<vmem>>, %arg12: memref<32x4xbf16, #tpu.memory_space<vmem>>, %arg13: memref<1x4xf32, #tpu.memory_space<vmem>>, %arg14: memref<512x4xf32, #tpu.memory_space<vmem>>) attributes {dimension_semantics = [#tpu.dimension_semantics<parallel>], iteration_bounds = array<i64: 1>, scalar_prefetch = 0 : i64, scratch_operands = 0 : i64, tpu.core_type = #tpu.core_type<tc>, window_params = [{transform_indices = @transform_0, window_bounds = array<i64: 512, 4>}, {transform_indices = @transform_1, window_bounds = array<i64: 512, 4>}, {transform_indices = @transform_2, window_bounds = array<i64: 512, 32>}, {transform_indices = @transform_3, window_bounds = array<i64: 512, 64>}, {pipeline_mode = #tpu.pipeline_mode<synchronous>, transform_indices = @transform_4, window_bounds = array<i64: 4, 32>}, {pipeline_mode = #tpu.pipeline_mode<synchronous>, transform_indices = @transform_5, window_bounds = array<i64: 4, 32>}, {pipeline_mode = #tpu.pipeline_mode<synchronous>, transform_indices = @transform_6, window_bounds = array<i64: 32, 32>}, {pipeline_mode = #tpu.pipeline_mode<synchronous>, transform_indices = @transform_7, window_bounds = array<i64: 64, 32>}, {pipeline_mode = #tpu.pipeline_mode<synchronous>, transform_indices = @transform_8, window_bounds = array<i64: 1, 32>}, {pipeline_mode = #tpu.pipeline_mode<synchronous>, transform_indices = @transform_9, window_bounds = array<i64: 1, 32>}, {pipeline_mode = #tpu.pipeline_mode<synchronous>, transform_indices = @transform_10, window_bounds = array<i64: 1, 32>}, {pipeline_mode = #tpu.pipeline_mode<synchronous>, transform_indices = @transform_11, window_bounds = array<i64: 32, 4>}, {pipeline_mode = #tpu.pipeline_mode<synchronous>, transform_indices = @transform_12, window_bounds = array<i64: 1, 4>}, {transform_indices = @transform_13, window_bounds = array<i64: 512, 4>}]} {
    %c0 = arith.constant 0 : index
    %c0_0 = arith.constant 0 : index
    %0 = vector.load %arg9[%c0, %c0_0] : memref<1x32xf32, #tpu.memory_space<vmem>>, vector<1x32xf32>
    %c0_1 = arith.constant 0 : index
    %c0_2 = arith.constant 0 : index
    %1 = vector.load %arg1[%c0_1, %c0_2] : memref<512x4xf32, #tpu.memory_space<vmem>>, vector<512x4xf32>
    %2 = arith.truncf %1 : vector<512x4xf32> to vector<512x4xbf16>
    %c0_3 = arith.constant 0 : index
    %c0_4 = arith.constant 0 : index
    %3 = vector.load %arg5[%c0_3, %c0_4] : memref<4x32xbf16, #tpu.memory_space<vmem>>, vector<4x32xbf16>
    %cst = arith.constant dense<0.000000e+00> : vector<512x32xf32>
    %4 = tpu.matmul %2, %3, %cst {dimension_numbers = #tpu.dot_dimension_numbers<[1], [0], [0], [1], [0, 0, 1, 1], [], []>} : vector<512x4xbf16>, vector<4x32xbf16>, vector<512x32xf32> -> vector<512x32xf32>
    %5 = vector.broadcast %0 : vector<1x32xf32> to vector<512x32xf32>
    %6 = arith.addf %5, %4 : vector<512x32xf32>
    %c0_5 = arith.constant 0 : index
    %c0_6 = arith.constant 0 : index
    %7 = vector.load %arg2[%c0_5, %c0_6] : memref<512x4xf32, #tpu.memory_space<vmem>>, vector<512x4xf32>
    %8 = arith.truncf %7 : vector<512x4xf32> to vector<512x4xbf16>
    %c0_7 = arith.constant 0 : index
    %c0_8 = arith.constant 0 : index
    %9 = vector.load %arg6[%c0_7, %c0_8] : memref<4x32xbf16, #tpu.memory_space<vmem>>, vector<4x32xbf16>
    %cst_9 = arith.constant dense<0.000000e+00> : vector<512x32xf32>
    %10 = tpu.matmul %8, %9, %cst_9 {dimension_numbers = #tpu.dot_dimension_numbers<[1], [0], [0], [1], [0, 0, 1, 1], [], []>} : vector<512x4xbf16>, vector<4x32xbf16>, vector<512x32xf32> -> vector<512x32xf32>
    %11 = arith.addf %6, %10 : vector<512x32xf32>
    %cst_10 = arith.constant 0.000000e+00 : f32
    %12 = vector.broadcast %cst_10 : f32 to vector<512x32xf32>
    %13 = arith.maximumf %11, %12 : vector<512x32xf32>
    %c0_11 = arith.constant 0 : index
    %c0_12 = arith.constant 0 : index
    %14 = vector.load %arg10[%c0_11, %c0_12] : memref<1x32xf32, #tpu.memory_space<vmem>>, vector<1x32xf32>
    %c0_13 = arith.constant 0 : index
    %c0_14 = arith.constant 0 : index
    %15 = vector.load %arg3[%c0_13, %c0_14] : memref<512x32xf32, #tpu.memory_space<vmem>>, vector<512x32xf32>
    %16 = arith.truncf %15 : vector<512x32xf32> to vector<512x32xbf16>
    %c0_15 = arith.constant 0 : index
    %c0_16 = arith.constant 0 : index
    %17 = vector.load %arg7[%c0_15, %c0_16] : memref<32x32xbf16, #tpu.memory_space<vmem>>, vector<32x32xbf16>
    %cst_17 = arith.constant dense<0.000000e+00> : vector<512x32xf32>
    %18 = tpu.matmul %16, %17, %cst_17 {dimension_numbers = #tpu.dot_dimension_numbers<[1], [0], [0], [1], [0, 0, 1, 1], [], []>} : vector<512x32xbf16>, vector<32x32xbf16>, vector<512x32xf32> -> vector<512x32xf32>
    %19 = vector.broadcast %14 : vector<1x32xf32> to vector<512x32xf32>
    %20 = arith.addf %19, %18 : vector<512x32xf32>
    %cst_18 = arith.constant 0.000000e+00 : f32
    %21 = vector.broadcast %cst_18 : f32 to vector<512x32xf32>
    %22 = arith.maximumf %20, %21 : vector<512x32xf32>
    %23 = arith.addf %13, %22 : vector<512x32xf32>
    %c0_19 = arith.constant 0 : index
    %c0_20 = arith.constant 0 : index
    %24 = vector.load %arg11[%c0_19, %c0_20] : memref<1x32xf32, #tpu.memory_space<vmem>>, vector<1x32xf32>
    %c0_21 = arith.constant 0 : index
    %c0_22 = arith.constant 0 : index
    %25 = vector.load %arg4[%c0_21, %c0_22] : memref<512x64xf32, #tpu.memory_space<vmem>>, vector<512x64xf32>
    %26 = arith.truncf %25 : vector<512x64xf32> to vector<512x64xbf16>
    %c0_23 = arith.constant 0 : index
    %c0_24 = arith.constant 0 : index
    %27 = vector.load %arg8[%c0_23, %c0_24] : memref<64x32xbf16, #tpu.memory_space<vmem>>, vector<64x32xbf16>
    %cst_25 = arith.constant dense<0.000000e+00> : vector<512x32xf32>
    %28 = tpu.matmul %26, %27, %cst_25 {dimension_numbers = #tpu.dot_dimension_numbers<[1], [0], [0], [1], [0, 0, 1, 1], [], []>} : vector<512x64xbf16>, vector<64x32xbf16>, vector<512x32xf32> -> vector<512x32xf32>
    %29 = vector.broadcast %24 : vector<1x32xf32> to vector<512x32xf32>
    %30 = arith.addf %29, %28 : vector<512x32xf32>
    %cst_26 = arith.constant 0.000000e+00 : f32
    %31 = vector.broadcast %cst_26 : f32 to vector<512x32xf32>
    %32 = arith.maximumf %30, %31 : vector<512x32xf32>
    %33 = arith.addf %23, %32 : vector<512x32xf32>
    %34 = arith.truncf %33 : vector<512x32xf32> to vector<512x32xbf16>
    %c0_27 = arith.constant 0 : index
    %c0_28 = arith.constant 0 : index
    %35 = vector.load %arg12[%c0_27, %c0_28] : memref<32x4xbf16, #tpu.memory_space<vmem>>, vector<32x4xbf16>
    %cst_29 = arith.constant dense<0.000000e+00> : vector<512x4xf32>
    %36 = tpu.matmul %34, %35, %cst_29 {dimension_numbers = #tpu.dot_dimension_numbers<[1], [0], [0], [1], [0, 0, 1, 1], [], []>} : vector<512x32xbf16>, vector<32x4xbf16>, vector<512x4xf32> -> vector<512x4xf32>
    %c0_30 = arith.constant 0 : index
    %c0_31 = arith.constant 0 : index
    %37 = vector.load %arg13[%c0_30, %c0_31] : memref<1x4xf32, #tpu.memory_space<vmem>>, vector<1x4xf32>
    %38 = vector.broadcast %37 : vector<1x4xf32> to vector<512x4xf32>
    %39 = arith.addf %36, %38 : vector<512x4xf32>
    %c0_32 = arith.constant 0 : index
    %c0_33 = arith.constant 0 : index
    %40 = vector.load %arg14[%c0_32, %c0_33] : memref<512x4xf32, #tpu.memory_space<vmem>>, vector<512x4xf32>
    tpu.vector_store %arg14[%c0_32, %c0_33], %39 {strides = array<i32>} : memref<512x4xf32, #tpu.memory_space<vmem>>, vector<512x4xf32>,
    return
  }
  func.func @transform_0(%arg0: i32) -> (i32, i32) {
    %c0_i32 = arith.constant 0 : i32
    %c0_i32_0 = arith.constant 0 : i32
    return %arg0, %c0_i32 : i32, i32
  }
  func.func @transform_1(%arg0: i32) -> (i32, i32) {
    %c0_i32 = arith.constant 0 : i32
    %c0_i32_0 = arith.constant 0 : i32
    return %arg0, %c0_i32 : i32, i32
  }
  func.func @transform_2(%arg0: i32) -> (i32, i32) {
    %c0_i32 = arith.constant 0 : i32
    %c0_i32_0 = arith.constant 0 : i32
    return %arg0, %c0_i32 : i32, i32
  }
  func.func @transform_3(%arg0: i32) -> (i32, i32) {
    %c0_i32 = arith.constant 0 : i32
    %c0_i32_0 = arith.constant 0 : i32
    return %arg0, %c0_i32 : i32, i32
  }
  func.func @transform_4(%arg0: i32) -> (i32, i32) {
    %c0_i32 = arith.constant 0 : i32
    %c0_i32_0 = arith.constant 0 : i32
    %c0_i32_1 = arith.constant 0 : i32
    return %c0_i32, %c0_i32_0 : i32, i32
  }
  func.func @transform_5(%arg0: i32) -> (i32, i32) {
    %c0_i32 = arith.constant 0 : i32
    %c0_i32_0 = arith.constant 0 : i32
    %c0_i32_1 = arith.constant 0 : i32
    return %c0_i32, %c0_i32_0 : i32, i32
  }
  func.func @transform_6(%arg0: i32) -> (i32, i32) {
    %c0_i32 = arith.constant 0 : i32
    %c0_i32_0 = arith.constant 0 : i32
    %c0_i32_1 = arith.constant 0 : i32
    return %c0_i32, %c0_i32_0 : i32, i32
  }
  func.func @transform_7(%arg0: i32) -> (i32, i32) {
    %c0_i32 = arith.constant 0 : i32
    %c0_i32_0 = arith.constant 0 : i32
    %c0_i32_1 = arith.constant 0 : i32
    return %c0_i32, %c0_i32_0 : i32, i32
  }
  func.func @transform_8(%arg0: i32) -> (i32, i32) {
    %c0_i32 = arith.constant 0 : i32
    %c0_i32_0 = arith.constant 0 : i32
    %c0_i32_1 = arith.constant 0 : i32
    return %c0_i32, %c0_i32_0 : i32, i32
  }
  func.func @transform_9(%arg0: i32) -> (i32, i32) {
    %c0_i32 = arith.constant 0 : i32
    %c0_i32_0 = arith.constant 0 : i32
    %c0_i32_1 = arith.constant 0 : i32
    return %c0_i32, %c0_i32_0 : i32, i32
  }
  func.func @transform_10(%arg0: i32) -> (i32, i32) {
    %c0_i32 = arith.constant 0 : i32
    %c0_i32_0 = arith.constant 0 : i32
    %c0_i32_1 = arith.constant 0 : i32
    return %c0_i32, %c0_i32_0 : i32, i32
  }
  func.func @transform_11(%arg0: i32) -> (i32, i32) {
    %c0_i32 = arith.constant 0 : i32
    %c0_i32_0 = arith.constant 0 : i32
    %c0_i32_1 = arith.constant 0 : i32
    return %c0_i32, %c0_i32_0 : i32, i32
  }
  func.func @transform_12(%arg0: i32) -> (i32, i32) {
    %c0_i32 = arith.constant 0 : i32
    %c0_i32_0 = arith.constant 0 : i32
    %c0_i32_1 = arith.constant 0 : i32
    return %c0_i32, %c0_i32_0 : i32, i32
  }
  func.func @transform_13(%arg0: i32) -> (i32, i32) {
    %c0_i32 = arith.constant 0 : i32
    %c0_i32_0 = arith.constant 0 : i32
    return %arg0, %c0_i32 : i32, i32
  }
}

</mosaic_0001>

<bundles_post_ra>
// kernel: _lambda_.16
= control target key start
LH: loop header
LB: loop body
LE: loop exit
PB: predicated region body
PF: predicated region fallthrough
CT: control target
= control target key end

     0   :  { %s772_s18 = smov 0   ;;  %s774_s19 = smov 0   ;;  %s865_s0 = inlined_call_operand.vmem [shape: f32[2,32,64], index: 0, kind: input, shape index: {}]   ;;  %s866_s1 = inlined_call_operand.vmem [shape: bf16[2,64,32], index: 1, kind: input, shape index: {}]   ;;  %s867_s2 = inlined_call_operand.vmem [shape: f32[2,1,32], index: 2, kind: input, shape index: {}]   ;;  %s868_s3 = inlined_call_operand.vmem [shape: f32[2,1,32], index: 3, kind: input, shape index: {}]   ;;  %s869_s4 = inlined_call_operand.vmem [shape: f32[2,1,32], index: 4, kind: input, shape index: {}]   ;;  %s870_s5 = inlined_call_operand.vmem [shape: f32[2,32,32], index: 5, kind: output, shape index: {}]  }
   0x1   :  { %s776_s20 = smov 0  }
   0x2 LB: > { %s27_s21 = sadd.s32 1, %s735_s19  ;;  %p641_p0 = scmp.ge.s32.totalorder %s739_s20, 1  ;;  %s739_s20 = sphi %s776_s20, %s15_s20   ;;  %s735_s19 = sphi %s774_s19, %s872_s19   ;;  %s731_s18 = sphi %s772_s18, %s871_s18  }
   0x3   : > { %p29_p1 = scmp.ge.s32.totalorder %s27_s21, 2  ;;  %p242_p2 = scmp.lt.s32.totalorder %s739_s20, 3 }
   0x5   : > { %s874_s21 = smov (%p29_p1, %s27_s21), 0  ;;  %p243_p3 = pnand %p641_p0, %p242_p2 }
   0x6   : > { %p293_p4 = scmp.lt.s32.totalorder (!%p243_p3), %s731_s18, 1 }
   0x7   : > { %246 = sbr.rel (%p243_p3) target bundleno = 437 (0x1b5), region = 40 }
   0xc   : > { %s876_s18 = smov (!%p293_p4, %s731_s18), 1  ;;  %vm369_vm0 = vcmask 523264   ;;  %vm395_vm1 = vcmask 261120   ;;  %v741_v23 = vmov 32.0  }
   0xd   : > { %s793_s22 = sshll.u32 %s876_s18, 5  ;;  %s309_s25 = scalar_lea.vmem %s867_s2, %s876_s18  ;;  %707 = vrcp.f32 %v741_v23 }
   0xe   : > { %s306_s28 = scalar_lea.vmem %s866_s1, %s793_s22  ;;  %s300_s6 = scalar_lea.vmem %s865_s0, %s793_s22  ;;  %v704_v10 = vld [vmem:[%s309_s25] ss:$0 sm:$0xff] }
   0xf   : > { %v674_v0 = vld [vmem:[%s306_s28 + $0x18] sm:$0xff]  ;;  %v673_v1 = vld [vmem:[%s306_s28 + $0x10] sm:$0xff]  ;;  %v672_v2 = vld [vmem:[%s306_s28 + $0x8] sm:$0xff]  ;;  %s312_s9 = scalar_lea.vmem %s868_s3, %s876_s18  ;;  %s315_s12 = scalar_lea.vmem %s869_s4, %s876_s18 }
  0x10   : > { %380 = vmatpush.bf16.msra.mxu0 %v674_v0  ;;  %675 = vmatpush.bf16.msra.mxu1 %v674_v0  ;;  %v671_v3 = vld [vmem:[%s306_s28] sm:$0xff]  ;;  %v328_v5 = vld [vmem:[%s300_s6 + $0x8] sm:$0xff]  ;;  %v329_v6 = vld [vmem:[%s300_s6 + $0x10] sm:$0xff]  ;;  %s324_s24 = scalar_lea.vmem %s870_s5, %s793_s22 }
  0x11   : > { %v327_v4 = vld [vmem:[%s300_s6] sm:$0xff]  ;;  %v330_v7 = vld [vmem:[%s300_s6 + $0x18] sm:$0xff] }
  0x12   : > { %v331_v8 = vpack.c.bf16 %v328_v5, %v327_v4  ;;  %v332_v9 = vpack.c.bf16 %v330_v7, %v329_v6 }
  0x13   : > { %v708_v24 = vpop.eup %707 }
  0x14   : > { %381 = vmatpush.bf16.msra.mxu0 %v673_v1  ;;  %676 = vmatpush.bf16.msra.mxu1 %v673_v1  ;;  %v409_v25 = vmul.f32 32.0, %v708_v24  ;;  %vm413_vm2 = vweird.f32 %v708_v24 }
  0x16   : > { %v410_v26 = vsub.f32 1.0, %v409_v25 }
  0x18   : > { %382 = vmatpush.bf16.msra.mxu0 %v672_v2  ;;  %677 = vmatpush.bf16.msra.mxu1 %v672_v2  ;;  %v411_v27 = vmul.f32 %v708_v24, %v410_v26 }
  0x1a   : > { %v412_v28 = vadd.f32 %v708_v24, %v411_v27 }
  0x1c   : > { %383 = vmatpush.bf16.msra.mxu0 %v671_v3  ;;  %678 = vmatpush.bf16.msra.mxu1 %v671_v3  ;;  %v414_v29 = vsel %vm413_vm2, %v708_v24, %v412_v28 }
  0x1f   : > { %664 = vmatmul.msk.bf16.vlgmr.msra.gmra.mxu0 %vm369_vm0, %v331_v8  ;;  %665 = vmatmul.msk.bf16.vlgmr.msra.gmra.mxu1 %vm369_vm0, %v332_v9 }
  0x9c   : > { %v385_v11 = vpop.f32.mrf.mxu0  ;;  %v390_v12 = vpop.f32.mrf.mxu1 }
  0x9d   : > { %v386_v13 = vadd.f32 %v704_v10, %v385_v11  ;;  %v391_v14 = vadd.f32 %v704_v10, %v390_v12  ;;  %v705_v12 = vld [vmem:[%s312_s9] ss:$0 sm:$0xff] }
  0x9f   : > { %v402_v15 = vsel %vm395_vm1, %v391_v14, 0.0  ;;  %v396_v16 = vsel %vm395_vm1, %v386_v13, 0.0 }
  0xa0   : > { %403 = vadd.xlane.f32.xlu1 %v402_v15  ;;  %397 = vadd.xlane.f32.xlu0 %v396_v16 }
  0xa4   : > { %v387_v17 = vpop.f32.mrf.mxu0  ;;  %v392_v18 = vpop.f32.mrf.mxu1 }
  0xa5   : > { %v388_v19 = vadd.f32 %v704_v10, %v387_v17  ;;  %v393_v20 = vadd.f32 %v704_v10, %v392_v18  ;;  %v706_v17 = vld [vmem:[%s315_s12] ss:$0 sm:$0xff] }
  0xa7   : > { %v405_v21 = vsel %vm395_vm1, %v393_v20, 0.0  ;;  %v399_v22 = vsel %vm395_vm1, %v388_v19, 0.0 }
  0xa8   : > { %406 = vadd.xlane.f32.xlu1 %v405_v21  ;;  %400 = vadd.xlane.f32.xlu0 %v399_v22 }
 0x113   : > { %v404_v30 = vpop.xlane.xlu1 %403  ;;  %v398_v31 = vpop.xlane.xlu0 %397 }
 0x114   : > { %v417_v32 = vmul.f32 %v414_v29, %v404_v30  ;;  %v415_v33 = vmul.f32 %v414_v29, %v398_v31 }
 0x116   : > { %v819_v34 = vsub.f32 %v391_v14, %v417_v32  ;;  %v419_v35 = vsub.f32 %v386_v13, %v415_v33 }
 0x118   : > { %v425_v36 = vmul.f32 %v819_v34, %v819_v34  ;;  %v423_v37 = vmul.f32 %v419_v35, %v419_v35 }
 0x11a   : > { %v433_v38 = vsel %vm395_vm1, %v425_v36, 0.0  ;;  %v427_v39 = vsel %vm395_vm1, %v423_v37, 0.0 }
 0x11b   : > { %v407_v40 = vpop.xlane.xlu1 %406  ;;  %434 = vadd.xlane.f32.xlu0 %v433_v38  ;;  %428 = vadd.xlane.f32.xlu2 %v427_v39  ;;  %v401_v41 = vpop.xlane.xlu0 %400 }
 0x11c   : > { %v418_v42 = vmul.f32 %v414_v29, %v407_v40  ;;  %v416_v43 = vmul.f32 %v414_v29, %v401_v41 }
 0x11e   : > { %v825_v44 = vsub.f32 %v393_v20, %v418_v42  ;;  %v827_v45 = vsub.f32 %v388_v19, %v416_v43 }
 0x120   : > { %v426_v46 = vmul.f32 %v825_v44, %v825_v44  ;;  %v424_v47 = vmul.f32 %v827_v45, %v827_v45 }
 0x122   : > { %v436_v48 = vsel %vm395_vm1, %v426_v46, 0.0  ;;  %v430_v49 = vsel %vm395_vm1, %v424_v47, 0.0 }
 0x123   : > { %437 = vadd.xlane.f32.xlu1 %v436_v48  ;;  %431 = vadd.xlane.f32.xlu2 %v430_v49 }
 0x18e   : > { %v429_v50 = vpop.xlane.xlu2 %428  ;;  %v435_v51 = vpop.xlane.xlu0 %434 }
 0x18f   : > { %v439_v52 = vmul.f32 %v429_v50, %v414_v29  ;;  %v441_v53 = vmul.f32 %v435_v51, %v414_v29 }
 0x191   : > { %v443_v54 = vadd.f32 1e-05, %v439_v52  ;;  %v445_v55 = vadd.f32 1e-05, %v441_v53 }
 0x193   : > { %709 = vrsqrt.f32 %v443_v54  ;;  %vm453_vm5 = vweird.f32 %v443_v54  ;;  %vm473_vm7 = vweird.f32 %v445_v55 }
 0x194   : > { %711 = vrsqrt.f32 %v445_v55 }
 0x196   : > { %v438_v56 = vpop.xlane.xlu1 %437  ;;  %v432_v57 = vpop.xlane.xlu2 %431 }
 0x197   : > { %v442_v58 = vmul.f32 %v438_v56, %v414_v29  ;;  %v440_v59 = vmul.f32 %v432_v57, %v414_v29 }
 0x199   : > { %v710_v60 = vpop.eup %709  ;;  %v446_v61 = vadd.f32 1e-05, %v442_v58  ;;  %v444_v62 = vadd.f32 1e-05, %v440_v59 }
 0x19a   : > { %v712_v63 = vpop.eup %711  ;;  %v448_v0 = vmul.f32 %v710_v60, %v443_v54  ;;  %vm454_vm3 = vweird.f32 %v710_v60 }
 0x19b   : > { %v468_v1 = vmul.f32 %v712_v63, %v445_v55  ;;  %713 = vrsqrt.f32 %v446_v61  ;;  %vm474_vm4 = vweird.f32 %v712_v63  ;;  %vm455_vm6 = vmor %vm453_vm5, %vm454_vm3  ;;  %vm483_vm11 = vweird.f32 %v446_v61 }
 0x19c   : > { %v449_v2 = vmul.f32 %v710_v60, %v448_v0  ;;  %715 = vrsqrt.f32 %v444_v62  ;;  %vm475_vm8 = vmor %vm473_vm7, %vm474_vm4  ;;  %vm463_vm13 = vweird.f32 %v444_v62 }
 0x19d   : > { %v469_v3 = vmul.f32 %v712_v63, %v468_v1 }
 0x19e   : > { %v450_v4 = vmul.f32 0.5, %v449_v2 }
 0x19f   : > { %v470_v5 = vmul.f32 0.5, %v469_v3 }
 0x1a0   : > { %v451_v6 = vsub.f32 1.5, %v450_v4 }
 0x1a1   : > { %v714_v7 = vpop.eup %713  ;;  %v471_v8 = vsub.f32 1.5, %v470_v5 }
 0x1a2   : > { %v716_v9 = vpop.eup %715  ;;  %v452_v10 = vmul.f32 %v710_v60, %v451_v6  ;;  %v478_v11 = vmul.f32 %v714_v7, %v446_v61  ;;  %vm484_vm9 = vweird.f32 %v714_v7 }
 0x1a3   : > { %v472_v13 = vmul.f32 %v712_v63, %v471_v8  ;;  %v458_v14 = vmul.f32 %v716_v9, %v444_v62  ;;  %vm464_vm10 = vweird.f32 %v716_v9  ;;  %vm485_vm12 = vmor %vm483_vm11, %vm484_vm9 }
 0x1a4   : > { %v456_v15 = vsel %vm455_vm6, %v710_v60, %v452_v10  ;;  %v479_v16 = vmul.f32 %v714_v7, %v478_v11  ;;  %vm465_vm14 = vmor %vm463_vm13, %vm464_vm10 }
 0x1a5   : > { %v487_v18 = vmul.f32 %v456_v15, %v419_v35  ;;  %v476_v19 = vsel %vm475_vm8, %v712_v63, %v472_v13  ;;  %v459_v20 = vmul.f32 %v716_v9, %v458_v14 }
 0x1a6   : > { %v489_v21 = vmul.f32 %v476_v19, %v819_v34  ;;  %v480_v22 = vmul.f32 0.5, %v479_v16 }
 0x1a7   : > { %v495_v23 = vmul.f32 %v705_v12, %v487_v18  ;;  %v460_v24 = vmul.f32 0.5, %v459_v20 }
 0x1a8   : > { %v497_v25 = vmul.f32 %v705_v12, %v489_v21  ;;  %v481_v26 = vsub.f32 1.5, %v480_v22 }
 0x1a9   : > { %v503_v27 = vadd.f32 %v706_v17, %v495_v23  ;;  %v461_v28 = vsub.f32 1.5, %v460_v24 }
 0x1aa   : > { %v505_v29 = vadd.f32 %v706_v17, %v497_v25  ;;  %v482_v30 = vmul.f32 %v714_v7, %v481_v26 }
 0x1ab   : > { %507 = vst.msk [vmem:[%s324_s24] sm:$0xff] %vm395_vm1, %v503_v27  ;;  %v462_v31 = vmul.f32 %v716_v9, %v461_v28 }
 0x1ac   : > { %509 = vst.msk [vmem:[%s324_s24 + $0x10] sm:$0xff] %vm395_vm1, %v505_v29  ;;  %v486_v32 = vsel %vm485_vm12, %v714_v7, %v482_v30 }
 0x1ad   : > { %v490_v33 = vmul.f32 %v486_v32, %v825_v44  ;;  %v466_v34 = vsel %vm465_vm14, %v716_v9, %v462_v31 }
 0x1ae   : > { %v488_v35 = vmul.f32 %v466_v34, %v827_v45 }
 0x1af   : > { %v498_v36 = vmul.f32 %v705_v12, %v490_v33 }
 0x1b0   : > { %v496_v37 = vmul.f32 %v705_v12, %v488_v35 }
 0x1b1   : > { %v506_v38 = vadd.f32 %v706_v17, %v498_v36 }
 0x1b2   : > { %v504_v39 = vadd.f32 %v706_v17, %v496_v37 }
 0x1b3   : > { %510 = vst.msk [vmem:[%s324_s24 + $0x18] sm:$0xff] %vm395_vm1, %v506_v38 }
 0x1b4   : > { %508 = vst.msk [vmem:[%s324_s24 + $0x8] sm:$0xff] %vm395_vm1, %v504_v39 }
 0x1b5 PF: > { %s15_s20 = sadd.s32 1, %s739_s20   ;;  %s871_s18 = smov %s735_s19 }
 0x1b6   : > { %p12_p5 = scmp.ge.s32.totalorder %s15_s20, 4   ;;  %s872_s19 = smov %s874_s21 }
 0x1b8   :  { %14 = sbr.rel (!%p12_p5) target bundleno = 2 (0x2), region = 82 }

// kernel: _lambda_.18
= control target key start
LH: loop header
LB: loop body
LE: loop exit
PB: predicated region body
PF: predicated region fallthrough
CT: control target
= control target key end

     0   :  { %vm56_vm0 = vcmask 261120   ;;  %s257_s3 = inlined_call_operand.vmem [shape: bf16[32,32], index: 3, kind: input, shape index: {}]   ;;  %s258_s2 = inlined_call_operand.vmem [shape: bf16[32,32], index: 2, kind: input, shape index: {}]   ;;  %s259_s1 = inlined_call_operand.vmem [shape: f32[2,32,32], index: 1, kind: input, shape index: {}, may-alias: {0,1}]   ;;  %s260_s0 = inlined_call_operand.vmem [shape: f32[2,32,32], index: 0, kind: input, shape index: {}, may-alias: {0,1}]   ;;  %s261_s4 = inlined_call_operand.vmem [shape: f32[1,32], index: 4, kind: input, shape index: {}]   ;;  %s262_s5 = inlined_call_operand.vmem [shape: f32[32,32], index: 5, kind: output, shape index: {}]  }
   0x1   :  { %v162_v0 = vld [vmem:[%s257_s3 + $0x8] sm:$0xff]  ;;  %v161_v2 = vld [vmem:[%s257_s3] sm:$0xff]  ;;  %v137_v6 = vld [vmem:[%s259_s1 + $0x30] sm:$0xff] }
   0x2   :  { %v160_v1 = vld [vmem:[%s258_s2 + $0x8] sm:$0xff]  ;;  %v159_v3 = vld [vmem:[%s258_s2] sm:$0xff]  ;;  %69 = vmatpush.bf16.msra.mxu0 %v162_v0  ;;  %163 = vmatpush.bf16.msra.mxu2 %v162_v0  ;;  %v138_v7 = vld [vmem:[%s259_s1 + $0x38] sm:$0xff] }
   0x3   :  { %v135_v4 = vld [vmem:[%s259_s1 + $0x20] sm:$0xff]  ;;  %v136_v5 = vld [vmem:[%s259_s1 + $0x28] sm:$0xff]  ;;  %106 = vmatpush.bf16.msra.mxu1 %v160_v1  ;;  %165 = vmatpush.bf16.msra.mxu3 %v160_v1  ;;  %v26_v10 = vld [vmem:[%s260_s0 + $0x10] sm:$0xff]  ;;  %v39_v13 = vpack.c.bf16 %v138_v7, %v137_v6 }
   0x4   :  { %v24_v8 = vld [vmem:[%s260_s0] sm:$0xff]  ;;  %v25_v9 = vld [vmem:[%s260_s0 + $0x8] sm:$0xff]  ;;  %v27_v11 = vld [vmem:[%s260_s0 + $0x18] sm:$0xff]  ;;  %v38_v12 = vpack.c.bf16 %v136_v5, %v135_v4 }
   0x5   :  { %v28_v14 = vpack.c.bf16 %v25_v9, %v24_v8  ;;  %v29_v15 = vpack.c.bf16 %v27_v11, %v26_v10  ;;  %v167_v17 = vld [vmem:[%s261_s4] ss:$0 sm:$0xff] }
   0x6   :  { %70 = vmatpush.bf16.msra.mxu0 %v161_v2  ;;  %164 = vmatpush.bf16.msra.mxu2 %v161_v2 }
   0x7   :  { %107 = vmatpush.bf16.msra.mxu1 %v159_v3  ;;  %166 = vmatpush.bf16.msra.mxu3 %v159_v3 }
   0x9   :  { %147 = vmatmul.msk.bf16.vlgmr.msra.gmra.mxu0 %vm56_vm0, %v38_v12  ;;  %148 = vmatmul.msk.bf16.vlgmr.msra.gmra.mxu2 %vm56_vm0, %v39_v13 }
   0xa   :  { %157 = vmatmul.msk.bf16.vlgmr.msra.gmra.mxu1 %vm56_vm0, %v28_v14  ;;  %158 = vmatmul.msk.bf16.vlgmr.msra.gmra.mxu3 %vm56_vm0, %v29_v15 }
  0x86   :  { %v72_v16 = vpop.f32.mrf.mxu0 }
  0x87   :  { %v109_v18 = vpop.f32.mrf.mxu1 }
  0x88   :  { %v110_v19 = vadd.f32 %v109_v18, %v72_v16 }
  0x8a   :  { %v123_v20 = vadd.f32 %v167_v17, %v110_v19 }
  0x8c   :  { %127 = vst.msk [vmem:[%s262_s5] sm:$0xff] %vm56_vm0, %v123_v20  ;;  %v77_v21 = vpop.f32.mrf.mxu2 }
  0x8d   :  { %v114_v22 = vpop.f32.mrf.mxu3 }
  0x8e   :  { %v115_v23 = vadd.f32 %v114_v22, %v77_v21  ;;  %v74_v24 = vpop.f32.mrf.mxu0 }
  0x8f   :  { %v111_v25 = vpop.f32.mrf.mxu1 }
  0x90   :  { %v125_v26 = vadd.f32 %v167_v17, %v115_v23  ;;  %v112_v27 = vadd.f32 %v111_v25, %v74_v24 }
  0x92   :  { %129 = vst.msk [vmem:[%s262_s5 + $0x10] sm:$0xff] %vm56_vm0, %v125_v26  ;;  %v124_v28 = vadd.f32 %v167_v17, %v112_v27 }
  0x94   :  { %128 = vst.msk [vmem:[%s262_s5 + $0x8] sm:$0xff] %vm56_vm0, %v124_v28  ;;  %v79_v29 = vpop.f32.mrf.mxu2 }
  0x95   :  { %v116_v30 = vpop.f32.mrf.mxu3 }
  0x96   :  { %v117_v31 = vadd.f32 %v116_v30, %v79_v29 }
  0x98   :  { %v126_v32 = vadd.f32 %v167_v17, %v117_v31 }
  0x9a   :  { %130 = vst.msk [vmem:[%s262_s5 + $0x18] sm:$0xff] %vm56_vm0, %v126_v32 }

// kernel: _lambda_.17
= control target key start
LH: loop header
LB: loop body
LE: loop exit
PB: predicated region body
PF: predicated region fallthrough
CT: control target
= control target key end

     0   :  { %s1735_s18 = smov 0   ;;  %s1737_s19 = smov 0   ;;  %s1958_s0 = inlined_call_operand.vmem [shape: f32[2,2,16,32], index: 0, kind: input, shape index: {}]   ;;  %s1959_s1 = inlined_call_operand.vmem [shape: f32[2,1,32], index: 1, kind: input, shape index: {}]   ;;  %s1960_s2 = inlined_call_operand.vmem [shape: f32[2,1,32], index: 2, kind: input, shape index: {}]   ;;  %s1961_s3 = inlined_call_operand.vmem [shape: bf16[2,32,96], index: 3, kind: input, shape index: {}]   ;;  %s1962_s4 = inlined_call_operand.vmem [shape: f32[2,1,96], index: 4, kind: input, shape index: {}]   ;;  %s1963_s5 = inlined_call_operand.vmem [shape: bf16[2,32,32], index: 5, kind: input, shape index: {}]   ;;  %s1964_s6 = inlined_call_operand.vmem [shape: f32[2,1,32], index: 6, kind: input, shape index: {}]   ;;  %s1965_s7 = inlined_call_operand.vmem [shape: f32[2,1,32], index: 7, kind: input, shape index: {}]   ;;  %s1966_s8 = inlined_call_operand.vmem [shape: f32[2,1,32], index: 8, kind: input, shape index: {}]   ;;  %s1967_s9 = inlined_call_operand.vmem [shape: bf16[2,32,64], index: 9, kind: input, shape index: {}]   ;;  %s1968_s10 = inlined_call_operand.vmem [shape: f32[2,1,64], index: 10, kind: input, shape index: {}]   ;;  %s1969_s11 = inlined_call_operand.vmem [shape: bf16[2,64,32], index: 11, kind: input, shape index: {}]   ;;  %s1970_s12 = inlined_call_operand.vmem [shape: f32[2,1,32], index: 12, kind: input, shape index: {}]   ;;  %s1971_s13 = inlined_call_operand.vmem [shape: f32[2,1,32], index: 13, kind: input, shape index: {}]   ;;  %s1972_s14 = inlined_call_operand.vmem [shape: f32[2,1,32], index: 14, kind: input, shape index: {}]   ;;  %s1973_s15 = inlined_call_operand.vmem [shape: f32[2,2,16,32], index: 15, kind: output, shape index: {}]  }
   0x1   :  { %1977 = sst [smem:[#allocation6_spill]] %s1958_s0  ;;  %s1739_s20 = smov 0  }
   0x2   :  { %s1741_s21 = smov 0   ;;  %s1743_s22 = smov 0  }
   0x3 LB: > { %1978 = sst [smem:[#allocation2_spill]] %s1642_s20  ;;  %s34_s23 = sadd.s32 1, %s1642_s20  ;;  %s1650_s22 = sphi %s1743_s22, %s25_s22   ;;  %s1646_s21 = sphi %s1741_s21, %s1987_s21   ;;  %s1642_s20 = sphi %s1739_s20, %s1986_s20   ;;  %s1638_s19 = sphi %s1737_s19, %s1985_s19   ;;  %s1634_s18 = sphi %s1735_s18, %s1984_s18  }
   0x4   : > { %1979 = sst [smem:[#allocation3_spill]] %s1646_s21  ;;  %s37_s24 = sadd.s32 1, %s1646_s21 }
   0x5   : > { %p35_p0 = scmp.ge.s32.totalorder %s34_s23, 2  ;;  %p1456_p1 = scmp.ge.s32.totalorder %s1650_s22, 1 }
   0x6   : > { %p577_p2 = scmp.lt.s32.totalorder %s1650_s22, 5 }
   0x7   : > { %s1989_s23 = smov (%p35_p0, %s34_s23), 0  ;;  %s1991_s24 = smov (!%p35_p0, %s37_s24), %s1646_s21 }
   0x8   : > { %1980 = sst [smem:[#allocation4_spill]] %s1989_s23  ;;  %p578_p3 = pnand %p1456_p1, %p577_p2 }
   0x9   : > { %p39_p4 = scmp.ge.s32.totalorder %s1991_s24, 2  ;;  %p683_p5 = scmp.lt.s32.totalorder (!%p578_p3), %s1638_s19, 1 }
   0xa   : > { %581 = sbr.rel (%p578_p3) target bundleno = 2068 (0x814), region = 80  ;;  %p685_p6 = scmp.lt.s32.totalorder (!%p578_p3), %s1634_s18, 1 }
   0xb   : > { %s1993_s24 = smov (%p39_p4, %s1991_s24), 0  ;;  %s1982_s0 = sld [smem:[#allocation6_spill]] (!%p578_p3) }
   0xc   : > { %1981 = sst [smem:[#allocation5_spill]] %s1993_s24 }
   0xf   : > { %s1995_s19 = smov (!%p683_p5, %s1638_s19), 1  ;;  %s1997_s18 = smov (!%p685_p6, %s1634_s18), 1  ;;  %vm754_vm0 = vcmask 261120   ;;  %v1652_v4 = vmov 32.0   ;;  %vm882_vm8 = vcmask 130048  }
  0x10   : > { %s1458_s25 = sshll.u32 %s1995_s19, 2  ;;  %s1457_s26 = sshll.u32 %s1997_s18, 1  ;;  %1586 = vrcp.f32 %v1652_v4 }
  0x11   : > { %s1768_s27 = sadd.s32 %s1458_s25, %s1457_s26  ;;  %s694_s25 = scalar_lea.vmem %s1959_s1, %s1995_s19 }
  0x12   : > { %s1974_s28 = sshll.u32 %s1768_s27, 3  ;;  %s697_s30 = scalar_lea.vmem %s1960_s2, %s1995_s19  ;;  %v1576_v42 = vld [vmem:[%s694_s25] ss:$0 sm:$0xff] }
  0x13   : > { %s691_s16 = scalar_lea.vmem %s1982_s0, %s1974_s28  ;;  %s705_s0 = scalar_lea.vmem %s1962_s4, %s1995_s19  ;;  %v1577_v47 = vld [vmem:[%s697_s30] ss:$0 sm:$0xff] }
  0x14   : > { %v1776_v0 = vld [vmem:[%s691_s16] sm:$0xff]  ;;  %v1780_v2 = vld [vmem:[%s691_s16 + $0x8] sm:$0xff]  ;;  %s1805_s24 = sshll.u32 %s1995_s19, 4  ;;  %s1653_s25 = smov 96  }
  0x15   : > { %v755_v1 = vsel %vm754_vm0, %v1776_v0, 0.0  ;;  %v758_v3 = vsel %vm754_vm0, %v1780_v2, 0.0  ;;  %s702_s20 = scalar_lea.vmem %s1961_s3, %s1805_s24  ;;  %v1578_v53 = vld [vmem:[%s705_s0] ss:$0 sm:$0xff]  ;;  %s1654_s0 = smov 64  }
  0x16   : > { %756 = vadd.xlane.f32.xlu0 %v755_v1  ;;  %v1587_v5 = vpop.eup %1586  ;;  %v1524_v21 = vld [vmem:[%s702_s20 + $0x8] sm:$0xff]  ;;  %v1523_v23 = vld [vmem:[%s702_s20] sm:$0xff]  ;;  %s713_s30 = scalar_lea.vmem %s1964_s6, %s1995_s19  ;;  %s710_s21 = scalar_lea.vmem %s1963_s5, %s1805_s24 }
  0x17   : > { %v762_v6 = vmul.f32 32.0, %v1587_v5  ;;  %vm766_vm1 = vweird.f32 %v1587_v5  ;;  %848 = vmatpush.bf16.msra.mxu0 %v1524_v21  ;;  %s716_s17 = scalar_lea.vmem %s1965_s7, %s1995_s19  ;;  %s735_s26 = scalar_lea.vmem %s1970_s12, %s1995_s19 }
  0x18   : > { %s1522_s29 = sshll.u32 %s1995_s19, 5  ;;  %s741_s16 = scalar_lea.vmem %s1972_s14, %s1995_s19 }
  0x19   : > { %v763_v7 = vsub.f32 1.0, %v762_v6 }
  0x1b   : > { %v764_v8 = vmul.f32 %v1587_v5, %v763_v7  ;;  %849 = vmatpush.bf16.msra.mxu0 %v1523_v23 }
  0x1d   : > { %v765_v9 = vadd.f32 %v1587_v5, %v764_v8 }
  0x1e   : > { %759 = vadd.xlane.f32.xlu0 %v758_v3 }
  0x1f   : > { %v1784_v10 = vsel %vm766_vm1, %v1587_v5, %v765_v9 }
  0x89   : > { %v757_v11 = vpop.xlane.xlu0 %756 }
  0x8a   : > { %v768_v12 = vmul.f32 %v1784_v10, %v757_v11 }
  0x8c   : > { %v770_v13 = vsub.f32 %v1776_v0, %v768_v12 }
  0x8e   : > { %v772_v14 = vmul.f32 %v770_v13, %v770_v13 }
  0x90   : > { %v774_v15 = vsel %vm754_vm0, %v772_v14, 0.0 }
  0x91   : > { %775 = vadd.xlane.f32.xlu1 %v774_v15  ;;  %v760_v16 = vpop.xlane.xlu0 %759 }
  0x92   : > { %v769_v17 = vmul.f32 %v1784_v10, %v760_v16 }
  0x94   : > { %v771_v18 = vsub.f32 %v1780_v2, %v769_v17 }
  0x96   : > { %v773_v19 = vmul.f32 %v771_v18, %v771_v18 }
  0x98   : > { %v777_v20 = vsel %vm754_vm0, %v773_v19, 0.0 }
  0x99   : > { %778 = vadd.xlane.f32.xlu1 %v777_v20 }
 0x104   : > { %v776_v22 = vpop.xlane.xlu1 %775 }
 0x105   : > { %v780_v24 = vmul.f32 %v776_v22, %v1784_v10 }
 0x107   : > { %v782_v25 = vadd.f32 1e-05, %v780_v24 }
 0x109   : > { %1588 = vrsqrt.f32 %v782_v25  ;;  %vm790_vm3 = vweird.f32 %v782_v25 }
 0x10c   : > { %v779_v26 = vpop.xlane.xlu1 %778 }
 0x10d   : > { %v781_v27 = vmul.f32 %v779_v26, %v1784_v10 }
 0x10f   : > { %v1589_v28 = vpop.eup %1588  ;;  %v783_v29 = vadd.f32 1e-05, %v781_v27 }
 0x110   : > { %v785_v30 = vmul.f32 %v1589_v28, %v782_v25  ;;  %vm791_vm2 = vweird.f32 %v1589_v28 }
 0x111   : > { %1590 = vrsqrt.f32 %v783_v29  ;;  %vm792_vm4 = vmor %vm790_vm3, %vm791_vm2  ;;  %vm800_vm6 = vweird.f32 %v783_v29 }
 0x112   : > { %v786_v31 = vmul.f32 %v1589_v28, %v785_v30 }
 0x114   : > { %v787_v32 = vmul.f32 0.5, %v786_v31 }
 0x116   : > { %v788_v33 = vsub.f32 1.5, %v787_v32 }
 0x117   : > { %v1591_v34 = vpop.eup %1590 }
 0x118   : > { %v789_v35 = vmul.f32 %v1589_v28, %v788_v33  ;;  %v795_v36 = vmul.f32 %v1591_v34, %v783_v29  ;;  %vm801_vm5 = vweird.f32 %v1591_v34 }
 0x119   : > { %vm802_vm7 = vmor %vm800_vm6, %vm801_vm5 }
 0x11a   : > { %v796_v37 = vmul.f32 %v1591_v34, %v795_v36  ;;  %v793_v38 = vsel %vm792_vm4, %v1589_v28, %v789_v35 }
 0x11b   : > { %v804_v41 = vmul.f32 %v793_v38, %v770_v13 }
 0x11c   : > { %v797_v39 = vmul.f32 0.5, %v796_v37 }
 0x11d   : > { %v810_v46 = vmul.f32 %v1576_v42, %v804_v41  ;;  %v1526_v41 = vld [vmem:[%s710_s21 + $0x8] sm:$0xff] }
 0x11e   : > { %v798_v40 = vsub.f32 1.5, %v797_v39  ;;  %982 = vmatpush.bf16.msra.mxu3 %v1526_v41 }
 0x11f   : > { %v816_v49 = vadd.f32 %v1577_v47, %v810_v46  ;;  %v1579_v46 = vld [vmem:[%s713_s30] ss:$0 sm:$0xff]  ;;  %s727_s30 = scalar_lea.vmem %s1968_s10, %s1995_s19 }
 0x120   : > { %v799_v43 = vmul.f32 %v1591_v34, %v798_v40 }
 0x122   : > { %v803_v44 = vsel %vm802_vm7, %v1591_v34, %v799_v43 }
 0x123   : > { %v805_v45 = vmul.f32 %v803_v44, %v771_v18 }
 0x125   : > { %v811_v48 = vmul.f32 %v1576_v42, %v805_v45  ;;  %v1525_v42 = vld [vmem:[%s710_s21] sm:$0xff]  ;;  %s724_s21 = scalar_lea.vmem %s1967_s9, %s1805_s24  ;;  %s1983_s24 = sshll.u32 %s1768_s27, 3 }
 0x126   : > { %983 = vmatpush.bf16.msra.mxu3 %v1525_v42  ;;  %s750_s28 = scalar_lea.vmem %s1973_s15, %s1983_s24 }
 0x127   : > { %v817_v50 = vadd.f32 %v1577_v47, %v811_v48 }
 0x129   : > { %v818_v51 = vpack.c.bf16 %v817_v50, %v816_v49 }
 0x12b   : > { %1479 = vmatmul.msk.bf16.vlgmr.msra.gmra.mxu0 %vm754_vm0, %v818_v51 }
 0x1a8   : > { %v851_v52 = vpop.f32.mrf.mxu0 }
 0x1a9   : > { %v852_v55 = vadd.f32 %v1578_v53, %v851_v52 }
 0x1b0   : > { %v853_v54 = vpop.f32.mrf.mxu0 }
 0x1b1   : > { %v854_v56 = vadd.f32 %v1578_v53, %v853_v54 }
 0x1b3   : > { %v856_v57 = vpack.c.bf16 %v854_v56, %v852_v55 }
 0x1b5   : > { %858 = vrot.lane.b32.xlu2 %v856_v57, %s1653_s25  ;;  %s738_s25 = scalar_lea.vmem %s1971_s13, %s1995_s19 }
 0x20f   : > { %v859_v58 = vpop.permute.xlu2 %858 }
 0x210   : > { %v864_v59 = vsel %vm754_vm0, %v859_v58, 0 }
 0x211   : > { %873 = vmatpush.bf16.xpose.msra.mxu1 %v864_v59 }
 0x218   : > { %1480 = vmatmul.msk.bf16.vlgmr.msra.gmra.mxu1 %vm754_vm0, %v856_v57 }
 0x295   : > { %v875_v60 = vpop.f32.mrf.mxu1 }
 0x296   : > { %v880_v61 = vmul.f32 0.17677669, %v875_v60 }
 0x298   : > { %v883_v62 = vsel %vm882_vm8, %v880_v61, -inf }
 0x299   : > { %884 = vmax.xlane.f32.xlu2 %v883_v62 }
 0x29d   : > { %v877_v63 = vpop.f32.mrf.mxu1 }
 0x29e   : > { %v881_v1 = vmul.f32 0.17677669, %v877_v63  ;;  %v1528_v63 = vld [vmem:[%s724_s21 + $0x8] sm:$0xff] }
 0x2a0   : > { %v886_v3 = vsel %vm882_vm8, %v881_v1, -inf }
 0x2a1   : > { %887 = vmax.xlane.f32.xlu0 %v886_v3  ;;  %v1527_v3 = vld [vmem:[%s724_s21] sm:$0xff]  ;;  %s732_s21 = scalar_lea.vmem %s1969_s11, %s1522_s29 }
 0x30c   : > { %v885_v4 = vpop.xlane.xlu2 %884 }
 0x30d   : > { %v889_v5 = vsub.f32 %v880_v61, %v885_v4 }
 0x30f   : > { %v891_v6 = vmul.f32 1.442695, %v889_v5 }
 0x311   : > { %1592 = vpow2.f32 %v891_v6 }
 0x314   : > { %v888_v7 = vpop.xlane.xlu0 %887 }
 0x315   : > { %v890_v8 = vsub.f32 %v881_v1, %v888_v7 }
 0x317   : > { %v1593_v9 = vpop.eup %1592  ;;  %v893_v11 = vmul.f32 1.442695, %v890_v8 }
 0x318   : > { %v895_v12 = vsel %vm882_vm8, %v1593_v9, 0.0 }
 0x319   : > { %1594 = vpow2.f32 %v893_v11  ;;  %896 = vadd.xlane.f32.xlu1 %v895_v12 }
 0x31f   : > { %v1595_v13 = vpop.eup %1594 }
 0x320   : > { %v898_v14 = vsel %vm882_vm8, %v1595_v13, 0.0 }
 0x321   : > { %899 = vadd.xlane.f32.xlu0 %v898_v14 }
 0x332   : > { %932 = vrot.lane.b32.xlu1 %v856_v57, %s1654_s0  ;;  %s719_s0 = scalar_lea.vmem %s1966_s8, %s1995_s19 }
 0x38c   : > { %v897_v15 = vpop.xlane.xlu1 %896 }
 0x38d   : > { %1596 = vrcp.f32 %v897_v15  ;;  %v912_v24 = vand.u32 2147483648, %v897_v15  ;;  %vm906_vm10 = vweird.f32 %v897_v15  ;;  %v910_v25 = vand.u32 2147483647, %v897_v15 }
 0x38f   : > { %v913_v31 = vor.u32 1.1754944e-38, %v912_v24  ;;  %vm911_vm13 = vcmp.eq.f32.partialorder %v910_v25, 8.507059e+37 }
 0x393   : > { %v1597_v16 = vpop.eup %1596 }
 0x394   : > { %v902_v17 = vmul.f32 %v1597_v16, %v897_v15  ;;  %v900_v18 = vpop.xlane.xlu0 %899  ;;  %vm907_vm9 = vweird.f32 %v1597_v16 }
 0x395   : > { %1598 = vrcp.f32 %v900_v18  ;;  %vm908_vm11 = vmor %vm906_vm10, %vm907_vm9  ;;  %v927_v27 = vand.u32 2147483648, %v900_v18  ;;  %v925_v29 = vand.u32 2147483647, %v900_v18  ;;  %vm921_vm14 = vweird.f32 %v900_v18 }
 0x396   : > { %v903_v19 = vsub.f32 1.0, %v902_v17 }
 0x397   : > { %v928_v33 = vor.u32 1.1754944e-38, %v927_v27  ;;  %vm926_vm1 = vcmp.eq.f32.partialorder %v925_v29, 8.507059e+37 }
 0x398   : > { %v904_v20 = vmul.f32 %v1597_v16, %v903_v19 }
 0x39a   : > { %v905_v22 = vadd.f32 %v1597_v16, %v904_v20 }
 0x39b   : > { %v1599_v21 = vpop.eup %1598 }
 0x39c   : > { %v917_v23 = vmul.f32 %v1599_v21, %v900_v18  ;;  %vm922_vm12 = vweird.f32 %v1599_v21  ;;  %v909_v30 = vsel %vm908_vm11, %v1597_v16, %v905_v22 }
 0x39d   : > { %vm923_vm15 = vmor %vm921_vm14, %vm922_vm12  ;;  %v914_v34 = vsel %vm911_vm13, %v913_v31, %v909_v30 }
 0x39e   : > { %v918_v26 = vsub.f32 1.0, %v917_v23  ;;  %v915_v38 = vmul.f32 %v1593_v9, %v914_v34  ;;  %v1580_v23 = vld [vmem:[%s716_s17] ss:$0 sm:$0xff]  ;;  %v1531_v34 = vld [vmem:[%s732_s21 + $0x10] sm:$0xff] }
 0x3a0   : > { %v919_v28 = vmul.f32 %v1599_v21, %v918_v26 }
 0x3a2   : > { %v920_v32 = vadd.f32 %v1599_v21, %v919_v28  ;;  %v1581_v28 = vld [vmem:[%s719_s0] ss:$0 sm:$0xff] }
 0x3a4   : > { %v933_v35 = vpop.permute.xlu1 %932  ;;  %v924_v36 = vsel %vm923_vm15, %v1599_v21, %v920_v32 }
 0x3a5   : > { %945 = vmatpush.bf16.msra.mxu2 %v933_v35  ;;  %v929_v37 = vsel %vm926_vm1, %v928_v33, %v924_v36  ;;  %v1532_v33 = vld [vmem:[%s732_s21 + $0x18] sm:$0xff]  ;;  %v1530_v35 = vld [vmem:[%s732_s21 + $0x8] sm:$0xff]  ;;  %v1582_v36 = vld [vmem:[%s727_s30] ss:$0 sm:$0xff] }
 0x3a6   : > { %v930_v39 = vmul.f32 %v1595_v13, %v929_v37  ;;  %1149 = vmatpush.bf16.msrb.mxu0 %v1532_v33  ;;  %v1529_v37 = vld [vmem:[%s732_s21] sm:$0xff] }
 0x3a7   : > { %v1585_v33 = vld [vmem:[%s741_s16] ss:$0 sm:$0xff] }
 0x3a8   : > { %v931_v40 = vpack.c.bf16 %v930_v39, %v915_v38 }
 0x3a9   : > { %1078 = vmatpush.bf16.msrb.mxu2 %v1528_v63 }
 0x3aa   : > { %1481 = vmatmul.msk.bf16.vlgmr.msra.gmra.mxu2 %vm882_vm8, %v931_v40  ;;  %1150 = vmatpush.bf16.msrb.mxu0 %v1531_v34  ;;  %vm1141_vm8 = vcmask 523264  }
 0x3ad   : > { %1079 = vmatpush.bf16.msrb.mxu2 %v1527_v3 }
 0x3ae   : > { %1151 = vmatpush.bf16.msrb.mxu0 %v1530_v35 }
 0x3b2   : > { %1152 = vmatpush.bf16.msrb.mxu0 %v1529_v37 }
 0x42d   : > { %v947_v43 = vpop.f32.mrf.mxu2 }
 0x435   : > { %v949_v44 = vpop.f32.mrf.mxu2 }
 0x436   : > { %v952_v45 = vpack.c.bf16 %v949_v44, %v947_v43 }
 0x438   : > { %1490 = vmatmul.msk.bf16.vlgmr.msra.gmra.mxu3 %vm754_vm0, %v952_v45 }
 0x4bb   : > { %v985_v47 = vpop.f32.mrf.mxu3 }
 0x4bc   : > { %v986_v48 = vadd.f32 %v1579_v46, %v985_v47 }
 0x4be   : > { %v1846_v49 = vadd.f32 %v986_v48, %v1776_v0 }
 0x4c0   : > { %v992_v50 = vsel %vm754_vm0, %v1846_v49, 0.0 }
 0x4c1   : > { %993 = vadd.xlane.f32.xlu0 %v992_v50 }
 0x4c3   : > { %v987_v51 = vpop.f32.mrf.mxu3 }
 0x4c4   : > { %v988_v52 = vadd.f32 %v1579_v46, %v987_v51 }
 0x4c6   : > { %v1851_v53 = vadd.f32 %v988_v52, %v1780_v2 }
 0x4c8   : > { %v995_v54 = vsel %vm754_vm0, %v1851_v53, 0.0 }
 0x4c9   : > { %996 = vadd.xlane.f32.xlu0 %v995_v54 }
 0x534   : > { %v994_v55 = vpop.xlane.xlu0 %993 }
 0x535   : > { %v998_v0 = vmul.f32 %v994_v55, %v1784_v10 }
 0x537   : > { %v1000_v56 = vsub.f32 %v1846_v49, %v998_v0 }
 0x539   : > { %v1002_v57 = vmul.f32 %v1000_v56, %v1000_v56 }
 0x53b   : > { %v1004_v58 = vsel %vm754_vm0, %v1002_v57, 0.0 }
 0x53c   : > { %1005 = vadd.xlane.f32.xlu0 %v1004_v58  ;;  %v997_v59 = vpop.xlane.xlu0 %996 }
 0x53d   : > { %v999_v2 = vmul.f32 %v997_v59, %v1784_v10 }
 0x53f   : > { %v1001_v60 = vsub.f32 %v1851_v53, %v999_v2 }
 0x541   : > { %v1003_v61 = vmul.f32 %v1001_v60, %v1001_v60 }
 0x543   : > { %v1007_v62 = vsel %vm754_vm0, %v1003_v61, 0.0  ;;  %v1583_v61 = vld [vmem:[%s735_s26] ss:$0 sm:$0xff] }
 0x544   : > { %1008 = vadd.xlane.f32.xlu1 %v1007_v62 }
 0x5af   : > { %v1006_v1 = vpop.xlane.xlu0 %1005 }
 0x5b0   : > { %v1010_v4 = vmul.f32 %v1006_v1, %v1784_v10 }
 0x5b2   : > { %v1012_v5 = vadd.f32 1e-05, %v1010_v4 }
 0x5b4   : > { %1600 = vrsqrt.f32 %v1012_v5  ;;  %vm1020_vm3 = vweird.f32 %v1012_v5 }
 0x5b7   : > { %v1009_v6 = vpop.xlane.xlu1 %1008 }
 0x5b8   : > { %v1011_v7 = vmul.f32 %v1009_v6, %v1784_v10 }
 0x5ba   : > { %v1601_v8 = vpop.eup %1600  ;;  %v1013_v9 = vadd.f32 1e-05, %v1011_v7 }
 0x5bb   : > { %v1015_v11 = vmul.f32 %v1601_v8, %v1012_v5  ;;  %vm1021_vm2 = vweird.f32 %v1601_v8 }
 0x5bc   : > { %1602 = vrsqrt.f32 %v1013_v9  ;;  %vm1022_vm4 = vmor %vm1020_vm3, %vm1021_vm2  ;;  %vm1030_vm6 = vweird.f32 %v1013_v9 }
 0x5bd   : > { %v1016_v12 = vmul.f32 %v1601_v8, %v1015_v11 }
 0x5bf   : > { %v1017_v13 = vmul.f32 0.5, %v1016_v12 }
 0x5c1   : > { %v1018_v14 = vsub.f32 1.5, %v1017_v13 }
 0x5c2   : > { %v1603_v15 = vpop.eup %1602 }
 0x5c3   : > { %v1019_v16 = vmul.f32 %v1601_v8, %v1018_v14  ;;  %v1025_v17 = vmul.f32 %v1603_v15, %v1013_v9  ;;  %vm1031_vm5 = vweird.f32 %v1603_v15 }
 0x5c4   : > { %vm1032_vm7 = vmor %vm1030_vm6, %vm1031_vm5 }
 0x5c5   : > { %v1026_v18 = vmul.f32 %v1603_v15, %v1025_v17  ;;  %v1023_v19 = vsel %vm1022_vm4, %v1601_v8, %v1019_v16 }
 0x5c6   : > { %v1034_v22 = vmul.f32 %v1023_v19, %v1000_v56 }
 0x5c7   : > { %v1027_v20 = vmul.f32 0.5, %v1026_v18 }
 0x5c8   : > { %v1040_v27 = vmul.f32 %v1580_v23, %v1034_v22 }
 0x5c9   : > { %v1028_v21 = vsub.f32 1.5, %v1027_v20 }
 0x5ca   : > { %v1046_v30 = vadd.f32 %v1581_v28, %v1040_v27 }
 0x5cb   : > { %v1029_v24 = vmul.f32 %v1603_v15, %v1028_v21 }
 0x5cd   : > { %v1033_v25 = vsel %vm1032_vm7, %v1603_v15, %v1029_v24 }
 0x5ce   : > { %v1035_v26 = vmul.f32 %v1033_v25, %v1001_v60 }
 0x5d0   : > { %v1041_v29 = vmul.f32 %v1580_v23, %v1035_v26 }
 0x5d2   : > { %v1047_v31 = vadd.f32 %v1581_v28, %v1041_v29 }
 0x5d4   : > { %v1048_v32 = vpack.c.bf16 %v1047_v31, %v1046_v30  ;;  %v1584_v31 = vld [vmem:[%s738_s25] ss:$0 sm:$0xff] }
 0x5d6   : > { %1499 = vmatmul.msk.bf16.vlgmr.msrb.gmra.mxu2 %vm754_vm0, %v1048_v32 }
 0x659   : > { %v1081_v38 = vpop.f32.mrf.mxu2 }
 0x65a   : > { %v1082_v39 = vadd.f32 %v1582_v36, %v1081_v38 }
 0x65c   : > { %v1086_v40 = vmul.f32 %v1082_v39, %v1082_v39 }
 0x65e   : > { %v1088_v41 = vmul.f32 %v1086_v40, %v1082_v39 }
 0x660   : > { %v1090_v42 = vmul.f32 0.044715, %v1088_v41 }
 0x661   : > { %v1083_v43 = vpop.f32.mrf.mxu2 }
 0x662   : > { %v1092_v44 = vadd.f32 %v1090_v42, %v1082_v39  ;;  %v1084_v45 = vadd.f32 %v1582_v36, %v1083_v43 }
 0x664   : > { %v1094_v46 = vmul.f32 0.7978846, %v1092_v44  ;;  %v1087_v47 = vmul.f32 %v1084_v45, %v1084_v45 }
 0x666   : > { %v1089_v48 = vmul.f32 %v1087_v47, %v1084_v45  ;;  %1604 = vtanh.f32 %v1094_v46 }
 0x668   : > { %v1091_v50 = vmul.f32 0.044715, %v1089_v48 }
 0x66a   : > { %v1093_v51 = vadd.f32 %v1091_v50, %v1084_v45 }
 0x66c   : > { %v1095_v52 = vmul.f32 0.7978846, %v1093_v51  ;;  %v1605_v54 = vpop.eup %1604 }
 0x66d   : > { %v1098_v55 = vadd.f32 1.0, %v1605_v54 }
 0x66e   : > { %1606 = vtanh.f32 %v1095_v52 }
 0x66f   : > { %v1100_v56 = vmul.f32 0.5, %v1098_v55 }
 0x671   : > { %v1102_v59 = vmul.f32 %v1100_v56, %v1082_v39 }
 0x674   : > { %v1607_v0 = vpop.eup %1606 }
 0x675   : > { %v1099_v57 = vadd.f32 1.0, %v1607_v0 }
 0x677   : > { %v1101_v58 = vmul.f32 0.5, %v1099_v57 }
 0x679   : > { %v1103_v2 = vmul.f32 %v1101_v58, %v1084_v45 }
 0x67b   : > { %v1104_v60 = vpack.c.bf16 %v1103_v2, %v1102_v59 }
 0x67d   : > { %1516 = vmatmul.msk.bf16.vlgmr.msrb.gmra.mxu0 %vm1141_vm8, %v1104_v60 }
 0x6fa   : > { %v1154_v62 = vpop.f32.mrf.mxu0 }
 0x6fb   : > { %v1155_v63 = vadd.f32 %v1583_v61, %v1154_v62 }
 0x6fd   : > { %v1159_v1 = vadd.f32 %v1155_v63, %v1846_v49 }
 0x6ff   : > { %v1161_v3 = vsel %vm754_vm0, %v1159_v1, 0.0 }
 0x700   : > { %1162 = vadd.xlane.f32.xlu2 %v1161_v3 }
 0x702   : > { %v1156_v4 = vpop.f32.mrf.mxu0 }
 0x703   : > { %v1157_v5 = vadd.f32 %v1583_v61, %v1156_v4 }
 0x705   : > { %v1160_v6 = vadd.f32 %v1157_v5, %v1851_v53 }
 0x707   : > { %v1164_v7 = vsel %vm754_vm0, %v1160_v6, 0.0 }
 0x708   : > { %1165 = vadd.xlane.f32.xlu0 %v1164_v7 }
 0x773   : > { %v1163_v8 = vpop.xlane.xlu2 %1162 }
 0x774   : > { %v1167_v49 = vmul.f32 %v1163_v8, %v1784_v10 }
 0x776   : > { %v1169_v9 = vsub.f32 %v1159_v1, %v1167_v49 }
 0x778   : > { %v1171_v11 = vmul.f32 %v1169_v9, %v1169_v9 }
 0x77a   : > { %v1173_v12 = vsel %vm754_vm0, %v1171_v11, 0.0 }
 0x77b   : > { %v1166_v13 = vpop.xlane.xlu0 %1165  ;;  %1174 = vadd.xlane.f32.xlu2 %v1173_v12 }
 0x77c   : > { %v1168_v14 = vmul.f32 %v1166_v13, %v1784_v10 }
 0x77e   : > { %v1170_v15 = vsub.f32 %v1160_v6, %v1168_v14 }
 0x780   : > { %v1172_v16 = vmul.f32 %v1170_v15, %v1170_v15 }
 0x782   : > { %v1176_v17 = vsel %vm754_vm0, %v1172_v16, 0.0 }
 0x783   : > { %1177 = vadd.xlane.f32.xlu0 %v1176_v17 }
 0x7ee   : > { %v1175_v53 = vpop.xlane.xlu2 %1174 }
 0x7ef   : > { %v1179_v18 = vmul.f32 %v1175_v53, %v1784_v10 }
 0x7f1   : > { %v1181_v19 = vadd.f32 1e-05, %v1179_v18 }
 0x7f3   : > { %1608 = vrsqrt.f32 %v1181_v19  ;;  %vm1189_vm10 = vweird.f32 %v1181_v19 }
 0x7f6   : > { %v1178_v20 = vpop.xlane.xlu0 %1177 }
 0x7f7   : > { %v1180_v21 = vmul.f32 %v1178_v20, %v1784_v10 }
 0x7f9   : > { %v1609_v22 = vpop.eup %1608  ;;  %v1182_v23 = vadd.f32 1e-05, %v1180_v21 }
 0x7fa   : > { %v1184_v24 = vmul.f32 %v1609_v22, %v1181_v19  ;;  %vm1190_vm9 = vweird.f32 %v1609_v22 }
 0x7fb   : > { %1610 = vrsqrt.f32 %v1182_v23  ;;  %vm1191_vm11 = vmor %vm1189_vm10, %vm1190_vm9  ;;  %vm1199_vm13 = vweird.f32 %v1182_v23 }
 0x7fc   : > { %v1185_v25 = vmul.f32 %v1609_v22, %v1184_v24 }
 0x7fe   : > { %v1186_v26 = vmul.f32 0.5, %v1185_v25 }
 0x800   : > { %v1187_v27 = vsub.f32 1.5, %v1186_v26 }
 0x801   : > { %v1611_v28 = vpop.eup %1610 }
 0x802   : > { %v1188_v29 = vmul.f32 %v1609_v22, %v1187_v27  ;;  %v1194_v30 = vmul.f32 %v1611_v28, %v1182_v23  ;;  %vm1200_vm12 = vweird.f32 %v1611_v28 }
 0x803   : > { %vm1201_vm14 = vmor %vm1199_vm13, %vm1200_vm12 }
 0x804   : > { %v1192_v10 = vsel %vm1191_vm11, %v1609_v22, %v1188_v29  ;;  %v1195_v32 = vmul.f32 %v1611_v28, %v1194_v30 }
 0x805   : > { %v1203_v34 = vmul.f32 %v1192_v10, %v1169_v9 }
 0x806   : > { %v1196_v35 = vmul.f32 0.5, %v1195_v32 }
 0x807   : > { %v1209_v36 = vmul.f32 %v1584_v31, %v1203_v34 }
 0x808   : > { %v1197_v37 = vsub.f32 1.5, %v1196_v35 }
 0x809   : > { %v1215_v38 = vadd.f32 %v1585_v33, %v1209_v36 }
 0x80a   : > { %v1198_v39 = vmul.f32 %v1611_v28, %v1197_v37 }
 0x80b   : > { %1217 = vst.msk [vmem:[%s750_s28] sm:$0xff] %vm754_vm0, %v1215_v38 }
 0x80c   : > { %v1202_v40 = vsel %vm1201_vm14, %v1611_v28, %v1198_v39 }
 0x80d   : > { %v1204_v41 = vmul.f32 %v1202_v40, %v1170_v15 }
 0x80f   : > { %v1210_v42 = vmul.f32 %v1584_v31, %v1204_v41 }
 0x811   : > { %v1216_v43 = vadd.f32 %v1585_v33, %v1210_v42 }
 0x813   : > { %1218 = vst.msk [vmem:[%s750_s28 + $0x8] sm:$0xff] %vm754_vm0, %v1216_v43 }
 0x814 PF: > { %s25_s22 = sadd.s32 1, %s1650_s22   ;;  %s1984_s18 = sld [smem:[#allocation2_spill]] }
 0x815   : > { %p22_p7 = scmp.ge.s32.totalorder %s25_s22, 6   ;;  %s1985_s19 = sld [smem:[#allocation3_spill]] }
 0x816   : > { %s1986_s20 = sld [smem:[#allocation4_spill]] }
 0x817   : > { %s1987_s21 = sld [smem:[#allocation5_spill]]  ;;  %24 = sbr.rel (!%p22_p7) target bundleno = 3 (0x3), region = 152 }

// kernel: _lambda_.22
= control target key start
LH: loop header
LB: loop body
LE: loop exit
PB: predicated region body
PF: predicated region fallthrough
CT: control target
= control target key end

     0   :  { %vm64_vm0 = vcmask 261120   ;;  %s431_s3 = inlined_call_operand.vmem [shape: bf16[32,32], index: 3, kind: input, shape index: {}]   ;;  %s432_s2 = inlined_call_operand.vmem [shape: bf16[32,32], index: 2, kind: input, shape index: {}]   ;;  %s433_s5 = inlined_call_operand.vmem [shape: bf16[32,32], index: 5, kind: input, shape index: {}]   ;;  %s434_s4 = inlined_call_operand.vmem [shape: bf16[32,32], index: 4, kind: input, shape index: {}]   ;;  %s435_s1 = inlined_call_operand.vmem [shape: f32[32,32], index: 1, kind: input, shape index: {}]   ;;  %s436_s0 = inlined_call_operand.vmem [shape: f32[32,32], index: 0, kind: input, shape index: {}]   ;;  %s437_s6 = inlined_call_operand.vmem [shape: f32[1,32], index: 6, kind: input, shape index: {}]   ;;  %s438_s7 = inlined_call_operand.vmem [shape: f32[1,32], index: 7, kind: input, shape index: {}]   ;;  %s439_s8 = inlined_call_operand.vmem [shape: f32[32,32], index: 8, kind: output, shape index: {0}]   ;;  %s440_s9 = inlined_call_operand.vmem [shape: f32[32,32], index: 9, kind: output, shape index: {1}]  }
   0x1   :  { %v280_v0 = vld [vmem:[%s431_s3 + $0x8] sm:$0xff]  ;;  %v279_v4 = vld [vmem:[%s431_s3] sm:$0xff]  ;;  %v40_v14 = vld [vmem:[%s435_s1 + $0x10] sm:$0xff] }
   0x2   :  { %v278_v1 = vld [vmem:[%s432_s2 + $0x8] sm:$0xff]  ;;  %v277_v5 = vld [vmem:[%s432_s2] sm:$0xff]  ;;  %77 = vmatpush.bf16.msra.mxu0 %v280_v0  ;;  %v41_v15 = vld [vmem:[%s435_s1 + $0x18] sm:$0xff] }
   0x3   :  { %v284_v2 = vld [vmem:[%s433_s5 + $0x8] sm:$0xff]  ;;  %114 = vmatpush.bf16.msra.mxu1 %v278_v1  ;;  %v283_v6 = vld [vmem:[%s433_s5] sm:$0xff]  ;;  %v34_v16 = vld [vmem:[%s436_s0 + $0x10] sm:$0xff]  ;;  %v43_v18 = vpack.c.bf16 %v41_v15, %v40_v14 }
   0x4   :  { %v282_v3 = vld [vmem:[%s434_s4 + $0x8] sm:$0xff]  ;;  %v281_v7 = vld [vmem:[%s434_s4] sm:$0xff]  ;;  %161 = vmatpush.bf16.msra.mxu2 %v284_v2  ;;  %v35_v17 = vld [vmem:[%s436_s0 + $0x18] sm:$0xff] }
   0x5   :  { %v38_v8 = vld [vmem:[%s435_s1] sm:$0xff]  ;;  %192 = vmatpush.bf16.msra.mxu3 %v282_v3  ;;  %v39_v9 = vld [vmem:[%s435_s1 + $0x8] sm:$0xff]  ;;  %v37_v19 = vpack.c.bf16 %v35_v17, %v34_v16 }
   0x6   :  { %v32_v10 = vld [vmem:[%s436_s0] sm:$0xff]  ;;  %v33_v11 = vld [vmem:[%s436_s0 + $0x8] sm:$0xff]  ;;  %v42_v12 = vpack.c.bf16 %v39_v9, %v38_v8  ;;  %78 = vmatpush.bf16.msra.mxu0 %v279_v4 }
   0x7   :  { %v36_v13 = vpack.c.bf16 %v33_v11, %v32_v10  ;;  %115 = vmatpush.bf16.msra.mxu1 %v277_v5  ;;  %v285_v20 = vld [vmem:[%s437_s6] ss:$0 sm:$0xff] }
   0x8   :  { %162 = vmatpush.bf16.msra.mxu2 %v283_v6  ;;  %v286_v26 = vld [vmem:[%s438_s7] ss:$0 sm:$0xff] }
   0x9   :  { %193 = vmatpush.bf16.msra.mxu3 %v281_v7  ;;  %245 = vmatmul.msk.bf16.vlgmr.msra.gmra.mxu0 %vm64_vm0, %v42_v12 }
   0xa   :  { %255 = vmatmul.msk.bf16.vlgmr.msra.gmra.mxu1 %vm64_vm0, %v36_v13 }
   0xb   :  { %265 = vmatmul.msk.bf16.vlgmr.msra.gmra.mxu2 %vm64_vm0, %v42_v12 }
   0xc   :  { %275 = vmatmul.msk.bf16.vlgmr.msra.gmra.mxu3 %vm64_vm0, %v36_v13 }
  0x19   :  { %246 = vmatmul.msk.bf16.gmra.mxu0 %vm64_vm0, %v43_v18 }
  0x1a   :  { %256 = vmatmul.msk.bf16.gmra.mxu1 %vm64_vm0, %v37_v19 }
  0x1b   :  { %266 = vmatmul.msk.bf16.gmra.mxu2 %vm64_vm0, %v43_v18 }
  0x1c   :  { %276 = vmatmul.msk.bf16.gmra.mxu3 %vm64_vm0, %v37_v19 }
  0x86   :  { %v80_v21 = vpop.f32.mrf.mxu0 }
  0x87   :  { %v117_v22 = vpop.f32.mrf.mxu1 }
  0x88   :  { %v118_v23 = vadd.f32 %v117_v22, %v80_v21 }
  0x8a   :  { %v131_v24 = vadd.f32 %v285_v20, %v118_v23 }
  0x8c   :  { %v213_v25 = vmax.f32 %v131_v24, 0.0 }
  0x8e   :  { %217 = vst.msk [vmem:[%s439_s8] sm:$0xff] %vm64_vm0, %v213_v25  ;;  %v164_v27 = vpop.f32.mrf.mxu2  ;;  %v82_v30 = vpop.f32.mrf.mxu0 }
  0x8f   :  { %v195_v28 = vpop.f32.mrf.mxu3  ;;  %v119_v31 = vpop.f32.mrf.mxu1 }
  0x90   :  { %v196_v29 = vadd.f32 %v195_v28, %v164_v27  ;;  %v120_v32 = vadd.f32 %v119_v31, %v82_v30 }
  0x92   :  { %v209_v33 = vadd.f32 %v286_v26, %v196_v29  ;;  %v132_v34 = vadd.f32 %v285_v20, %v120_v32 }
  0x94   :  { %v221_v35 = vmax.f32 %v209_v33, 0.0  ;;  %v214_v36 = vmax.f32 %v132_v34, 0.0 }
  0x96   :  { %225 = vst.msk [vmem:[%s440_s9] sm:$0xff] %vm64_vm0, %v221_v35  ;;  %v166_v37 = vpop.f32.mrf.mxu2  ;;  %v85_v40 = vpop.f32.mrf.mxu0 }
  0x97   :  { %218 = vst.msk [vmem:[%s439_s8 + $0x8] sm:$0xff] %vm64_vm0, %v214_v36  ;;  %v197_v38 = vpop.f32.mrf.mxu3  ;;  %v122_v41 = vpop.f32.mrf.mxu1 }
  0x98   :  { %v198_v39 = vadd.f32 %v197_v38, %v166_v37  ;;  %v123_v42 = vadd.f32 %v122_v41, %v85_v40 }
  0x9a   :  { %v210_v43 = vadd.f32 %v286_v26, %v198_v39  ;;  %v133_v44 = vadd.f32 %v285_v20, %v123_v42 }
  0x9c   :  { %v222_v45 = vmax.f32 %v210_v43, 0.0  ;;  %v215_v46 = vmax.f32 %v133_v44, 0.0 }
  0x9e   :  { %226 = vst.msk [vmem:[%s440_s9 + $0x8] sm:$0xff] %vm64_vm0, %v222_v45  ;;  %v169_v47 = vpop.f32.mrf.mxu2  ;;  %v87_v50 = vpop.f32.mrf.mxu0 }
  0x9f   :  { %219 = vst.msk [vmem:[%s439_s8 + $0x10] sm:$0xff] %vm64_vm0, %v215_v46  ;;  %v200_v48 = vpop.f32.mrf.mxu3  ;;  %v124_v51 = vpop.f32.mrf.mxu1 }
  0xa0   :  { %v201_v49 = vadd.f32 %v200_v48, %v169_v47  ;;  %v125_v52 = vadd.f32 %v124_v51, %v87_v50 }
  0xa2   :  { %v211_v53 = vadd.f32 %v286_v26, %v201_v49  ;;  %v134_v54 = vadd.f32 %v285_v20, %v125_v52 }
  0xa4   :  { %v223_v55 = vmax.f32 %v211_v53, 0.0  ;;  %v216_v56 = vmax.f32 %v134_v54, 0.0 }
  0xa6   :  { %227 = vst.msk [vmem:[%s440_s9 + $0x10] sm:$0xff] %vm64_vm0, %v223_v55  ;;  %v171_v57 = vpop.f32.mrf.mxu2 }
  0xa7   :  { %220 = vst.msk [vmem:[%s439_s8 + $0x18] sm:$0xff] %vm64_vm0, %v216_v56  ;;  %v202_v58 = vpop.f32.mrf.mxu3 }
  0xa8   :  { %v203_v59 = vadd.f32 %v202_v58, %v171_v57 }
  0xaa   :  { %v212_v60 = vadd.f32 %v286_v26, %v203_v59 }
  0xac   :  { %v224_v61 = vmax.f32 %v212_v60, 0.0 }
  0xae   :  { %228 = vst.msk [vmem:[%s440_s9 + $0x18] sm:$0xff] %vm64_vm0, %v224_v61 }

// kernel: _lambda_.23
= control target key start
LH: loop header
LB: loop body
LE: loop exit
PB: predicated region body
PF: predicated region fallthrough
CT: control target
= control target key end

     0   :  { %s689_s18 = smov 0   ;;  %s691_s19 = smov 0   ;;  %s758_s0 = inlined_call_operand.vmem [shape: f32[2,8,128], index: 0, kind: input, shape index: {}]   ;;  %s759_s1 = inlined_call_operand.vmem [shape: bf16[2,128,64], index: 1, kind: input, shape index: {}]   ;;  %s760_s2 = inlined_call_operand.vmem [shape: f32[2,1,64], index: 2, kind: input, shape index: {}]   ;;  %s761_s3 = inlined_call_operand.vmem [shape: f32[2,1,64], index: 3, kind: input, shape index: {}]   ;;  %s762_s4 = inlined_call_operand.vmem [shape: f32[2,1,64], index: 4, kind: input, shape index: {}]   ;;  %s763_s5 = inlined_call_operand.vmem [shape: f32[2,8,64], index: 5, kind: output, shape index: {}]  }
   0x1   :  { %s693_s20 = smov 0  }
   0x2 LB: > { %s27_s21 = sadd.s32 1, %s652_s19  ;;  %p554_p0 = scmp.ge.s32.totalorder %s656_s20, 1  ;;  %s656_s20 = sphi %s693_s20, %s15_s20   ;;  %s652_s19 = sphi %s691_s19, %s765_s19   ;;  %s648_s18 = sphi %s689_s18, %s764_s18  }
   0x3   : > { %p29_p1 = scmp.ge.s32.totalorder %s27_s21, 2  ;;  %p239_p2 = scmp.lt.s32.totalorder %s656_s20, 3 }
   0x5   : > { %s767_s21 = smov (%p29_p1, %s27_s21), 0  ;;  %p240_p3 = pnand %p554_p0, %p239_p2 }
   0x6   : > { %p285_p4 = scmp.lt.s32.totalorder (!%p240_p3), %s648_s18, 1 }
   0x7   : > { %243 = sbr.rel (%p240_p3) target bundleno = 444 (0x1bc), region = 40 }
   0xc   : > { %s769_s18 = smov (!%p285_p4, %s648_s18), 1  ;;  %vm396_vm0 = vcmask 523264   ;;  %v658_v15 = vmov 64.0  }
   0xd   : > { %s593_s22 = sshll.u32 %s769_s18, 6  ;;  %s299_s28 = scalar_lea.vmem %s760_s2, %s769_s18  ;;  %630 = vrcp.f32 %v658_v15 }
   0xe   : > { %s296_s25 = scalar_lea.vmem %s759_s1, %s593_s22  ;;  %s555_s29 = sshll.u32 %s769_s18, 3  ;;  %v627_v10 = vld [vmem:[%s299_s28] ss:$0 sm:$0xff] }
   0xf   : > { %v601_v0 = vld [vmem:[%s296_s25 + $0x38] sm:$0xff]  ;;  %v600_v1 = vld [vmem:[%s296_s25 + $0x30] sm:$0xff]  ;;  %v599_v2 = vld [vmem:[%s296_s25 + $0x28] sm:$0xff]  ;;  %s291_s7 = scalar_lea.vmem %s758_s0, %s555_s29  ;;  %s302_s10 = scalar_lea.vmem %s761_s3, %s769_s18 }
  0x10   : > { %383 = vmatpush.bf16.msra.mxu0 %v601_v0  ;;  %v598_v3 = vld [vmem:[%s296_s25 + $0x20] sm:$0xff]  ;;  %v597_v4 = vld [vmem:[%s296_s25 + $0x18] sm:$0xff]  ;;  %v596_v5 = vld [vmem:[%s296_s25 + $0x10] sm:$0xff]  ;;  %s305_s13 = scalar_lea.vmem %s762_s4, %s769_s18  ;;  %s312_s24 = scalar_lea.vmem %s763_s5, %s555_s29 }
  0x11   : > { %v595_v6 = vld [vmem:[%s296_s25 + $0x8] sm:$0xff]  ;;  %v594_v7 = vld [vmem:[%s296_s25] sm:$0xff] }
  0x12   : > { %v313_v8 = vld [vmem:[%s291_s7] sm:$0xff] }
  0x13   : > { %v314_v9 = vpack.c.bf16 %v313_v8, %v313_v8  ;;  %v631_v16 = vpop.eup %630  ;;  %v628_v36 = vld [vmem:[%s302_s10] ss:$0 sm:$0xff] }
  0x14   : > { %384 = vmatpush.bf16.msra.mxu0 %v600_v1  ;;  %v401_v17 = vmul.f32 64.0, %v631_v16  ;;  %vm405_vm1 = vweird.f32 %v631_v16  ;;  %v629_v38 = vld [vmem:[%s305_s13] ss:$0 sm:$0xff] }
  0x16   : > { %v402_v18 = vsub.f32 1.0, %v401_v17 }
  0x18   : > { %385 = vmatpush.bf16.msra.mxu0 %v599_v2  ;;  %v403_v19 = vmul.f32 %v631_v16, %v402_v18 }
  0x1a   : > { %v404_v20 = vadd.f32 %v631_v16, %v403_v19 }
  0x1c   : > { %386 = vmatpush.bf16.msra.mxu0 %v598_v3  ;;  %v406_v21 = vsel %vm405_vm1, %v631_v16, %v404_v20 }
  0x20   : > { %387 = vmatpush.bf16.msra.mxu0 %v597_v4 }
  0x24   : > { %388 = vmatpush.bf16.msra.mxu0 %v596_v5 }
  0x28   : > { %389 = vmatpush.bf16.msra.mxu0 %v595_v6 }
  0x2c   : > { %390 = vmatpush.bf16.msra.mxu0 %v594_v7 }
  0x2f   : > { %391 = vmatmul.bf16.vlgmr.msra.gmra.mxu0 %v314_v9 }
  0xac   : > { %v392_v11 = vpop.f32.mrf.mxu0 }
  0xad   : > { %v393_v12 = vadd.f32 %v627_v10, %v392_v11 }
  0xaf   : > { %v397_v13 = vsel %vm396_vm0, %v393_v12, 0.0 }
  0xb0   : > { %398 = vadd.xlane.f32.xlu0 %v397_v13 }
  0xb4   : > { %v394_v14 = vpop.f32.mrf.mxu0 }
 0x123   : > { %v399_v22 = vpop.xlane.xlu0 %398 }
 0x124   : > { %v407_v23 = vmul.f32 %v406_v21, %v399_v22 }
 0x126   : > { %v408_v24 = vsub.f32 %v393_v12, %v407_v23 }
 0x128   : > { %v409_v25 = vmul.f32 %v408_v24, %v408_v24 }
 0x12a   : > { %v410_v26 = vsel %vm396_vm0, %v409_v25, 0.0 }
 0x12b   : > { %411 = vadd.xlane.f32.xlu0 %v410_v26 }
 0x19e   : > { %v412_v27 = vpop.xlane.xlu0 %411 }
 0x19f   : > { %v413_v28 = vmul.f32 %v412_v27, %v406_v21 }
 0x1a1   : > { %v414_v29 = vadd.f32 1e-05, %v413_v28 }
 0x1a3   : > { %632 = vrsqrt.f32 %v414_v29  ;;  %vm421_vm3 = vweird.f32 %v414_v29 }
 0x1a9   : > { %v633_v30 = vpop.eup %632 }
 0x1aa   : > { %v416_v31 = vmul.f32 %v633_v30, %v414_v29  ;;  %vm422_vm2 = vweird.f32 %v633_v30 }
 0x1ab   : > { %vm423_vm4 = vmor %vm421_vm3, %vm422_vm2 }
 0x1ac   : > { %v417_v32 = vmul.f32 %v633_v30, %v416_v31 }
 0x1ae   : > { %v418_v33 = vmul.f32 0.5, %v417_v32 }
 0x1b0   : > { %v419_v34 = vsub.f32 1.5, %v418_v33 }
 0x1b2   : > { %v420_v35 = vmul.f32 %v633_v30, %v419_v34 }
 0x1b4   : > { %v424_v37 = vsel %vm423_vm4, %v633_v30, %v420_v35 }
 0x1b5   : > { %v425_v39 = vmul.f32 %v424_v37, %v408_v24 }
 0x1b7   : > { %v430_v40 = vmul.f32 %v628_v36, %v425_v39 }
 0x1b9   : > { %v435_v41 = vadd.f32 %v629_v38, %v430_v40 }
 0x1bb   : > { %436 = vst.msk [vmem:[%s312_s24] sm:$0xff] %vm396_vm0, %v435_v41 }
 0x1bc PF: > { %s15_s20 = sadd.s32 1, %s656_s20   ;;  %s764_s18 = smov %s652_s19 }
 0x1bd   : > { %p12_p5 = scmp.ge.s32.totalorder %s15_s20, 4   ;;  %s765_s19 = smov %s767_s21 }
 0x1bf   :  { %14 = sbr.rel (!%p12_p5) target bundleno = 2 (0x2), region = 82 }

// kernel: _lambda_.25
= control target key start
LH: loop header
LB: loop body
LE: loop exit
PB: predicated region body
PF: predicated region fallthrough
CT: control target
= control target key end

     0   :  { %vm68_vm0 = vcmask 523264   ;;  %s245_s3 = inlined_call_operand.vmem [shape: bf16[64,64], index: 3, kind: input, shape index: {}]   ;;  %s246_s2 = inlined_call_operand.vmem [shape: bf16[64,64], index: 2, kind: input, shape index: {}]   ;;  %s247_s1 = inlined_call_operand.vmem [shape: f32[2,8,64], index: 1, kind: input, shape index: {}, may-alias: {0,1}]   ;;  %s248_s0 = inlined_call_operand.vmem [shape: f32[2,8,64], index: 0, kind: input, shape index: {}, may-alias: {0,1}]   ;;  %s249_s4 = inlined_call_operand.vmem [shape: f32[1,64], index: 4, kind: input, shape index: {}]   ;;  %s250_s5 = inlined_call_operand.vmem [shape: f32[8,64], index: 5, kind: output, shape index: {}]  }
   0x1   :  { %v177_v0 = vld [vmem:[%s245_s3 + $0x18] sm:$0xff]  ;;  %v176_v2 = vld [vmem:[%s245_s3 + $0x10] sm:$0xff]  ;;  %v175_v4 = vld [vmem:[%s245_s3 + $0x8] sm:$0xff] }
   0x2   :  { %v173_v1 = vld [vmem:[%s246_s2 + $0x18] sm:$0xff]  ;;  %76 = vmatpush.bf16.msra.mxu0 %v177_v0  ;;  %v172_v3 = vld [vmem:[%s246_s2 + $0x10] sm:$0xff]  ;;  %v171_v5 = vld [vmem:[%s246_s2 + $0x8] sm:$0xff] }
   0x3   :  { %116 = vmatpush.bf16.msra.mxu1 %v173_v1  ;;  %v174_v6 = vld [vmem:[%s245_s3] sm:$0xff]  ;;  %v135_v8 = vld [vmem:[%s247_s1 + $0x8] sm:$0xff] }
   0x4   :  { %v170_v7 = vld [vmem:[%s246_s2] sm:$0xff]  ;;  %v35_v10 = vpack.c.bf16 %v135_v8, %v135_v8 }
   0x5   :  { %v24_v9 = vld [vmem:[%s248_s0] sm:$0xff] }
   0x6   :  { %77 = vmatpush.bf16.msra.mxu0 %v176_v2  ;;  %v25_v11 = vpack.c.bf16 %v24_v9, %v24_v9  ;;  %v178_v12 = vld [vmem:[%s249_s4] ss:$0 sm:$0xff] }
   0x7   :  { %117 = vmatpush.bf16.msra.mxu1 %v172_v3 }
   0xa   :  { %78 = vmatpush.bf16.msra.mxu0 %v175_v4 }
   0xb   :  { %118 = vmatpush.bf16.msra.mxu1 %v171_v5 }
   0xe   :  { %79 = vmatpush.bf16.msra.mxu0 %v174_v6 }
   0xf   :  { %119 = vmatpush.bf16.msra.mxu1 %v170_v7 }
  0x11   :  { %152 = vmatmul.msk.bf16.vlgmr.msra.gmra.mxu0 %vm68_vm0, %v35_v10 }
  0x12   :  { %169 = vmatmul.msk.bf16.vlgmr.msra.gmra.mxu1 %vm68_vm0, %v25_v11 }
  0x8e   :  { %v81_v13 = vpop.f32.mrf.mxu0 }
  0x8f   :  { %v121_v14 = vpop.f32.mrf.mxu1 }
  0x90   :  { %v122_v15 = vadd.f32 %v121_v14, %v81_v13 }
  0x92   :  { %v129_v16 = vadd.f32 %v178_v12, %v122_v15 }
  0x94   :  { %130 = vst.msk [vmem:[%s250_s5] sm:$0xff] %vm68_vm0, %v129_v16 }
  0x96   :  { %v83_v17 = vpop.f32.mrf.mxu0 }
  0x97   :  { %v123_v18 = vpop.f32.mrf.mxu1 }

// kernel: _lambda_.29
= control target key start
LH: loop header
LB: loop body
LE: loop exit
PB: predicated region body
PF: predicated region fallthrough
CT: control target
= control target key end

     0   :  { %vm76_vm0 = vcmask 523264   ;;  %s453_s3 = inlined_call_operand.vmem [shape: bf16[64,64], index: 3, kind: input, shape index: {}]   ;;  %s454_s2 = inlined_call_operand.vmem [shape: bf16[64,64], index: 2, kind: input, shape index: {}]   ;;  %s455_s5 = inlined_call_operand.vmem [shape: bf16[64,64], index: 5, kind: input, shape index: {}]   ;;  %s456_s4 = inlined_call_operand.vmem [shape: bf16[64,64], index: 4, kind: input, shape index: {}]   ;;  %s457_s1 = inlined_call_operand.vmem [shape: f32[8,64], index: 1, kind: input, shape index: {}]   ;;  %s458_s0 = inlined_call_operand.vmem [shape: f32[8,64], index: 0, kind: input, shape index: {}]   ;;  %s459_s6 = inlined_call_operand.vmem [shape: f32[1,64], index: 6, kind: input, shape index: {}]   ;;  %s460_s7 = inlined_call_operand.vmem [shape: f32[1,64], index: 7, kind: input, shape index: {}]   ;;  %s461_s8 = inlined_call_operand.vmem [shape: f32[8,64], index: 8, kind: output, shape index: {0}]   ;;  %s462_s9 = inlined_call_operand.vmem [shape: f32[8,64], index: 9, kind: output, shape index: {1}]  }
   0x1   :  { %v320_v0 = vld [vmem:[%s453_s3 + $0x18] sm:$0xff]  ;;  %v319_v4 = vld [vmem:[%s453_s3 + $0x10] sm:$0xff]  ;;  %v318_v8 = vld [vmem:[%s453_s3 + $0x8] sm:$0xff] }
   0x2   :  { %v316_v1 = vld [vmem:[%s454_s2 + $0x18] sm:$0xff]  ;;  %84 = vmatpush.bf16.msra.mxu0 %v320_v0  ;;  %v315_v5 = vld [vmem:[%s454_s2 + $0x10] sm:$0xff]  ;;  %v314_v9 = vld [vmem:[%s454_s2 + $0x8] sm:$0xff] }
   0x3   :  { %v328_v2 = vld [vmem:[%s455_s5 + $0x18] sm:$0xff]  ;;  %124 = vmatpush.bf16.msra.mxu1 %v316_v1  ;;  %v327_v6 = vld [vmem:[%s455_s5 + $0x10] sm:$0xff]  ;;  %v326_v10 = vld [vmem:[%s455_s5 + $0x8] sm:$0xff] }
   0x4   :  { %v324_v3 = vld [vmem:[%s456_s4 + $0x18] sm:$0xff]  ;;  %182 = vmatpush.bf16.msra.mxu2 %v328_v2  ;;  %v323_v7 = vld [vmem:[%s456_s4 + $0x10] sm:$0xff]  ;;  %v322_v11 = vld [vmem:[%s456_s4 + $0x8] sm:$0xff] }
   0x5   :  { %219 = vmatpush.bf16.msra.mxu3 %v324_v3  ;;  %v317_v12 = vld [vmem:[%s453_s3] sm:$0xff] }
   0x6   :  { %85 = vmatpush.bf16.msra.mxu0 %v319_v4  ;;  %v313_v13 = vld [vmem:[%s454_s2] sm:$0xff] }
   0x7   :  { %125 = vmatpush.bf16.msra.mxu1 %v315_v5  ;;  %v34_v14 = vld [vmem:[%s457_s1] sm:$0xff] }
   0x8   :  { %183 = vmatpush.bf16.msra.mxu2 %v327_v6  ;;  %v32_v15 = vld [vmem:[%s458_s0] sm:$0xff]  ;;  %v35_v18 = vpack.c.bf16 %v34_v14, %v34_v14 }
   0x9   :  { %220 = vmatpush.bf16.msra.mxu3 %v323_v7  ;;  %v325_v16 = vld [vmem:[%s455_s5] sm:$0xff]  ;;  %v33_v19 = vpack.c.bf16 %v32_v15, %v32_v15 }
   0xa   :  { %86 = vmatpush.bf16.msra.mxu0 %v318_v8  ;;  %v321_v17 = vld [vmem:[%s456_s4] sm:$0xff] }
   0xb   :  { %126 = vmatpush.bf16.msra.mxu1 %v314_v9  ;;  %v329_v20 = vld [vmem:[%s459_s6] ss:$0 sm:$0xff] }
   0xc   :  { %184 = vmatpush.bf16.msra.mxu2 %v326_v10  ;;  %v330_v26 = vld [vmem:[%s460_s7] ss:$0 sm:$0xff] }
   0xd   :  { %221 = vmatpush.bf16.msra.mxu3 %v322_v11 }
   0xe   :  { %87 = vmatpush.bf16.msra.mxu0 %v317_v12 }
   0xf   :  { %127 = vmatpush.bf16.msra.mxu1 %v313_v13 }
  0x10   :  { %185 = vmatpush.bf16.msra.mxu2 %v325_v16 }
  0x11   :  { %222 = vmatpush.bf16.msra.mxu3 %v321_v17  ;;  %261 = vmatmul.msk.bf16.vlgmr.msra.gmra.mxu0 %vm76_vm0, %v35_v18 }
  0x12   :  { %278 = vmatmul.msk.bf16.vlgmr.msra.gmra.mxu1 %vm76_vm0, %v33_v19 }
  0x13   :  { %295 = vmatmul.msk.bf16.vlgmr.msra.gmra.mxu2 %vm76_vm0, %v35_v18 }
  0x14   :  { %312 = vmatmul.msk.bf16.vlgmr.msra.gmra.mxu3 %vm76_vm0, %v33_v19 }
  0x8e   :  { %v89_v21 = vpop.f32.mrf.mxu0 }
  0x8f   :  { %v129_v22 = vpop.f32.mrf.mxu1 }
  0x90   :  { %v130_v23 = vadd.f32 %v129_v22, %v89_v21 }
  0x92   :  { %v137_v24 = vadd.f32 %v329_v20, %v130_v23 }
  0x94   :  { %v233_v25 = vmax.f32 %v137_v24, 0.0 }
  0x96   :  { %234 = vst.msk [vmem:[%s461_s8] sm:$0xff] %vm76_vm0, %v233_v25  ;;  %v187_v27 = vpop.f32.mrf.mxu2  ;;  %v91_v30 = vpop.f32.mrf.mxu0 }
  0x97   :  { %v224_v28 = vpop.f32.mrf.mxu3  ;;  %v131_v31 = vpop.f32.mrf.mxu1 }
  0x98   :  { %v225_v29 = vadd.f32 %v224_v28, %v187_v27 }
  0x9a   :  { %v232_v32 = vadd.f32 %v330_v26, %v225_v29 }
  0x9c   :  { %v235_v33 = vmax.f32 %v232_v32, 0.0 }
  0x9e   :  { %236 = vst.msk [vmem:[%s462_s9] sm:$0xff] %vm76_vm0, %v235_v33  ;;  %v189_v34 = vpop.f32.mrf.mxu2 }
  0x9f   :  { %v226_v35 = vpop.f32.mrf.mxu3 }

// kernel: _lambda_.24
= control target key start
LH: loop header
LB: loop body
LE: loop exit
PB: predicated region body
PF: predicated region fallthrough
CT: control target
= control target key end

     0   :  { %s1863_s18 = smov 0   ;;  %s1865_s19 = smov 0   ;;  %s2065_s0 = inlined_call_operand.vmem [shape: f32[2,2,4,64], index: 0, kind: input, shape index: {}]   ;;  %s2066_s1 = inlined_call_operand.vmem [shape: f32[2,1,64], index: 1, kind: input, shape index: {}]   ;;  %s2067_s2 = inlined_call_operand.vmem [shape: f32[2,1,64], index: 2, kind: input, shape index: {}]   ;;  %s2068_s3 = inlined_call_operand.vmem [shape: bf16[2,64,192], index: 3, kind: input, shape index: {}]   ;;  %s2069_s4 = inlined_call_operand.vmem [shape: f32[2,1,192], index: 4, kind: input, shape index: {}]   ;;  %s2070_s5 = inlined_call_operand.vmem [shape: bf16[2,64,64], index: 5, kind: input, shape index: {}]   ;;  %s2071_s6 = inlined_call_operand.vmem [shape: f32[2,1,64], index: 6, kind: input, shape index: {}]   ;;  %s2072_s7 = inlined_call_operand.vmem [shape: f32[2,1,64], index: 7, kind: input, shape index: {}]   ;;  %s2073_s8 = inlined_call_operand.vmem [shape: f32[2,1,64], index: 8, kind: input, shape index: {}]   ;;  %s2074_s9 = inlined_call_operand.vmem [shape: bf16[2,64,128], index: 9, kind: input, shape index: {}]   ;;  %s2075_s10 = inlined_call_operand.vmem [shape: f32[2,1,128], index: 10, kind: input, shape index: {}]   ;;  %s2076_s11 = inlined_call_operand.vmem [shape: bf16[2,128,64], index: 11, kind: input, shape index: {}]   ;;  %s2077_s12 = inlined_call_operand.vmem [shape: f32[2,1,64], index: 12, kind: input, shape index: {}]   ;;  %s2078_s13 = inlined_call_operand.vmem [shape: f32[2,1,64], index: 13, kind: input, shape index: {}]   ;;  %s2079_s14 = inlined_call_operand.vmem [shape: f32[2,1,64], index: 14, kind: input, shape index: {}]   ;;  %s2080_s15 = inlined_call_operand.vmem [shape: f32[2,2,4,64], index: 15, kind: output, shape index: {}]  }
   0x1   :  { %2084 = sst [smem:[#allocation3_spill]] %s2065_s0  ;;  %s1867_s20 = smov 0  }
   0x2   :  { %2085 = sst [smem:[#allocation4_spill]] %s2066_s1  ;;  %s1869_s21 = smov 0  }
   0x3   :  { %2086 = sst [smem:[#allocation5_spill]] %s2067_s2  ;;  %s1871_s22 = smov 0  }
   0x4   :  { %2087 = sst [smem:[#allocation6_spill]] %s2068_s3 }
   0x5 LB: > { %s34_s23 = sadd.s32 1, %s1769_s20  ;;  %s37_s24 = sadd.s32 1, %s1773_s21  ;;  %s1777_s22 = sphi %s1871_s22, %s25_s22   ;;  %s1773_s21 = sphi %s1869_s21, %s2100_s21   ;;  %s1769_s20 = sphi %s1867_s20, %s2099_s20   ;;  %s1765_s19 = sphi %s1865_s19, %s2098_s19   ;;  %s1761_s18 = sphi %s1863_s18, %s2097_s18  }
   0x6   : > { %p35_p0 = scmp.ge.s32.totalorder %s34_s23, 2  ;;  %p1520_p1 = scmp.ge.s32.totalorder %s1777_s22, 1 }
   0x7   : > { %p577_p2 = scmp.lt.s32.totalorder %s1777_s22, 5 }
   0x8   : > { %s2102_s23 = smov (%p35_p0, %s34_s23), 0  ;;  %s2104_s24 = smov (!%p35_p0, %s37_s24), %s1773_s21 }
   0x9   : > { %p578_p3 = pnand %p1520_p1, %p577_p2  ;;  %p39_p4 = scmp.ge.s32.totalorder %s2104_s24, 2 }
   0xa   : > { %p682_p5 = scmp.lt.s32.totalorder (!%p578_p3), %s1765_s19, 1  ;;  %p684_p6 = scmp.lt.s32.totalorder (!%p578_p3), %s1761_s18, 1 }
   0xb   : > { %s2106_s24 = smov (%p39_p4, %s2104_s24), 0  ;;  %581 = sbr.rel (%p578_p3) target bundleno = 2145 (0x861), region = 80 }
   0xc   : > { %2088 = sst [smem:[#allocation2_spill]] %s2106_s24 }
   0xd   : > { %s2089_s0 = sld [smem:[#allocation3_spill]] (!%p578_p3) }
   0xe   : > { %s2090_s1 = sld [smem:[#allocation4_spill]] (!%p578_p3) }
   0xf   : > { %s2091_s2 = sld [smem:[#allocation5_spill]] (!%p578_p3) }
  0x10   : > { %s2108_s19 = smov (!%p682_p5, %s1765_s19), 1  ;;  %s2110_s18 = smov (!%p684_p6, %s1761_s18), 1  ;;  %vm751_vm0 = vcmask 519168   ;;  %v1779_v2 = vmov 64.0   ;;  %vm846_vm5 = vcmask 523264   ;;  %vm880_vm6 = vcmask 261120  }
  0x11   : > { %s2082_s25 = sshll.u32 %s2108_s19, 1  ;;  %1721 = vrcp.f32 %v1779_v2  ;;  %s2092_s3 = sld [smem:[#allocation6_spill]]  ;;  %vm932_vm7 = vcmask 1041408   ;;  %vm901_vm8 = vcmask 27648   ;;  %vm928_vm13 = vcmask 31744  }
  0x12   : > { %s1898_s26 = sadd.s32 %s2082_s25, %s2110_s18  ;;  %s2093_s17 = sshll.u32 %s2108_s19, 1 }
  0x13   : > { %s2081_s27 = sshll.u32 %s1898_s26, 2  ;;  %s1641_s28 = sshll.u32 %s2108_s19, 5 }
  0x14   : > { %s689_s30 = scalar_lea.vmem %s2089_s0, %s2081_s27  ;;  %s692_s18 = scalar_lea.vmem %s2090_s1, %s2108_s19 }
  0x15   : > { %v1906_v0 = vld [vmem:[%s689_s30] sm:$0xf]  ;;  %s695_s30 = scalar_lea.vmem %s2091_s2, %s2108_s19  ;;  %s2083_s27 = sshll.u32 %s2108_s19, 6 }
  0x16   : > { %v752_v1 = vsel %vm751_vm0, %v1906_v0, 0.0  ;;  %v1712_v47 = vld [vmem:[%s692_s18] ss:$0 sm:$0xff]  ;;  %s704_s18 = scalar_lea.vmem %s2069_s4, %s2093_s17  ;;  %s1781_s0 = smov 64  }
  0x17   : > { %753 = vadd.xlane.f32.xlu0 %v752_v1  ;;  %v1722_v3 = vpop.eup %1721  ;;  %s700_s24 = scalar_lea.vmem %s2092_s3, %s2083_s27  ;;  %v1713_v50 = vld [vmem:[%s695_s30] ss:$0 sm:$0xff]  ;;  %s1780_s30 = smov 96  }
  0x18   : > { %v756_v4 = vmul.f32 64.0, %v1722_v3  ;;  %vm760_vm1 = vweird.f32 %v1722_v3  ;;  %v1560_v14 = vld [vmem:[%s700_s24 + $0x30] sm:$0xf]  ;;  %v1651_v15 = vld [vmem:[%s700_s24 + $0x34] sm:$0xf0]  ;;  %s712_s17 = scalar_lea.vmem %s2071_s6, %s2108_s19  ;;  %s715_s25 = scalar_lea.vmem %s2072_s7, %s2108_s19 }
  0x19   : > { %v1650_v16 = vld [vmem:[%s700_s24 + $0x34] sm:$0xf]  ;;  %v1561_v17 = vor.u32 %v1651_v15, %v1560_v14  ;;  %v1562_v18 = vld [vmem:[%s700_s24 + $0x38] sm:$0xf0]  ;;  %v1552_v20 = vld [vmem:[%s700_s24 + $0x20] sm:$0xf]  ;;  %s718_s29 = scalar_lea.vmem %s2073_s8, %s2108_s19  ;;  %s726_s27 = scalar_lea.vmem %s2075_s10, %s2108_s19 }
  0x1a   : > { %v757_v5 = vsub.f32 1.0, %v756_v4  ;;  %v1565_v19 = vor.u32 %v1650_v16, %v1562_v18  ;;  %v1649_v21 = vld [vmem:[%s700_s24 + $0x24] sm:$0xf0]  ;;  %v1648_v22 = vld [vmem:[%s700_s24 + $0x24] sm:$0xf]  ;;  %s723_s3 = scalar_lea.vmem %s2074_s9, %s1641_s28 }
  0x1b   : > { %854 = vmatpush.bf16.msra.mxu0 %v1561_v17  ;;  %v1553_v23 = vor.u32 %v1649_v21, %v1552_v20  ;;  %v1554_v24 = vld [vmem:[%s700_s24 + $0x28] sm:$0xf0]  ;;  %v1544_v26 = vld [vmem:[%s700_s24 + $0x10] sm:$0xf]  ;;  %v1647_v27 = vld [vmem:[%s700_s24 + $0x14] sm:$0xf0] }
  0x1c   : > { %v758_v6 = vmul.f32 %v1722_v3, %v757_v5  ;;  %867 = vmatpush.bf16.msra.mxu1 %v1565_v19  ;;  %v1557_v25 = vor.u32 %v1648_v22, %v1554_v24  ;;  %v1646_v28 = vld [vmem:[%s700_s24 + $0x14] sm:$0xf]  ;;  %v1545_v29 = vor.u32 %v1647_v27, %v1544_v26  ;;  %v1546_v30 = vld [vmem:[%s700_s24 + $0x18] sm:$0xf0]  ;;  %v1536_v31 = vld [vmem:[%s700_s24] sm:$0xf] }
  0x1d   : > { %v1645_v32 = vld [vmem:[%s700_s24 + $0x4] sm:$0xf0]  ;;  %v1549_v33 = vor.u32 %v1646_v28, %v1546_v30  ;;  %v1644_v34 = vld [vmem:[%s700_s24 + $0x4] sm:$0xf]  ;;  %v1538_v35 = vld [vmem:[%s700_s24 + $0x8] sm:$0xf0] }
  0x1e   : > { %v759_v7 = vadd.f32 %v1722_v3, %v758_v6  ;;  %v1537_v36 = vor.u32 %v1645_v32, %v1536_v31  ;;  %v1541_v37 = vor.u32 %v1644_v34, %v1538_v35  ;;  %v800_v54 = vld [vmem:[%s704_s18] sm:$0x3]  ;;  %s1782_s24 = smov 32  }
  0x1f   : > { %855 = vmatpush.bf16.msra.mxu0 %v1553_v23  ;;  %v802_v55 = vperm.slane %v800_v54, 0  ;;  %v803_v62 = vperm.slane %v800_v54, 1 }
  0x20   : > { %v1910_v8 = vsel %vm760_vm1, %v1722_v3, %v759_v7  ;;  %868 = vmatpush.bf16.msra.mxu1 %v1557_v25 }
  0x23   : > { %856 = vmatpush.bf16.msra.mxu0 %v1545_v29 }
  0x24   : > { %869 = vmatpush.bf16.msra.mxu1 %v1549_v33 }
  0x27   : > { %857 = vmatpush.bf16.msra.mxu0 %v1537_v36 }
  0x28   : > { %870 = vmatpush.bf16.msra.mxu1 %v1541_v37 }
  0x8a   : > { %v754_v9 = vpop.xlane.xlu0 %753 }
  0x8b   : > { %v762_v10 = vmul.f32 %v1910_v8, %v754_v9 }
  0x8d   : > { %v763_v11 = vsub.f32 %v1906_v0, %v762_v10 }
  0x8f   : > { %v764_v12 = vmul.f32 %v763_v11, %v763_v11 }
  0x91   : > { %v765_v13 = vsel %vm751_vm0, %v764_v12, 0.0 }
  0x92   : > { %766 = vadd.xlane.f32.xlu0 %v765_v13 }
 0x105   : > { %v767_v38 = vpop.xlane.xlu0 %766 }
 0x106   : > { %v768_v39 = vmul.f32 %v767_v38, %v1910_v8 }
 0x108   : > { %v769_v40 = vadd.f32 1e-05, %v768_v39 }
 0x10a   : > { %1723 = vrsqrt.f32 %v769_v40  ;;  %vm776_vm3 = vweird.f32 %v769_v40 }
 0x110   : > { %v1724_v41 = vpop.eup %1723 }
 0x111   : > { %v771_v42 = vmul.f32 %v1724_v41, %v769_v40  ;;  %vm777_vm2 = vweird.f32 %v1724_v41 }
 0x112   : > { %vm778_vm4 = vmor %vm776_vm3, %vm777_vm2 }
 0x113   : > { %v772_v43 = vmul.f32 %v1724_v41, %v771_v42 }
 0x115   : > { %v773_v44 = vmul.f32 0.5, %v772_v43 }
 0x117   : > { %v774_v45 = vsub.f32 1.5, %v773_v44 }
 0x119   : > { %v775_v46 = vmul.f32 %v1724_v41, %v774_v45 }
 0x11b   : > { %v779_v48 = vsel %vm778_vm4, %v1724_v41, %v775_v46 }
 0x11c   : > { %v780_v49 = vmul.f32 %v779_v48, %v763_v11 }
 0x11e   : > { %v785_v51 = vmul.f32 %v1712_v47, %v780_v49 }
 0x120   : > { %v790_v52 = vadd.f32 %v1713_v50, %v785_v51 }
 0x122   : > { %v791_v53 = vpack.c.bf16 %v790_v52, %v790_v52 }
 0x124   : > { %1566 = vmatmul.msk.bf16.vlgmr.msra.gmra.mxu0 %vm846_vm5, %v791_v53  ;;  %1567 = vmatmul.msk.bf16.vlgmr.msra.gmra.mxu1 %vm846_vm5, %v791_v53 }
 0x1a1   : > { %v859_v56 = vpop.f32.mrf.mxu0  ;;  %v872_v57 = vpop.f32.mrf.mxu1 }
 0x1a2   : > { %v860_v58 = vadd.f32 %v859_v56, %v802_v55  ;;  %v873_v63 = vadd.f32 %v872_v57, %v803_v62 }
 0x1a4   : > { %v876_v59 = vpack.c.bf16 %v860_v58, %v860_v58  ;;  %v927_v1 = vpack.c.bf16 %v873_v63, %v873_v63 }
 0x1a6   : > { %949 = vrot.lane.b32.xlu2 %v876_v59, %s1780_s30  ;;  %878 = vrot.lane.b32.xlu1 %v876_v59, %s1781_s0  ;;  %v934_v4 = vsel %vm932_vm7, %v927_v1, 0  ;;  %s2094_s0 = sshll.u32 %s2108_s19, 6 }
 0x1a9   : > { %v861_v60 = vpop.f32.mrf.mxu0  ;;  %v874_v61 = vpop.f32.mrf.mxu1 }
 0x1ae   : > { %951 = vrot.lane.b32.xlu1 %v876_v59, %s1782_s24 }
 0x200   : > { %v950_v7 = vpop.permute.xlu2 %949 }
 0x218   : > { %v879_v2 = vpop.permute.xlu1 %878 }
 0x219   : > { %v885_v3 = vsel %vm880_vm6, %v879_v2, 0 }
 0x21a   : > { %894 = vmatpush.bf16.xpose.msra.mxu2 %v885_v3  ;;  %v1714_v3 = vld [vmem:[%s712_s17] ss:$0 sm:$0xff]  ;;  %s2005_s17 = scalar_lea.vmem %s2076_s11, %s2094_s0  ;;  %s737_s0 = scalar_lea.vmem %s2078_s13, %s2108_s19 }
 0x220   : > { %v952_v5 = vpop.permute.xlu1 %951 }
 0x221   : > { %1568 = vmatmul.msk.bf16.vlgmr.msra.gmra.mxu2 %vm880_vm6, %v876_v59  ;;  %v957_v6 = vsel %vm880_vm6, %v952_v5, 0 }
 0x222   : > { %943 = vmatpush.bf16.msrb.mxu2 %v934_v4  ;;  %966 = vmatpush.bf16.xpose.msra.mxu3 %v957_v6 }
 0x229   : > { %1570 = vmatmul.msk.bf16.vlgmr.msra.gmra.mxu3 %vm880_vm6, %v950_v7 }
 0x2a4   : > { %v896_v9 = vpop.f32.mrf.mxu2 }
 0x2a5   : > { %v900_v10 = vmul.f32 0.17677669, %v896_v9 }
 0x2a7   : > { %v902_v11 = vsel %vm901_vm8, %v900_v10, -inf }
 0x2a8   : > { %903 = vmax.xlane.f32.xlu2 %v902_v11 }
 0x2ac   : > { %v898_v12 = vpop.f32.mrf.mxu2  ;;  %v968_v13 = vpop.f32.mrf.mxu3 }
 0x2ad   : > { %v972_v14 = vmul.f32 0.17677669, %v968_v13 }
 0x2af   : > { %v973_v15 = vsel %vm901_vm8, %v972_v14, -inf }
 0x2b0   : > { %974 = vmax.xlane.f32.xlu0 %v973_v15  ;;  %v1658_v15 = vld [vmem:[%s723_s3 + $0x10] sm:$0xff] }
 0x2b4   : > { %v970_v16 = vpop.f32.mrf.mxu3 }
 0x2b5   : > { %v1657_v16 = vld [vmem:[%s723_s3 + $0x8] sm:$0xff] }
 0x31b   : > { %v904_v17 = vpop.xlane.xlu2 %903 }
 0x31c   : > { %v905_v18 = vsub.f32 %v900_v10, %v904_v17  ;;  %v1656_v17 = vld [vmem:[%s723_s3] sm:$0xff] }
 0x31e   : > { %v906_v19 = vmul.f32 1.442695, %v905_v18  ;;  %v1667_v18 = vld [vmem:[%s2005_s17 + $0x38] sm:$0xff] }
 0x31f   : > { %1242 = vmatpush.bf16.msrb.mxu3 %v1667_v18 }
 0x320   : > { %1725 = vpow2.f32 %v906_v19 }
 0x323   : > { %v975_v20 = vpop.xlane.xlu0 %974 }
 0x324   : > { %v976_v21 = vsub.f32 %v972_v14, %v975_v20 }
 0x326   : > { %v1726_v22 = vpop.eup %1725  ;;  %v977_v23 = vmul.f32 1.442695, %v976_v21 }
 0x327   : > { %v908_v24 = vsel %vm901_vm8, %v1726_v22, 0.0 }
 0x328   : > { %1727 = vpow2.f32 %v977_v23  ;;  %909 = vadd.xlane.f32.xlu1 %v908_v24 }
 0x32e   : > { %v1728_v25 = vpop.eup %1727 }
 0x32f   : > { %v979_v26 = vsel %vm901_vm8, %v1728_v25, 0.0 }
 0x330   : > { %980 = vadd.xlane.f32.xlu0 %v979_v26 }
 0x344   : > { %999 = vrot.lane.b32.xlu0 %v927_v1, %s1780_s30  ;;  %s709_s30 = scalar_lea.vmem %s2070_s5, %s1641_s28 }
 0x345   : > { %v1655_v55 = vld [vmem:[%s709_s30 + $0x18] sm:$0xff]  ;;  %v1654_v56 = vld [vmem:[%s709_s30 + $0x10] sm:$0xff]  ;;  %v1653_v57 = vld [vmem:[%s709_s30 + $0x8] sm:$0xff] }
 0x346   : > { %1069 = vmatpush.bf16.msrb.mxu0 %v1655_v55  ;;  %v1652_v62 = vld [vmem:[%s709_s30] sm:$0xff] }
 0x34a   : > { %1070 = vmatpush.bf16.msrb.mxu0 %v1654_v56 }
 0x34e   : > { %1071 = vmatpush.bf16.msrb.mxu0 %v1653_v57 }
 0x352   : > { %1072 = vmatpush.bf16.msrb.mxu0 %v1652_v62 }
 0x39b   : > { %v910_v27 = vpop.xlane.xlu1 %909 }
 0x39c   : > { %1729 = vrcp.f32 %v910_v27  ;;  %v922_v32 = vand.u32 2147483648, %v910_v27  ;;  %v920_v34 = vand.u32 2147483647, %v910_v27  ;;  %vm916_vm10 = vweird.f32 %v910_v27 }
 0x39e   : > { %v923_v37 = vor.u32 1.1754944e-38, %v922_v32  ;;  %vm921_vm12 = vcmp.eq.f32.partialorder %v920_v34, 8.507059e+37 }
 0x3a2   : > { %v1730_v28 = vpop.eup %1729 }
 0x3a3   : > { %v912_v29 = vmul.f32 %v1730_v28, %v910_v27  ;;  %v981_v30 = vpop.xlane.xlu0 %980  ;;  %vm917_vm9 = vweird.f32 %v1730_v28 }
 0x3a4   : > { %1731 = vrcp.f32 %v981_v30  ;;  %vm918_vm11 = vmor %vm916_vm10, %vm917_vm9  ;;  %v993_v46 = vand.u32 2147483648, %v981_v30  ;;  %vm987_vm15 = vweird.f32 %v981_v30  ;;  %v991_v47 = vand.u32 2147483647, %v981_v30 }
 0x3a5   : > { %v913_v31 = vsub.f32 1.0, %v912_v29 }
 0x3a6   : > { %v994_v49 = vor.u32 1.1754944e-38, %v993_v46  ;;  %vm992_vm2 = vcmp.eq.f32.partialorder %v991_v47, 8.507059e+37 }
 0x3a7   : > { %v914_v33 = vmul.f32 %v1730_v28, %v913_v31  ;;  %v1716_v31 = vld [vmem:[%s718_s29] ss:$0 sm:$0xff] }
 0x3a9   : > { %v915_v35 = vadd.f32 %v1730_v28, %v914_v33 }
 0x3aa   : > { %v1732_v36 = vpop.eup %1731 }
 0x3ab   : > { %v983_v38 = vmul.f32 %v1732_v36, %v981_v30  ;;  %v919_v39 = vsel %vm918_vm11, %v1730_v28, %v915_v35  ;;  %vm988_vm14 = vweird.f32 %v1732_v36  ;;  %v1715_v28 = vld [vmem:[%s715_s25] ss:$0 sm:$0xff]  ;;  %v1666_v35 = vld [vmem:[%s2005_s17 + $0x30] sm:$0xff] }
 0x3ac   : > { %v924_v40 = vsel %vm921_vm12, %v923_v37, %v919_v39  ;;  %vm989_vm1 = vmor %vm987_vm15, %vm988_vm14  ;;  %1243 = vmatpush.bf16.msrb.mxu3 %v1666_v35  ;;  %v1664_v37 = vld [vmem:[%s2005_s17 + $0x20] sm:$0xff]  ;;  %v1662_v39 = vld [vmem:[%s2005_s17 + $0x10] sm:$0xff] }
 0x3ad   : > { %v984_v41 = vsub.f32 1.0, %v983_v38  ;;  %v925_v42 = vmul.f32 %v1726_v22, %v924_v40  ;;  %v1663_v38 = vld [vmem:[%s2005_s17 + $0x18] sm:$0xff]  ;;  %v1661_v40 = vld [vmem:[%s2005_s17 + $0x8] sm:$0xff] }
 0x3af   : > { %v985_v43 = vmul.f32 %v1732_v36, %v984_v41  ;;  %v926_v44 = vpack.c.bf16 %v925_v42, %v925_v42  ;;  %v1660_v41 = vld [vmem:[%s2005_s17] sm:$0xff] }
 0x3b0   : > { %v1717_v42 = vld [vmem:[%s726_s27] ss:$0 sm:$0xff] }
 0x3b1   : > { %v986_v45 = vadd.f32 %v1732_v36, %v985_v43  ;;  %1569 = vmatmul.msk.bf16.vlgmr.msrb.gmra.mxu2 %vm928_vm13, %v926_v44 }
 0x3b3   : > { %v990_v48 = vsel %vm989_vm1, %v1732_v36, %v986_v45  ;;  %v1665_v36 = vld [vmem:[%s2005_s17 + $0x28] sm:$0xff]  ;;  %s740_s17 = scalar_lea.vmem %s2079_s14, %s2108_s19 }
 0x3b4   : > { %v995_v52 = vsel %vm992_vm2, %v994_v49, %v990_v48  ;;  %1244 = vmatpush.bf16.msrb.mxu3 %v1665_v36 }
 0x3b5   : > { %v996_v53 = vmul.f32 %v1728_v25, %v995_v52 }
 0x3b6   : > { %v1000_v50 = vpop.permute.xlu0 %999 }
 0x3b7   : > { %v1005_v51 = vsel %vm932_vm7, %v1000_v50, 0  ;;  %v997_v54 = vpack.c.bf16 %v996_v53, %v996_v53 }
 0x3b8   : > { %1014 = vmatpush.bf16.msra.mxu2 %v1005_v51  ;;  %1245 = vmatpush.bf16.msrb.mxu3 %v1664_v37 }
 0x3bc   : > { %1246 = vmatpush.bf16.msrb.mxu3 %v1663_v38 }
 0x3c0   : > { %1247 = vmatpush.bf16.msrb.mxu3 %v1662_v39 }
 0x3c1   : > { %1571 = vmatmul.msk.bf16.vlgmr.msra.gmra.mxu2 %vm928_vm13, %v997_v54 }
 0x3c4   : > { %1248 = vmatpush.bf16.msrb.mxu3 %v1661_v40 }
 0x3c8   : > { %1249 = vmatpush.bf16.msrb.mxu3 %v1660_v41 }
 0x434   : > { %v945_v58 = vpop.f32.mrf.mxu2 }
 0x43c   : > { %v947_v59 = vpop.f32.mrf.mxu2 }
 0x444   : > { %v1016_v60 = vpop.f32.mrf.mxu2 }
 0x445   : > { %1021 = vrot.lane.b32.xlu2 %v1016_v60, %s1782_s24 }
 0x44c   : > { %v1018_v61 = vpop.f32.mrf.mxu2 }
 0x49f   : > { %v1022_v63 = vpop.permute.xlu2 %1021 }
 0x4a0   : > { %v1024_v1 = vsel %vm880_vm6, %v945_v58, %v1022_v63 }
 0x4a1   : > { %v1025_v2 = vpack.c.bf16 %v1024_v1, %v1024_v1 }
 0x4a3   : > { %1588 = vmatmul.msk.bf16.vlgmr.msrb.gmra.mxu0 %vm846_vm5, %v1025_v2 }
 0x520   : > { %v1074_v4 = vpop.f32.mrf.mxu0 }
 0x521   : > { %v1075_v5 = vadd.f32 %v1714_v3, %v1074_v4 }
 0x523   : > { %v1976_v6 = vadd.f32 %v1075_v5, %v1906_v0  ;;  %v1659_v0 = vld [vmem:[%s723_s3 + $0x18] sm:$0xff]  ;;  %s734_s3 = scalar_lea.vmem %s2077_s12, %s2108_s19  ;;  %s2095_s19 = sshll.u32 %s1898_s26, 2 }
 0x524   : > { %1155 = vmatpush.bf16.msrb.mxu1 %v1659_v0  ;;  %v1718_v56 = vld [vmem:[%s734_s3] ss:$0 sm:$0xff]  ;;  %s748_s3 = scalar_lea.vmem %s2080_s15, %s2095_s19 }
 0x525   : > { %v1079_v7 = vsel %vm751_vm0, %v1976_v6, 0.0 }
 0x526   : > { %1080 = vadd.xlane.f32.xlu0 %v1079_v7 }
 0x528   : > { %v1076_v9 = vpop.f32.mrf.mxu0  ;;  %1156 = vmatpush.bf16.msrb.mxu1 %v1658_v15  ;;  %v1720_v15 = vld [vmem:[%s740_s17] ss:$0 sm:$0xff] }
 0x52c   : > { %1157 = vmatpush.bf16.msrb.mxu1 %v1657_v16 }
 0x530   : > { %1158 = vmatpush.bf16.msrb.mxu1 %v1656_v17 }
 0x599   : > { %v1081_v10 = vpop.xlane.xlu0 %1080 }
 0x59a   : > { %v1082_v11 = vmul.f32 %v1081_v10, %v1910_v8 }
 0x59c   : > { %v1083_v12 = vsub.f32 %v1976_v6, %v1082_v11 }
 0x59e   : > { %v1084_v13 = vmul.f32 %v1083_v12, %v1083_v12 }
 0x5a0   : > { %v1085_v14 = vsel %vm751_vm0, %v1084_v13, 0.0 }
 0x5a1   : > { %1086 = vadd.xlane.f32.xlu1 %v1085_v14  ;;  %v1719_v14 = vld [vmem:[%s737_s0] ss:$0 sm:$0xff] }
 0x614   : > { %v1087_v19 = vpop.xlane.xlu1 %1086 }
 0x615   : > { %v1088_v20 = vmul.f32 %v1087_v19, %v1910_v8 }
 0x617   : > { %v1089_v21 = vadd.f32 1e-05, %v1088_v20 }
 0x619   : > { %1733 = vrsqrt.f32 %v1089_v21  ;;  %vm1096_vm4 = vweird.f32 %v1089_v21 }
 0x61f   : > { %v1734_v22 = vpop.eup %1733 }
 0x620   : > { %v1091_v23 = vmul.f32 %v1734_v22, %v1089_v21  ;;  %vm1097_vm3 = vweird.f32 %v1734_v22 }
 0x621   : > { %vm1098_vm6 = vmor %vm1096_vm4, %vm1097_vm3 }
 0x622   : > { %v1092_v24 = vmul.f32 %v1734_v22, %v1091_v23 }
 0x624   : > { %v1093_v25 = vmul.f32 0.5, %v1092_v24 }
 0x626   : > { %v1094_v26 = vsub.f32 1.5, %v1093_v25 }
 0x628   : > { %v1095_v27 = vmul.f32 %v1734_v22, %v1094_v26 }
 0x62a   : > { %v1099_v29 = vsel %vm1098_vm6, %v1734_v22, %v1095_v27 }
 0x62b   : > { %v1100_v30 = vmul.f32 %v1099_v29, %v1083_v12 }
 0x62d   : > { %v1105_v32 = vmul.f32 %v1715_v28, %v1100_v30 }
 0x62f   : > { %v1110_v33 = vadd.f32 %v1716_v31, %v1105_v32 }
 0x631   : > { %v1111_v34 = vpack.c.bf16 %v1110_v33, %v1110_v33 }
 0x633   : > { %1605 = vmatmul.msk.bf16.vlgmr.msrb.gmra.mxu1 %vm846_vm5, %v1111_v34 }
 0x6b0   : > { %v1160_v43 = vpop.f32.mrf.mxu1 }
 0x6b1   : > { %v1161_v44 = vadd.f32 %v1717_v42, %v1160_v43 }
 0x6b3   : > { %v1164_v45 = vmul.f32 %v1161_v44, %v1161_v44 }
 0x6b5   : > { %v1165_v46 = vmul.f32 %v1164_v45, %v1161_v44 }
 0x6b7   : > { %v1166_v47 = vmul.f32 0.044715, %v1165_v46 }
 0x6b8   : > { %v1162_v48 = vpop.f32.mrf.mxu1 }
 0x6b9   : > { %v1167_v49 = vadd.f32 %v1166_v47, %v1161_v44 }
 0x6bb   : > { %v1168_v50 = vmul.f32 0.7978846, %v1167_v49 }
 0x6bd   : > { %1735 = vtanh.f32 %v1168_v50 }
 0x6c3   : > { %v1736_v51 = vpop.eup %1735 }
 0x6c4   : > { %v1170_v52 = vadd.f32 1.0, %v1736_v51 }
 0x6c6   : > { %v1171_v53 = vmul.f32 0.5, %v1170_v52 }
 0x6c8   : > { %v1172_v54 = vmul.f32 %v1171_v53, %v1161_v44 }
 0x6ca   : > { %v1173_v55 = vpack.c.bf16 %v1172_v54, %v1172_v54 }
 0x6cc   : > { %1250 = vmatmul.bf16.vlgmr.msrb.gmra.mxu3 %v1173_v55 }
 0x74f   : > { %v1251_v57 = vpop.f32.mrf.mxu3 }
 0x750   : > { %v1252_v58 = vadd.f32 %v1718_v56, %v1251_v57 }
 0x752   : > { %v1255_v59 = vadd.f32 %v1252_v58, %v1976_v6 }
 0x754   : > { %v1256_v60 = vsel %vm751_vm0, %v1255_v59, 0.0 }
 0x755   : > { %1257 = vadd.xlane.f32.xlu1 %v1256_v60 }
 0x757   : > { %v1253_v61 = vpop.f32.mrf.mxu3 }
 0x7c8   : > { %v1258_v62 = vpop.xlane.xlu1 %1257 }
 0x7c9   : > { %v1259_v63 = vmul.f32 %v1258_v62, %v1910_v8 }
 0x7cb   : > { %v1260_v1 = vsub.f32 %v1255_v59, %v1259_v63 }
 0x7cd   : > { %v1261_v2 = vmul.f32 %v1260_v1, %v1260_v1 }
 0x7cf   : > { %v1262_v3 = vsel %vm751_vm0, %v1261_v2, 0.0 }
 0x7d0   : > { %1263 = vadd.xlane.f32.xlu2 %v1262_v3 }
 0x843   : > { %v1264_v4 = vpop.xlane.xlu2 %1263 }
 0x844   : > { %v1265_v5 = vmul.f32 %v1264_v4, %v1910_v8 }
 0x846   : > { %v1266_v7 = vadd.f32 1e-05, %v1265_v5 }
 0x848   : > { %1737 = vrsqrt.f32 %v1266_v7  ;;  %vm1273_vm7 = vweird.f32 %v1266_v7 }
 0x84e   : > { %v1738_v9 = vpop.eup %1737 }
 0x84f   : > { %v1268_v6 = vmul.f32 %v1738_v9, %v1266_v7  ;;  %vm1274_vm5 = vweird.f32 %v1738_v9 }
 0x850   : > { %vm1275_vm8 = vmor %vm1273_vm7, %vm1274_vm5 }
 0x851   : > { %v1269_v10 = vmul.f32 %v1738_v9, %v1268_v6 }
 0x853   : > { %v1270_v11 = vmul.f32 0.5, %v1269_v10 }
 0x855   : > { %v1271_v12 = vsub.f32 1.5, %v1270_v11 }
 0x857   : > { %v1272_v13 = vmul.f32 %v1738_v9, %v1271_v12 }
 0x859   : > { %v1276_v0 = vsel %vm1275_vm8, %v1738_v9, %v1272_v13 }
 0x85a   : > { %v1277_v16 = vmul.f32 %v1276_v0, %v1260_v1 }
 0x85c   : > { %v1282_v17 = vmul.f32 %v1719_v14, %v1277_v16 }
 0x85e   : > { %v1287_v8 = vadd.f32 %v1720_v15, %v1282_v17 }
 0x860   : > { %1288 = vst.msk [vmem:[%s748_s3] sm:$0xf] %vm751_vm0, %v1287_v8 }
 0x861 PF: > { %s25_s22 = sadd.s32 1, %s1777_s22   ;;  %s2096_s28 = sld [smem:[#allocation2_spill]] }
 0x862   : > { %p22_p7 = scmp.ge.s32.totalorder %s25_s22, 6   ;;  %s2097_s18 = smov %s1769_s20 }
 0x863   : > { %s2098_s19 = smov %s1773_s21  ;;  %s2099_s20 = smov %s2102_s23 }
 0x864   :  { %24 = sbr.rel (!%p22_p7) target bundleno = 5 (0x5), region = 152 }
 0x867   : > { %s2100_s21 = smov %s2096_s28 }

// kernel: _lambda_.30
= control target key start
LH: loop header
LB: loop body
LE: loop exit
PB: predicated region body
PF: predicated region fallthrough
CT: control target
= control target key end

     0   :  { %s415_s0 = inlined_call_operand.vmem [shape: f32[32,32], index: 0, kind: input, shape index: {}]   ;;  %s416_s1 = inlined_call_operand.vmem [shape: f32[32,64], index: 1, kind: input, shape index: {}]   ;;  %s417_s2 = inlined_call_operand.vmem [shape: bf16[32,32], index: 2, kind: input, shape index: {}]   ;;  %s418_s3 = inlined_call_operand.vmem [shape: bf16[64,32], index: 3, kind: input, shape index: {}]   ;;  %s419_s4 = inlined_call_operand.vmem [shape: f32[1,32], index: 4, kind: input, shape index: {}]   ;;  %s420_s5 = inlined_call_operand.vmem [shape: bf16[32,8], index: 5, kind: input, shape index: {}]   ;;  %s421_s6 = inlined_call_operand.vmem [shape: f32[1,8], index: 6, kind: input, shape index: {}]   ;;  %s422_s7 = inlined_call_operand.hbm [shape: f32[32,8], index: 7, kind: output, shape index: {}]  }
   0x1   :  { %v265_v0 = vld [vmem:[%s417_s2 + $0x8] sm:$0xff]  ;;  %v269_v1 = vld [vmem:[%s418_s3 + $0x18] sm:$0xff]  ;;  %v264_v2 = vld [vmem:[%s417_s2] sm:$0xff] }
   0x2   :  { %64 = vmatpush.bf16.msra.mxu0 %v265_v0  ;;  %133 = vmatpush.bf16.msra.mxu1 %v269_v1  ;;  %v268_v3 = vld [vmem:[%s418_s3 + $0x10] sm:$0xff]  ;;  %v29_v4 = vld [vmem:[%s415_s0] sm:$0xff]  ;;  %v30_v5 = vld [vmem:[%s415_s0 + $0x8] sm:$0xff] }
   0x3   :  { %272 = vmatpush.bf16.msra.mxu3 %v269_v1  ;;  %v33_v6 = vpack.c.bf16 %v30_v5, %v29_v4 }
   0x4   :  { %12 = vsyncpa [#allocation3], 0  ;;  %vm51_vm0 = vcmask 261120   ;;  %v267_v7 = vld [vmem:[%s418_s3 + $0x8] sm:$0xff]  ;;  %v266_v8 = vld [vmem:[%s418_s3] sm:$0xff]  ;;  %vm122_vm1 = vcmask 523264  }
   0x5   :  { %v84_v9 = vld [vmem:[%s416_s1] sm:$0xff]  ;;  %v85_v10 = vld [vmem:[%s416_s1 + $0x8] sm:$0xff]  ;;  %v86_v11 = vld [vmem:[%s416_s1 + $0x10] sm:$0xff]  ;;  %vm203_vm2 = vcmask 64512   ;;  %s214_s12 = sshll.u32 %s422_s7, 4  ;;  %s309_s2 = smov 8   ;;  %s215_s12 = int_to_ptr.hbm [resolvable:$true] %s214_s12 }
   0x6   :  { %65 = vmatpush.bf16.msra.mxu0 %v264_v2  ;;  %134 = vmatpush.bf16.msra.mxu1 %v268_v3  ;;  %v87_v12 = vld [vmem:[%s416_s1 + $0x18] sm:$0xff]  ;;  %v88_v13 = vpack.c.bf16 %v85_v10, %v84_v9  ;;  %v31_v15 = vld [vmem:[%s415_s0 + $0x10] sm:$0xff]  ;;  %v271_v18 = vld [vmem:[%s420_s5 + $0x8] sm:$0xff] }
   0x7   :  { %273 = vmatpush.bf16.msra.mxu3 %v268_v3  ;;  %v89_v14 = vpack.c.bf16 %v87_v12, %v86_v11  ;;  %v32_v16 = vld [vmem:[%s415_s0 + $0x18] sm:$0xff]  ;;  %190 = vmatpush.bf16.msra.mxu2 %v271_v18  ;;  %v270_v19 = vld [vmem:[%s420_s5] sm:$0xff]  ;;  %s307_s5 = smov [#allocation2]  }
   0x8   :  { %v34_v17 = vpack.c.bf16 %v32_v16, %v31_v15  ;;  %v279_v21 = vld [vmem:[%s419_s4] ss:$0 sm:$0xff]  ;;  %s212_s9 = sshll.u32 %s307_s5, 4  ;;  %s213_s9 = int_to_ptr.vmem [resolvable:$true] %s212_s9 }
   0x9   :  { %234 = vmatmul.msk.bf16.vlgmr.msra.gmra.mxu0 %vm51_vm0, %v33_v6  ;;  %v280_v43 = vld [vmem:[%s421_s6] ss:$0 sm:$0xff]  ;;  %s308_s6 = smov 128  }
   0xa   :  { %135 = vmatpush.bf16.msra.mxu1 %v267_v7 }
   0xb   :  { %274 = vmatpush.bf16.msra.mxu3 %v267_v7  ;;  %191 = vmatpush.bf16.msra.mxu2 %v270_v19 }
   0xe   :  { %136 = vmatpush.bf16.msra.mxu1 %v266_v8 }
   0xf   :  { %275 = vmatpush.bf16.msra.mxu3 %v266_v8 }
  0x11   :  { %252 = vmatmul.msk.bf16.vlgmr.msra.gmra.mxu1 %vm122_vm1, %v88_v13 }
  0x12   :  { %253 = vmatmul.msk.bf16.vlgmr.msra.gmra.mxu3 %vm122_vm1, %v89_v14 }
  0x19   :  { %235 = vmatmul.msk.bf16.gmra.mxu0 %vm51_vm0, %v34_v17 }
  0x86   :  { %v67_v20 = vpop.f32.mrf.mxu0 }
  0x87   :  { %v80_v24 = vadd.f32 %v279_v21, %v67_v20 }
  0x8e   :  { %v69_v22 = vpop.f32.mrf.mxu0  ;;  %v138_v23 = vpop.f32.mrf.mxu1 }
  0x8f   :  { %v81_v25 = vadd.f32 %v279_v21, %v69_v22  ;;  %v148_v26 = vadd.f32 %v138_v23, %v80_v24 }
  0x91   :  { %v152_v31 = vmax.f32 %v148_v26, 0.0 }
  0x95   :  { %v143_v30 = vpop.f32.mrf.mxu3 }
  0x96   :  { %v72_v27 = vpop.f32.mrf.mxu0  ;;  %v140_v28 = vpop.f32.mrf.mxu1 }
  0x97   :  { %v149_v29 = vadd.f32 %v140_v28, %v81_v25  ;;  %v82_v36 = vadd.f32 %v279_v21, %v72_v27 }
  0x99   :  { %v153_v32 = vmax.f32 %v149_v29, 0.0  ;;  %v150_v39 = vadd.f32 %v143_v30, %v82_v36 }
  0x9b   :  { %v156_v33 = vpack.c.bf16 %v153_v32, %v152_v31  ;;  %v154_v41 = vmax.f32 %v150_v39, 0.0 }
  0x9d   :  { %262 = vmatmul.msk.bf16.vlgmr.msra.gmra.mxu2 %vm51_vm0, %v156_v33  ;;  %v145_v37 = vpop.f32.mrf.mxu3 }
  0x9e   :  { %v74_v34 = vpop.f32.mrf.mxu0 }
  0x9f   :  { %v83_v35 = vadd.f32 %v279_v21, %v74_v34 }
  0xa1   :  { %v151_v38 = vadd.f32 %v145_v37, %v83_v35 }
  0xa3   :  { %v155_v40 = vmax.f32 %v151_v38, 0.0 }
  0xa5   :  { %v157_v42 = vpack.c.bf16 %v155_v40, %v154_v41 }
  0xad   :  { %263 = vmatmul.msk.bf16.gmra.mxu2 %vm51_vm0, %v157_v42 }
 0x120   :  { %v193_v44 = vpop.f32.mrf.mxu2 }
 0x121   :  { %v194_v45 = vadd.f32 %v280_v43, %v193_v44 }
 0x123   :  { %204 = vst.msk [vmem:[#allocation2] sm:$0xff] %vm203_vm2, %v194_v45 }
 0x128   :  { %v195_v46 = vpop.f32.mrf.mxu2 }
 0x129   :  { %v196_v47 = vadd.f32 %v280_v43, %v195_v46 }
 0x12b   :  { %205 = vst.msk [vmem:[#allocation2 + $0x8] sm:$0xff] %vm203_vm2, %v196_v47 }
 0x130   :  { %v198_v48 = vpop.f32.mrf.mxu2 }
 0x131   :  { %v199_v49 = vadd.f32 %v280_v43, %v198_v48 }
 0x133   :  { %206 = vst.msk [vmem:[#allocation2 + $0x10] sm:$0xff] %vm203_vm2, %v199_v49 }
 0x138   :  { %v200_v50 = vpop.f32.mrf.mxu2 }
 0x139   :  { %v201_v51 = vadd.f32 %v280_v43, %v200_v50 }
 0x13b   :  { %207 = vst.msk [vmem:[#allocation2 + $0x18] sm:$0xff] %vm203_vm2, %v201_v51 }
 0x13c   :  { %220 = dma.vmem_to_hbm [thread:$0]  %s213_s9, 512, %s215_s12, [#allocation3], %s308_s6, %s308_s6, %s309_s2  }
 0x13d   :  { %305 = dma.done.wait [#allocation3], 512  }
 0x13e   :  { %306 = vsyncadd [#allocation3], 4294966784 }
 0x13f   :  { %225 = vsyncpa [#allocation3], 1 }

// kernel: _lambda_.31
= control target key start
LH: loop header
LB: loop body
LE: loop exit
PB: predicated region body
PF: predicated region fallthrough
CT: control target
= control target key end

     0   :  { %vm240_vm0 = vcmask 1041408   ;;  %vm143_vm1 = vcmask 31744   ;;  %vm1086_vm2 = vcmask 261120   ;;  %vm1676_vm3 = vcmask 523264   ;;  %s4480_s4 = inlined_call_operand.vmem [shape: bf16[4,32], index: 4, kind: input, shape index: {}]   ;;  %s4481_s0 = inlined_call_operand.vmem [shape: f32[512,4], index: 0, kind: input, shape index: {}]   ;;  %s4482_s6 = inlined_call_operand.vmem [shape: bf16[32,32], index: 6, kind: input, shape index: {}]   ;;  %s4483_s7 = inlined_call_operand.vmem [shape: bf16[64,32], index: 7, kind: input, shape index: {}]   ;;  %s4484_s5 = inlined_call_operand.vmem [shape: bf16[4,32], index: 5, kind: input, shape index: {}]   ;;  %s4485_s8 = inlined_call_operand.vmem [shape: f32[1,32], index: 8, kind: input, shape index: {}]   ;;  %s4486_s11 = inlined_call_operand.vmem [shape: bf16[32,4], index: 11, kind: input, shape index: {}]   ;;  %s4487_s1 = inlined_call_operand.vmem [shape: f32[512,4], index: 1, kind: input, shape index: {}]   ;;  %s4488_s2 = inlined_call_operand.vmem [shape: f32[512,32], index: 2, kind: input, shape index: {}]   ;;  %s4489_s3 = inlined_call_operand.vmem [shape: f32[512,64], index: 3, kind: input, shape index: {}]   ;;  %s4490_s9 = inlined_call_operand.vmem [shape: f32[1,32], index: 9, kind: input, shape index: {}]   ;;  %s4491_s10 = inlined_call_operand.vmem [shape: f32[1,32], index: 10, kind: input, shape index: {}]   ;;  %s4492_s12 = inlined_call_operand.vmem [shape: f32[1,4], index: 12, kind: input, shape index: {}]   ;;  %s4493_s13 = inlined_call_operand.vmem [shape: f32[512,4], index: 13, kind: output, shape index: {}]  }
   0x1   :  { %v142_v0 = vld [vmem:[%s4480_s4] sm:$0x3]  ;;  %v63_v2 = vld [vmem:[%s4481_s0 + $0x88] sm:$0xff]  ;;  %v2719_v11 = vld [vmem:[%s4483_s7 + $0x18] sm:$0xff] }
   0x2   :  { %v62_v1 = vld [vmem:[%s4481_s0 + $0x80] sm:$0xff]  ;;  %v242_v3 = vsel %vm240_vm0, %v142_v0, 0  ;;  %v79_v6 = vld [vmem:[%s4481_s0 + $0x108] sm:$0xff]  ;;  %v2718_v15 = vld [vmem:[%s4483_s7 + $0x10] sm:$0xff] }
   0x3   :  { %v118_v4 = vpack.c.bf16 %v63_v2, %v62_v1  ;;  %v78_v5 = vld [vmem:[%s4481_s0 + $0x100] sm:$0xff]  ;;  %2722 = vmatpush.bf16.msra.mxu1 %v242_v3  ;;  %2723 = vmatpush.bf16.msra.mxu2 %v242_v3  ;;  %v95_v9 = vld [vmem:[%s4481_s0 + $0x188] sm:$0xff]  ;;  %v64_v16 = vld [vmem:[%s4481_s0 + $0x90] sm:$0xff] }
   0x4   :  { %v94_v7 = vld [vmem:[%s4481_s0 + $0x180] sm:$0xff]  ;;  %v126_v8 = vpack.c.bf16 %v79_v6, %v78_v5  ;;  %v2715_v10 = vld [vmem:[%s4482_s6 + $0x8] sm:$0xff]  ;;  %2724 = vmatpush.bf16.msra.mxu3 %v242_v3  ;;  %251 = vmatpush.bf16.msra.mxu0 %v242_v3  ;;  %v65_v17 = vld [vmem:[%s4481_s0 + $0x98] sm:$0xff] }
   0x5   :  { %v134_v12 = vpack.c.bf16 %v95_v9, %v94_v7  ;;  %v576_v13 = vld [vmem:[%s4484_s5] sm:$0x3]  ;;  %v80_v18 = vld [vmem:[%s4481_s0 + $0x110] sm:$0xff]  ;;  %v81_v19 = vld [vmem:[%s4481_s0 + $0x118] sm:$0xff]  ;;  %v119_v22 = vpack.c.bf16 %v65_v17, %v64_v16 }
   0x6   :  { %v674_v14 = vsel %vm240_vm0, %v576_v13, 0  ;;  %2530 = vmatmul.msk.bf16.vlgmr.msra.gmra.mxu1 %vm143_vm1, %v118_v4  ;;  %2538 = vmatmul.msk.bf16.vlgmr.msra.gmra.mxu2 %vm143_vm1, %v126_v8  ;;  %v96_v20 = vld [vmem:[%s4481_s0 + $0x190] sm:$0xff]  ;;  %v97_v21 = vld [vmem:[%s4481_s0 + $0x198] sm:$0xff]  ;;  %v127_v23 = vpack.c.bf16 %v81_v19, %v80_v18  ;;  %v66_v25 = vld [vmem:[%s4481_s0 + $0xa0] sm:$0xff] }
   0x7   :  { %1189 = vmatpush.bf16.msrb.mxu2 %v2715_v10  ;;  %2546 = vmatmul.msk.bf16.vlgmr.msra.gmra.mxu3 %vm143_vm1, %v134_v12  ;;  %v135_v24 = vpack.c.bf16 %v97_v21, %v96_v20  ;;  %v67_v26 = vld [vmem:[%s4481_s0 + $0xa8] sm:$0xff]  ;;  %v82_v27 = vld [vmem:[%s4481_s0 + $0x120] sm:$0xff]  ;;  %v68_v36 = vld [vmem:[%s4481_s0 + $0xb0] sm:$0xff] }
   0x8   :  { %1777 = vmatpush.bf16.msrb.mxu3 %v2719_v11  ;;  %683 = vmatpush.bf16.msrb.mxu1 %v674_v14  ;;  %v83_v28 = vld [vmem:[%s4481_s0 + $0x128] sm:$0xff]  ;;  %v98_v29 = vld [vmem:[%s4481_s0 + $0x1a0] sm:$0xff]  ;;  %v120_v31 = vpack.c.bf16 %v67_v26, %v66_v25  ;;  %v69_v37 = vld [vmem:[%s4481_s0 + $0xb8] sm:$0xff] }
   0x9   :  { %v99_v30 = vld [vmem:[%s4481_s0 + $0x1a8] sm:$0xff]  ;;  %v128_v32 = vpack.c.bf16 %v83_v28, %v82_v27  ;;  %v2714_v34 = vld [vmem:[%s4482_s6] sm:$0xff]  ;;  %v84_v38 = vld [vmem:[%s4481_s0 + $0x130] sm:$0xff]  ;;  %v121_v42 = vpack.c.bf16 %v69_v37, %v68_v36 }
   0xa   :  { %v136_v33 = vpack.c.bf16 %v99_v30, %v98_v29  ;;  %v2717_v35 = vld [vmem:[%s4483_s7 + $0x8] sm:$0xff]  ;;  %v85_v39 = vld [vmem:[%s4481_s0 + $0x138] sm:$0xff]  ;;  %v100_v40 = vld [vmem:[%s4481_s0 + $0x1b0] sm:$0xff] }
   0xb   :  { %1190 = vmatpush.bf16.msrb.mxu2 %v2714_v34  ;;  %v101_v41 = vld [vmem:[%s4481_s0 + $0x1b8] sm:$0xff]  ;;  %v129_v43 = vpack.c.bf16 %v85_v39, %v84_v38  ;;  %v70_v45 = vld [vmem:[%s4481_s0 + $0xc0] sm:$0xff]  ;;  %v71_v46 = vld [vmem:[%s4481_s0 + $0xc8] sm:$0xff] }
   0xc   :  { %1778 = vmatpush.bf16.msrb.mxu3 %v2718_v15  ;;  %v137_v44 = vpack.c.bf16 %v101_v41, %v100_v40  ;;  %v86_v47 = vld [vmem:[%s4481_s0 + $0x140] sm:$0xff]  ;;  %v87_v48 = vld [vmem:[%s4481_s0 + $0x148] sm:$0xff]  ;;  %v122_v51 = vpack.c.bf16 %v71_v46, %v70_v45  ;;  %v72_v55 = vld [vmem:[%s4481_s0 + $0xd0] sm:$0xff] }
   0xd   :  { %v102_v49 = vld [vmem:[%s4481_s0 + $0x1c0] sm:$0xff]  ;;  %v103_v50 = vld [vmem:[%s4481_s0 + $0x1c8] sm:$0xff]  ;;  %v130_v52 = vpack.c.bf16 %v87_v48, %v86_v47  ;;  %v73_v56 = vld [vmem:[%s4481_s0 + $0xd8] sm:$0xff] }
   0xe   :  { %v138_v53 = vpack.c.bf16 %v103_v50, %v102_v49  ;;  %v2716_v54 = vld [vmem:[%s4483_s7] sm:$0xff]  ;;  %v88_v57 = vld [vmem:[%s4481_s0 + $0x150] sm:$0xff]  ;;  %v89_v58 = vld [vmem:[%s4481_s0 + $0x158] sm:$0xff]  ;;  %v123_v61 = vpack.c.bf16 %v73_v56, %v72_v55 }
   0xf   :  { %v104_v59 = vld [vmem:[%s4481_s0 + $0x1d0] sm:$0xff]  ;;  %v105_v60 = vld [vmem:[%s4481_s0 + $0x1d8] sm:$0xff]  ;;  %v131_v62 = vpack.c.bf16 %v89_v58, %v88_v57  ;;  %v46_v0 = vld [vmem:[%s4481_s0] sm:$0xff] }
  0x10   :  { %1779 = vmatpush.bf16.msrb.mxu3 %v2717_v35  ;;  %v139_v63 = vpack.c.bf16 %v105_v60, %v104_v59  ;;  %v47_v1 = vld [vmem:[%s4481_s0 + $0x8] sm:$0xff]  ;;  %v74_v3 = vld [vmem:[%s4481_s0 + $0xe0] sm:$0xff]  ;;  %v76_v12 = vld [vmem:[%s4481_s0 + $0xf0] sm:$0xff] }
  0x11   :  { %v110_v2 = vpack.c.bf16 %v47_v1, %v46_v0  ;;  %v75_v4 = vld [vmem:[%s4481_s0 + $0xe8] sm:$0xff]  ;;  %v90_v5 = vld [vmem:[%s4481_s0 + $0x160] sm:$0xff]  ;;  %v77_v13 = vld [vmem:[%s4481_s0 + $0xf8] sm:$0xff] }
  0x12   :  { %v91_v6 = vld [vmem:[%s4481_s0 + $0x168] sm:$0xff]  ;;  %v106_v7 = vld [vmem:[%s4481_s0 + $0x1e0] sm:$0xff]  ;;  %v124_v9 = vpack.c.bf16 %v75_v4, %v74_v3  ;;  %v92_v14 = vld [vmem:[%s4481_s0 + $0x170] sm:$0xff]  ;;  %v125_v21 = vpack.c.bf16 %v77_v13, %v76_v12 }
  0x13   :  { %2522 = vmatmul.msk.bf16.vlgmr.msra.gmra.mxu0 %vm143_vm1, %v110_v2  ;;  %v107_v8 = vld [vmem:[%s4481_s0 + $0x1e8] sm:$0xff]  ;;  %v132_v10 = vpack.c.bf16 %v91_v6, %v90_v5  ;;  %v93_v15 = vld [vmem:[%s4481_s0 + $0x178] sm:$0xff]  ;;  %v108_v16 = vld [vmem:[%s4481_s0 + $0x1f0] sm:$0xff] }
  0x14   :  { %1780 = vmatpush.bf16.msrb.mxu3 %v2716_v54  ;;  %v140_v11 = vpack.c.bf16 %v107_v8, %v106_v7  ;;  %v109_v17 = vld [vmem:[%s4481_s0 + $0x1f8] sm:$0xff]  ;;  %v48_v18 = vld [vmem:[%s4481_s0 + $0x10] sm:$0xff]  ;;  %v480_v25 = vld [vmem:[%s4487_s1] sm:$0xff] }
  0x15   :  { %v49_v19 = vld [vmem:[%s4481_s0 + $0x18] sm:$0xff]  ;;  %v481_v26 = vld [vmem:[%s4487_s1 + $0x8] sm:$0xff]  ;;  %v974_v27 = vld [vmem:[%s4488_s2] sm:$0xff] }
  0x16   :  { %2531 = vmatmul.msk.bf16.gmra.mxu1 %vm143_vm1, %v119_v22  ;;  %2539 = vmatmul.msk.bf16.gmra.mxu2 %vm143_vm1, %v127_v23  ;;  %v111_v20 = vpack.c.bf16 %v49_v19, %v48_v18  ;;  %v133_v22 = vpack.c.bf16 %v93_v15, %v92_v14  ;;  %v141_v23 = vpack.c.bf16 %v109_v17, %v108_v16  ;;  %v975_v28 = vld [vmem:[%s4488_s2 + $0x8] sm:$0xff]  ;;  %v1548_v29 = vld [vmem:[%s4489_s3] sm:$0xff]  ;;  %v482_v41 = vld [vmem:[%s4487_s1 + $0x10] sm:$0xff] }
  0x17   :  { %2547 = vmatmul.msk.bf16.gmra.mxu3 %vm143_vm1, %v135_v24  ;;  %v2721_v24 = vld [vmem:[%s4486_s11 + $0x8] sm:$0xff]  ;;  %v544_v34 = vpack.c.bf16 %v481_v26, %v480_v25  ;;  %v1038_v35 = vpack.c.bf16 %v975_v28, %v974_v27  ;;  %v1550_v45 = vld [vmem:[%s4489_s3 + $0x10] sm:$0xff]  ;;  %v1551_v46 = vld [vmem:[%s4489_s3 + $0x18] sm:$0xff] }
  0x18   :  { %2291 = vmatpush.bf16.msrb.mxu0 %v2721_v24  ;;  %v1549_v30 = vld [vmem:[%s4489_s3 + $0x8] sm:$0xff]  ;;  %v52_v47 = vld [vmem:[%s4481_s0 + $0x30] sm:$0xff]  ;;  %v53_v48 = vld [vmem:[%s4481_s0 + $0x38] sm:$0xff]  ;;  %v1613_v55 = vpack.c.bf16 %v1551_v46, %v1550_v45 }
  0x19   :  { %v1612_v37 = vpack.c.bf16 %v1549_v30, %v1548_v29  ;;  %v113_v50 = vpack.c.bf16 %v53_v48, %v52_v47  ;;  %v484_v59 = vld [vmem:[%s4487_s1 + $0x20] sm:$0xff]  ;;  %v485_v60 = vld [vmem:[%s4487_s1 + $0x28] sm:$0xff]  ;;  %v486_v13 = vld [vmem:[%s4487_s1 + $0x30] sm:$0xff] }
  0x1a   :  { %v1553_v0 = vld [vmem:[%s4489_s3 + $0x28] sm:$0xff]  ;;  %v54_v1 = vld [vmem:[%s4481_s0 + $0x40] sm:$0xff]  ;;  %v546_v6 = vpack.c.bf16 %v485_v60, %v484_v59  ;;  %v487_v14 = vld [vmem:[%s4487_s1 + $0x38] sm:$0xff] }
  0x1b   :  { %v55_v2 = vld [vmem:[%s4481_s0 + $0x48] sm:$0xff]  ;;  %v980_v15 = vld [vmem:[%s4488_s2 + $0x30] sm:$0xff]  ;;  %v981_v16 = vld [vmem:[%s4488_s2 + $0x38] sm:$0xff]  ;;  %v547_v24 = vpack.c.bf16 %v487_v14, %v486_v13 }
  0x1c   :  { %v114_v4 = vpack.c.bf16 %v55_v2, %v54_v1  ;;  %v1554_v17 = vld [vmem:[%s4489_s3 + $0x30] sm:$0xff]  ;;  %v1555_v18 = vld [vmem:[%s4489_s3 + $0x38] sm:$0xff]  ;;  %v1041_v25 = vpack.c.bf16 %v981_v16, %v980_v15 }
  0x1d   :  { %v56_v19 = vld [vmem:[%s4481_s0 + $0x50] sm:$0xff]  ;;  %v1615_v27 = vpack.c.bf16 %v1555_v18, %v1554_v17  ;;  %v1559_v1 = vld [vmem:[%s4489_s3 + $0x58] sm:$0xff] }
  0x1e   :  { %v490_v60 = vld [vmem:[%s4487_s1 + $0x50] sm:$0xff] }
  0x1f   :  { %v60_v2 = vld [vmem:[%s4481_s0 + $0x70] sm:$0xff] }
  0x23   :  { %2523 = vmatmul.msk.bf16.gmra.mxu0 %vm143_vm1, %v111_v20  ;;  %v57_v20 = vld [vmem:[%s4481_s0 + $0x58] sm:$0xff] }
  0x26   :  { %2532 = vmatmul.msk.bf16.gmra.mxu1 %vm143_vm1, %v120_v31  ;;  %2540 = vmatmul.msk.bf16.gmra.mxu2 %vm143_vm1, %v128_v32  ;;  %v50_v31 = vld [vmem:[%s4481_s0 + $0x20] sm:$0xff]  ;;  %v51_v32 = vld [vmem:[%s4481_s0 + $0x28] sm:$0xff] }
  0x27   :  { %2548 = vmatmul.msk.bf16.gmra.mxu3 %vm143_vm1, %v136_v33  ;;  %v112_v33 = vpack.c.bf16 %v51_v32, %v50_v31  ;;  %v2720_v31 = vld [vmem:[%s4486_s11] sm:$0xff] }
  0x28   :  { %v488_v32 = vld [vmem:[%s4487_s1 + $0x40] sm:$0xff]  ;;  %2292 = vmatpush.bf16.msrb.mxu0 %v2720_v31  ;;  %v1561_v31 = vld [vmem:[%s4489_s3 + $0x68] sm:$0xff] }
  0x33   :  { %2524 = vmatmul.msk.bf16.gmra.mxu0 %vm143_vm1, %v112_v33  ;;  %v489_v33 = vld [vmem:[%s4487_s1 + $0x48] sm:$0xff] }
  0x34   :  { %v548_v47 = vpack.c.bf16 %v489_v33, %v488_v32 }
  0x36   :  { %2533 = vmatmul.msk.bf16.gmra.mxu1 %vm143_vm1, %v121_v42  ;;  %2541 = vmatmul.msk.bf16.gmra.mxu2 %vm143_vm1, %v129_v43  ;;  %v483_v42 = vld [vmem:[%s4487_s1 + $0x18] sm:$0xff]  ;;  %v976_v43 = vld [vmem:[%s4488_s2 + $0x10] sm:$0xff] }
  0x37   :  { %2549 = vmatmul.msk.bf16.gmra.mxu3 %vm143_vm1, %v137_v44  ;;  %v977_v44 = vld [vmem:[%s4488_s2 + $0x18] sm:$0xff] }
  0x43   :  { %2525 = vmatmul.msk.bf16.gmra.mxu0 %vm143_vm1, %v113_v50 }
  0x46   :  { %2534 = vmatmul.msk.bf16.gmra.mxu1 %vm143_vm1, %v122_v51  ;;  %2542 = vmatmul.msk.bf16.gmra.mxu2 %vm143_vm1, %v130_v52  ;;  %v545_v52 = vpack.c.bf16 %v483_v42, %v482_v41  ;;  %v1557_v41 = vld [vmem:[%s4489_s3 + $0x48] sm:$0xff]  ;;  %v58_v42 = vld [vmem:[%s4481_s0 + $0x60] sm:$0xff] }
  0x47   :  { %2550 = vmatmul.msk.bf16.gmra.mxu3 %vm143_vm1, %v138_v53  ;;  %v1039_v53 = vpack.c.bf16 %v977_v44, %v976_v43  ;;  %v59_v43 = vld [vmem:[%s4481_s0 + $0x68] sm:$0xff] }
  0x48   :  { %v116_v45 = vpack.c.bf16 %v59_v43, %v58_v42 }
  0x53   :  { %2526 = vmatmul.msk.bf16.gmra.mxu0 %vm143_vm1, %v114_v4  ;;  %v61_v4 = vld [vmem:[%s4481_s0 + $0x78] sm:$0xff] }
  0x56   :  { %2535 = vmatmul.msk.bf16.gmra.mxu1 %vm143_vm1, %v123_v61  ;;  %2543 = vmatmul.msk.bf16.gmra.mxu2 %vm143_vm1, %v131_v62  ;;  %v978_v61 = vld [vmem:[%s4488_s2 + $0x20] sm:$0xff]  ;;  %v979_v62 = vld [vmem:[%s4488_s2 + $0x28] sm:$0xff] }
  0x57   :  { %2551 = vmatmul.msk.bf16.gmra.mxu3 %vm143_vm1, %v139_v63  ;;  %v1552_v63 = vld [vmem:[%s4489_s3 + $0x20] sm:$0xff]  ;;  %v1040_v7 = vpack.c.bf16 %v979_v62, %v978_v61  ;;  %v491_v61 = vld [vmem:[%s4487_s1 + $0x58] sm:$0xff]  ;;  %v984_v62 = vld [vmem:[%s4488_s2 + $0x50] sm:$0xff] }
  0x58   :  { %v549_v13 = vpack.c.bf16 %v491_v61, %v490_v60  ;;  %v988_v60 = vld [vmem:[%s4488_s2 + $0x70] sm:$0xff]  ;;  %v989_v61 = vld [vmem:[%s4488_s2 + $0x78] sm:$0xff] }
  0x66   :  { %2536 = vmatmul.msk.bf16.gmra.mxu1 %vm143_vm1, %v124_v9  ;;  %2544 = vmatmul.msk.bf16.gmra.mxu2 %vm143_vm1, %v132_v10  ;;  %v1614_v9 = vpack.c.bf16 %v1553_v0, %v1552_v63  ;;  %v985_v63 = vld [vmem:[%s4488_s2 + $0x58] sm:$0xff]  ;;  %v1558_v0 = vld [vmem:[%s4489_s3 + $0x50] sm:$0xff] }
  0x67   :  { %2552 = vmatmul.msk.bf16.gmra.mxu3 %vm143_vm1, %v140_v11  ;;  %v1043_v14 = vpack.c.bf16 %v985_v63, %v984_v62  ;;  %v1617_v16 = vpack.c.bf16 %v1559_v1, %v1558_v0  ;;  %v1562_v63 = vld [vmem:[%s4489_s3 + $0x70] sm:$0xff]  ;;  %v1563_v0 = vld [vmem:[%s4489_s3 + $0x78] sm:$0xff] }
  0x76   :  { %2537 = vmatmul.msk.bf16.gmra.mxu1 %vm143_vm1, %v125_v21  ;;  %2545 = vmatmul.msk.bf16.gmra.mxu2 %vm143_vm1, %v133_v22  ;;  %v115_v22 = vpack.c.bf16 %v57_v20, %v56_v19  ;;  %v492_v20 = vld [vmem:[%s4487_s1 + $0x60] sm:$0xff] }
  0x77   :  { %2553 = vmatmul.msk.bf16.gmra.mxu3 %vm143_vm1, %v141_v23 }
  0x78   :  { %2527 = vmatmul.msk.bf16.gmra.mxu0 %vm143_vm1, %v115_v22  ;;  %v493_v22 = vld [vmem:[%s4487_s1 + $0x68] sm:$0xff] }
  0x83   :  { %v3041_v36 = vpop.f32.mrf.mxu1 }
  0x86   :  { %2554 = vmatmul.msk.bf16.vlgmr.msrb.gmra.mxu1 %vm143_vm1, %v544_v34  ;;  %2594 = vmatmul.msk.bf16.vlgmr.msrb.gmra.mxu2 %vm1086_vm2, %v1038_v35  ;;  %v982_v34 = vld [vmem:[%s4488_s2 + $0x40] sm:$0xff]  ;;  %v983_v35 = vld [vmem:[%s4488_s2 + $0x48] sm:$0xff] }
  0x87   :  { %2642 = vmatmul.msk.bf16.vlgmr.msrb.gmra.mxu3 %vm1676_vm3, %v1612_v37  ;;  %v1556_v37 = vld [vmem:[%s4489_s3 + $0x40] sm:$0xff]  ;;  %v1042_v48 = vpack.c.bf16 %v983_v35, %v982_v34  ;;  %v550_v34 = vpack.c.bf16 %v493_v22, %v492_v20 }
  0x88   :  { %2528 = vmatmul.msk.bf16.gmra.mxu0 %vm143_vm1, %v116_v45 }
  0x89   :  { %v3047_v38 = vpop.f32.mrf.mxu2 }
  0x8a   :  { %v3049_v39 = vpop.f32.mrf.mxu3 }
  0x8b   :  { %v3051_v40 = vpop.f32.mrf.mxu1 }
  0x90   :  { %v253_v42 = vpop.f32.mrf.mxu0 }
  0x91   :  { %v3077_v49 = vpop.f32.mrf.mxu2 }
  0x92   :  { %v3079_v51 = vpop.f32.mrf.mxu3 }
  0x93   :  { %4494 = vst [vmem:[#allocation2_spill] sm:$0xff] %v3079_v51  ;;  %v3081_v54 = vpop.f32.mrf.mxu1 }
  0x96   :  { %2555 = vmatmul.msk.bf16.gmra.mxu1 %vm143_vm1, %v545_v52  ;;  %2595 = vmatmul.msk.bf16.gmra.mxu2 %vm1086_vm2, %v1039_v53  ;;  %v1616_v52 = vpack.c.bf16 %v1557_v41, %v1556_v37 }
  0x97   :  { %2643 = vmatmul.msk.bf16.gmra.mxu3 %vm1676_vm3, %v1613_v55 }
  0x98   :  { %v255_v62 = vpop.f32.mrf.mxu0 }
  0x99   :  { %v3087_v56 = vpop.f32.mrf.mxu2 }
  0x9a   :  { %v3089_v57 = vpop.f32.mrf.mxu3 }
  0x9b   :  { %4495 = vst [vmem:[#allocation3_spill] sm:$0xff] %v3089_v57  ;;  %v3091_v58 = vpop.f32.mrf.mxu1 }
  0xa0   :  { %v258_v20 = vpop.f32.mrf.mxu0 }
  0xa1   :  { %v3117_v3 = vpop.f32.mrf.mxu2 }
  0xa2   :  { %v3119_v5 = vpop.f32.mrf.mxu3 }
  0xa3   :  { %4496 = vst [vmem:[#allocation4_spill] sm:$0xff] %v3119_v5  ;;  %v3121_v8 = vpop.f32.mrf.mxu1 }
  0xa6   :  { %2556 = vmatmul.msk.bf16.gmra.mxu1 %vm143_vm1, %v546_v6  ;;  %2596 = vmatmul.msk.bf16.gmra.mxu2 %vm1086_vm2, %v1040_v7  ;;  %v117_v7 = vpack.c.bf16 %v61_v4, %v60_v2 }
  0xa7   :  { %2644 = vmatmul.msk.bf16.gmra.mxu3 %vm1676_vm3, %v1614_v9 }
  0xa8   :  { %2529 = vmatmul.msk.bf16.gmra.mxu0 %vm143_vm1, %v117_v7  ;;  %v1045_v7 = vpack.c.bf16 %v989_v61, %v988_v60 }
  0xa9   :  { %v3127_v10 = vpop.f32.mrf.mxu2 }
  0xaa   :  { %v3129_v11 = vpop.f32.mrf.mxu3 }
  0xab   :  { %4497 = vst [vmem:[#allocation5_spill] sm:$0xff] %v3129_v11  ;;  %v3131_v12 = vpop.f32.mrf.mxu1 }
  0xb1   :  { %v3157_v21 = vpop.f32.mrf.mxu2 }
  0xb2   :  { %v3159_v23 = vpop.f32.mrf.mxu3 }
  0xb3   :  { %4498 = vst [vmem:[#allocation6_spill] sm:$0xff] %v3159_v23  ;;  %v3161_v26 = vpop.f32.mrf.mxu1 }
  0xb6   :  { %2557 = vmatmul.msk.bf16.gmra.mxu1 %vm143_vm1, %v547_v24  ;;  %2597 = vmatmul.msk.bf16.gmra.mxu2 %vm1086_vm2, %v1041_v25  ;;  %v986_v24 = vld [vmem:[%s4488_s2 + $0x60] sm:$0xff]  ;;  %v987_v25 = vld [vmem:[%s4488_s2 + $0x68] sm:$0xff] }
  0xb7   :  { %2645 = vmatmul.msk.bf16.gmra.mxu3 %vm1676_vm3, %v1615_v27  ;;  %v1560_v27 = vld [vmem:[%s4489_s3 + $0x60] sm:$0xff]  ;;  %v1044_v35 = vpack.c.bf16 %v987_v25, %v986_v24 }
  0xb8   :  { %v1618_v41 = vpack.c.bf16 %v1561_v31, %v1560_v27  ;;  %v496_v25 = vld [vmem:[%s4487_s1 + $0x80] sm:$0xff]  ;;  %v497_v27 = vld [vmem:[%s4487_s1 + $0x88] sm:$0xff] }
  0xb9   :  { %v3167_v28 = vpop.f32.mrf.mxu2  ;;  %v990_v31 = vld [vmem:[%s4488_s2 + $0x80] sm:$0xff]  ;;  %v552_v60 = vpack.c.bf16 %v497_v27, %v496_v25 }
  0xba   :  { %v3169_v29 = vpop.f32.mrf.mxu3  ;;  %v3356_v25 = vld [vmem:[%s4490_s9] ss:$0 sm:$0xff] }
  0xbb   :  { %4499 = vst [vmem:[#allocation7_spill] sm:$0xff] %v3169_v29  ;;  %v3171_v30 = vpop.f32.mrf.mxu1 }
  0xc1   :  { %v3200_v44 = vpop.f32.mrf.mxu2 }
  0xc2   :  { %v3202_v46 = vpop.f32.mrf.mxu3 }
  0xc3   :  { %4500 = vst [vmem:[#allocation8_spill] sm:$0xff] %v3202_v46  ;;  %v3204_v50 = vpop.f32.mrf.mxu1 }
  0xc6   :  { %2558 = vmatmul.msk.bf16.gmra.mxu1 %vm143_vm1, %v548_v47  ;;  %2598 = vmatmul.msk.bf16.gmra.mxu2 %vm1086_vm2, %v1042_v48  ;;  %v494_v48 = vld [vmem:[%s4487_s1 + $0x70] sm:$0xff] }
  0xc7   :  { %2646 = vmatmul.msk.bf16.gmra.mxu3 %vm1676_vm3, %v1616_v52  ;;  %v495_v52 = vld [vmem:[%s4487_s1 + $0x78] sm:$0xff] }
  0xc8   :  { %v551_v4 = vpack.c.bf16 %v495_v52, %v494_v48 }
  0xc9   :  { %v3210_v53 = vpop.f32.mrf.mxu2 }
  0xca   :  { %v3212_v55 = vpop.f32.mrf.mxu3 }
  0xcb   :  { %4501 = vst [vmem:[#allocation9_spill] sm:$0xff] %v3212_v55  ;;  %v3214_v59 = vpop.f32.mrf.mxu1 }
  0xd1   :  { %v3240_v6 = vpop.f32.mrf.mxu2 }
  0xd2   :  { %v3242_v9 = vpop.f32.mrf.mxu3 }
  0xd3   :  { %4502 = vst [vmem:[#allocation10_spill] sm:$0xff] %v3242_v9  ;;  %v3244_v15 = vpop.f32.mrf.mxu1 }
  0xd6   :  { %2559 = vmatmul.msk.bf16.gmra.mxu1 %vm143_vm1, %v549_v13  ;;  %2599 = vmatmul.msk.bf16.gmra.mxu2 %vm1086_vm2, %v1043_v14  ;;  %v1619_v14 = vpack.c.bf16 %v1563_v0, %v1562_v63 }
  0xd7   :  { %2647 = vmatmul.msk.bf16.gmra.mxu3 %vm1676_vm3, %v1617_v16 }
  0xd9   :  { %v3250_v17 = vpop.f32.mrf.mxu2 }
  0xda   :  { %v3252_v18 = vpop.f32.mrf.mxu3 }
  0xdb   :  { %4503 = vst [vmem:[#allocation11_spill] sm:$0xff] %v3252_v18  ;;  %v3254_v19 = vpop.f32.mrf.mxu1 }
  0xe1   :  { %v3274_v32 = vpop.f32.mrf.mxu2 }
  0xe2   :  { %v3276_v33 = vpop.f32.mrf.mxu3 }
  0xe3   :  { %4504 = vst [vmem:[#allocation12_spill] sm:$0xff] %v3276_v33  ;;  %v3278_v37 = vpop.f32.mrf.mxu1  ;;  %v1567_v33 = vld [vmem:[%s4489_s3 + $0x98] sm:$0xff] }
  0xe6   :  { %2560 = vmatmul.msk.bf16.gmra.mxu1 %vm143_vm1, %v550_v34  ;;  %2600 = vmatmul.msk.bf16.gmra.mxu2 %vm1086_vm2, %v1044_v35  ;;  %v991_v34 = vld [vmem:[%s4488_s2 + $0x88] sm:$0xff]  ;;  %v1564_v35 = vld [vmem:[%s4489_s3 + $0x80] sm:$0xff] }
  0xe7   :  { %2648 = vmatmul.msk.bf16.gmra.mxu3 %vm1676_vm3, %v1618_v41  ;;  %v1565_v41 = vld [vmem:[%s4489_s3 + $0x88] sm:$0xff]  ;;  %v1046_v61 = vpack.c.bf16 %v991_v34, %v990_v31 }
  0xe8   :  { %v1620_v0 = vpack.c.bf16 %v1565_v41, %v1564_v35 }
  0xe9   :  { %v3283_v43 = vpop.f32.mrf.mxu2 }
  0xea   :  { %v3285_v45 = vpop.f32.mrf.mxu3 }
  0xeb   :  { %4505 = vst [vmem:[#allocation13_spill] sm:$0xff] %v3285_v45  ;;  %v3287_v47 = vpop.f32.mrf.mxu1  ;;  %v1566_v45 = vld [vmem:[%s4489_s3 + $0x90] sm:$0xff] }
  0xec   :  { %v1621_v23 = vpack.c.bf16 %v1567_v33, %v1566_v45 }
  0xf1   :  { %v3307_v1 = vpop.f32.mrf.mxu2 }
  0xf2   :  { %v3309_v2 = vpop.f32.mrf.mxu3 }
  0xf3   :  { %4506 = vst [vmem:[#allocation14_spill] sm:$0xff] %v3309_v2  ;;  %v3311_v13 = vpop.f32.mrf.mxu1 }
  0xf6   :  { %2561 = vmatmul.msk.bf16.gmra.mxu1 %vm143_vm1, %v551_v4  ;;  %2601 = vmatmul.msk.bf16.gmra.mxu2 %vm1086_vm2, %v1045_v7  ;;  %v260_v4 = vpop.f32.mrf.mxu0  ;;  %v3347_v7 = vld [vmem:[%s4485_s8] ss:$0 sm:$0xff] }
  0xf7   :  { %2649 = vmatmul.msk.bf16.gmra.mxu3 %vm1676_vm3, %v1619_v14  ;;  %v416_v14 = vadd.f32 %v3347_v7, %v253_v42  ;;  %v417_v42 = vadd.f32 %v3347_v7, %v255_v62 }
  0xf9   :  { %v3316_v16 = vpop.f32.mrf.mxu2 }
  0xfa   :  { %v3318_v22 = vpop.f32.mrf.mxu3 }
  0xfb   :  { %4507 = vst [vmem:[#allocation15_spill] sm:$0xff] %v3318_v22  ;;  %v3320_v24 = vpop.f32.mrf.mxu1 }
 0x101   :  { %v3340_v48 = vpop.f32.mrf.mxu2 }
 0x102   :  { %v3342_v52 = vpop.f32.mrf.mxu3 }
 0x103   :  { %4508 = vst [vmem:[#allocation16_spill] sm:$0xff] %v3342_v52  ;;  %v685_v63 = vpop.f32.mrf.mxu1  ;;  %v499_v52 = vld [vmem:[%s4487_s1 + $0x98] sm:$0xff] }
 0x104   :  { %v845_v35 = vadd.f32 %v685_v63, %v416_v14  ;;  %v992_v63 = vld [vmem:[%s4488_s2 + $0x90] sm:$0xff]  ;;  %v993_v14 = vld [vmem:[%s4488_s2 + $0x98] sm:$0xff] }
 0x105   :  { %v1047_v29 = vpack.c.bf16 %v993_v14, %v992_v63  ;;  %v1569_v14 = vld [vmem:[%s4489_s3 + $0xa8] sm:$0xff] }
 0x106   :  { %2562 = vmatmul.msk.bf16.gmra.mxu1 %vm143_vm1, %v552_v60  ;;  %2602 = vmatmul.msk.bf16.gmra.mxu2 %vm1086_vm2, %v1046_v61  ;;  %v3362_v60 = vld [vmem:[%s4491_s10] ss:$0 sm:$0xff]  ;;  %v3364_v61 = vpop.f32.mrf.mxu0 }
 0x107   :  { %2650 = vmatmul.msk.bf16.gmra.mxu3 %vm1676_vm3, %v1620_v0  ;;  %v498_v0 = vld [vmem:[%s4487_s1 + $0x90] sm:$0xff] }
 0x108   :  { %v553_v46 = vpack.c.bf16 %v499_v52, %v498_v0  ;;  %v418_v52 = vadd.f32 %v3347_v7, %v258_v20 }
 0x109   :  { %v1192_v27 = vpop.f32.mrf.mxu2 }
 0x10a   :  { %v1782_v31 = vpop.f32.mrf.mxu3  ;;  %v1355_v41 = vadd.f32 %v3356_v25, %v1192_v27  ;;  %v909_v27 = vmax.f32 %v845_v35, 0.0 }
 0x10b   :  { %v687_v34 = vpop.f32.mrf.mxu1  ;;  %v1945_v62 = vadd.f32 %v3362_v60, %v1782_v31 }
 0x10c   :  { %v1419_v22 = vmax.f32 %v1355_v41, 0.0  ;;  %v846_v2 = vadd.f32 %v687_v34, %v417_v42 }
 0x10d   :  { %v2009_v34 = vmax.f32 %v1945_v62, 0.0 }
 0x10e   :  { %v1483_v31 = vadd.f32 %v1419_v22, %v909_v27  ;;  %v910_v42 = vmax.f32 %v846_v2, 0.0 }
 0x110   :  { %v2073_v51 = vadd.f32 %v2009_v34, %v1483_v31 }
 0x111   :  { %v1194_v18 = vpop.f32.mrf.mxu2 }
 0x112   :  { %v1356_v9 = vadd.f32 %v3356_v25, %v1194_v18  ;;  %v1784_v55 = vpop.f32.mrf.mxu3  ;;  %v265_v18 = vpop.f32.mrf.mxu0 }
 0x113   :  { %v1946_v35 = vadd.f32 %v3362_v60, %v1784_v55  ;;  %v690_v41 = vpop.f32.mrf.mxu1 }
 0x114   :  { %v1420_v11 = vmax.f32 %v1356_v9, 0.0  ;;  %v847_v22 = vadd.f32 %v690_v41, %v418_v52 }
 0x115   :  { %v2010_v57 = vmax.f32 %v1946_v35, 0.0 }
 0x116   :  { %v1484_v5 = vadd.f32 %v1420_v11, %v910_v42  ;;  %2563 = vmatmul.msk.bf16.gmra.mxu1 %vm143_vm1, %v553_v46  ;;  %2603 = vmatmul.msk.bf16.gmra.mxu2 %vm1086_vm2, %v1047_v29  ;;  %v419_v11 = vadd.f32 %v3347_v7, %v260_v4  ;;  %v501_v29 = vld [vmem:[%s4487_s1 + $0xa8] sm:$0xff]  ;;  %v1568_v4 = vld [vmem:[%s4489_s3 + $0xa0] sm:$0xff] }
 0x117   :  { %2651 = vmatmul.msk.bf16.gmra.mxu3 %vm1676_vm3, %v1621_v23  ;;  %v500_v23 = vld [vmem:[%s4487_s1 + $0xa0] sm:$0xff] }
 0x118   :  { %v2074_v0 = vadd.f32 %v2010_v57, %v1484_v5  ;;  %v995_v57 = vld [vmem:[%s4488_s2 + $0xa8] sm:$0xff]  ;;  %v911_v5 = vmax.f32 %v847_v22, 0.0  ;;  %v554_v31 = vpack.c.bf16 %v501_v29, %v500_v23  ;;  %v420_v23 = vadd.f32 %v3347_v7, %v3364_v61  ;;  %v503_v61 = vld [vmem:[%s4487_s1 + $0xb8] sm:$0xff] }
 0x119   :  { %v1197_v55 = vpop.f32.mrf.mxu2 }
 0x11a   :  { %v2137_v63 = vpack.c.bf16 %v2074_v0, %v2073_v51  ;;  %v1787_v33 = vpop.f32.mrf.mxu3  ;;  %v1357_v9 = vadd.f32 %v3356_v25, %v1197_v55  ;;  %v994_v51 = vld [vmem:[%s4488_s2 + $0xa0] sm:$0xff]  ;;  %v268_v62 = vpop.f32.mrf.mxu0  ;;  %v1622_v0 = vpack.c.bf16 %v1569_v14, %v1568_v4  ;;  %v421_v14 = vadd.f32 %v3347_v7, %v265_v18 }
 0x11b   :  { %v692_v45 = vpop.f32.mrf.mxu1  ;;  %v1947_v2 = vadd.f32 %v3362_v60, %v1787_v33  ;;  %v1048_v34 = vpack.c.bf16 %v995_v57, %v994_v51 }
 0x11c   :  { %2682 = vmatmul.msk.bf16.vlgmr.msrb.gmra.mxu0 %vm1086_vm2, %v2137_v63  ;;  %v1421_v46 = vmax.f32 %v1357_v9, 0.0  ;;  %v848_v20 = vadd.f32 %v692_v45, %v419_v11 }
 0x11d   :  { %v2011_v63 = vmax.f32 %v1947_v2, 0.0 }
 0x11e   :  { %v1485_v55 = vadd.f32 %v1421_v46, %v911_v5  ;;  %v912_v33 = vmax.f32 %v848_v20, 0.0 }
 0x120   :  { %v2075_v11 = vadd.f32 %v2011_v63, %v1485_v55 }
 0x121   :  { %v1199_v27 = vpop.f32.mrf.mxu2 }
 0x122   :  { %v1358_v35 = vadd.f32 %v3356_v25, %v1199_v27  ;;  %v1789_v41 = vpop.f32.mrf.mxu3  ;;  %v270_v46 = vpop.f32.mrf.mxu0  ;;  %v502_v27 = vld [vmem:[%s4487_s1 + $0xb0] sm:$0xff] }
 0x123   :  { %v1948_v42 = vadd.f32 %v3362_v60, %v1789_v41  ;;  %v695_v52 = vpop.f32.mrf.mxu1  ;;  %v997_v41 = vld [vmem:[%s4488_s2 + $0xb8] sm:$0xff] }
 0x124   :  { %v1422_v45 = vmax.f32 %v1358_v35, 0.0  ;;  %v849_v2 = vadd.f32 %v695_v52, %v420_v23  ;;  %v996_v35 = vld [vmem:[%s4488_s2 + $0xb0] sm:$0xff] }
 0x125   :  { %v2012_v9 = vmax.f32 %v1948_v42, 0.0  ;;  %v1570_v52 = vld [vmem:[%s4489_s3 + $0xb0] sm:$0xff] }
 0x126   :  { %v1486_v22 = vadd.f32 %v1422_v45, %v912_v33  ;;  %2564 = vmatmul.msk.bf16.gmra.mxu1 %vm143_vm1, %v554_v31  ;;  %2604 = vmatmul.msk.bf16.gmra.mxu2 %vm1086_vm2, %v1048_v34  ;;  %v913_v31 = vmax.f32 %v849_v2, 0.0  ;;  %v555_v45 = vpack.c.bf16 %v503_v61, %v502_v27  ;;  %v422_v27 = vadd.f32 %v3347_v7, %v268_v62  ;;  %v505_v62 = vld [vmem:[%s4487_s1 + $0xc8] sm:$0xff] }
 0x127   :  { %2652 = vmatmul.msk.bf16.gmra.mxu3 %vm1676_vm3, %v1622_v0  ;;  %v1571_v0 = vld [vmem:[%s4489_s3 + $0xb8] sm:$0xff] }
 0x128   :  { %v2076_v29 = vadd.f32 %v2012_v9, %v1486_v22  ;;  %v1049_v22 = vpack.c.bf16 %v997_v41, %v996_v35  ;;  %v1623_v23 = vpack.c.bf16 %v1571_v0, %v1570_v52  ;;  %v504_v0 = vld [vmem:[%s4487_s1 + $0xc0] sm:$0xff] }
 0x129   :  { %v1202_v51 = vpop.f32.mrf.mxu2 }
 0x12a   :  { %v1792_v57 = vpop.f32.mrf.mxu3  ;;  %v2138_v4 = vpack.c.bf16 %v2076_v29, %v2075_v11  ;;  %v1359_v20 = vadd.f32 %v3356_v25, %v1202_v51 }
 0x12b   :  { %v697_v5 = vpop.f32.mrf.mxu1  ;;  %v1949_v18 = vadd.f32 %v3362_v60, %v1792_v57 }
 0x12c   :  { %2683 = vmatmul.msk.bf16.gmra.mxu0 %vm1086_vm2, %v2138_v4  ;;  %v1423_v34 = vmax.f32 %v1359_v20, 0.0  ;;  %v850_v42 = vadd.f32 %v697_v5, %v421_v14  ;;  %v273_v5 = vpop.f32.mrf.mxu0 }
 0x12d   :  { %v2013_v51 = vmax.f32 %v1949_v18, 0.0 }
 0x12e   :  { %v1487_v29 = vadd.f32 %v1423_v34, %v913_v31  ;;  %v914_v57 = vmax.f32 %v850_v42, 0.0  ;;  %v423_v42 = vadd.f32 %v3347_v7, %v270_v46 }
 0x130   :  { %v2077_v14 = vadd.f32 %v2013_v51, %v1487_v29 }
 0x131   :  { %v1204_v55 = vpop.f32.mrf.mxu2 }
 0x132   :  { %v1360_v63 = vadd.f32 %v3356_v25, %v1204_v55  ;;  %v1794_v33 = vpop.f32.mrf.mxu3  ;;  %v998_v55 = vld [vmem:[%s4488_s2 + $0xc0] sm:$0xff] }
 0x133   :  { %v1950_v9 = vadd.f32 %v3362_v60, %v1794_v33  ;;  %v700_v11 = vpop.f32.mrf.mxu1 }
 0x134   :  { %v1424_v4 = vmax.f32 %v1360_v63, 0.0  ;;  %v851_v34 = vadd.f32 %v700_v11, %v422_v27  ;;  %v999_v63 = vld [vmem:[%s4488_s2 + $0xc8] sm:$0xff]  ;;  %v275_v33 = vpop.f32.mrf.mxu0  ;;  %v1572_v11 = vld [vmem:[%s4489_s3 + $0xc0] sm:$0xff] }
 0x135   :  { %v2014_v20 = vmax.f32 %v1950_v9, 0.0 }
 0x136   :  { %v1488_v2 = vadd.f32 %v1424_v4, %v914_v57  ;;  %2565 = vmatmul.msk.bf16.gmra.mxu1 %vm143_vm1, %v555_v45  ;;  %2605 = vmatmul.msk.bf16.gmra.mxu2 %vm1086_vm2, %v1049_v22  ;;  %v915_v45 = vmax.f32 %v851_v34, 0.0  ;;  %v556_v4 = vpack.c.bf16 %v505_v62, %v504_v0 }
 0x137   :  { %2653 = vmatmul.msk.bf16.gmra.mxu3 %vm1676_vm3, %v1623_v23  ;;  %v1573_v23 = vld [vmem:[%s4489_s3 + $0xc8] sm:$0xff] }
 0x138   :  { %v2078_v61 = vadd.f32 %v2014_v20, %v1488_v2  ;;  %v1050_v2 = vpack.c.bf16 %v999_v63, %v998_v55  ;;  %v1624_v27 = vpack.c.bf16 %v1573_v23, %v1572_v11  ;;  %v506_v23 = vld [vmem:[%s4487_s1 + $0xd0] sm:$0xff] }
 0x139   :  { %v1207_v35 = vpop.f32.mrf.mxu2 }
 0x13a   :  { %v1797_v41 = vpop.f32.mrf.mxu3  ;;  %v2139_v52 = vpack.c.bf16 %v2078_v61, %v2077_v14  ;;  %v1361_v18 = vadd.f32 %v3356_v25, %v1207_v35 }
 0x13b   :  { %v702_v31 = vpop.f32.mrf.mxu1  ;;  %v1951_v46 = vadd.f32 %v3362_v60, %v1797_v41 }
 0x13c   :  { %2684 = vmatmul.msk.bf16.gmra.mxu0 %vm1086_vm2, %v2139_v52  ;;  %v1425_v22 = vmax.f32 %v1361_v18, 0.0  ;;  %v852_v9 = vadd.f32 %v702_v31, %v423_v42  ;;  %v424_v42 = vadd.f32 %v3347_v7, %v273_v5  ;;  %v278_v55 = vpop.f32.mrf.mxu0  ;;  %v507_v5 = vld [vmem:[%s4487_s1 + $0xd8] sm:$0xff] }
 0x13d   :  { %v2015_v35 = vmax.f32 %v1951_v46, 0.0 }
 0x13e   :  { %v1489_v61 = vadd.f32 %v1425_v22, %v915_v45  ;;  %v916_v41 = vmax.f32 %v852_v9, 0.0  ;;  %v425_v9 = vadd.f32 %v3347_v7, %v275_v33 }
 0x140   :  { %v2079_v18 = vadd.f32 %v2015_v35, %v1489_v61 }
 0x141   :  { %v1209_v29 = vpop.f32.mrf.mxu2 }
 0x142   :  { %v1362_v51 = vadd.f32 %v3356_v25, %v1209_v29  ;;  %v1799_v57 = vpop.f32.mrf.mxu3  ;;  %v1000_v29 = vld [vmem:[%s4488_s2 + $0xd0] sm:$0xff] }
 0x143   :  { %v1952_v20 = vadd.f32 %v3362_v60, %v1799_v57  ;;  %v705_v14 = vpop.f32.mrf.mxu1 }
 0x144   :  { %v1426_v52 = vmax.f32 %v1362_v51, 0.0  ;;  %v853_v22 = vadd.f32 %v705_v14, %v424_v42  ;;  %v1001_v51 = vld [vmem:[%s4488_s2 + $0xd8] sm:$0xff]  ;;  %v280_v42 = vpop.f32.mrf.mxu0 }
 0x145   :  { %v2016_v34 = vmax.f32 %v1952_v20, 0.0  ;;  %v1574_v20 = vld [vmem:[%s4489_s3 + $0xd0] sm:$0xff]  ;;  %v1575_v14 = vld [vmem:[%s4489_s3 + $0xd8] sm:$0xff] }
 0x146   :  { %v1490_v31 = vadd.f32 %v1426_v52, %v916_v41  ;;  %2566 = vmatmul.msk.bf16.gmra.mxu1 %vm143_vm1, %v556_v4  ;;  %2606 = vmatmul.msk.bf16.gmra.mxu2 %vm1086_vm2, %v1050_v2  ;;  %v917_v57 = vmax.f32 %v853_v22, 0.0  ;;  %v557_v41 = vpack.c.bf16 %v507_v5, %v506_v23  ;;  %v1051_v52 = vpack.c.bf16 %v1001_v51, %v1000_v29 }
 0x147   :  { %2654 = vmatmul.msk.bf16.gmra.mxu3 %vm1676_vm3, %v1624_v27 }
 0x148   :  { %v2080_v0 = vadd.f32 %v2016_v34, %v1490_v31 }
 0x149   :  { %v1212_v62 = vpop.f32.mrf.mxu2 }
 0x14a   :  { %v1802_v63 = vpop.f32.mrf.mxu3  ;;  %v2140_v11 = vpack.c.bf16 %v2080_v0, %v2079_v18  ;;  %v1363_v46 = vadd.f32 %v3356_v25, %v1212_v62  ;;  %v1625_v18 = vpack.c.bf16 %v1575_v14, %v1574_v20  ;;  %v508_v14 = vld [vmem:[%s4487_s1 + $0xe0] sm:$0xff] }
 0x14b   :  { %v707_v45 = vpop.f32.mrf.mxu1  ;;  %v1953_v33 = vadd.f32 %v3362_v60, %v1802_v63 }
 0x14c   :  { %2685 = vmatmul.msk.bf16.gmra.mxu0 %vm1086_vm2, %v2140_v11  ;;  %v1427_v4 = vmax.f32 %v1363_v46, 0.0  ;;  %v854_v2 = vadd.f32 %v707_v45, %v425_v9  ;;  %v426_v9 = vadd.f32 %v3347_v7, %v278_v55  ;;  %v509_v55 = vld [vmem:[%s4487_s1 + $0xe8] sm:$0xff] }
 0x14d   :  { %v2017_v62 = vmax.f32 %v1953_v33, 0.0  ;;  %v283_v33 = vpop.f32.mrf.mxu0 }
 0x14e   :  { %v1491_v0 = vadd.f32 %v1427_v4, %v917_v57  ;;  %v918_v63 = vmax.f32 %v854_v2, 0.0  ;;  %v427_v2 = vadd.f32 %v3347_v7, %v280_v42 }
 0x150   :  { %v2081_v46 = vadd.f32 %v2017_v62, %v1491_v0 }
 0x151   :  { %v1214_v27 = vpop.f32.mrf.mxu2 }
 0x152   :  { %v1364_v61 = vadd.f32 %v3356_v25, %v1214_v27  ;;  %v1804_v35 = vpop.f32.mrf.mxu3  ;;  %v1002_v27 = vld [vmem:[%s4488_s2 + $0xe0] sm:$0xff] }
 0x153   :  { %v1954_v31 = vadd.f32 %v3362_v60, %v1804_v35  ;;  %v710_v34 = vpop.f32.mrf.mxu1 }
 0x154   :  { %v1428_v11 = vmax.f32 %v1364_v61, 0.0  ;;  %v855_v57 = vadd.f32 %v710_v34, %v426_v9  ;;  %v1003_v61 = vld [vmem:[%s4488_s2 + $0xe8] sm:$0xff]  ;;  %v1576_v34 = vld [vmem:[%s4489_s3 + $0xe0] sm:$0xff] }
 0x155   :  { %v2018_v22 = vmax.f32 %v1954_v31, 0.0 }
 0x156   :  { %v1492_v45 = vadd.f32 %v1428_v11, %v918_v63  ;;  %2567 = vmatmul.msk.bf16.gmra.mxu1 %vm143_vm1, %v557_v41  ;;  %2607 = vmatmul.msk.bf16.gmra.mxu2 %vm1086_vm2, %v1051_v52  ;;  %v919_v35 = vmax.f32 %v855_v57, 0.0  ;;  %v558_v63 = vpack.c.bf16 %v509_v55, %v508_v14  ;;  %v1052_v11 = vpack.c.bf16 %v1003_v61, %v1002_v27  ;;  %v285_v57 = vpop.f32.mrf.mxu0 }
 0x157   :  { %2655 = vmatmul.msk.bf16.gmra.mxu3 %vm1676_vm3, %v1625_v18  ;;  %v1577_v18 = vld [vmem:[%s4489_s3 + $0xe8] sm:$0xff] }
 0x158   :  { %v2082_v23 = vadd.f32 %v2018_v22, %v1492_v45 }
 0x159   :  { %v1217_v5 = vpop.f32.mrf.mxu2 }
 0x15a   :  { %v2141_v29 = vpack.c.bf16 %v2082_v23, %v2081_v46  ;;  %v1807_v51 = vpop.f32.mrf.mxu3  ;;  %v1365_v4 = vadd.f32 %v3356_v25, %v1217_v5  ;;  %v1626_v46 = vpack.c.bf16 %v1577_v18, %v1576_v34  ;;  %v510_v34 = vld [vmem:[%s4487_s1 + $0xf0] sm:$0xff] }
 0x15b   :  { %v712_v20 = vpop.f32.mrf.mxu1  ;;  %v1955_v52 = vadd.f32 %v3362_v60, %v1807_v51  ;;  %v1004_v18 = vld [vmem:[%s4488_s2 + $0xf0] sm:$0xff] }
 0x15c   :  { %2686 = vmatmul.msk.bf16.gmra.mxu0 %vm1086_vm2, %v2141_v29  ;;  %v1429_v41 = vmax.f32 %v1365_v4, 0.0  ;;  %v856_v31 = vadd.f32 %v712_v20, %v427_v2  ;;  %v428_v2 = vadd.f32 %v3347_v7, %v283_v33  ;;  %v511_v33 = vld [vmem:[%s4487_s1 + $0xf8] sm:$0xff] }
 0x15d   :  { %v2019_v23 = vmax.f32 %v1955_v52, 0.0 }
 0x15e   :  { %v1493_v9 = vadd.f32 %v1429_v41, %v919_v35  ;;  %v920_v5 = vmax.f32 %v856_v31, 0.0  ;;  %v429_v31 = vadd.f32 %v3347_v7, %v285_v57 }
 0x160   :  { %v2083_v4 = vadd.f32 %v2019_v23, %v1493_v9 }
 0x161   :  { %v1219_v42 = vpop.f32.mrf.mxu2 }
 0x162   :  { %v1366_v0 = vadd.f32 %v3356_v25, %v1219_v42  ;;  %v1809_v62 = vpop.f32.mrf.mxu3  ;;  %v1005_v42 = vld [vmem:[%s4488_s2 + $0xf8] sm:$0xff] }
 0x163   :  { %v1956_v45 = vadd.f32 %v3362_v60, %v1809_v62  ;;  %v715_v22 = vpop.f32.mrf.mxu1 }
 0x164   :  { %v1430_v29 = vmax.f32 %v1366_v0, 0.0  ;;  %v857_v41 = vadd.f32 %v715_v22, %v428_v2  ;;  %v1579_v22 = vld [vmem:[%s4489_s3 + $0xf8] sm:$0xff] }
 0x165   :  { %v2020_v20 = vmax.f32 %v1956_v45, 0.0  ;;  %v1578_v45 = vld [vmem:[%s4489_s3 + $0xf0] sm:$0xff] }
 0x166   :  { %v1494_v51 = vadd.f32 %v1430_v29, %v920_v5  ;;  %2568 = vmatmul.msk.bf16.gmra.mxu1 %vm143_vm1, %v558_v63  ;;  %2608 = vmatmul.msk.bf16.gmra.mxu2 %vm1086_vm2, %v1052_v11  ;;  %v921_v0 = vmax.f32 %v857_v41, 0.0  ;;  %v559_v29 = vpack.c.bf16 %v511_v33, %v510_v34 }
 0x167   :  { %2656 = vmatmul.msk.bf16.gmra.mxu3 %vm1676_vm3, %v1626_v46  ;;  %v288_v46 = vpop.f32.mrf.mxu0 }
 0x168   :  { %v2084_v14 = vadd.f32 %v2020_v20, %v1494_v51  ;;  %v1053_v51 = vpack.c.bf16 %v1005_v42, %v1004_v18 }
 0x169   :  { %v1222_v55 = vpop.f32.mrf.mxu2 }
 0x16a   :  { %v2142_v27 = vpack.c.bf16 %v2084_v14, %v2083_v4  ;;  %v1812_v61 = vpop.f32.mrf.mxu3  ;;  %v1367_v52 = vadd.f32 %v3356_v25, %v1222_v55  ;;  %v1627_v4 = vpack.c.bf16 %v1579_v22, %v1578_v45  ;;  %v512_v45 = vld [vmem:[%s4487_s1 + $0x100] sm:$0xff]  ;;  %v513_v22 = vld [vmem:[%s4487_s1 + $0x108] sm:$0xff] }
 0x16b   :  { %v717_v35 = vpop.f32.mrf.mxu1  ;;  %v1957_v63 = vadd.f32 %v3362_v60, %v1812_v61 }
 0x16c   :  { %2687 = vmatmul.msk.bf16.gmra.mxu0 %vm1086_vm2, %v2142_v27  ;;  %v1431_v62 = vmax.f32 %v1367_v52, 0.0  ;;  %v858_v11 = vadd.f32 %v717_v35, %v429_v31  ;;  %v430_v52 = vadd.f32 %v3347_v7, %v288_v46  ;;  %v1006_v46 = vld [vmem:[%s4488_s2 + $0x100] sm:$0xff] }
 0x16d   :  { %v2021_v14 = vmax.f32 %v1957_v63, 0.0 }
 0x16e   :  { %v1495_v2 = vadd.f32 %v1431_v62, %v921_v0  ;;  %v922_v55 = vmax.f32 %v858_v11, 0.0 }
 0x16f   :  { %v290_v42 = vpop.f32.mrf.mxu0 }
 0x170   :  { %v2085_v41 = vadd.f32 %v2021_v14, %v1495_v2  ;;  %v431_v11 = vadd.f32 %v3347_v7, %v290_v42 }
 0x171   :  { %v1224_v9 = vpop.f32.mrf.mxu2 }
 0x172   :  { %v1368_v23 = vadd.f32 %v3356_v25, %v1224_v9  ;;  %v1814_v5 = vpop.f32.mrf.mxu3  ;;  %v1007_v9 = vld [vmem:[%s4488_s2 + $0x108] sm:$0xff] }
 0x173   :  { %v1958_v20 = vadd.f32 %v3362_v60, %v1814_v5  ;;  %v720_v57 = vpop.f32.mrf.mxu1 }
 0x174   :  { %v1432_v27 = vmax.f32 %v1368_v23, 0.0  ;;  %v859_v62 = vadd.f32 %v720_v57, %v430_v52  ;;  %v1581_v57 = vld [vmem:[%s4489_s3 + $0x108] sm:$0xff] }
 0x175   :  { %v2022_v35 = vmax.f32 %v1958_v20, 0.0  ;;  %v1580_v20 = vld [vmem:[%s4489_s3 + $0x100] sm:$0xff] }
 0x176   :  { %v1496_v61 = vadd.f32 %v1432_v27, %v922_v55  ;;  %2569 = vmatmul.msk.bf16.gmra.mxu1 %vm143_vm1, %v559_v29  ;;  %2609 = vmatmul.msk.bf16.gmra.mxu2 %vm1086_vm2, %v1053_v51  ;;  %v923_v23 = vmax.f32 %v859_v62, 0.0  ;;  %v560_v55 = vpack.c.bf16 %v513_v22, %v512_v45  ;;  %v1054_v27 = vpack.c.bf16 %v1007_v9, %v1006_v46 }
 0x177   :  { %2657 = vmatmul.msk.bf16.gmra.mxu3 %vm1676_vm3, %v1627_v4  ;;  %v432_v46 = vadd.f32 %v3347_v7, %v3041_v36  ;;  %v1008_v36 = vld [vmem:[%s4488_s2 + $0x110] sm:$0xff] }
 0x178   :  { %v2086_v31 = vadd.f32 %v2022_v35, %v1496_v61 }
 0x179   :  { %v1227_v34 = vpop.f32.mrf.mxu2 }
 0x17a   :  { %v2143_v33 = vpack.c.bf16 %v2086_v31, %v2085_v41  ;;  %v1817_v18 = vpop.f32.mrf.mxu3  ;;  %v1369_v63 = vadd.f32 %v3356_v25, %v1227_v34  ;;  %v1628_v41 = vpack.c.bf16 %v1581_v57, %v1580_v20  ;;  %v1009_v20 = vld [vmem:[%s4488_s2 + $0x118] sm:$0xff] }
 0x17b   :  { %v722_v0 = vpop.f32.mrf.mxu1  ;;  %v1959_v29 = vadd.f32 %v3362_v60, %v1817_v18 }
 0x17c   :  { %2688 = vmatmul.msk.bf16.gmra.mxu0 %vm1086_vm2, %v2143_v33  ;;  %v1433_v5 = vmax.f32 %v1369_v63, 0.0  ;;  %v860_v51 = vadd.f32 %v722_v0, %v431_v11 }
 0x17d   :  { %v2023_v31 = vmax.f32 %v1959_v29, 0.0  ;;  %v514_v29 = vld [vmem:[%s4487_s1 + $0x110] sm:$0xff] }
 0x17e   :  { %v1497_v52 = vadd.f32 %v1433_v5, %v923_v23  ;;  %v924_v34 = vmax.f32 %v860_v51, 0.0  ;;  %v433_v23 = vadd.f32 %v3347_v7, %v3051_v40  ;;  %v515_v51 = vld [vmem:[%s4487_s1 + $0x118] sm:$0xff] }
 0x180   :  { %v2087_v0 = vadd.f32 %v2023_v31, %v1497_v52  ;;  %v1055_v52 = vpack.c.bf16 %v1009_v20, %v1008_v36  ;;  %v434_v20 = vadd.f32 %v3347_v7, %v3081_v54  ;;  %v517_v54 = vld [vmem:[%s4487_s1 + $0x128] sm:$0xff] }
 0x181   :  { %v1229_v4 = vpop.f32.mrf.mxu2 }
 0x182   :  { %v1370_v2 = vadd.f32 %v3356_v25, %v1229_v4  ;;  %v1819_v14 = vpop.f32.mrf.mxu3 }
 0x183   :  { %v1960_v61 = vadd.f32 %v3362_v60, %v1819_v14  ;;  %v725_v35 = vpop.f32.mrf.mxu1  ;;  %v1583_v14 = vld [vmem:[%s4489_s3 + $0x118] sm:$0xff] }
 0x184   :  { %v1434_v33 = vmax.f32 %v1370_v2, 0.0  ;;  %v861_v5 = vadd.f32 %v725_v35, %v432_v46  ;;  %v1582_v2 = vld [vmem:[%s4489_s3 + $0x110] sm:$0xff] }
 0x185   :  { %v2024_v42 = vmax.f32 %v1960_v61, 0.0 }
 0x186   :  { %v1498_v18 = vadd.f32 %v1434_v33, %v924_v34  ;;  %2570 = vmatmul.msk.bf16.gmra.mxu1 %vm143_vm1, %v560_v55  ;;  %2610 = vmatmul.msk.bf16.gmra.mxu2 %vm1086_vm2, %v1054_v27  ;;  %v925_v27 = vmax.f32 %v861_v5, 0.0  ;;  %v1629_v33 = vpack.c.bf16 %v1583_v14, %v1582_v2  ;;  %v516_v2 = vld [vmem:[%s4487_s1 + $0x120] sm:$0xff] }
 0x187   :  { %2658 = vmatmul.msk.bf16.gmra.mxu3 %vm1676_vm3, %v1628_v41  ;;  %v561_v41 = vpack.c.bf16 %v515_v51, %v514_v29  ;;  %v1010_v14 = vld [vmem:[%s4488_s2 + $0x120] sm:$0xff] }
 0x188   :  { %v2088_v62 = vadd.f32 %v2024_v42, %v1498_v18 }
 0x189   :  { %v1232_v63 = vpop.f32.mrf.mxu2 }
 0x18a   :  { %v2144_v11 = vpack.c.bf16 %v2088_v62, %v2087_v0  ;;  %v1822_v45 = vpop.f32.mrf.mxu3  ;;  %v1371_v9 = vadd.f32 %v3356_v25, %v1232_v63 }
 0x18b   :  { %v727_v22 = vpop.f32.mrf.mxu1  ;;  %v1961_v40 = vadd.f32 %v3362_v60, %v1822_v45  ;;  %v3620_v45 = vld [vmem:[%s4492_s12] ss:$0 sm:$0xff] }
 0x18c   :  { %2689 = vmatmul.msk.bf16.gmra.mxu0 %vm1086_vm2, %v2144_v11  ;;  %v1435_v57 = vmax.f32 %v1371_v9, 0.0  ;;  %v862_v4 = vadd.f32 %v727_v22, %v433_v23 }
 0x18d   :  { %v2025_v42 = vmax.f32 %v1961_v40, 0.0  ;;  %v435_v40 = vadd.f32 %v3347_v7, %v3091_v58 }
 0x18e   :  { %v1499_v18 = vadd.f32 %v1435_v57, %v925_v27  ;;  %v926_v0 = vmax.f32 %v862_v4, 0.0 }
 0x190   :  { %v2089_v22 = vadd.f32 %v2025_v42, %v1499_v18 }
 0x191   :  { %v1234_v55 = vpop.f32.mrf.mxu2 }
 0x192   :  { %v1372_v61 = vadd.f32 %v3356_v25, %v1234_v55  ;;  %v1824_v35 = vpop.f32.mrf.mxu3  ;;  %v1011_v55 = vld [vmem:[%s4488_s2 + $0x128] sm:$0xff] }
 0x193   :  { %v1962_v31 = vadd.f32 %v3362_v60, %v1824_v35  ;;  %v730_v34 = vpop.f32.mrf.mxu1  ;;  %v1584_v35 = vld [vmem:[%s4489_s3 + $0x120] sm:$0xff] }
 0x194   :  { %v1436_v62 = vmax.f32 %v1372_v61, 0.0  ;;  %v863_v4 = vadd.f32 %v730_v34, %v434_v20  ;;  %v562_v34 = vpack.c.bf16 %v517_v54, %v516_v2 }
 0x195   :  { %v2026_v11 = vmax.f32 %v1962_v31, 0.0 }
 0x196   :  { %v1500_v63 = vadd.f32 %v1436_v62, %v926_v0  ;;  %2571 = vmatmul.msk.bf16.gmra.mxu1 %vm143_vm1, %v561_v41  ;;  %2611 = vmatmul.msk.bf16.gmra.mxu2 %vm1086_vm2, %v1055_v52  ;;  %v1585_v41 = vld [vmem:[%s4489_s3 + $0x128] sm:$0xff]  ;;  %v1056_v62 = vpack.c.bf16 %v1011_v55, %v1010_v14  ;;  %v436_v55 = vadd.f32 %v3347_v7, %v3121_v8  ;;  %v519_v8 = vld [vmem:[%s4487_s1 + $0x138] sm:$0xff] }
 0x197   :  { %2659 = vmatmul.msk.bf16.gmra.mxu3 %vm1676_vm3, %v1629_v33  ;;  %v927_v33 = vmax.f32 %v863_v4, 0.0 }
 0x198   :  { %v2090_v46 = vadd.f32 %v2026_v11, %v1500_v63 }
 0x199   :  { %v1237_v9 = vpop.f32.mrf.mxu2  ;;  %v2294_v23 = vpop.f32.mrf.mxu0 }
 0x19a   :  { %v2145_v5 = vpack.c.bf16 %v2090_v46, %v2089_v22  ;;  %v1827_v29 = vpop.f32.mrf.mxu3  ;;  %v2295_v51 = vadd.f32 %v3620_v45, %v2294_v23  ;;  %v1373_v57 = vadd.f32 %v3356_v25, %v1237_v9  ;;  %v1630_v22 = vpack.c.bf16 %v1585_v41, %v1584_v35  ;;  %v518_v35 = vld [vmem:[%s4487_s1 + $0x130] sm:$0xff] }
 0x19b   :  { %v732_v36 = vpop.f32.mrf.mxu1  ;;  %v1963_v58 = vadd.f32 %v3362_v60, %v1827_v29  ;;  %v1012_v41 = vld [vmem:[%s4488_s2 + $0x130] sm:$0xff] }
 0x19c   :  { %2454 = vst.msk [vmem:[%s4493_s13] sm:$0xff] %vm143_vm1, %v2295_v51  ;;  %2690 = vmatmul.msk.bf16.gmra.mxu0 %vm1086_vm2, %v2145_v5  ;;  %v1437_v27 = vmax.f32 %v1373_v57, 0.0  ;;  %v864_v61 = vadd.f32 %v732_v36, %v435_v40 }
 0x19d   :  { %v2027_v9 = vmax.f32 %v1963_v58, 0.0  ;;  %v437_v58 = vadd.f32 %v3347_v7, %v3131_v12 }
 0x19e   :  { %v1501_v46 = vadd.f32 %v1437_v27, %v927_v33  ;;  %v928_v23 = vmax.f32 %v864_v61, 0.0  ;;  %v1586_v33 = vld [vmem:[%s4489_s3 + $0x130] sm:$0xff] }
 0x1a0   :  { %v2091_v36 = vadd.f32 %v2027_v9, %v1501_v46 }
 0x1a1   :  { %v1239_v52 = vpop.f32.mrf.mxu2  ;;  %v2296_v31 = vpop.f32.mrf.mxu0 }
 0x1a2   :  { %v1374_v18 = vadd.f32 %v3356_v25, %v1239_v52  ;;  %v1829_v42 = vpop.f32.mrf.mxu3  ;;  %v2297_v0 = vadd.f32 %v3620_v45, %v2296_v31  ;;  %v1013_v52 = vld [vmem:[%s4488_s2 + $0x138] sm:$0xff] }
 0x1a3   :  { %v1964_v63 = vadd.f32 %v3362_v60, %v1829_v42  ;;  %v735_v11 = vpop.f32.mrf.mxu1  ;;  %v1057_v9 = vpack.c.bf16 %v1013_v52, %v1012_v41  ;;  %v439_v52 = vadd.f32 %v3347_v7, %v3171_v30 }
 0x1a4   :  { %v1438_v5 = vmax.f32 %v1374_v18, 0.0  ;;  %2455 = vst.msk [vmem:[%s4493_s13 + $0x8] sm:$0xff] %vm143_vm1, %v2297_v0  ;;  %v865_v61 = vadd.f32 %v735_v11, %v436_v55  ;;  %v1587_v18 = vld [vmem:[%s4489_s3 + $0x138] sm:$0xff] }
 0x1a5   :  { %v2028_v51 = vmax.f32 %v1964_v63, 0.0 }
 0x1a6   :  { %v1502_v29 = vadd.f32 %v1438_v5, %v928_v23  ;;  %2572 = vmatmul.msk.bf16.gmra.mxu1 %vm143_vm1, %v562_v34  ;;  %2612 = vmatmul.msk.bf16.gmra.mxu2 %vm1086_vm2, %v1056_v62  ;;  %v563_v62 = vpack.c.bf16 %v519_v8, %v518_v35  ;;  %v929_v63 = vmax.f32 %v865_v61, 0.0  ;;  %v438_v8 = vadd.f32 %v3347_v7, %v3161_v26  ;;  %v521_v26 = vld [vmem:[%s4487_s1 + $0x148] sm:$0xff] }
 0x1a7   :  { %2660 = vmatmul.msk.bf16.gmra.mxu3 %vm1676_vm3, %v1630_v22 }
 0x1a8   :  { %v2092_v20 = vadd.f32 %v2028_v51, %v1502_v29  ;;  %v1631_v29 = vpack.c.bf16 %v1587_v18, %v1586_v33  ;;  %v1015_v33 = vld [vmem:[%s4488_s2 + $0x148] sm:$0xff] }
 0x1a9   :  { %v1242_v57 = vpop.f32.mrf.mxu2  ;;  %v2299_v40 = vpop.f32.mrf.mxu0 }
 0x1aa   :  { %v2146_v4 = vpack.c.bf16 %v2092_v20, %v2091_v36  ;;  %v1832_v2 = vpop.f32.mrf.mxu3  ;;  %v2300_v54 = vadd.f32 %v3620_v45, %v2299_v40  ;;  %v1375_v27 = vadd.f32 %v3356_v25, %v1242_v57 }
 0x1ab   :  { %v737_v14 = vpop.f32.mrf.mxu1  ;;  %v1965_v12 = vadd.f32 %v3362_v60, %v1832_v2 }
 0x1ac   :  { %2456 = vst.msk [vmem:[%s4493_s13 + $0x10] sm:$0xff] %vm143_vm1, %v2300_v54  ;;  %2691 = vmatmul.msk.bf16.gmra.mxu0 %vm1086_vm2, %v2146_v4  ;;  %v1439_v31 = vmax.f32 %v1375_v27, 0.0  ;;  %v866_v34 = vadd.f32 %v737_v14, %v437_v58 }
 0x1ad   :  { %v2029_v36 = vmax.f32 %v1965_v12, 0.0  ;;  %v520_v12 = vld [vmem:[%s4487_s1 + $0x140] sm:$0xff] }
 0x1ae   :  { %v1503_v51 = vadd.f32 %v1439_v31, %v929_v63  ;;  %v930_v20 = vmax.f32 %v866_v34, 0.0  ;;  %v1014_v34 = vld [vmem:[%s4488_s2 + $0x140] sm:$0xff] }
 0x1b0   :  { %v2093_v2 = vadd.f32 %v2029_v36, %v1503_v51 }
 0x1b1   :  { %v1244_v42 = vpop.f32.mrf.mxu2  ;;  %v2301_v0 = vpop.f32.mrf.mxu0 }
 0x1b2   :  { %v1376_v11 = vadd.f32 %v3356_v25, %v1244_v42  ;;  %v1834_v22 = vpop.f32.mrf.mxu3  ;;  %v2302_v46 = vadd.f32 %v3620_v45, %v2301_v0  ;;  %v1588_v0 = vld [vmem:[%s4489_s3 + $0x140] sm:$0xff] }
 0x1b3   :  { %v1966_v23 = vadd.f32 %v3362_v60, %v1834_v22  ;;  %v740_v5 = vpop.f32.mrf.mxu1  ;;  %v564_v22 = vpack.c.bf16 %v521_v26, %v520_v12  ;;  %v441_v26 = vadd.f32 %v3347_v7, %v3214_v59 }
 0x1b4   :  { %v1440_v57 = vmax.f32 %v1376_v11, 0.0  ;;  %2457 = vst.msk [vmem:[%s4493_s13 + $0x18] sm:$0xff] %vm143_vm1, %v2302_v46  ;;  %v867_v31 = vadd.f32 %v740_v5, %v438_v8 }
 0x1b5   :  { %v2030_v4 = vmax.f32 %v1966_v23, 0.0 }
 0x1b6   :  { %v1504_v40 = vadd.f32 %v1440_v57, %v930_v20  ;;  %2573 = vmatmul.msk.bf16.gmra.mxu1 %vm143_vm1, %v563_v62  ;;  %2613 = vmatmul.msk.bf16.gmra.mxu2 %vm1086_vm2, %v1057_v9  ;;  %v1589_v62 = vld [vmem:[%s4489_s3 + $0x148] sm:$0xff]  ;;  %v931_v46 = vmax.f32 %v867_v31, 0.0  ;;  %v440_v31 = vadd.f32 %v3347_v7, %v3204_v50  ;;  %v523_v50 = vld [vmem:[%s4487_s1 + $0x158] sm:$0xff] }
 0x1b7   :  { %2661 = vmatmul.msk.bf16.gmra.mxu3 %vm1676_vm3, %v1631_v29  ;;  %v1058_v29 = vpack.c.bf16 %v1015_v33, %v1014_v34  ;;  %v1632_v20 = vpack.c.bf16 %v1589_v62, %v1588_v0  ;;  %v522_v33 = vld [vmem:[%s4487_s1 + $0x150] sm:$0xff]  ;;  %v1591_v0 = vld [vmem:[%s4489_s3 + $0x158] sm:$0xff] }
 0x1b8   :  { %v2094_v54 = vadd.f32 %v2030_v4, %v1504_v40 }
 0x1b9   :  { %v1247_v14 = vpop.f32.mrf.mxu2  ;;  %v2304_v55 = vpop.f32.mrf.mxu0 }
 0x1ba   :  { %v2147_v27 = vpack.c.bf16 %v2094_v54, %v2093_v2  ;;  %v1837_v58 = vpop.f32.mrf.mxu3  ;;  %v2305_v61 = vadd.f32 %v3620_v45, %v2304_v55  ;;  %v1377_v41 = vadd.f32 %v3356_v25, %v1247_v14 }
 0x1bb   :  { %v742_v35 = vpop.f32.mrf.mxu1  ;;  %v1967_v30 = vadd.f32 %v3362_v60, %v1837_v58 }
 0x1bc   :  { %2458 = vst.msk [vmem:[%s4493_s13 + $0x20] sm:$0xff] %vm143_vm1, %v2305_v61  ;;  %2692 = vmatmul.msk.bf16.gmra.mxu0 %vm1086_vm2, %v2147_v27  ;;  %v1441_v18 = vmax.f32 %v1377_v41, 0.0  ;;  %v868_v42 = vadd.f32 %v742_v35, %v439_v52 }
 0x1bd   :  { %v2031_v40 = vmax.f32 %v1967_v30, 0.0 }
 0x1be   :  { %v1505_v57 = vadd.f32 %v1441_v18, %v931_v46  ;;  %v932_v4 = vmax.f32 %v868_v42, 0.0  ;;  %v1017_v18 = vld [vmem:[%s4488_s2 + $0x158] sm:$0xff]  ;;  %v1590_v42 = vld [vmem:[%s4489_s3 + $0x150] sm:$0xff]  ;;  %v3776_v46 = vld [vmem:[%s4490_s9] ss:$0 sm:$0xff] }
 0x1c0   :  { %v2095_v55 = vadd.f32 %v2031_v40, %v1505_v57 }
 0x1c1   :  { %v1249_v63 = vpop.f32.mrf.mxu2  ;;  %v2306_v11 = vpop.f32.mrf.mxu0 }
 0x1c2   :  { %v1378_v9 = vadd.f32 %v3356_v25, %v1249_v63  ;;  %v1839_v23 = vpop.f32.mrf.mxu3  ;;  %v2307_v5 = vadd.f32 %v3620_v45, %v2306_v11  ;;  %v565_v11 = vpack.c.bf16 %v523_v50, %v522_v33  ;;  %v524_v50 = vld [vmem:[%s4487_s1 + $0x160] sm:$0xff] }
 0x1c3   :  { %v1968_v51 = vadd.f32 %v3362_v60, %v1839_v23  ;;  %v745_v36 = vpop.f32.mrf.mxu1 }
 0x1c4   :  { %v1442_v2 = vmax.f32 %v1378_v9, 0.0  ;;  %2459 = vst.msk [vmem:[%s4493_s13 + $0x28] sm:$0xff] %vm143_vm1, %v2307_v5  ;;  %v869_v34 = vadd.f32 %v745_v36, %v440_v31  ;;  %v3797_v31 = vld [vmem:[%s4485_s8] ss:$0 sm:$0xff] }
 0x1c5   :  { %v2032_v14 = vmax.f32 %v1968_v51, 0.0 }
 0x1c6   :  { %v1506_v54 = vadd.f32 %v1442_v2, %v932_v4  ;;  %2574 = vmatmul.msk.bf16.gmra.mxu1 %vm143_vm1, %v564_v22  ;;  %2614 = vmatmul.msk.bf16.gmra.mxu2 %vm1086_vm2, %v1058_v29  ;;  %v933_v22 = vmax.f32 %v869_v34, 0.0  ;;  %v3783_v29 = vld [vmem:[%s4491_s10] ss:$0 sm:$0xff]  ;;  %v443_v34 = vadd.f32 %v3797_v31, %v3254_v19 }
 0x1c7   :  { %2662 = vmatmul.msk.bf16.gmra.mxu3 %vm1676_vm3, %v1632_v20  ;;  %v1633_v20 = vpack.c.bf16 %v1591_v0, %v1590_v42  ;;  %v1593_v42 = vld [vmem:[%s4489_s3 + $0x168] sm:$0xff] }
 0x1c8   :  { %v2096_v27 = vadd.f32 %v2032_v14, %v1506_v54 }
 0x1c9   :  { %v1252_v58 = vpop.f32.mrf.mxu2  ;;  %v2309_v61 = vpop.f32.mrf.mxu0 }
 0x1ca   :  { %v2148_v35 = vpack.c.bf16 %v2096_v27, %v2095_v55  ;;  %v1842_v8 = vpop.f32.mrf.mxu3  ;;  %v2310_v41 = vadd.f32 %v3620_v45, %v2309_v61  ;;  %v1379_v12 = vadd.f32 %v3356_v25, %v1252_v58  ;;  %v1016_v25 = vld [vmem:[%s4488_s2 + $0x150] sm:$0xff] }
 0x1cb   :  { %v747_v52 = vpop.f32.mrf.mxu1  ;;  %v1969_v59 = vadd.f32 %v3362_v60, %v1842_v8  ;;  %v1059_v5 = vpack.c.bf16 %v1017_v18, %v1016_v25  ;;  %v1018_v25 = vld [vmem:[%s4488_s2 + $0x160] sm:$0xff]  ;;  %v1019_v18 = vld [vmem:[%s4488_s2 + $0x168] sm:$0xff] }
 0x1cc   :  { %2460 = vst.msk [vmem:[%s4493_s13 + $0x30] sm:$0xff] %vm143_vm1, %v2310_v41  ;;  %2693 = vmatmul.msk.bf16.gmra.mxu0 %vm1086_vm2, %v2148_v35  ;;  %v1443_v30 = vmax.f32 %v1379_v12, 0.0  ;;  %v870_v7 = vadd.f32 %v747_v52, %v441_v26  ;;  %v442_v12 = vadd.f32 %v3797_v31, %v3244_v15  ;;  %v525_v15 = vld [vmem:[%s4487_s1 + $0x168] sm:$0xff] }
 0x1cd   :  { %v2033_v40 = vmax.f32 %v1969_v59, 0.0 }
 0x1ce   :  { %v1507_v57 = vadd.f32 %v1443_v30, %v933_v22  ;;  %v934_v4 = vmax.f32 %v870_v7, 0.0  ;;  %v1592_v7 = vld [vmem:[%s4489_s3 + $0x160] sm:$0xff] }
 0x1d0   :  { %v2097_v55 = vadd.f32 %v2033_v40, %v1507_v57 }
 0x1d1   :  { %v1254_v62 = vpop.f32.mrf.mxu2  ;;  %v2311_v63 = vpop.f32.mrf.mxu0 }
 0x1d2   :  { %v1380_v60 = vadd.f32 %v3776_v46, %v1254_v62  ;;  %v1844_v9 = vpop.f32.mrf.mxu3  ;;  %v2312_v23 = vadd.f32 %v3620_v45, %v2311_v63  ;;  %v566_v63 = vpack.c.bf16 %v525_v15, %v524_v50  ;;  %v1020_v50 = vld [vmem:[%s4488_s2 + $0x170] sm:$0xff]  ;;  %v1021_v15 = vld [vmem:[%s4488_s2 + $0x178] sm:$0xff] }
 0x1d3   :  { %v1970_v51 = vadd.f32 %v3783_v29, %v1844_v9  ;;  %v750_v36 = vpop.f32.mrf.mxu1 }
 0x1d4   :  { %v1444_v2 = vmax.f32 %v1380_v60, 0.0  ;;  %2461 = vst.msk [vmem:[%s4493_s13 + $0x38] sm:$0xff] %vm143_vm1, %v2312_v23  ;;  %v871_v33 = vadd.f32 %v750_v36, %v442_v12  ;;  %v1060_v23 = vpack.c.bf16 %v1019_v18, %v1018_v25  ;;  %v1634_v36 = vpack.c.bf16 %v1593_v42, %v1592_v7 }
 0x1d5   :  { %v2034_v14 = vmax.f32 %v1970_v51, 0.0 }
 0x1d6   :  { %v1508_v54 = vadd.f32 %v1444_v2, %v934_v4  ;;  %2575 = vmatmul.msk.bf16.gmra.mxu1 %vm143_vm1, %v565_v11  ;;  %2615 = vmatmul.msk.bf16.gmra.mxu2 %vm1086_vm2, %v1059_v5  ;;  %v935_v11 = vmax.f32 %v871_v33, 0.0  ;;  %v526_v33 = vld [vmem:[%s4487_s1 + $0x170] sm:$0xff] }
 0x1d7   :  { %2663 = vmatmul.msk.bf16.gmra.mxu3 %vm1676_vm3, %v1633_v20 }
 0x1d8   :  { %v2098_v27 = vadd.f32 %v2034_v14, %v1508_v54 }
 0x1d9   :  { %v1257_v58 = vpop.f32.mrf.mxu2  ;;  %v2314_v61 = vpop.f32.mrf.mxu0 }
 0x1da   :  { %v2149_v35 = vpack.c.bf16 %v2098_v27, %v2097_v55  ;;  %v1847_v8 = vpop.f32.mrf.mxu3  ;;  %v2315_v41 = vadd.f32 %v3620_v45, %v2314_v61  ;;  %v1381_v26 = vadd.f32 %v3776_v46, %v1257_v58 }
 0x1db   :  { %v752_v52 = vpop.f32.mrf.mxu1  ;;  %v1971_v19 = vadd.f32 %v3783_v29, %v1847_v8 }
 0x1dc   :  { %2462 = vst.msk [vmem:[%s4493_s13 + $0x40] sm:$0xff] %vm143_vm1, %v2315_v41  ;;  %2694 = vmatmul.msk.bf16.gmra.mxu0 %vm1086_vm2, %v2149_v35  ;;  %v1445_v30 = vmax.f32 %v1381_v26, 0.0  ;;  %v872_v59 = vadd.f32 %v752_v52, %v443_v34  ;;  %v444_v52 = vadd.f32 %v3797_v31, %v3278_v37  ;;  %v445_v26 = vadd.f32 %v3797_v31, %v3287_v47  ;;  %v527_v37 = vld [vmem:[%s4487_s1 + $0x178] sm:$0xff] }
 0x1dd   :  { %v2035_v57 = vmax.f32 %v1971_v19, 0.0  ;;  %v1595_v19 = vld [vmem:[%s4489_s3 + $0x178] sm:$0xff]  ;;  %v567_v42 = vpack.c.bf16 %v527_v37, %v526_v33 }
 0x1de   :  { %v1509_v20 = vadd.f32 %v1445_v30, %v935_v11  ;;  %v936_v40 = vmax.f32 %v872_v59, 0.0  ;;  %v1594_v30 = vld [vmem:[%s4489_s3 + $0x170] sm:$0xff] }
 0x1e0   :  { %v2099_v14 = vadd.f32 %v2035_v57, %v1509_v20 }
 0x1e1   :  { %v1259_v0 = vpop.f32.mrf.mxu2  ;;  %v2316_v62 = vpop.f32.mrf.mxu0 }
 0x1e2   :  { %v1382_v22 = vadd.f32 %v3776_v46, %v1259_v0  ;;  %v1849_v60 = vpop.f32.mrf.mxu3  ;;  %v2317_v9 = vadd.f32 %v3620_v45, %v2316_v62 }
 0x1e3   :  { %v1972_v5 = vadd.f32 %v3783_v29, %v1849_v60  ;;  %v755_v51 = vpop.f32.mrf.mxu1 }
 0x1e4   :  { %v1446_v4 = vmax.f32 %v1382_v22, 0.0  ;;  %2463 = vst.msk [vmem:[%s4493_s13 + $0x48] sm:$0xff] %vm143_vm1, %v2317_v9  ;;  %v873_v34 = vadd.f32 %v755_v51, %v444_v52  ;;  %v1061_v22 = vpack.c.bf16 %v1021_v15, %v1020_v50  ;;  %v1596_v50 = vld [vmem:[%s4489_s3 + $0x180] sm:$0xff]  ;;  %v1597_v15 = vld [vmem:[%s4489_s3 + $0x188] sm:$0xff] }
 0x1e5   :  { %v2036_v54 = vmax.f32 %v1972_v5, 0.0 }
 0x1e6   :  { %v1510_v2 = vadd.f32 %v1446_v4, %v936_v40  ;;  %2576 = vmatmul.msk.bf16.gmra.mxu1 %vm143_vm1, %v566_v63  ;;  %2616 = vmatmul.msk.bf16.gmra.mxu2 %vm1086_vm2, %v1060_v23  ;;  %v937_v0 = vmax.f32 %v873_v34, 0.0  ;;  %v1635_v23 = vpack.c.bf16 %v1595_v19, %v1594_v30  ;;  %v1023_v34 = vld [vmem:[%s4488_s2 + $0x188] sm:$0xff] }
 0x1e7   :  { %2664 = vmatmul.msk.bf16.gmra.mxu3 %vm1676_vm3, %v1634_v36 }
 0x1e8   :  { %v2100_v55 = vadd.f32 %v2036_v54, %v1510_v2 }
 0x1e9   :  { %v1262_v27 = vpop.f32.mrf.mxu2  ;;  %v2319_v58 = vpop.f32.mrf.mxu0 }
 0x1ea   :  { %v2150_v61 = vpack.c.bf16 %v2100_v55, %v2099_v14  ;;  %v1852_v35 = vpop.f32.mrf.mxu3  ;;  %v2320_v8 = vadd.f32 %v3620_v45, %v2319_v58  ;;  %v1383_v12 = vadd.f32 %v3776_v46, %v1262_v27 }
 0x1eb   :  { %v757_v41 = vpop.f32.mrf.mxu1  ;;  %v1973_v47 = vadd.f32 %v3783_v29, %v1852_v35  ;;  %v446_v35 = vadd.f32 %v3797_v31, %v3311_v13  ;;  %v529_v13 = vld [vmem:[%s4487_s1 + $0x188] sm:$0xff] }
 0x1ec   :  { %2464 = vst.msk [vmem:[%s4493_s13 + $0x50] sm:$0xff] %vm143_vm1, %v2320_v8  ;;  %2695 = vmatmul.msk.bf16.gmra.mxu0 %vm1086_vm2, %v2150_v61  ;;  %v1447_v25 = vmax.f32 %v1383_v12, 0.0  ;;  %v874_v18 = vadd.f32 %v757_v41, %v445_v26  ;;  %v447_v41 = vadd.f32 %v3797_v31, %v3320_v24  ;;  %v528_v12 = vld [vmem:[%s4487_s1 + $0x180] sm:$0xff] }
 0x1ed   :  { %v2037_v51 = vmax.f32 %v1973_v47, 0.0  ;;  %v1022_v26 = vld [vmem:[%s4488_s2 + $0x180] sm:$0xff] }
 0x1ee   :  { %v1511_v5 = vadd.f32 %v1447_v25, %v937_v0  ;;  %v938_v36 = vmax.f32 %v874_v18, 0.0  ;;  %v568_v18 = vpack.c.bf16 %v529_v13, %v528_v12  ;;  %v1598_v12 = vld [vmem:[%s4489_s3 + $0x190] sm:$0xff]  ;;  %v1599_v13 = vld [vmem:[%s4489_s3 + $0x198] sm:$0xff] }
 0x1f0   :  { %v2101_v4 = vadd.f32 %v2037_v51, %v1511_v5 }
 0x1f1   :  { %v1264_v59 = vpop.f32.mrf.mxu2  ;;  %v2321_v7 = vpop.f32.mrf.mxu0 }
 0x1f2   :  { %v1384_v62 = vadd.f32 %v3776_v46, %v1264_v59  ;;  %v1854_v63 = vpop.f32.mrf.mxu3  ;;  %v2322_v11 = vadd.f32 %v3620_v45, %v2321_v7 }
 0x1f3   :  { %v1974_v60 = vadd.f32 %v3783_v29, %v1854_v63  ;;  %v760_v9 = vpop.f32.mrf.mxu1  ;;  %v1636_v63 = vpack.c.bf16 %v1597_v15, %v1596_v50 }
 0x1f4   :  { %v1448_v20 = vmax.f32 %v1384_v62, 0.0  ;;  %2465 = vst.msk [vmem:[%s4493_s13 + $0x58] sm:$0xff] %vm143_vm1, %v2322_v11  ;;  %v875_v52 = vadd.f32 %v760_v9, %v446_v35  ;;  %v1024_v35 = vld [vmem:[%s4488_s2 + $0x190] sm:$0xff] }
 0x1f5   :  { %v2038_v40 = vmax.f32 %v1974_v60, 0.0 }
 0x1f6   :  { %v1512_v57 = vadd.f32 %v1448_v20, %v938_v36  ;;  %2577 = vmatmul.msk.bf16.gmra.mxu1 %vm143_vm1, %v567_v42  ;;  %2617 = vmatmul.msk.bf16.gmra.mxu2 %vm1086_vm2, %v1061_v22  ;;  %v939_v30 = vmax.f32 %v875_v52, 0.0  ;;  %v1062_v42 = vpack.c.bf16 %v1023_v34, %v1022_v26 }
 0x1f7   :  { %2665 = vmatmul.msk.bf16.gmra.mxu3 %vm1676_vm3, %v1635_v23 }
 0x1f8   :  { %v2102_v2 = vadd.f32 %v2038_v40, %v1512_v57 }
 0x1f9   :  { %v1267_v54 = vpop.f32.mrf.mxu2  ;;  %v2324_v14 = vpop.f32.mrf.mxu0 }
 0x1fa   :  { %v2151_v55 = vpack.c.bf16 %v2102_v2, %v2101_v4  ;;  %v1857_v27 = vpop.f32.mrf.mxu3  ;;  %v2325_v58 = vadd.f32 %v3620_v45, %v2324_v14  ;;  %v1385_v8 = vadd.f32 %v3776_v46, %v1267_v54  ;;  %v448_v14 = vadd.f32 %v3797_v31, %v3047_v38  ;;  %v531_v38 = vld [vmem:[%s4487_s1 + $0x198] sm:$0xff] }
 0x1fb   :  { %v762_v61 = vpop.f32.mrf.mxu1  ;;  %v1975_v24 = vadd.f32 %v3783_v29, %v1857_v27  ;;  %v449_v27 = vadd.f32 %v3797_v31, %v3077_v49 }
 0x1fc   :  { %2466 = vst.msk [vmem:[%s4493_s13 + $0x60] sm:$0xff] %vm143_vm1, %v2325_v58  ;;  %2696 = vmatmul.msk.bf16.gmra.mxu0 %vm1086_vm2, %v2151_v55  ;;  %v1449_v33 = vmax.f32 %v1385_v8, 0.0  ;;  %v876_v37 = vadd.f32 %v762_v61, %v447_v41  ;;  %v530_v61 = vld [vmem:[%s4487_s1 + $0x190] sm:$0xff]  ;;  %v1025_v8 = vld [vmem:[%s4488_s2 + $0x198] sm:$0xff] }
 0x1fd   :  { %v2039_v22 = vmax.f32 %v1975_v24, 0.0 }
 0x1fe   :  { %v1513_v11 = vadd.f32 %v1449_v33, %v939_v30  ;;  %v940_v60 = vmax.f32 %v876_v37, 0.0  ;;  %v569_v33 = vpack.c.bf16 %v531_v38, %v530_v61  ;;  %v1637_v30 = vpack.c.bf16 %v1599_v13, %v1598_v12 }
 0x200   :  { %v2103_v51 = vadd.f32 %v2039_v22, %v1513_v11 }
 0x201   :  { %v1269_v25 = vpop.f32.mrf.mxu2  ;;  %v2326_v47 = vpop.f32.mrf.mxu0 }
 0x202   :  { %v1386_v19 = vadd.f32 %v3776_v46, %v1269_v25  ;;  %v1859_v59 = vpop.f32.mrf.mxu3  ;;  %v2327_v7 = vadd.f32 %v3620_v45, %v2326_v47  ;;  %v1063_v25 = vpack.c.bf16 %v1025_v8, %v1024_v35 }
 0x203   :  { %v1976_v0 = vadd.f32 %v3783_v29, %v1859_v59  ;;  %v765_v62 = vpop.f32.mrf.mxu1 }
 0x204   :  { %v1450_v9 = vmax.f32 %v1386_v19, 0.0  ;;  %2467 = vst.msk [vmem:[%s4493_s13 + $0x68] sm:$0xff] %vm143_vm1, %v2327_v7  ;;  %v877_v58 = vadd.f32 %v765_v62, %v448_v14 }
 0x205   :  { %v2040_v5 = vmax.f32 %v1976_v0, 0.0 }
 0x206   :  { %v1514_v23 = vadd.f32 %v1450_v9, %v940_v60  ;;  %2578 = vmatmul.msk.bf16.gmra.mxu1 %vm143_vm1, %v568_v18  ;;  %2618 = vmatmul.msk.bf16.gmra.mxu2 %vm1086_vm2, %v1062_v42  ;;  %v941_v24 = vmax.f32 %v877_v58, 0.0  ;;  %v1601_v58 = vld [vmem:[%s4489_s3 + $0x1a8] sm:$0xff] }
 0x207   :  { %2666 = vmatmul.msk.bf16.gmra.mxu3 %vm1676_vm3, %v1636_v63 }
 0x208   :  { %v2104_v36 = vadd.f32 %v2040_v5, %v1514_v23 }
 0x209   :  { %v1272_v20 = vpop.f32.mrf.mxu2  ;;  %v2329_v57 = vpop.f32.mrf.mxu0 }
 0x20a   :  { %v2152_v40 = vpack.c.bf16 %v2104_v36, %v2103_v51  ;;  %v1862_v4 = vpop.f32.mrf.mxu3  ;;  %v2330_v2 = vadd.f32 %v3620_v45, %v2329_v57  ;;  %v1387_v55 = vadd.f32 %v3776_v46, %v1272_v20  ;;  %v450_v36 = vadd.f32 %v3797_v31, %v3087_v56  ;;  %v533_v56 = vld [vmem:[%s4487_s1 + $0x1a8] sm:$0xff] }
 0x20b   :  { %v767_v54 = vpop.f32.mrf.mxu1  ;;  %v1977_v49 = vadd.f32 %v3783_v29, %v1862_v4  ;;  %v451_v57 = vadd.f32 %v3797_v31, %v3117_v3  ;;  %v532_v4 = vld [vmem:[%s4487_s1 + $0x1a0] sm:$0xff] }
 0x20c   :  { %2468 = vst.msk [vmem:[%s4493_s13 + $0x70] sm:$0xff] %vm143_vm1, %v2330_v2  ;;  %2697 = vmatmul.msk.bf16.gmra.mxu0 %vm1086_vm2, %v2152_v40  ;;  %v1451_v41 = vmax.f32 %v1387_v55, 0.0  ;;  %v878_v52 = vadd.f32 %v767_v54, %v449_v27  ;;  %v1026_v2 = vld [vmem:[%s4488_s2 + $0x1a0] sm:$0xff]  ;;  %v1027_v54 = vld [vmem:[%s4488_s2 + $0x1a8] sm:$0xff]  ;;  %v570_v35 = vpack.c.bf16 %v533_v56, %v532_v4 }
 0x20d   :  { %v2041_v59 = vmax.f32 %v1977_v49, 0.0  ;;  %v1600_v27 = vld [vmem:[%s4489_s3 + $0x1a0] sm:$0xff]  ;;  %v1064_v12 = vpack.c.bf16 %v1027_v54, %v1026_v2 }
 0x20e   :  { %v1515_v19 = vadd.f32 %v1451_v41, %v941_v24  ;;  %v942_v7 = vmax.f32 %v878_v52, 0.0 }
 0x210   :  { %v2105_v63 = vadd.f32 %v2041_v59, %v1515_v19 }
 0x211   :  { %v1274_v26 = vpop.f32.mrf.mxu2  ;;  %v2331_v34 = vpop.f32.mrf.mxu0 }
 0x212   :  { %v1388_v37 = vadd.f32 %v3776_v46, %v1274_v26  ;;  %v1864_v50 = vpop.f32.mrf.mxu3  ;;  %v2332_v15 = vadd.f32 %v3620_v45, %v2331_v34  ;;  %v1638_v34 = vpack.c.bf16 %v1601_v58, %v1600_v27 }
 0x213   :  { %v1978_v47 = vadd.f32 %v3783_v29, %v1864_v50  ;;  %v770_v18 = vpop.f32.mrf.mxu1 }
 0x214   :  { %v1452_v42 = vmax.f32 %v1388_v37, 0.0  ;;  %2469 = vst.msk [vmem:[%s4493_s13 + $0x78] sm:$0xff] %vm143_vm1, %v2332_v15  ;;  %v879_v40 = vadd.f32 %v770_v18, %v450_v36  ;;  %v1602_v36 = vld [vmem:[%s4489_s3 + $0x1b0] sm:$0xff] }
 0x215   :  { %v2042_v62 = vmax.f32 %v1978_v47, 0.0 }
 0x216   :  { %v1516_v0 = vadd.f32 %v1452_v42, %v942_v7  ;;  %2579 = vmatmul.msk.bf16.gmra.mxu1 %vm143_vm1, %v569_v33  ;;  %2619 = vmatmul.msk.bf16.gmra.mxu2 %vm1086_vm2, %v1063_v25  ;;  %v943_v8 = vmax.f32 %v879_v40, 0.0 }
 0x217   :  { %2667 = vmatmul.msk.bf16.gmra.mxu3 %vm1676_vm3, %v1637_v30 }
 0x218   :  { %v2106_v11 = vadd.f32 %v2042_v62, %v1516_v0  ;;  %v452_v62 = vadd.f32 %v3797_v31, %v3127_v10  ;;  %v535_v10 = vld [vmem:[%s4487_s1 + $0x1b8] sm:$0xff] }
 0x219   :  { %v1277_v22 = vpop.f32.mrf.mxu2  ;;  %v2334_v60 = vpop.f32.mrf.mxu0 }
 0x21a   :  { %v2153_v9 = vpack.c.bf16 %v2106_v11, %v2105_v63  ;;  %v1867_v23 = vpop.f32.mrf.mxu3  ;;  %v2335_v5 = vadd.f32 %v3620_v45, %v2334_v60  ;;  %v1389_v20 = vadd.f32 %v3776_v46, %v1277_v22  ;;  %v453_v11 = vadd.f32 %v3797_v31, %v3157_v21  ;;  %v534_v60 = vld [vmem:[%s4487_s1 + $0x1b0] sm:$0xff] }
 0x21b   :  { %v772_v51 = vpop.f32.mrf.mxu1  ;;  %v1979_v3 = vadd.f32 %v3783_v29, %v1867_v23  ;;  %v1029_v23 = vld [vmem:[%s4488_s2 + $0x1b8] sm:$0xff]  ;;  %v571_v4 = vpack.c.bf16 %v535_v10, %v534_v60 }
 0x21c   :  { %2470 = vst.msk [vmem:[%s4493_s13 + $0x80] sm:$0xff] %vm143_vm1, %v2335_v5  ;;  %2698 = vmatmul.msk.bf16.gmra.mxu0 %vm1086_vm2, %v2153_v9  ;;  %v1453_v14 = vmax.f32 %v1389_v20, 0.0  ;;  %v880_v55 = vadd.f32 %v772_v51, %v451_v57  ;;  %v1028_v9 = vld [vmem:[%s4488_s2 + $0x1b0] sm:$0xff]  ;;  %v1603_v20 = vld [vmem:[%s4489_s3 + $0x1b8] sm:$0xff] }
 0x21d   :  { %v2043_v24 = vmax.f32 %v1979_v3, 0.0  ;;  %v1065_v3 = vpack.c.bf16 %v1029_v23, %v1028_v9  ;;  %v1639_v58 = vpack.c.bf16 %v1603_v20, %v1602_v36 }
 0x21e   :  { %v1517_v33 = vadd.f32 %v1453_v14, %v943_v8  ;;  %v944_v37 = vmax.f32 %v880_v55, 0.0 }
 0x220   :  { %v2107_v47 = vadd.f32 %v2043_v24, %v1517_v33 }
 0x221   :  { %v1279_v61 = vpop.f32.mrf.mxu2  ;;  %v2336_v38 = vpop.f32.mrf.mxu0 }
 0x222   :  { %v1390_v41 = vadd.f32 %v3776_v46, %v1279_v61  ;;  %v1869_v49 = vpop.f32.mrf.mxu3  ;;  %v2337_v52 = vadd.f32 %v3620_v45, %v2336_v38 }
 0x223   :  { %v1980_v13 = vadd.f32 %v3783_v29, %v1869_v49  ;;  %v775_v26 = vpop.f32.mrf.mxu1 }
 0x224   :  { %v1454_v50 = vmax.f32 %v1390_v41, 0.0  ;;  %2471 = vst.msk [vmem:[%s4493_s13 + $0x88] sm:$0xff] %vm143_vm1, %v2337_v52  ;;  %v881_v22 = vadd.f32 %v775_v26, %v452_v62 }
 0x225   :  { %v2044_v25 = vmax.f32 %v1980_v13, 0.0 }
 0x226   :  { %v1518_v15 = vadd.f32 %v1454_v50, %v944_v37  ;;  %2580 = vmatmul.msk.bf16.gmra.mxu1 %vm143_vm1, %v570_v35  ;;  %2620 = vmatmul.msk.bf16.gmra.mxu2 %vm1086_vm2, %v1064_v12  ;;  %v945_v56 = vmax.f32 %v881_v22, 0.0  ;;  %v454_v50 = vadd.f32 %v3797_v31, %v3167_v28  ;;  %v537_v28 = vld [vmem:[%s4487_s1 + $0x1c8] sm:$0xff] }
 0x227   :  { %2668 = vmatmul.msk.bf16.gmra.mxu3 %vm1676_vm3, %v1638_v34 }
 0x228   :  { %v2108_v18 = vadd.f32 %v2044_v25, %v1518_v15  ;;  %v455_v25 = vadd.f32 %v3797_v31, %v3200_v44 }
 0x229   :  { %v1282_v30 = vpop.f32.mrf.mxu2  ;;  %v2339_v19 = vpop.f32.mrf.mxu0 }
 0x22a   :  { %v2154_v59 = vpack.c.bf16 %v2108_v18, %v2107_v47  ;;  %v1872_v7 = vpop.f32.mrf.mxu3  ;;  %v2340_v42 = vadd.f32 %v3620_v45, %v2339_v19  ;;  %v1391_v63 = vadd.f32 %v3776_v46, %v1282_v30  ;;  %v536_v18 = vld [vmem:[%s4487_s1 + $0x1c0] sm:$0xff]  ;;  %v1031_v19 = vld [vmem:[%s4488_s2 + $0x1c8] sm:$0xff] }
 0x22b   :  { %v777_v0 = vpop.f32.mrf.mxu1  ;;  %v1981_v21 = vadd.f32 %v3783_v29, %v1872_v7  ;;  %v1030_v30 = vld [vmem:[%s4488_s2 + $0x1c0] sm:$0xff] }
 0x22c   :  { %2472 = vst.msk [vmem:[%s4493_s13 + $0x90] sm:$0xff] %vm143_vm1, %v2340_v42  ;;  %2699 = vmatmul.msk.bf16.gmra.mxu0 %vm1086_vm2, %v2154_v59  ;;  %v1455_v5 = vmax.f32 %v1391_v63, 0.0  ;;  %v882_v51 = vadd.f32 %v777_v0, %v453_v11  ;;  %v1604_v42 = vld [vmem:[%s4489_s3 + $0x1c0] sm:$0xff]  ;;  %v1605_v0 = vld [vmem:[%s4489_s3 + $0x1c8] sm:$0xff]  ;;  %v572_v11 = vpack.c.bf16 %v537_v28, %v536_v18  ;;  %v1066_v23 = vpack.c.bf16 %v1031_v19, %v1030_v30 }
 0x22d   :  { %v2045_v38 = vmax.f32 %v1981_v21, 0.0 }
 0x22e   :  { %v1519_v61 = vadd.f32 %v1455_v5, %v945_v56  ;;  %v946_v35 = vmax.f32 %v882_v51, 0.0  ;;  %v1640_v51 = vpack.c.bf16 %v1605_v0, %v1604_v42 }
 0x230   :  { %v2109_v52 = vadd.f32 %v2045_v38, %v1519_v61  ;;  %v456_v38 = vadd.f32 %v3797_v31, %v3210_v53  ;;  %v539_v53 = vld [vmem:[%s4487_s1 + $0x1d8] sm:$0xff] }
 0x231   :  { %v1284_v57 = vpop.f32.mrf.mxu2  ;;  %v2341_v40 = vpop.f32.mrf.mxu0 }
 0x232   :  { %v1392_v2 = vadd.f32 %v3776_v46, %v1284_v57  ;;  %v1874_v54 = vpop.f32.mrf.mxu3  ;;  %v2342_v14 = vadd.f32 %v3620_v45, %v2341_v40 }
 0x233   :  { %v1982_v55 = vadd.f32 %v3783_v29, %v1874_v54  ;;  %v780_v27 = vpop.f32.mrf.mxu1 }
 0x234   :  { %v1456_v8 = vmax.f32 %v1392_v2, 0.0  ;;  %2473 = vst.msk [vmem:[%s4493_s13 + $0x98] sm:$0xff] %vm143_vm1, %v2342_v14  ;;  %v883_v47 = vadd.f32 %v780_v27, %v454_v50 }
 0x235   :  { %v2046_v49 = vmax.f32 %v1982_v55, 0.0 }
 0x236   :  { %v1520_v41 = vadd.f32 %v1456_v8, %v946_v35  ;;  %2581 = vmatmul.msk.bf16.gmra.mxu1 %vm143_vm1, %v571_v4  ;;  %2621 = vmatmul.msk.bf16.gmra.mxu2 %vm1086_vm2, %v1065_v3  ;;  %v947_v22 = vmax.f32 %v883_v47, 0.0  ;;  %v457_v8 = vadd.f32 %v3797_v31, %v3240_v6  ;;  %v4112_v47 = vld [vmem:[%s4492_s12] ss:$0 sm:$0xff] }
 0x237   :  { %2669 = vmatmul.msk.bf16.gmra.mxu3 %vm1676_vm3, %v1639_v58 }
 0x238   :  { %v2110_v12 = vadd.f32 %v2046_v49, %v1520_v41  ;;  %v1032_v49 = vld [vmem:[%s4488_s2 + $0x1d0] sm:$0xff] }
 0x239   :  { %v1287_v13 = vpop.f32.mrf.mxu2  ;;  %v2344_v26 = vpop.f32.mrf.mxu0 }
 0x23a   :  { %v2155_v34 = vpack.c.bf16 %v2110_v12, %v2109_v52  ;;  %v1877_v33 = vpop.f32.mrf.mxu3  ;;  %v2345_v24 = vadd.f32 %v3620_v45, %v2344_v26  ;;  %v1393_v15 = vadd.f32 %v3776_v46, %v1287_v13  ;;  %v1033_v52 = vld [vmem:[%s4488_s2 + $0x1d8] sm:$0xff]  ;;  %v1606_v26 = vld [vmem:[%s4489_s3 + $0x1d0] sm:$0xff] }
 0x23b   :  { %v782_v37 = vpop.f32.mrf.mxu1  ;;  %v1983_v44 = vadd.f32 %v3783_v29, %v1877_v33  ;;  %v1067_v28 = vpack.c.bf16 %v1033_v52, %v1032_v49 }
 0x23c   :  { %2474 = vst.msk [vmem:[%s4493_s13 + $0xa0] sm:$0xff] %vm143_vm1, %v2345_v24  ;;  %2700 = vmatmul.msk.bf16.gmra.mxu0 %vm1086_vm2, %v2155_v34  ;;  %v1457_v59 = vmax.f32 %v1393_v15, 0.0  ;;  %v884_v7 = vadd.f32 %v782_v37, %v455_v25  ;;  %v1607_v34 = vld [vmem:[%s4489_s3 + $0x1d8] sm:$0xff] }
 0x23d   :  { %v2047_v20 = vmax.f32 %v1983_v44, 0.0 }
 0x23e   :  { %v1521_v36 = vadd.f32 %v1457_v59, %v947_v22  ;;  %v948_v57 = vmax.f32 %v884_v7, 0.0  ;;  %v1641_v59 = vpack.c.bf16 %v1607_v34, %v1606_v26 }
 0x240   :  { %v2111_v2 = vadd.f32 %v2047_v20, %v1521_v36  ;;  %v459_v20 = vadd.f32 %v3797_v31, %v3274_v32 }
 0x241   :  { %v1289_v62 = vpop.f32.mrf.mxu2  ;;  %v2346_v63 = vpop.f32.mrf.mxu0 }
 0x242   :  { %v1394_v60 = vadd.f32 %v3776_v46, %v1289_v62  ;;  %v1879_v10 = vpop.f32.mrf.mxu3  ;;  %v2347_v9 = vadd.f32 %v3620_v45, %v2346_v63 }
 0x243   :  { %v1984_v5 = vadd.f32 %v3783_v29, %v1879_v10  ;;  %v785_v21 = vpop.f32.mrf.mxu1 }
 0x244   :  { %v1458_v40 = vmax.f32 %v1394_v60, 0.0  ;;  %2475 = vst.msk [vmem:[%s4493_s13 + $0xa8] sm:$0xff] %vm143_vm1, %v2347_v9  ;;  %v885_v41 = vadd.f32 %v785_v21, %v456_v38 }
 0x245   :  { %v2048_v56 = vmax.f32 %v1984_v5, 0.0 }
 0x246   :  { %v1522_v4 = vadd.f32 %v1458_v40, %v948_v57  ;;  %2582 = vmatmul.msk.bf16.gmra.mxu1 %vm143_vm1, %v572_v11  ;;  %2622 = vmatmul.msk.bf16.gmra.mxu2 %vm1086_vm2, %v1066_v23  ;;  %v949_v50 = vmax.f32 %v885_v41, 0.0  ;;  %v540_v40 = vld [vmem:[%s4487_s1 + $0x1e0] sm:$0xff] }
 0x247   :  { %2670 = vmatmul.msk.bf16.gmra.mxu3 %vm1676_vm3, %v1640_v51  ;;  %v458_v51 = vadd.f32 %v3797_v31, %v3250_v17  ;;  %v541_v17 = vld [vmem:[%s4487_s1 + $0x1e8] sm:$0xff] }
 0x248   :  { %v2112_v54 = vadd.f32 %v2048_v56, %v1522_v4  ;;  %v1034_v4 = vld [vmem:[%s4488_s2 + $0x1e0] sm:$0xff]  ;;  %v1035_v56 = vld [vmem:[%s4488_s2 + $0x1e8] sm:$0xff] }
 0x249   :  { %v1292_v14 = vpop.f32.mrf.mxu2  ;;  %v2349_v3 = vpop.f32.mrf.mxu0  ;;  %v1068_v41 = vpack.c.bf16 %v1035_v56, %v1034_v4 }
 0x24a   :  { %v2156_v55 = vpack.c.bf16 %v2112_v54, %v2111_v2  ;;  %v1882_v27 = vpop.f32.mrf.mxu3  ;;  %v2350_v58 = vadd.f32 %v3620_v45, %v2349_v3  ;;  %v1395_v35 = vadd.f32 %v3776_v46, %v1292_v14  ;;  %v538_v45 = vld [vmem:[%s4487_s1 + $0x1d0] sm:$0xff]  ;;  %v1608_v14 = vld [vmem:[%s4489_s3 + $0x1e0] sm:$0xff]  ;;  %v1609_v3 = vld [vmem:[%s4489_s3 + $0x1e8] sm:$0xff] }
 0x24b   :  { %v787_v61 = vpop.f32.mrf.mxu1  ;;  %v1985_v6 = vadd.f32 %v3783_v29, %v1882_v27  ;;  %v573_v37 = vpack.c.bf16 %v539_v53, %v538_v45  ;;  %v1642_v49 = vpack.c.bf16 %v1609_v3, %v1608_v14 }
 0x24c   :  { %2476 = vst.msk [vmem:[%s4493_s13 + $0xb0] sm:$0xff] %vm143_vm1, %v2350_v58  ;;  %2701 = vmatmul.msk.bf16.gmra.mxu0 %vm1086_vm2, %v2156_v55  ;;  %v1459_v12 = vmax.f32 %v1395_v35, 0.0  ;;  %v886_v13 = vadd.f32 %v787_v61, %v457_v8  ;;  %v574_v58 = vpack.c.bf16 %v541_v17, %v540_v40 }
 0x24d   :  { %v2049_v7 = vmax.f32 %v1985_v6, 0.0 }
 0x24e   :  { %v1523_v44 = vadd.f32 %v1459_v12, %v949_v50  ;;  %v950_v42 = vmax.f32 %v886_v13, 0.0 }
 0x250   :  { %v2113_v11 = vadd.f32 %v2049_v7, %v1523_v44  ;;  %v542_v7 = vld [vmem:[%s4487_s1 + $0x1f0] sm:$0xff] }
 0x251   :  { %v1294_v33 = vpop.f32.mrf.mxu2  ;;  %v2351_v24 = vpop.f32.mrf.mxu0 }
 0x252   :  { %v1396_v15 = vadd.f32 %v3776_v46, %v1294_v33  ;;  %v1884_v25 = vpop.f32.mrf.mxu3  ;;  %v2352_v18 = vadd.f32 %v4112_v47, %v2351_v24 }
 0x253   :  { %v1986_v30 = vadd.f32 %v3783_v29, %v1884_v25  ;;  %v790_v19 = vpop.f32.mrf.mxu1 }
 0x254   :  { %v1460_v0 = vmax.f32 %v1396_v15, 0.0  ;;  %2477 = vst.msk [vmem:[%s4493_s13 + $0xb8] sm:$0xff] %vm143_vm1, %v2352_v18  ;;  %v887_v57 = vadd.f32 %v790_v19, %v458_v51 }
 0x255   :  { %v2050_v63 = vmax.f32 %v1986_v30, 0.0  ;;  %v460_v30 = vadd.f32 %v3797_v31, %v3283_v43  ;;  %v543_v43 = vld [vmem:[%s4487_s1 + $0x1f8] sm:$0xff] }
 0x256   :  { %v1524_v62 = vadd.f32 %v1460_v0, %v950_v42  ;;  %2583 = vmatmul.msk.bf16.gmra.mxu1 %vm143_vm1, %v573_v37  ;;  %2623 = vmatmul.msk.bf16.gmra.mxu2 %vm1086_vm2, %v1067_v28  ;;  %v951_v61 = vmax.f32 %v887_v57, 0.0  ;;  %v1036_v42 = vld [vmem:[%s4488_s2 + $0x1f0] sm:$0xff]  ;;  %v1037_v0 = vld [vmem:[%s4488_s2 + $0x1f8] sm:$0xff] }
 0x257   :  { %2671 = vmatmul.msk.bf16.gmra.mxu3 %vm1676_vm3, %v1641_v59  ;;  %v461_v59 = vadd.f32 %v3797_v31, %v3307_v1 }
 0x258   :  { %v2114_v22 = vadd.f32 %v2050_v63, %v1524_v62 }
 0x259   :  { %v1297_v60 = vpop.f32.mrf.mxu2  ;;  %v2354_v10 = vpop.f32.mrf.mxu0 }
 0x25a   :  { %v2157_v9 = vpack.c.bf16 %v2114_v22, %v2113_v11  ;;  %v1887_v23 = vpop.f32.mrf.mxu3  ;;  %v2355_v5 = vadd.f32 %v4112_v47, %v2354_v10  ;;  %v1397_v36 = vadd.f32 %v3776_v46, %v1297_v60  ;;  %v1610_v11 = vld [vmem:[%s4489_s3 + $0x1f0] sm:$0xff]  ;;  %v1611_v22 = vld [vmem:[%s4489_s3 + $0x1f8] sm:$0xff] }
 0x25b   :  { %v792_v21 = vpop.f32.mrf.mxu1  ;;  %v1987_v32 = vadd.f32 %v3783_v29, %v1887_v23  ;;  %v1643_v40 = vpack.c.bf16 %v1611_v22, %v1610_v11 }
 0x25c   :  { %2478 = vst.msk [vmem:[%s4493_s13 + $0xc0] sm:$0xff] %vm143_vm1, %v2355_v5  ;;  %2702 = vmatmul.msk.bf16.gmra.mxu0 %vm1086_vm2, %v2157_v9  ;;  %v1461_v2 = vmax.f32 %v1397_v36, 0.0  ;;  %v888_v54 = vadd.f32 %v792_v21, %v459_v20  ;;  %v575_v9 = vpack.c.bf16 %v543_v43, %v542_v7  ;;  %v1069_v36 = vpack.c.bf16 %v1037_v0, %v1036_v42 }
 0x25d   :  { %v2051_v12 = vmax.f32 %v1987_v32, 0.0 }
 0x25e   :  { %v1525_v52 = vadd.f32 %v1461_v2, %v951_v61  ;;  %v952_v6 = vmax.f32 %v888_v54, 0.0 }
 0x260   :  { %v2115_v33 = vadd.f32 %v2051_v12, %v1525_v52 }
 0x261   :  { %v1299_v55 = vpop.f32.mrf.mxu2  ;;  %v2356_v27 = vpop.f32.mrf.mxu0 }
 0x262   :  { %v1398_v38 = vadd.f32 %v3776_v46, %v1299_v55  ;;  %v1889_v35 = vpop.f32.mrf.mxu3  ;;  %v2357_v8 = vadd.f32 %v4112_v47, %v2356_v27 }
 0x263   :  { %v1988_v45 = vadd.f32 %v3783_v29, %v1889_v35  ;;  %v795_v53 = vpop.f32.mrf.mxu1 }
 0x264   :  { %v1462_v13 = vmax.f32 %v1398_v38, 0.0  ;;  %2479 = vst.msk [vmem:[%s4493_s13 + $0xc8] sm:$0xff] %vm143_vm1, %v2357_v8  ;;  %v889_v44 = vadd.f32 %v795_v53, %v460_v30  ;;  %v462_v8 = vadd.f32 %v3797_v31, %v3316_v16 }
 0x265   :  { %v2052_v34 = vmax.f32 %v1988_v45, 0.0  ;;  %v463_v45 = vadd.f32 %v3797_v31, %v3340_v48 }
 0x266   :  { %v1526_v26 = vadd.f32 %v1462_v13, %v952_v6  ;;  %2584 = vmatmul.msk.bf16.gmra.mxu1 %vm143_vm1, %v574_v58  ;;  %2624 = vmatmul.msk.bf16.gmra.mxu2 %vm1086_vm2, %v1068_v41  ;;  %v953_v23 = vmax.f32 %v889_v44, 0.0 }
 0x267   :  { %2672 = vmatmul.msk.bf16.gmra.mxu3 %vm1676_vm3, %v1642_v49 }
 0x268   :  { %v2116_v24 = vadd.f32 %v2052_v34, %v1526_v26 }
 0x269   :  { %v1302_v37 = vpop.f32.mrf.mxu2  ;;  %v2359_v50 = vpop.f32.mrf.mxu0 }
 0x26a   :  { %v2158_v15 = vpack.c.bf16 %v2116_v24, %v2115_v33  ;;  %v1892_v25 = vpop.f32.mrf.mxu3  ;;  %v2360_v18 = vadd.f32 %v4112_v47, %v2359_v50  ;;  %v1399_v19 = vadd.f32 %v3776_v46, %v1302_v37 }
 0x26b   :  { %v797_v28 = vpop.f32.mrf.mxu1  ;;  %v1989_v1 = vadd.f32 %v3783_v29, %v1892_v25 }
 0x26c   :  { %2480 = vst.msk [vmem:[%s4493_s13 + $0xd0] sm:$0xff] %vm143_vm1, %v2360_v18  ;;  %2703 = vmatmul.msk.bf16.gmra.mxu0 %vm1086_vm2, %v2158_v15  ;;  %v1463_v62 = vmax.f32 %v1399_v19, 0.0  ;;  %v890_v63 = vadd.f32 %v797_v28, %v461_v59 }
 0x26d   :  { %v2053_v4 = vmax.f32 %v1989_v1, 0.0 }
 0x26e   :  { %v1527_v17 = vadd.f32 %v1463_v62, %v953_v23  ;;  %v954_v56 = vmax.f32 %v890_v63, 0.0  ;;  %v464_v62 = vadd.f32 %v3797_v31, %v3049_v39  ;;  %v4509_v63 = vld [vmem:[#allocation2_spill] sm:$0xff] }
 0x26f   :  { %v465_v11 = vadd.f32 %v3797_v31, %v4509_v63 }
 0x270   :  { %v2117_v14 = vadd.f32 %v2053_v4, %v1527_v17 }
 0x271   :  { %v1304_v60 = vpop.f32.mrf.mxu2  ;;  %v2361_v10 = vpop.f32.mrf.mxu0 }
 0x272   :  { %v1400_v5 = vadd.f32 %v3776_v46, %v1304_v60  ;;  %v1894_v21 = vpop.f32.mrf.mxu3  ;;  %v2362_v51 = vadd.f32 %v4112_v47, %v2361_v10 }
 0x273   :  { %v1990_v20 = vadd.f32 %v3783_v29, %v1894_v21  ;;  %v800_v57 = vpop.f32.mrf.mxu1 }
 0x274   :  { %v1464_v2 = vmax.f32 %v1400_v5, 0.0  ;;  %2481 = vst.msk [vmem:[%s4493_s13 + $0xd8] sm:$0xff] %vm143_vm1, %v2362_v51  ;;  %v891_v53 = vadd.f32 %v800_v57, %v462_v8 }
 0x275   :  { %v2054_v54 = vmax.f32 %v1990_v20, 0.0 }
 0x276   :  { %v1528_v32 = vadd.f32 %v1464_v2, %v954_v56  ;;  %2585 = vmatmul.msk.bf16.gmra.mxu1 %vm143_vm1, %v575_v9  ;;  %2625 = vmatmul.msk.bf16.gmra.mxu2 %vm1086_vm2, %v1069_v36  ;;  %v955_v16 = vmax.f32 %v891_v53, 0.0 }
 0x277   :  { %2673 = vmatmul.msk.bf16.gmra.mxu3 %vm1676_vm3, %v1643_v40 }
 0x278   :  { %v2118_v3 = vadd.f32 %v2054_v54, %v1528_v32 }
 0x279   :  { %v1307_v55 = vpop.f32.mrf.mxu2  ;;  %v2364_v27 = vpop.f32.mrf.mxu0 }
 0x27a   :  { %v2159_v58 = vpack.c.bf16 %v2118_v3, %v2117_v14  ;;  %v1897_v61 = vpop.f32.mrf.mxu3  ;;  %v2365_v38 = vadd.f32 %v4112_v47, %v2364_v27  ;;  %v1401_v41 = vadd.f32 %v3776_v46, %v1307_v55 }
 0x27b   :  { %v802_v35 = vpop.f32.mrf.mxu1  ;;  %v1991_v52 = vadd.f32 %v3783_v29, %v1897_v61  ;;  %v4510_v61 = vld [vmem:[#allocation3_spill] sm:$0xff] }
 0x27c   :  { %2482 = vst.msk [vmem:[%s4493_s13 + $0xe0] sm:$0xff] %vm143_vm1, %v2365_v38  ;;  %2704 = vmatmul.msk.bf16.gmra.mxu0 %vm1086_vm2, %v2159_v58  ;;  %v1465_v49 = vmax.f32 %v1401_v41, 0.0  ;;  %v892_v12 = vadd.f32 %v802_v35, %v463_v45  ;;  %v466_v38 = vadd.f32 %v3797_v31, %v4510_v61  ;;  %v4247_v35 = vld [vmem:[%s4490_s9] ss:$0 sm:$0xff]  ;;  %v4511_v41 = vld [vmem:[#allocation4_spill] sm:$0xff] }
 0x27d   :  { %v2055_v15 = vmax.f32 %v1991_v52, 0.0  ;;  %v467_v45 = vadd.f32 %v3797_v31, %v4511_v41  ;;  %v4260_v52 = vld [vmem:[%s4491_s10] ss:$0 sm:$0xff] }
 0x27e   :  { %v1529_v50 = vadd.f32 %v1465_v49, %v955_v16  ;;  %v956_v25 = vmax.f32 %v892_v12, 0.0 }
 0x280   :  { %v2119_v30 = vadd.f32 %v2055_v15, %v1529_v50 }
 0x281   :  { %v1309_v6 = vpop.f32.mrf.mxu2  ;;  %v2366_v13 = vpop.f32.mrf.mxu0 }
 0x282   :  { %v1402_v26 = vadd.f32 %v3776_v46, %v1309_v6  ;;  %v1899_v34 = vpop.f32.mrf.mxu3  ;;  %v2367_v33 = vadd.f32 %v4112_v47, %v2366_v13 }
 0x283   :  { %v1992_v24 = vadd.f32 %v3783_v29, %v1899_v34  ;;  %v805_v37 = vpop.f32.mrf.mxu1 }
 0x284   :  { %v1466_v48 = vmax.f32 %v1402_v26, 0.0  ;;  %2483 = vst.msk [vmem:[%s4493_s13 + $0xe8] sm:$0xff] %vm143_vm1, %v2367_v33  ;;  %v893_v22 = vadd.f32 %v805_v37, %v464_v62  ;;  %v4274_v62 = vld [vmem:[%s4485_s8] ss:$0 sm:$0xff] }
 0x285   :  { %v2056_v28 = vmax.f32 %v1992_v24, 0.0 }
 0x286   :  { %v1530_v18 = vadd.f32 %v1466_v48, %v956_v25  ;;  %v957_v39 = vmax.f32 %v893_v22, 0.0  ;;  %v4513_v22 = vld [vmem:[#allocation6_spill] sm:$0xff] }
 0x288   :  { %v2120_v19 = vadd.f32 %v2056_v28, %v1530_v18 }
 0x289   :  { %v1312_v59 = vpop.f32.mrf.mxu2  ;;  %v2369_v44 = vpop.f32.mrf.mxu0 }
 0x28a   :  { %v2160_v7 = vpack.c.bf16 %v2120_v19, %v2119_v30  ;;  %v1902_v43 = vpop.f32.mrf.mxu3  ;;  %v2370_v42 = vadd.f32 %v4112_v47, %v2369_v44  ;;  %v1403_v1 = vadd.f32 %v3776_v46, %v1312_v59 }
 0x28b   :  { %v807_v0 = vpop.f32.mrf.mxu1  ;;  %v1993_v10 = vadd.f32 %v3783_v29, %v1902_v43 }
 0x28c   :  { %2484 = vst.msk [vmem:[%s4493_s13 + $0xf0] sm:$0xff] %vm143_vm1, %v2370_v42  ;;  %2705 = vmatmul.msk.bf16.gmra.mxu0 %vm1086_vm2, %v2160_v7  ;;  %v1467_v60 = vmax.f32 %v1403_v1, 0.0  ;;  %v894_v9 = vadd.f32 %v807_v0, %v465_v11  ;;  %v4512_v1 = vld [vmem:[#allocation5_spill] sm:$0xff] }
 0x28d   :  { %v2057_v17 = vmax.f32 %v1993_v10, 0.0  ;;  %v468_v63 = vadd.f32 %v4274_v62, %v4512_v1 }
 0x28e   :  { %v1531_v40 = vadd.f32 %v1467_v60, %v957_v39  ;;  %v958_v4 = vmax.f32 %v894_v9, 0.0  ;;  %v469_v60 = vadd.f32 %v4274_v62, %v4513_v22 }
 0x290   :  { %v2121_v54 = vadd.f32 %v2057_v17, %v1531_v40 }
 0x291   :  { %v1314_v23 = vpop.f32.mrf.mxu2  ;;  %v2371_v5 = vpop.f32.mrf.mxu0 }
 0x292   :  { %v1404_v21 = vadd.f32 %v3776_v46, %v1314_v23  ;;  %v1904_v51 = vpop.f32.mrf.mxu3  ;;  %v2372_v36 = vadd.f32 %v4112_v47, %v2371_v5 }
 0x293   :  { %v1994_v20 = vadd.f32 %v3783_v29, %v1904_v51  ;;  %v810_v57 = vpop.f32.mrf.mxu1 }
 0x294   :  { %v1468_v56 = vmax.f32 %v1404_v21, 0.0  ;;  %2485 = vst.msk [vmem:[%s4493_s13 + $0xf8] sm:$0xff] %vm143_vm1, %v2372_v36  ;;  %v895_v53 = vadd.f32 %v810_v57, %v466_v38 }
 0x295   :  { %v2058_v32 = vmax.f32 %v1994_v20, 0.0 }
 0x296   :  { %v1532_v2 = vadd.f32 %v1468_v56, %v958_v4  ;;  %v959_v26 = vmax.f32 %v895_v53, 0.0  ;;  %v4515_v53 = vld [vmem:[#allocation8_spill] sm:$0xff] }
 0x298   :  { %v2122_v14 = vadd.f32 %v2058_v32, %v1532_v2 }
 0x299   :  { %v1317_v46 = vpop.f32.mrf.mxu2  ;;  %v2374_v3 = vpop.f32.mrf.mxu0 }
 0x29a   :  { %v2161_v55 = vpack.c.bf16 %v2122_v14, %v2121_v54  ;;  %v1907_v27 = vpop.f32.mrf.mxu3  ;;  %v2375_v29 = vadd.f32 %v4112_v47, %v2374_v3  ;;  %v1405_v8 = vadd.f32 %v4247_v35, %v1317_v46 }
 0x29b   :  { %v812_v58 = vpop.f32.mrf.mxu1  ;;  %v1995_v12 = vadd.f32 %v4260_v52, %v1907_v27 }
 0x29c   :  { %2486 = vst.msk [vmem:[%s4493_s13 + $0x100] sm:$0xff] %vm143_vm1, %v2375_v29  ;;  %2706 = vmatmul.msk.bf16.gmra.mxu0 %vm1086_vm2, %v2161_v55  ;;  %v1469_v49 = vmax.f32 %v1405_v8, 0.0  ;;  %v896_v6 = vadd.f32 %v812_v58, %v467_v45  ;;  %v4514_v8 = vld [vmem:[#allocation7_spill] sm:$0xff] }
 0x29d   :  { %v2059_v15 = vmax.f32 %v1995_v12, 0.0  ;;  %v470_v41 = vadd.f32 %v4274_v62, %v4514_v8 }
 0x29e   :  { %v1533_v50 = vadd.f32 %v1469_v49, %v959_v26  ;;  %v960_v25 = vmax.f32 %v896_v6, 0.0  ;;  %v471_v49 = vadd.f32 %v4274_v62, %v4515_v53 }
 0x2a0   :  { %v2123_v30 = vadd.f32 %v2059_v15, %v1533_v50 }
 0x2a1   :  { %v1319_v13 = vpop.f32.mrf.mxu2  ;;  %v2376_v16 = vpop.f32.mrf.mxu0 }
 0x2a2   :  { %v1406_v34 = vadd.f32 %v4247_v35, %v1319_v13  ;;  %v1909_v33 = vpop.f32.mrf.mxu3  ;;  %v2377_v24 = vadd.f32 %v4112_v47, %v2376_v16 }
 0x2a3   :  { %v1996_v31 = vadd.f32 %v4260_v52, %v1909_v33  ;;  %v815_v37 = vpop.f32.mrf.mxu1 }
 0x2a4   :  { %v1470_v48 = vmax.f32 %v1406_v34, 0.0  ;;  %2487 = vst.msk [vmem:[%s4493_s13 + $0x108] sm:$0xff] %vm143_vm1, %v2377_v24  ;;  %v897_v10 = vadd.f32 %v815_v37, %v468_v63 }
 0x2a5   :  { %v2060_v28 = vmax.f32 %v1996_v31, 0.0 }
 0x2a6   :  { %v1534_v18 = vadd.f32 %v1470_v48, %v960_v25  ;;  %v961_v51 = vmax.f32 %v897_v10, 0.0  ;;  %v4517_v10 = vld [vmem:[#allocation10_spill] sm:$0xff] }
 0x2a8   :  { %v2124_v19 = vadd.f32 %v2060_v28, %v1534_v18 }
 0x2a9   :  { %v1322_v59 = vpop.f32.mrf.mxu2  ;;  %v2379_v44 = vpop.f32.mrf.mxu0 }
 0x2aa   :  { %v2162_v7 = vpack.c.bf16 %v2124_v19, %v2123_v30  ;;  %v1912_v43 = vpop.f32.mrf.mxu3  ;;  %v2380_v42 = vadd.f32 %v4112_v47, %v2379_v44  ;;  %v1407_v11 = vadd.f32 %v4247_v35, %v1322_v59 }
 0x2ab   :  { %v817_v0 = vpop.f32.mrf.mxu1  ;;  %v1997_v23 = vadd.f32 %v4260_v52, %v1912_v43 }
 0x2ac   :  { %2488 = vst.msk [vmem:[%s4493_s13 + $0x110] sm:$0xff] %vm143_vm1, %v2380_v42  ;;  %2707 = vmatmul.msk.bf16.gmra.mxu0 %vm1086_vm2, %v2162_v7  ;;  %v1471_v9 = vmax.f32 %v1407_v11, 0.0  ;;  %v898_v5 = vadd.f32 %v817_v0, %v469_v60  ;;  %v4516_v11 = vld [vmem:[#allocation9_spill] sm:$0xff] }
 0x2ad   :  { %v2061_v56 = vmax.f32 %v1997_v23, 0.0  ;;  %v472_v22 = vadd.f32 %v4274_v62, %v4516_v11 }
 0x2ae   :  { %v1535_v4 = vadd.f32 %v1471_v9, %v961_v51  ;;  %v962_v2 = vmax.f32 %v898_v5, 0.0  ;;  %v473_v9 = vadd.f32 %v4274_v62, %v4517_v10 }
 0x2b0   :  { %v2125_v46 = vadd.f32 %v2061_v56, %v1535_v4 }
 0x2b1   :  { %v1324_v39 = vpop.f32.mrf.mxu2  ;;  %v2381_v21 = vpop.f32.mrf.mxu0 }
 0x2b2   :  { %v1408_v36 = vadd.f32 %v4247_v35, %v1324_v39  ;;  %v1914_v20 = vpop.f32.mrf.mxu3  ;;  %v2382_v57 = vadd.f32 %v4112_v47, %v2381_v21 }
 0x2b3   :  { %v1998_v40 = vadd.f32 %v4260_v52, %v1914_v20  ;;  %v820_v17 = vpop.f32.mrf.mxu1 }
 0x2b4   :  { %v1472_v32 = vmax.f32 %v1408_v36, 0.0  ;;  %2489 = vst.msk [vmem:[%s4493_s13 + $0x118] sm:$0xff] %vm143_vm1, %v2382_v57  ;;  %v899_v12 = vadd.f32 %v820_v17, %v470_v41 }
 0x2b5   :  { %v2062_v14 = vmax.f32 %v1998_v40, 0.0 }
 0x2b6   :  { %v1536_v54 = vadd.f32 %v1472_v32, %v962_v2  ;;  %v963_v33 = vmax.f32 %v899_v12, 0.0  ;;  %v4519_v12 = vld [vmem:[#allocation12_spill] sm:$0xff] }
 0x2b8   :  { %v2126_v3 = vadd.f32 %v2062_v14, %v1536_v54 }
 0x2b9   :  { %v1327_v55 = vpop.f32.mrf.mxu2  ;;  %v2384_v27 = vpop.f32.mrf.mxu0 }
 0x2ba   :  { %v2163_v29 = vpack.c.bf16 %v2126_v3, %v2125_v46  ;;  %v1917_v58 = vpop.f32.mrf.mxu3  ;;  %v2385_v61 = vadd.f32 %v4112_v47, %v2384_v27  ;;  %v1409_v45 = vadd.f32 %v4247_v35, %v1327_v55 }
 0x2bb   :  { %v822_v38 = vpop.f32.mrf.mxu1  ;;  %v1999_v13 = vadd.f32 %v4260_v52, %v1917_v58 }
 0x2bc   :  { %2490 = vst.msk [vmem:[%s4493_s13 + $0x120] sm:$0xff] %vm143_vm1, %v2385_v61  ;;  %2708 = vmatmul.msk.bf16.gmra.mxu0 %vm1086_vm2, %v2163_v29  ;;  %v1473_v6 = vmax.f32 %v1409_v45, 0.0  ;;  %v900_v16 = vadd.f32 %v822_v38, %v471_v49  ;;  %v4518_v45 = vld [vmem:[#allocation11_spill] sm:$0xff] }
 0x2bd   :  { %v2063_v48 = vmax.f32 %v1999_v13, 0.0  ;;  %v474_v53 = vadd.f32 %v4274_v62, %v4518_v45 }
 0x2be   :  { %v1537_v25 = vadd.f32 %v1473_v6, %v963_v33  ;;  %v964_v18 = vmax.f32 %v900_v16, 0.0  ;;  %v475_v6 = vadd.f32 %v4274_v62, %v4519_v12 }
 0x2c0   :  { %v2127_v59 = vadd.f32 %v2063_v48, %v1537_v25 }
 0x2c1   :  { %v1329_v26 = vpop.f32.mrf.mxu2  ;;  %v2386_v34 = vpop.f32.mrf.mxu0 }
 0x2c2   :  { %v1410_v24 = vadd.f32 %v4247_v35, %v1329_v26  ;;  %v1919_v31 = vpop.f32.mrf.mxu3  ;;  %v2387_v37 = vadd.f32 %v4112_v47, %v2386_v34 }
 0x2c3   :  { %v2000_v50 = vadd.f32 %v4260_v52, %v1919_v31  ;;  %v825_v15 = vpop.f32.mrf.mxu1 }
 0x2c4   :  { %v1474_v28 = vmax.f32 %v1410_v24, 0.0  ;;  %2491 = vst.msk [vmem:[%s4493_s13 + $0x128] sm:$0xff] %vm143_vm1, %v2387_v37  ;;  %v901_v23 = vadd.f32 %v825_v15, %v472_v22 }
 0x2c5   :  { %v2064_v19 = vmax.f32 %v2000_v50, 0.0 }
 0x2c6   :  { %v1538_v30 = vadd.f32 %v1474_v28, %v964_v18  ;;  %v965_v20 = vmax.f32 %v901_v23, 0.0  ;;  %v4521_v23 = vld [vmem:[#allocation14_spill] sm:$0xff] }
 0x2c8   :  { %v2128_v44 = vadd.f32 %v2064_v19, %v1538_v30 }
 0x2c9   :  { %v1332_v7 = vpop.f32.mrf.mxu2  ;;  %v2389_v43 = vpop.f32.mrf.mxu0 }
 0x2ca   :  { %v2164_v42 = vpack.c.bf16 %v2128_v44, %v2127_v59  ;;  %v1922_v0 = vpop.f32.mrf.mxu3  ;;  %v2390_v1 = vadd.f32 %v4112_v47, %v2389_v43  ;;  %v1411_v60 = vadd.f32 %v4247_v35, %v1332_v7 }
 0x2cb   :  { %v827_v63 = vpop.f32.mrf.mxu1  ;;  %v2001_v39 = vadd.f32 %v4260_v52, %v1922_v0 }
 0x2cc   :  { %2492 = vst.msk [vmem:[%s4493_s13 + $0x130] sm:$0xff] %vm143_vm1, %v2390_v1  ;;  %2709 = vmatmul.msk.bf16.gmra.mxu0 %vm1086_vm2, %v2164_v42  ;;  %v1475_v5 = vmax.f32 %v1411_v60, 0.0  ;;  %v902_v21 = vadd.f32 %v827_v63, %v473_v9  ;;  %v4520_v60 = vld [vmem:[#allocation13_spill] sm:$0xff] }
 0x2cd   :  { %v2065_v32 = vmax.f32 %v2001_v39, 0.0  ;;  %v476_v10 = vadd.f32 %v4274_v62, %v4520_v60 }
 0x2ce   :  { %v1539_v2 = vadd.f32 %v1475_v5, %v965_v20  ;;  %v966_v54 = vmax.f32 %v902_v21, 0.0  ;;  %v477_v5 = vadd.f32 %v4274_v62, %v4521_v23 }
 0x2d0   :  { %v2129_v55 = vadd.f32 %v2065_v32, %v1539_v2 }
 0x2d1   :  { %v1334_v51 = vpop.f32.mrf.mxu2  ;;  %v2391_v36 = vpop.f32.mrf.mxu0 }
 0x2d2   :  { %v1412_v57 = vadd.f32 %v4247_v35, %v1334_v51  ;;  %v1924_v40 = vpop.f32.mrf.mxu3  ;;  %v2392_v17 = vadd.f32 %v4112_v47, %v2391_v36 }
 0x2d3   :  { %v2002_v4 = vadd.f32 %v4260_v52, %v1924_v40  ;;  %v830_v56 = vpop.f32.mrf.mxu1 }
 0x2d4   :  { %v1476_v14 = vmax.f32 %v1412_v57, 0.0  ;;  %2493 = vst.msk [vmem:[%s4493_s13 + $0x138] sm:$0xff] %vm143_vm1, %v2392_v17  ;;  %v903_v13 = vadd.f32 %v830_v56, %v474_v53  ;;  %v4522_v53 = vld [vmem:[#allocation15_spill] sm:$0xff] }
 0x2d5   :  { %v2066_v3 = vmax.f32 %v2002_v4, 0.0 }
 0x2d6   :  { %v1540_v46 = vadd.f32 %v1476_v14, %v966_v54  ;;  %v967_v31 = vmax.f32 %v903_v13, 0.0  ;;  %v4523_v13 = vld [vmem:[#allocation16_spill] sm:$0xff] }
 0x2d8   :  { %v2130_v27 = vadd.f32 %v2066_v3, %v1540_v46 }
 0x2d9   :  { %v1337_v29 = vpop.f32.mrf.mxu2  ;;  %v2394_v58 = vpop.f32.mrf.mxu0 }
 0x2da   :  { %v2165_v61 = vpack.c.bf16 %v2130_v27, %v2129_v55  ;;  %v1927_v38 = vpop.f32.mrf.mxu3  ;;  %v2395_v8 = vadd.f32 %v4112_v47, %v2394_v58  ;;  %v1413_v49 = vadd.f32 %v4247_v35, %v1337_v29 }
 0x2db   :  { %v832_v41 = vpop.f32.mrf.mxu1  ;;  %v2003_v26 = vadd.f32 %v4260_v52, %v1927_v38 }
 0x2dc   :  { %2494 = vst.msk [vmem:[%s4493_s13 + $0x140] sm:$0xff] %vm143_vm1, %v2395_v8  ;;  %2710 = vmatmul.msk.bf16.gmra.mxu0 %vm1086_vm2, %v2165_v61  ;;  %v1477_v16 = vmax.f32 %v1413_v49, 0.0  ;;  %v904_v34 = vadd.f32 %v832_v41, %v475_v6  ;;  %v478_v49 = vadd.f32 %v4274_v62, %v4522_v53 }
 0x2dd   :  { %v2067_v28 = vmax.f32 %v2003_v26, 0.0 }
 0x2de   :  { %v1541_v18 = vadd.f32 %v1477_v16, %v967_v31  ;;  %v968_v30 = vmax.f32 %v904_v34, 0.0  ;;  %v479_v16 = vadd.f32 %v4274_v62, %v4523_v13 }
 0x2e0   :  { %v2131_v7 = vadd.f32 %v2067_v28, %v1541_v18 }
 0x2e1   :  { %v1339_v33 = vpop.f32.mrf.mxu2  ;;  %v2396_v24 = vpop.f32.mrf.mxu0 }
 0x2e2   :  { %v1414_v37 = vadd.f32 %v4247_v35, %v1339_v33  ;;  %v1929_v50 = vpop.f32.mrf.mxu3  ;;  %v2397_v15 = vadd.f32 %v4112_v47, %v2396_v24 }
 0x2e3   :  { %v2004_v25 = vadd.f32 %v4260_v52, %v1929_v50  ;;  %v835_v48 = vpop.f32.mrf.mxu1 }
 0x2e4   :  { %v1478_v19 = vmax.f32 %v1414_v37, 0.0  ;;  %2495 = vst.msk [vmem:[%s4493_s13 + $0x148] sm:$0xff] %vm143_vm1, %v2397_v15  ;;  %v905_v39 = vadd.f32 %v835_v48, %v476_v10 }
 0x2e5   :  { %v2068_v44 = vmax.f32 %v2004_v25, 0.0 }
 0x2e6   :  { %v1542_v59 = vadd.f32 %v1478_v19, %v968_v30  ;;  %v969_v40 = vmax.f32 %v905_v39, 0.0 }
 0x2e8   :  { %v2132_v43 = vadd.f32 %v2068_v44, %v1542_v59 }
 0x2e9   :  { %v1342_v42 = vpop.f32.mrf.mxu2  ;;  %v2399_v0 = vpop.f32.mrf.mxu0 }
 0x2ea   :  { %v2166_v1 = vpack.c.bf16 %v2132_v43, %v2131_v7  ;;  %v1932_v63 = vpop.f32.mrf.mxu3  ;;  %v2400_v11 = vadd.f32 %v4112_v47, %v2399_v0  ;;  %v1415_v9 = vadd.f32 %v4247_v35, %v1342_v42 }
 0x2eb   :  { %v837_v22 = vpop.f32.mrf.mxu1  ;;  %v2005_v51 = vadd.f32 %v4260_v52, %v1932_v63 }
 0x2ec   :  { %2496 = vst.msk [vmem:[%s4493_s13 + $0x150] sm:$0xff] %vm143_vm1, %v2400_v11  ;;  %2711 = vmatmul.msk.bf16.gmra.mxu0 %vm1086_vm2, %v2166_v1  ;;  %v1479_v21 = vmax.f32 %v1415_v9, 0.0  ;;  %v906_v36 = vadd.f32 %v837_v22, %v477_v5 }
 0x2ed   :  { %v2069_v14 = vmax.f32 %v2005_v51, 0.0 }
 0x2ee   :  { %v1543_v54 = vadd.f32 %v1479_v21, %v969_v40  ;;  %v970_v46 = vmax.f32 %v906_v36, 0.0 }
 0x2f0   :  { %v2133_v29 = vadd.f32 %v2069_v14, %v1543_v54 }
 0x2f1   :  { %v1344_v20 = vpop.f32.mrf.mxu2  ;;  %v2401_v57 = vpop.f32.mrf.mxu0 }
 0x2f2   :  { %v1416_v17 = vadd.f32 %v4247_v35, %v1344_v20  ;;  %v1934_v4 = vpop.f32.mrf.mxu3  ;;  %v2402_v56 = vadd.f32 %v4112_v47, %v2401_v57 }
 0x2f3   :  { %v2006_v2 = vadd.f32 %v4260_v52, %v1934_v4  ;;  %v840_v32 = vpop.f32.mrf.mxu1 }
 0x2f4   :  { %v1480_v3 = vmax.f32 %v1416_v17, 0.0  ;;  %2497 = vst.msk [vmem:[%s4493_s13 + $0x158] sm:$0xff] %vm143_vm1, %v2402_v56  ;;  %v907_v26 = vadd.f32 %v840_v32, %v478_v49 }
 0x2f5   :  { %v2070_v27 = vmax.f32 %v2006_v2, 0.0 }
 0x2f6   :  { %v1544_v55 = vadd.f32 %v1480_v3, %v970_v46  ;;  %v971_v50 = vmax.f32 %v907_v26, 0.0 }
 0x2f8   :  { %v2134_v58 = vadd.f32 %v2070_v27, %v1544_v55 }
 0x2f9   :  { %v1347_v61 = vpop.f32.mrf.mxu2  ;;  %v2404_v38 = vpop.f32.mrf.mxu0 }
 0x2fa   :  { %v2167_v8 = vpack.c.bf16 %v2134_v58, %v2133_v29  ;;  %v1937_v41 = vpop.f32.mrf.mxu3  ;;  %v2405_v45 = vadd.f32 %v4112_v47, %v2404_v38  ;;  %v1417_v12 = vadd.f32 %v4247_v35, %v1347_v61 }
 0x2fb   :  { %v842_v6 = vpop.f32.mrf.mxu1  ;;  %v2007_v33 = vadd.f32 %v4260_v52, %v1937_v41 }
 0x2fc   :  { %2498 = vst.msk [vmem:[%s4493_s13 + $0x160] sm:$0xff] %vm143_vm1, %v2405_v45  ;;  %2712 = vmatmul.msk.bf16.gmra.mxu0 %vm1086_vm2, %v2167_v8  ;;  %v1481_v34 = vmax.f32 %v1417_v12, 0.0  ;;  %v908_v24 = vadd.f32 %v842_v6, %v479_v16 }
 0x2fd   :  { %v2071_v30 = vmax.f32 %v2007_v33, 0.0 }
 0x2fe   :  { %v1545_v28 = vadd.f32 %v1481_v34, %v971_v50  ;;  %v972_v19 = vmax.f32 %v908_v24, 0.0 }
 0x300   :  { %v2135_v7 = vadd.f32 %v2071_v30, %v1545_v28 }
 0x301   :  { %v1349_v31 = vpop.f32.mrf.mxu2  ;;  %v2406_v37 = vpop.f32.mrf.mxu0 }
 0x302   :  { %v1418_v15 = vadd.f32 %v4247_v35, %v1349_v31  ;;  %v1939_v25 = vpop.f32.mrf.mxu3  ;;  %v2407_v48 = vadd.f32 %v4112_v47, %v2406_v37 }
 0x303   :  { %v2008_v18 = vadd.f32 %v4260_v52, %v1939_v25 }
 0x304   :  { %v1482_v59 = vmax.f32 %v1418_v15, 0.0  ;;  %2499 = vst.msk [vmem:[%s4493_s13 + $0x168] sm:$0xff] %vm143_vm1, %v2407_v48 }
 0x305   :  { %v2072_v44 = vmax.f32 %v2008_v18, 0.0 }
 0x306   :  { %v1546_v62 = vadd.f32 %v1482_v59, %v972_v19 }
 0x308   :  { %v2136_v43 = vadd.f32 %v2072_v44, %v1546_v62 }
 0x309   :  { %v2409_v42 = vpop.f32.mrf.mxu0 }
 0x30a   :  { %v2168_v35 = vpack.c.bf16 %v2136_v43, %v2135_v7  ;;  %v2410_v0 = vadd.f32 %v4112_v47, %v2409_v42 }
 0x30c   :  { %2500 = vst.msk [vmem:[%s4493_s13 + $0x170] sm:$0xff] %vm143_vm1, %v2410_v0  ;;  %2713 = vmatmul.msk.bf16.gmra.mxu0 %vm1086_vm2, %v2168_v35 }
 0x311   :  { %v2411_v52 = vpop.f32.mrf.mxu0 }
 0x312   :  { %v2412_v1 = vadd.f32 %v4112_v47, %v2411_v52 }
 0x314   :  { %2501 = vst.msk [vmem:[%s4493_s13 + $0x178] sm:$0xff] %vm143_vm1, %v2412_v1 }
 0x319   :  { %v2414_v63 = vpop.f32.mrf.mxu0 }
 0x31a   :  { %v2415_v11 = vadd.f32 %v4112_v47, %v2414_v63 }
 0x31c   :  { %2502 = vst.msk [vmem:[%s4493_s13 + $0x180] sm:$0xff] %vm143_vm1, %v2415_v11 }
 0x321   :  { %v2416_v22 = vpop.f32.mrf.mxu0 }
 0x322   :  { %v2417_v60 = vadd.f32 %v4112_v47, %v2416_v22 }
 0x324   :  { %2503 = vst.msk [vmem:[%s4493_s13 + $0x188] sm:$0xff] %vm143_vm1, %v2417_v60 }
 0x329   :  { %v2419_v10 = vpop.f32.mrf.mxu0 }
 0x32a   :  { %v2420_v9 = vadd.f32 %v4112_v47, %v2419_v10 }
 0x32c   :  { %2504 = vst.msk [vmem:[%s4493_s13 + $0x190] sm:$0xff] %vm143_vm1, %v2420_v9 }
 0x331   :  { %v2421_v23 = vpop.f32.mrf.mxu0 }
 0x332   :  { %v2422_v5 = vadd.f32 %v4112_v47, %v2421_v23 }
 0x334   :  { %2505 = vst.msk [vmem:[%s4493_s13 + $0x198] sm:$0xff] %vm143_vm1, %v2422_v5 }
 0x339   :  { %v2424_v39 = vpop.f32.mrf.mxu0 }
 0x33a   :  { %v2425_v21 = vadd.f32 %v4112_v47, %v2424_v39 }
 0x33c   :  { %2506 = vst.msk [vmem:[%s4493_s13 + $0x1a0] sm:$0xff] %vm143_vm1, %v2425_v21 }
 0x341   :  { %v2426_v51 = vpop.f32.mrf.mxu0 }
 0x342   :  { %v2427_v36 = vadd.f32 %v4112_v47, %v2426_v51 }
 0x344   :  { %2507 = vst.msk [vmem:[%s4493_s13 + $0x1a8] sm:$0xff] %vm143_vm1, %v2427_v36 }
 0x349   :  { %v2429_v20 = vpop.f32.mrf.mxu0 }
 0x34a   :  { %v2430_v57 = vadd.f32 %v4112_v47, %v2429_v20 }
 0x34c   :  { %2508 = vst.msk [vmem:[%s4493_s13 + $0x1b0] sm:$0xff] %vm143_vm1, %v2430_v57 }
 0x351   :  { %v2431_v40 = vpop.f32.mrf.mxu0 }
 0x352   :  { %v2432_v17 = vadd.f32 %v4112_v47, %v2431_v40 }
 0x354   :  { %2509 = vst.msk [vmem:[%s4493_s13 + $0x1b8] sm:$0xff] %vm143_vm1, %v2432_v17 }
 0x359   :  { %v2434_v4 = vpop.f32.mrf.mxu0 }
 0x35a   :  { %v2435_v56 = vadd.f32 %v4112_v47, %v2434_v4 }
 0x35c   :  { %2510 = vst.msk [vmem:[%s4493_s13 + $0x1c0] sm:$0xff] %vm143_vm1, %v2435_v56 }
 0x361   :  { %v2436_v2 = vpop.f32.mrf.mxu0 }
 0x362   :  { %v2437_v32 = vadd.f32 %v4112_v47, %v2436_v2 }
 0x364   :  { %2511 = vst.msk [vmem:[%s4493_s13 + $0x1c8] sm:$0xff] %vm143_vm1, %v2437_v32 }
 0x369   :  { %v2439_v54 = vpop.f32.mrf.mxu0 }
 0x36a   :  { %v2440_v14 = vadd.f32 %v4112_v47, %v2439_v54 }
 0x36c   :  { %2512 = vst.msk [vmem:[%s4493_s13 + $0x1d0] sm:$0xff] %vm143_vm1, %v2440_v14 }
 0x371   :  { %v2441_v46 = vpop.f32.mrf.mxu0 }
 0x372   :  { %v2442_v3 = vadd.f32 %v4112_v47, %v2441_v46 }
 0x374   :  { %2513 = vst.msk [vmem:[%s4493_s13 + $0x1d8] sm:$0xff] %vm143_vm1, %v2442_v3 }
 0x379   :  { %v2444_v55 = vpop.f32.mrf.mxu0 }
 0x37a   :  { %v2445_v27 = vadd.f32 %v4112_v47, %v2444_v55 }
 0x37c   :  { %2514 = vst.msk [vmem:[%s4493_s13 + $0x1e0] sm:$0xff] %vm143_vm1, %v2445_v27 }
 0x381   :  { %v2446_v29 = vpop.f32.mrf.mxu0 }
 0x382   :  { %v2447_v58 = vadd.f32 %v4112_v47, %v2446_v29 }
 0x384   :  { %2515 = vst.msk [vmem:[%s4493_s13 + $0x1e8] sm:$0xff] %vm143_vm1, %v2447_v58 }
 0x389   :  { %v2449_v61 = vpop.f32.mrf.mxu0 }
 0x38a   :  { %v2450_v38 = vadd.f32 %v4112_v47, %v2449_v61 }
 0x38c   :  { %2516 = vst.msk [vmem:[%s4493_s13 + $0x1f0] sm:$0xff] %vm143_vm1, %v2450_v38 }
 0x391   :  { %v2451_v8 = vpop.f32.mrf.mxu0 }
 0x392   :  { %v2452_v41 = vadd.f32 %v4112_v47, %v2451_v8 }
 0x394   :  { %2517 = vst.msk [vmem:[%s4493_s13 + $0x1f8] sm:$0xff] %vm143_vm1, %v2452_v41 }

</bundles_post_ra>
